<compile_context>
chip_gen: v7x
topology: tpu7x:2x2x1
jax: 0.10.0
libtpu: 0.0.40
codegen_flags: <defaults>
</compile_context>

<pallas_src>
import functools

import numpy as np
import jax
import jax.numpy as jnp
from jax.experimental import pallas as pl
from jax.experimental.pallas import tpu as pltpu


# (h % 3, w % 3) -> base temporal shift (stride = 1), matching the PyTorch code.
_SHIFT_TABLE = np.array(
    [[-4, 1, 2],
     [-1, 0, 3],
     [-2, -3, 4]], dtype=np.int64)


def _patch_shift_kernel(shift_ref, x_ref, o_ref, *, shifts, t_len):
    """shift_ref: (hw_blk, 1) int32, per-HW-row shift reduced mod T.
    x_ref / o_ref: (T, hw_blk, c_blk).

    out[t, p, :] = x[(t - shift[p]) % T, p, :]
    """
    smap = shift_ref[...]                       # (hw_blk, 1)
    masks = [smap == s for s in shifts]         # hoisted, tiny per-row masks
    # T is small (typically 8) -> static unroll over output time-slabs.
    for t in range(t_len):
        acc = x_ref[t]                          # shift == 0 positions pass through
        for m, s in zip(masks, shifts):
            # Leading-axis "roll": just a statically indexed slab load.
            acc = jnp.where(m, x_ref[(t - s) % t_len], acc)
        o_ref[t] = acc                          # dense lane-wide slab store


def _largest_divisor_multiple(n, unit, cap):
    """Largest d with d | n, d % unit == 0 and d <= cap; None if none exists."""
    best = None
    d = unit
    cap = min(n, cap)
    while d <= cap:
        if n % d == 0:
            best = d
        d += unit
    return best


def _choose_tiles(T, HW, C, itemsize, budget_bytes):
    """Pick (hw_blk, c_blk): the biggest lane-dense tile within the VMEM budget."""
    hw_blk, c_blk = HW, C

    def blk_bytes():
        return T * hw_blk * c_blk * itemsize

    # Shrink the lane (C) axis first, keeping it a multiple of 128 when possible.
    if blk_bytes() > budget_bytes and C % 128 == 0:
        target_c = max(128, budget_bytes // max(1, T * hw_blk * itemsize))
        c_blk = _largest_divisor_multiple(C, 128, target_c) or 128
    # Then shrink the sublane (HW) axis in multiples of 8 if still too big.
    if blk_bytes() > budget_bytes and HW % 8 == 0:
        target_hw = max(8, budget_bytes // max(1, T * c_blk * itemsize))
        hw_blk = _largest_divisor_multiple(HW, 8, target_hw) or hw_blk
    return hw_blk, c_blk


def patch_shift(x, inv: bool = False, *, block_budget_bytes: int = 6 * 1024 * 1024):
    """Pallas TPU implementation of PatchShift.forward; x: (B, T, H, W, C)."""
    B, T, H, W, C = x.shape
    multiplier = -1 if inv else 1

    # Static per-HW-position temporal shift, reduced mod T (dedupes classes;
    # roll wraps mod T so this is exact).
    shift_hw = multiplier * _SHIFT_TABLE[np.arange(H)[:, None] % 3,
                                         np.arange(W)[None, :] % 3]      # (H, W)
    shift_hw = np.mod(shift_hw, T).astype(np.int32)
    shift_map_np = np.ascontiguousarray(shift_hw.reshape(H * W, 1))       # (HW, 1)
    shifts = tuple(sorted(int(s) for s in np.unique(shift_map_np) if s != 0))

    HW = H * W
    itemsize = int(np.dtype(x.dtype).itemsize)
    hw_blk, c_blk = _choose_tiles(T, HW, C, itemsize, block_budget_bytes)
    n_hw, n_c = HW // hw_blk, C // c_blk

    x_flat = x.reshape(B, T, HW, C)            # free reshape (merges H, W)
    shift_map = jnp.asarray(shift_map_np)      # tiny int32 side input

    kernel = functools.partial(_patch_shift_kernel, shifts=shifts, t_len=T)
    bytes_accessed = 2 * B * T * HW * C * itemsize + HW * 4

    out_flat = pl.pallas_call(
        kernel,
        out_shape=jax.ShapeDtypeStruct((B, T, HW, C), x.dtype),
        grid=(n_hw, B, n_c),                   # map block index constant on inner axes
        in_specs=[
            pl.BlockSpec((hw_blk, 1), lambda p, b, c: (p, 0)),               # shift map
            pl.BlockSpec((None, T, hw_blk, c_blk), lambda p, b, c: (b, 0, p, c)),  # x
        ],
        out_specs=pl.BlockSpec((None, T, hw_blk, c_blk),
                               lambda p, b, c: (b, 0, p, c)),
        compiler_params=pltpu.CompilerParams(
            dimension_semantics=("parallel", "parallel", "parallel"),
            vmem_limit_bytes=48 * 1024 * 1024),
        cost_estimate=pl.CostEstimate(flops=0, transcendentals=0,
                                      bytes_accessed=int(bytes_accessed)),
    )(shift_map, x_flat)
    return out_flat.reshape(B, T, H, W, C)


def patch_shift_ref(x, inv: bool = False):
    """Pure-JAX reference mirroring the PyTorch strided-slice + torch.roll code."""
    multiplier = -1 if inv else 1
    _, _, H, W, _ = x.shape
    out = x
    for hm in range(3):
        for wm in range(3):
            s = int(_SHIFT_TABLE[hm, wm]) * multiplier
            if s == 0:
                continue
            rolled = jnp.roll(x, s, axis=1)
            hsel = (jnp.arange(H) % 3 == hm)[None, None, :, None, None]
            wsel = (jnp.arange(W) % 3 == wm)[None, None, None, :, None]
            out = jnp.where(hsel & wsel, rolled, out)
    return out


if __name__ == "__main__":
    key, key2 = jax.random.split(jax.random.PRNGKey(0))

    # Shape 1: single-block path (C not a multiple of 128 -> full-C lane block).
    B, T, H, W, C = 2, 8, 12, 12, 32
    x = jax.random.normal(key, (B, T, H, W, C), dtype=jnp.float32)

    out = jax.block_until_ready(patch_shift(x, inv=False))
    ref = jax.block_until_ready(patch_shift_ref(x, inv=False))
    assert out.shape == x.shape and out.dtype == x.dtype
    assert jnp.allclose(out, ref), "Pallas PatchShift mismatch vs reference"

    out_inv = jax.block_until_ready(patch_shift(x, inv=True))
    ref_inv = jax.block_until_ready(patch_shift_ref(x, inv=True))
    assert jnp.allclose(out_inv, ref_inv), "Pallas PatchShift(inv) mismatch"

    # Shape 2: force HW and C tiling (multi-step grid) with a tiny block budget;
    # T=4 also exercises the mod-T shift-class merging.
    B2, T2, H2, W2, C2 = 2, 4, 8, 9, 256
    x2 = jax.random.normal(key2, (B2, T2, H2, W2, C2), dtype=jnp.float32)
    out2 = jax.block_until_ready(
        patch_shift(x2, inv=False, block_budget_bytes=64 * 1024))
    ref2 = jax.block_until_ready(patch_shift_ref(x2, inv=False))
    assert jnp.allclose(out2, ref2), "Pallas PatchShift tiled-grid mismatch"

    print("KERNEL_OK")
</pallas_src>

<mosaic_0001>
module attributes {stable_mosaic.version = 11 : i64} {
  func.func @_patch_shift_kernel(%arg0: i32, %arg1: i32, %arg2: i32, %arg3: memref<144x1xi32, #tpu.memory_space<vmem>>, %arg4: memref<1x8x144x32xf32, #tpu.memory_space<vmem>>, %arg5: memref<1x8x144x32xf32, #tpu.memory_space<vmem>>) attributes {dimension_semantics = [#tpu.dimension_semantics<parallel>, #tpu.dimension_semantics<parallel>, #tpu.dimension_semantics<parallel>], iteration_bounds = array<i64: 1, 2, 1>, scalar_prefetch = 0 : i64, scratch_operands = 0 : i64, tpu.core_type = #tpu.core_type<tc>, window_params = [{transform_indices = @transform_0, window_bounds = array<i64: 144, 1>}, {transform_indices = @transform_1, window_bounds = array<i64: 1, 8, 144, 32>}, {transform_indices = @transform_2, window_bounds = array<i64: 1, 8, 144, 32>}]} {
    %c0 = arith.constant 0 : index
    %c0_0 = arith.constant 0 : index
    %0 = vector.load %arg3[%c0, %c0_0] : memref<144x1xi32, #tpu.memory_space<vmem>>, vector<144x1xi32>
    %c1_i32 = arith.constant 1 : i32
    %1 = vector.broadcast %c1_i32 : i32 to vector<144x1xi32>
    %2 = arith.cmpi eq, %0, %1 : vector<144x1xi32>
    %c2_i32 = arith.constant 2 : i32
    %3 = vector.broadcast %c2_i32 : i32 to vector<144x1xi32>
    %4 = arith.cmpi eq, %0, %3 : vector<144x1xi32>
    %c3_i32 = arith.constant 3 : i32
    %5 = vector.broadcast %c3_i32 : i32 to vector<144x1xi32>
    %6 = arith.cmpi eq, %0, %5 : vector<144x1xi32>
    %c4_i32 = arith.constant 4 : i32
    %7 = vector.broadcast %c4_i32 : i32 to vector<144x1xi32>
    %8 = arith.cmpi eq, %0, %7 : vector<144x1xi32>
    %c5_i32 = arith.constant 5 : i32
    %9 = vector.broadcast %c5_i32 : i32 to vector<144x1xi32>
    %10 = arith.cmpi eq, %0, %9 : vector<144x1xi32>
    %c6_i32 = arith.constant 6 : i32
    %11 = vector.broadcast %c6_i32 : i32 to vector<144x1xi32>
    %12 = arith.cmpi eq, %0, %11 : vector<144x1xi32>
    %c7_i32 = arith.constant 7 : i32
    %13 = vector.broadcast %c7_i32 : i32 to vector<144x1xi32>
    %14 = arith.cmpi eq, %0, %13 : vector<144x1xi32>
    %c0_1 = arith.constant 0 : index
    %c0_2 = arith.constant 0 : index
    %c0_3 = arith.constant 0 : index
    %c0_4 = arith.constant 0 : index
    %15 = vector.load %arg4[%c0_1, %c0_2, %c0_3, %c0_4] : memref<1x8x144x32xf32, #tpu.memory_space<vmem>>, vector<1x1x144x32xf32>
    %16 = vector.shape_cast %15 : vector<1x1x144x32xf32> to vector<144x32xf32>
    %c0_5 = arith.constant 0 : index
    %c7 = arith.constant 7 : index
    %c0_6 = arith.constant 0 : index
    %c0_7 = arith.constant 0 : index
    %17 = vector.load %arg4[%c0_5, %c7, %c0_6, %c0_7] : memref<1x8x144x32xf32, #tpu.memory_space<vmem>>, vector<1x1x144x32xf32>
    %18 = vector.shape_cast %17 : vector<1x1x144x32xf32> to vector<144x32xf32>
    %19 = vector.shape_cast %2 : vector<144x1xi1> to vector<144x1xi1>
    %20 = vector.broadcast %19 : vector<144x1xi1> to vector<144x32xi1>
    %21 = arith.select %20, %18, %16 : vector<144x32xi1>, vector<144x32xf32>
    %c0_8 = arith.constant 0 : index
    %c6 = arith.constant 6 : index
    %c0_9 = arith.constant 0 : index
    %c0_10 = arith.constant 0 : index
    %22 = vector.load %arg4[%c0_8, %c6, %c0_9, %c0_10] : memref<1x8x144x32xf32, #tpu.memory_space<vmem>>, vector<1x1x144x32xf32>
    %23 = vector.shape_cast %22 : vector<1x1x144x32xf32> to vector<144x32xf32>
    %24 = vector.shape_cast %4 : vector<144x1xi1> to vector<144x1xi1>
    %25 = vector.broadcast %24 : vector<144x1xi1> to vector<144x32xi1>
    %26 = arith.select %25, %23, %21 : vector<144x32xi1>, vector<144x32xf32>
    %c0_11 = arith.constant 0 : index
    %c5 = arith.constant 5 : index
    %c0_12 = arith.constant 0 : index
    %c0_13 = arith.constant 0 : index
    %27 = vector.load %arg4[%c0_11, %c5, %c0_12, %c0_13] : memref<1x8x144x32xf32, #tpu.memory_space<vmem>>, vector<1x1x144x32xf32>
    %28 = vector.shape_cast %27 : vector<1x1x144x32xf32> to vector<144x32xf32>
    %29 = vector.shape_cast %6 : vector<144x1xi1> to vector<144x1xi1>
    %30 = vector.broadcast %29 : vector<144x1xi1> to vector<144x32xi1>
    %31 = arith.select %30, %28, %26 : vector<144x32xi1>, vector<144x32xf32>
    %c0_14 = arith.constant 0 : index
    %c4 = arith.constant 4 : index
    %c0_15 = arith.constant 0 : index
    %c0_16 = arith.constant 0 : index
    %32 = vector.load %arg4[%c0_14, %c4, %c0_15, %c0_16] : memref<1x8x144x32xf32, #tpu.memory_space<vmem>>, vector<1x1x144x32xf32>
    %33 = vector.shape_cast %32 : vector<1x1x144x32xf32> to vector<144x32xf32>
    %34 = vector.shape_cast %8 : vector<144x1xi1> to vector<144x1xi1>
    %35 = vector.broadcast %34 : vector<144x1xi1> to vector<144x32xi1>
    %36 = arith.select %35, %33, %31 : vector<144x32xi1>, vector<144x32xf32>
    %c0_17 = arith.constant 0 : index
    %c3 = arith.constant 3 : index
    %c0_18 = arith.constant 0 : index
    %c0_19 = arith.constant 0 : index
    %37 = vector.load %arg4[%c0_17, %c3, %c0_18, %c0_19] : memref<1x8x144x32xf32, #tpu.memory_space<vmem>>, vector<1x1x144x32xf32>
    %38 = vector.shape_cast %37 : vector<1x1x144x32xf32> to vector<144x32xf32>
    %39 = vector.shape_cast %10 : vector<144x1xi1> to vector<144x1xi1>
    %40 = vector.broadcast %39 : vector<144x1xi1> to vector<144x32xi1>
    %41 = arith.select %40, %38, %36 : vector<144x32xi1>, vector<144x32xf32>
    %c0_20 = arith.constant 0 : index
    %c2 = arith.constant 2 : index
    %c0_21 = arith.constant 0 : index
    %c0_22 = arith.constant 0 : index
    %42 = vector.load %arg4[%c0_20, %c2, %c0_21, %c0_22] : memref<1x8x144x32xf32, #tpu.memory_space<vmem>>, vector<1x1x144x32xf32>
    %43 = vector.shape_cast %42 : vector<1x1x144x32xf32> to vector<144x32xf32>
    %44 = vector.shape_cast %12 : vector<144x1xi1> to vector<144x1xi1>
    %45 = vector.broadcast %44 : vector<144x1xi1> to vector<144x32xi1>
    %46 = arith.select %45, %43, %41 : vector<144x32xi1>, vector<144x32xf32>
    %c0_23 = arith.constant 0 : index
    %c1 = arith.constant 1 : index
    %c0_24 = arith.constant 0 : index
    %c0_25 = arith.constant 0 : index
    %47 = vector.load %arg4[%c0_23, %c1, %c0_24, %c0_25] : memref<1x8x144x32xf32, #tpu.memory_space<vmem>>, vector<1x1x144x32xf32>
    %48 = vector.shape_cast %47 : vector<1x1x144x32xf32> to vector<144x32xf32>
    %49 = vector.shape_cast %14 : vector<144x1xi1> to vector<144x1xi1>
    %50 = vector.broadcast %49 : vector<144x1xi1> to vector<144x32xi1>
    %51 = arith.select %50, %48, %46 : vector<144x32xi1>, vector<144x32xf32>
    %c0_26 = arith.constant 0 : index
    %c0_27 = arith.constant 0 : index
    %c0_28 = arith.constant 0 : index
    %c0_29 = arith.constant 0 : index
    %52 = vector.load %arg5[%c0_26, %c0_27, %c0_28, %c0_29] : memref<1x8x144x32xf32, #tpu.memory_space<vmem>>, vector<1x1x144x32xf32>
    %53 = vector.shape_cast %52 : vector<1x1x144x32xf32> to vector<144x32xf32>
    %54 = vector.shape_cast %51 : vector<144x32xf32> to vector<1x1x144x32xf32>
    tpu.vector_store %arg5[%c0_26, %c0_27, %c0_28, %c0_29], %54 {strides = array<i32>} : memref<1x8x144x32xf32, #tpu.memory_space<vmem>>, vector<1x1x144x32xf32>,
    %c0_30 = arith.constant 0 : index
    %c1_31 = arith.constant 1 : index
    %c0_32 = arith.constant 0 : index
    %c0_33 = arith.constant 0 : index
    %55 = vector.load %arg4[%c0_30, %c1_31, %c0_32, %c0_33] : memref<1x8x144x32xf32, #tpu.memory_space<vmem>>, vector<1x1x144x32xf32>
    %56 = vector.shape_cast %55 : vector<1x1x144x32xf32> to vector<144x32xf32>
    %c0_34 = arith.constant 0 : index
    %c0_35 = arith.constant 0 : index
    %c0_36 = arith.constant 0 : index
    %c0_37 = arith.constant 0 : index
    %57 = vector.load %arg4[%c0_34, %c0_35, %c0_36, %c0_37] : memref<1x8x144x32xf32, #tpu.memory_space<vmem>>, vector<1x1x144x32xf32>
    %58 = vector.shape_cast %57 : vector<1x1x144x32xf32> to vector<144x32xf32>
    %59 = vector.shape_cast %2 : vector<144x1xi1> to vector<144x1xi1>
    %60 = vector.broadcast %59 : vector<144x1xi1> to vector<144x32xi1>
    %61 = arith.select %60, %58, %56 : vector<144x32xi1>, vector<144x32xf32>
    %c0_38 = arith.constant 0 : index
    %c7_39 = arith.constant 7 : index
    %c0_40 = arith.constant 0 : index
    %c0_41 = arith.constant 0 : index
    %62 = vector.load %arg4[%c0_38, %c7_39, %c0_40, %c0_41] : memref<1x8x144x32xf32, #tpu.memory_space<vmem>>, vector<1x1x144x32xf32>
    %63 = vector.shape_cast %62 : vector<1x1x144x32xf32> to vector<144x32xf32>
    %64 = vector.shape_cast %4 : vector<144x1xi1> to vector<144x1xi1>
    %65 = vector.broadcast %64 : vector<144x1xi1> to vector<144x32xi1>
    %66 = arith.select %65, %63, %61 : vector<144x32xi1>, vector<144x32xf32>
    %c0_42 = arith.constant 0 : index
    %c6_43 = arith.constant 6 : index
    %c0_44 = arith.constant 0 : index
    %c0_45 = arith.constant 0 : index
    %67 = vector.load %arg4[%c0_42, %c6_43, %c0_44, %c0_45] : memref<1x8x144x32xf32, #tpu.memory_space<vmem>>, vector<1x1x144x32xf32>
    %68 = vector.shape_cast %67 : vector<1x1x144x32xf32> to vector<144x32xf32>
    %69 = vector.shape_cast %6 : vector<144x1xi1> to vector<144x1xi1>
    %70 = vector.broadcast %69 : vector<144x1xi1> to vector<144x32xi1>
    %71 = arith.select %70, %68, %66 : vector<144x32xi1>, vector<144x32xf32>
    %c0_46 = arith.constant 0 : index
    %c5_47 = arith.constant 5 : index
    %c0_48 = arith.constant 0 : index
    %c0_49 = arith.constant 0 : index
    %72 = vector.load %arg4[%c0_46, %c5_47, %c0_48, %c0_49] : memref<1x8x144x32xf32, #tpu.memory_space<vmem>>, vector<1x1x144x32xf32>
    %73 = vector.shape_cast %72 : vector<1x1x144x32xf32> to vector<144x32xf32>
    %74 = vector.shape_cast %8 : vector<144x1xi1> to vector<144x1xi1>
    %75 = vector.broadcast %74 : vector<144x1xi1> to vector<144x32xi1>
    %76 = arith.select %75, %73, %71 : vector<144x32xi1>, vector<144x32xf32>
    %c0_50 = arith.constant 0 : index
    %c4_51 = arith.constant 4 : index
    %c0_52 = arith.constant 0 : index
    %c0_53 = arith.constant 0 : index
    %77 = vector.load %arg4[%c0_50, %c4_51, %c0_52, %c0_53] : memref<1x8x144x32xf32, #tpu.memory_space<vmem>>, vector<1x1x144x32xf32>
    %78 = vector.shape_cast %77 : vector<1x1x144x32xf32> to vector<144x32xf32>
    %79 = vector.shape_cast %10 : vector<144x1xi1> to vector<144x1xi1>
    %80 = vector.broadcast %79 : vector<144x1xi1> to vector<144x32xi1>
    %81 = arith.select %80, %78, %76 : vector<144x32xi1>, vector<144x32xf32>
    %c0_54 = arith.constant 0 : index
    %c3_55 = arith.constant 3 : index
    %c0_56 = arith.constant 0 : index
    %c0_57 = arith.constant 0 : index
    %82 = vector.load %arg4[%c0_54, %c3_55, %c0_56, %c0_57] : memref<1x8x144x32xf32, #tpu.memory_space<vmem>>, vector<1x1x144x32xf32>
    %83 = vector.shape_cast %82 : vector<1x1x144x32xf32> to vector<144x32xf32>
    %84 = vector.shape_cast %12 : vector<144x1xi1> to vector<144x1xi1>
    %85 = vector.broadcast %84 : vector<144x1xi1> to vector<144x32xi1>
    %86 = arith.select %85, %83, %81 : vector<144x32xi1>, vector<144x32xf32>
    %c0_58 = arith.constant 0 : index
    %c2_59 = arith.constant 2 : index
    %c0_60 = arith.constant 0 : index
    %c0_61 = arith.constant 0 : index
    %87 = vector.load %arg4[%c0_58, %c2_59, %c0_60, %c0_61] : memref<1x8x144x32xf32, #tpu.memory_space<vmem>>, vector<1x1x144x32xf32>
    %88 = vector.shape_cast %87 : vector<1x1x144x32xf32> to vector<144x32xf32>
    %89 = vector.shape_cast %14 : vector<144x1xi1> to vector<144x1xi1>
    %90 = vector.broadcast %89 : vector<144x1xi1> to vector<144x32xi1>
    %91 = arith.select %90, %88, %86 : vector<144x32xi1>, vector<144x32xf32>
    %c0_62 = arith.constant 0 : index
    %c1_63 = arith.constant 1 : index
    %c0_64 = arith.constant 0 : index
    %c0_65 = arith.constant 0 : index
    %92 = vector.load %arg5[%c0_62, %c1_63, %c0_64, %c0_65] : memref<1x8x144x32xf32, #tpu.memory_space<vmem>>, vector<1x1x144x32xf32>
    %93 = vector.shape_cast %92 : vector<1x1x144x32xf32> to vector<144x32xf32>
    %94 = vector.shape_cast %91 : vector<144x32xf32> to vector<1x1x144x32xf32>
    tpu.vector_store %arg5[%c0_62, %c1_63, %c0_64, %c0_65], %94 {strides = array<i32>} : memref<1x8x144x32xf32, #tpu.memory_space<vmem>>, vector<1x1x144x32xf32>,
    %c0_66 = arith.constant 0 : index
    %c2_67 = arith.constant 2 : index
    %c0_68 = arith.constant 0 : index
    %c0_69 = arith.constant 0 : index
    %95 = vector.load %arg4[%c0_66, %c2_67, %c0_68, %c0_69] : memref<1x8x144x32xf32, #tpu.memory_space<vmem>>, vector<1x1x144x32xf32>
    %96 = vector.shape_cast %95 : vector<1x1x144x32xf32> to vector<144x32xf32>
    %c0_70 = arith.constant 0 : index
    %c1_71 = arith.constant 1 : index
    %c0_72 = arith.constant 0 : index
    %c0_73 = arith.constant 0 : index
    %97 = vector.load %arg4[%c0_70, %c1_71, %c0_72, %c0_73] : memref<1x8x144x32xf32, #tpu.memory_space<vmem>>, vector<1x1x144x32xf32>
    %98 = vector.shape_cast %97 : vector<1x1x144x32xf32> to vector<144x32xf32>
    %99 = vector.shape_cast %2 : vector<144x1xi1> to vector<144x1xi1>
    %100 = vector.broadcast %99 : vector<144x1xi1> to vector<144x32xi1>
    %101 = arith.select %100, %98, %96 : vector<144x32xi1>, vector<144x32xf32>
    %c0_74 = arith.constant 0 : index
    %c0_75 = arith.constant 0 : index
    %c0_76 = arith.constant 0 : index
    %c0_77 = arith.constant 0 : index
    %102 = vector.load %arg4[%c0_74, %c0_75, %c0_76, %c0_77] : memref<1x8x144x32xf32, #tpu.memory_space<vmem>>, vector<1x1x144x32xf32>
    %103 = vector.shape_cast %102 : vector<1x1x144x32xf32> to vector<144x32xf32>
    %104 = vector.shape_cast %4 : vector<144x1xi1> to vector<144x1xi1>
    %105 = vector.broadcast %104 : vector<144x1xi1> to vector<144x32xi1>
    %106 = arith.select %105, %103, %101 : vector<144x32xi1>, vector<144x32xf32>
    %c0_78 = arith.constant 0 : index
    %c7_79 = arith.constant 7 : index
    %c0_80 = arith.constant 0 : index
    %c0_81 = arith.constant 0 : index
    %107 = vector.load %arg4[%c0_78, %c7_79, %c0_80, %c0_81] : memref<1x8x144x32xf32, #tpu.memory_space<vmem>>, vector<1x1x144x32xf32>
    %108 = vector.shape_cast %107 : vector<1x1x144x32xf32> to vector<144x32xf32>
    %109 = vector.shape_cast %6 : vector<144x1xi1> to vector<144x1xi1>
    %110 = vector.broadcast %109 : vector<144x1xi1> to vector<144x32xi1>
    %111 = arith.select %110, %108, %106 : vector<144x32xi1>, vector<144x32xf32>
    %c0_82 = arith.constant 0 : index
    %c6_83 = arith.constant 6 : index
    %c0_84 = arith.constant 0 : index
    %c0_85 = arith.constant 0 : index
    %112 = vector.load %arg4[%c0_82, %c6_83, %c0_84, %c0_85] : memref<1x8x144x32xf32, #tpu.memory_space<vmem>>, vector<1x1x144x32xf32>
    %113 = vector.shape_cast %112 : vector<1x1x144x32xf32> to vector<144x32xf32>
    %114 = vector.shape_cast %8 : vector<144x1xi1> to vector<144x1xi1>
    %115 = vector.broadcast %114 : vector<144x1xi1> to vector<144x32xi1>
    %116 = arith.select %115, %113, %111 : vector<144x32xi1>, vector<144x32xf32>
    %c0_86 = arith.constant 0 : index
    %c5_87 = arith.constant 5 : index
    %c0_88 = arith.constant 0 : index
    %c0_89 = arith.constant 0 : index
    %117 = vector.load %arg4[%c0_86, %c5_87, %c0_88, %c0_89] : memref<1x8x144x32xf32, #tpu.memory_space<vmem>>, vector<1x1x144x32xf32>
    %118 = vector.shape_cast %117 : vector<1x1x144x32xf32> to vector<144x32xf32>
    %119 = vector.shape_cast %10 : vector<144x1xi1> to vector<144x1xi1>
    %120 = vector.broadcast %119 : vector<144x1xi1> to vector<144x32xi1>
    %121 = arith.select %120, %118, %116 : vector<144x32xi1>, vector<144x32xf32>
    %c0_90 = arith.constant 0 : index
    %c4_91 = arith.constant 4 : index
    %c0_92 = arith.constant 0 : index
    %c0_93 = arith.constant 0 : index
    %122 = vector.load %arg4[%c0_90, %c4_91, %c0_92, %c0_93] : memref<1x8x144x32xf32, #tpu.memory_space<vmem>>, vector<1x1x144x32xf32>
    %123 = vector.shape_cast %122 : vector<1x1x144x32xf32> to vector<144x32xf32>
    %124 = vector.shape_cast %12 : vector<144x1xi1> to vector<144x1xi1>
    %125 = vector.broadcast %124 : vector<144x1xi1> to vector<144x32xi1>
    %126 = arith.select %125, %123, %121 : vector<144x32xi1>, vector<144x32xf32>
    %c0_94 = arith.constant 0 : index
    %c3_95 = arith.constant 3 : index
    %c0_96 = arith.constant 0 : index
    %c0_97 = arith.constant 0 : index
    %127 = vector.load %arg4[%c0_94, %c3_95, %c0_96, %c0_97] : memref<1x8x144x32xf32, #tpu.memory_space<vmem>>, vector<1x1x144x32xf32>
    %128 = vector.shape_cast %127 : vector<1x1x144x32xf32> to vector<144x32xf32>
    %129 = vector.shape_cast %14 : vector<144x1xi1> to vector<144x1xi1>
    %130 = vector.broadcast %129 : vector<144x1xi1> to vector<144x32xi1>
    %131 = arith.select %130, %128, %126 : vector<144x32xi1>, vector<144x32xf32>
    %c0_98 = arith.constant 0 : index
    %c2_99 = arith.constant 2 : index
    %c0_100 = arith.constant 0 : index
    %c0_101 = arith.constant 0 : index
    %132 = vector.load %arg5[%c0_98, %c2_99, %c0_100, %c0_101] : memref<1x8x144x32xf32, #tpu.memory_space<vmem>>, vector<1x1x144x32xf32>
    %133 = vector.shape_cast %132 : vector<1x1x144x32xf32> to vector<144x32xf32>
    %134 = vector.shape_cast %131 : vector<144x32xf32> to vector<1x1x144x32xf32>
    tpu.vector_store %arg5[%c0_98, %c2_99, %c0_100, %c0_101], %134 {strides = array<i32>} : memref<1x8x144x32xf32, #tpu.memory_space<vmem>>, vector<1x1x144x32xf32>,
    %c0_102 = arith.constant 0 : index
    %c3_103 = arith.constant 3 : index
    %c0_104 = arith.constant 0 : index
    %c0_105 = arith.constant 0 : index
    %135 = vector.load %arg4[%c0_102, %c3_103, %c0_104, %c0_105] : memref<1x8x144x32xf32, #tpu.memory_space<vmem>>, vector<1x1x144x32xf32>
    %136 = vector.shape_cast %135 : vector<1x1x144x32xf32> to vector<144x32xf32>
    %c0_106 = arith.constant 0 : index
    %c2_107 = arith.constant 2 : index
    %c0_108 = arith.constant 0 : index
    %c0_109 = arith.constant 0 : index
    %137 = vector.load %arg4[%c0_106, %c2_107, %c0_108, %c0_109] : memref<1x8x144x32xf32, #tpu.memory_space<vmem>>, vector<1x1x144x32xf32>
    %138 = vector.shape_cast %137 : vector<1x1x144x32xf32> to vector<144x32xf32>
    %139 = vector.shape_cast %2 : vector<144x1xi1> to vector<144x1xi1>
    %140 = vector.broadcast %139 : vector<144x1xi1> to vector<144x32xi1>
    %141 = arith.select %140, %138, %136 : vector<144x32xi1>, vector<144x32xf32>
    %c0_110 = arith.constant 0 : index
    %c1_111 = arith.constant 1 : index
    %c0_112 = arith.constant 0 : index
    %c0_113 = arith.constant 0 : index
    %142 = vector.load %arg4[%c0_110, %c1_111, %c0_112, %c0_113] : memref<1x8x144x32xf32, #tpu.memory_space<vmem>>, vector<1x1x144x32xf32>
    %143 = vector.shape_cast %142 : vector<1x1x144x32xf32> to vector<144x32xf32>
    %144 = vector.shape_cast %4 : vector<144x1xi1> to vector<144x1xi1>
    %145 = vector.broadcast %144 : vector<144x1xi1> to vector<144x32xi1>
    %146 = arith.select %145, %143, %141 : vector<144x32xi1>, vector<144x32xf32>
    %c0_114 = arith.constant 0 : index
    %c0_115 = arith.constant 0 : index
    %c0_116 = arith.constant 0 : index
    %c0_117 = arith.constant 0 : index
    %147 = vector.load %arg4[%c0_114, %c0_115, %c0_116, %c0_117] : memref<1x8x144x32xf32, #tpu.memory_space<vmem>>, vector<1x1x144x32xf32>
    %148 = vector.shape_cast %147 : vector<1x1x144x32xf32> to vector<144x32xf32>
    %149 = vector.shape_cast %6 : vector<144x1xi1> to vector<144x1xi1>
    %150 = vector.broadcast %149 : vector<144x1xi1> to vector<144x32xi1>
    %151 = arith.select %150, %148, %146 : vector<144x32xi1>, vector<144x32xf32>
    %c0_118 = arith.constant 0 : index
    %c7_119 = arith.constant 7 : index
    %c0_120 = arith.constant 0 : index
    %c0_121 = arith.constant 0 : index
    %152 = vector.load %arg4[%c0_118, %c7_119, %c0_120, %c0_121] : memref<1x8x144x32xf32, #tpu.memory_space<vmem>>, vector<1x1x144x32xf32>
    %153 = vector.shape_cast %152 : vector<1x1x144x32xf32> to vector<144x32xf32>
    %154 = vector.shape_cast %8 : vector<144x1xi1> to vector<144x1xi1>
    %155 = vector.broadcast %154 : vector<144x1xi1> to vector<144x32xi1>
    %156 = arith.select %155, %153, %151 : vector<144x32xi1>, vector<144x32xf32>
    %c0_122 = arith.constant 0 : index
    %c6_123 = arith.constant 6 : index
    %c0_124 = arith.constant 0 : index
    %c0_125 = arith.constant 0 : index
    %157 = vector.load %arg4[%c0_122, %c6_123, %c0_124, %c0_125] : memref<1x8x144x32xf32, #tpu.memory_space<vmem>>, vector<1x1x144x32xf32>
    %158 = vector.shape_cast %157 : vector<1x1x144x32xf32> to vector<144x32xf32>
    %159 = vector.shape_cast %10 : vector<144x1xi1> to vector<144x1xi1>
    %160 = vector.broadcast %159 : vector<144x1xi1> to vector<144x32xi1>
    %161 = arith.select %160, %158, %156 : vector<144x32xi1>, vector<144x32xf32>
    %c0_126 = arith.constant 0 : index
    %c5_127 = arith.constant 5 : index
    %c0_128 = arith.constant 0 : index
    %c0_129 = arith.constant 0 : index
    %162 = vector.load %arg4[%c0_126, %c5_127, %c0_128, %c0_129] : memref<1x8x144x32xf32, #tpu.memory_space<vmem>>, vector<1x1x144x32xf32>
    %163 = vector.shape_cast %162 : vector<1x1x144x32xf32> to vector<144x32xf32>
    %164 = vector.shape_cast %12 : vector<144x1xi1> to vector<144x1xi1>
    %165 = vector.broadcast %164 : vector<144x1xi1> to vector<144x32xi1>
    %166 = arith.select %165, %163, %161 : vector<144x32xi1>, vector<144x32xf32>
    %c0_130 = arith.constant 0 : index
    %c4_131 = arith.constant 4 : index
    %c0_132 = arith.constant 0 : index
    %c0_133 = arith.constant 0 : index
    %167 = vector.load %arg4[%c0_130, %c4_131, %c0_132, %c0_133] : memref<1x8x144x32xf32, #tpu.memory_space<vmem>>, vector<1x1x144x32xf32>
    %168 = vector.shape_cast %167 : vector<1x1x144x32xf32> to vector<144x32xf32>
    %169 = vector.shape_cast %14 : vector<144x1xi1> to vector<144x1xi1>
    %170 = vector.broadcast %169 : vector<144x1xi1> to vector<144x32xi1>
    %171 = arith.select %170, %168, %166 : vector<144x32xi1>, vector<144x32xf32>
    %c0_134 = arith.constant 0 : index
    %c3_135 = arith.constant 3 : index
    %c0_136 = arith.constant 0 : index
    %c0_137 = arith.constant 0 : index
    %172 = vector.load %arg5[%c0_134, %c3_135, %c0_136, %c0_137] : memref<1x8x144x32xf32, #tpu.memory_space<vmem>>, vector<1x1x144x32xf32>
    %173 = vector.shape_cast %172 : vector<1x1x144x32xf32> to vector<144x32xf32>
    %174 = vector.shape_cast %171 : vector<144x32xf32> to vector<1x1x144x32xf32>
    tpu.vector_store %arg5[%c0_134, %c3_135, %c0_136, %c0_137], %174 {strides = array<i32>} : memref<1x8x144x32xf32, #tpu.memory_space<vmem>>, vector<1x1x144x32xf32>,
    %c0_138 = arith.constant 0 : index
    %c4_139 = arith.constant 4 : index
    %c0_140 = arith.constant 0 : index
    %c0_141 = arith.constant 0 : index
    %175 = vector.load %arg4[%c0_138, %c4_139, %c0_140, %c0_141] : memref<1x8x144x32xf32, #tpu.memory_space<vmem>>, vector<1x1x144x32xf32>
    %176 = vector.shape_cast %175 : vector<1x1x144x32xf32> to vector<144x32xf32>
    %c0_142 = arith.constant 0 : index
    %c3_143 = arith.constant 3 : index
    %c0_144 = arith.constant 0 : index
    %c0_145 = arith.constant 0 : index
    %177 = vector.load %arg4[%c0_142, %c3_143, %c0_144, %c0_145] : memref<1x8x144x32xf32, #tpu.memory_space<vmem>>, vector<1x1x144x32xf32>
    %178 = vector.shape_cast %177 : vector<1x1x144x32xf32> to vector<144x32xf32>
    %179 = vector.shape_cast %2 : vector<144x1xi1> to vector<144x1xi1>
    %180 = vector.broadcast %179 : vector<144x1xi1> to vector<144x32xi1>
    %181 = arith.select %180, %178, %176 : vector<144x32xi1>, vector<144x32xf32>
    %c0_146 = arith.constant 0 : index
    %c2_147 = arith.constant 2 : index
    %c0_148 = arith.constant 0 : index
    %c0_149 = arith.constant 0 : index
    %182 = vector.load %arg4[%c0_146, %c2_147, %c0_148, %c0_149] : memref<1x8x144x32xf32, #tpu.memory_space<vmem>>, vector<1x1x144x32xf32>
    %183 = vector.shape_cast %182 : vector<1x1x144x32xf32> to vector<144x32xf32>
    %184 = vector.shape_cast %4 : vector<144x1xi1> to vector<144x1xi1>
    %185 = vector.broadcast %184 : vector<144x1xi1> to vector<144x32xi1>
    %186 = arith.select %185, %183, %181 : vector<144x32xi1>, vector<144x32xf32>
    %c0_150 = arith.constant 0 : index
    %c1_151 = arith.constant 1 : index
    %c0_152 = arith.constant 0 : index
    %c0_153 = arith.constant 0 : index
    %187 = vector.load %arg4[%c0_150, %c1_151, %c0_152, %c0_153] : memref<1x8x144x32xf32, #tpu.memory_space<vmem>>, vector<1x1x144x32xf32>
    %188 = vector.shape_cast %187 : vector<1x1x144x32xf32> to vector<144x32xf32>
    %189 = vector.shape_cast %6 : vector<144x1xi1> to vector<144x1xi1>
    %190 = vector.broadcast %189 : vector<144x1xi1> to vector<144x32xi1>
    %191 = arith.select %190, %188, %186 : vector<144x32xi1>, vector<144x32xf32>
    %c0_154 = arith.constant 0 : index
    %c0_155 = arith.constant 0 : index
    %c0_156 = arith.constant 0 : index
    %c0_157 = arith.constant 0 : index
    %192 = vector.load %arg4[%c0_154, %c0_155, %c0_156, %c0_157] : memref<1x8x144x32xf32, #tpu.memory_space<vmem>>, vector<1x1x144x32xf32>
    %193 = vector.shape_cast %192 : vector<1x1x144x32xf32> to vector<144x32xf32>
    %194 = vector.shape_cast %8 : vector<144x1xi1> to vector<144x1xi1>
    %195 = vector.broadcast %194 : vector<144x1xi1> to vector<144x32xi1>
    %196 = arith.select %195, %193, %191 : vector<144x32xi1>, vector<144x32xf32>
    %c0_158 = arith.constant 0 : index
    %c7_159 = arith.constant 7 : index
    %c0_160 = arith.constant 0 : index
    %c0_161 = arith.constant 0 : index
    %197 = vector.load %arg4[%c0_158, %c7_159, %c0_160, %c0_161] : memref<1x8x144x32xf32, #tpu.memory_space<vmem>>, vector<1x1x144x32xf32>
    %198 = vector.shape_cast %197 : vector<1x1x144x32xf32> to vector<144x32xf32>
    %199 = vector.shape_cast %10 : vector<144x1xi1> to vector<144x1xi1>
    %200 = vector.broadcast %199 : vector<144x1xi1> to vector<144x32xi1>
    %201 = arith.select %200, %198, %196 : vector<144x32xi1>, vector<144x32xf32>
    %c0_162 = arith.constant 0 : index
    %c6_163 = arith.constant 6 : index
    %c0_164 = arith.constant 0 : index
    %c0_165 = arith.constant 0 : index
    %202 = vector.load %arg4[%c0_162, %c6_163, %c0_164, %c0_165] : memref<1x8x144x32xf32, #tpu.memory_space<vmem>>, vector<1x1x144x32xf32>
    %203 = vector.shape_cast %202 : vector<1x1x144x32xf32> to vector<144x32xf32>
    %204 = vector.shape_cast %12 : vector<144x1xi1> to vector<144x1xi1>
    %205 = vector.broadcast %204 : vector<144x1xi1> to vector<144x32xi1>
    %206 = arith.select %205, %203, %201 : vector<144x32xi1>, vector<144x32xf32>
    %c0_166 = arith.constant 0 : index
    %c5_167 = arith.constant 5 : index
    %c0_168 = arith.constant 0 : index
    %c0_169 = arith.constant 0 : index
    %207 = vector.load %arg4[%c0_166, %c5_167, %c0_168, %c0_169] : memref<1x8x144x32xf32, #tpu.memory_space<vmem>>, vector<1x1x144x32xf32>
    %208 = vector.shape_cast %207 : vector<1x1x144x32xf32> to vector<144x32xf32>
    %209 = vector.shape_cast %14 : vector<144x1xi1> to vector<144x1xi1>
    %210 = vector.broadcast %209 : vector<144x1xi1> to vector<144x32xi1>
    %211 = arith.select %210, %208, %206 : vector<144x32xi1>, vector<144x32xf32>
    %c0_170 = arith.constant 0 : index
    %c4_171 = arith.constant 4 : index
    %c0_172 = arith.constant 0 : index
    %c0_173 = arith.constant 0 : index
    %212 = vector.load %arg5[%c0_170, %c4_171, %c0_172, %c0_173] : memref<1x8x144x32xf32, #tpu.memory_space<vmem>>, vector<1x1x144x32xf32>
    %213 = vector.shape_cast %212 : vector<1x1x144x32xf32> to vector<144x32xf32>
    %214 = vector.shape_cast %211 : vector<144x32xf32> to vector<1x1x144x32xf32>
    tpu.vector_store %arg5[%c0_170, %c4_171, %c0_172, %c0_173], %214 {strides = array<i32>} : memref<1x8x144x32xf32, #tpu.memory_space<vmem>>, vector<1x1x144x32xf32>,
    %c0_174 = arith.constant 0 : index
    %c5_175 = arith.constant 5 : index
    %c0_176 = arith.constant 0 : index
    %c0_177 = arith.constant 0 : index
    %215 = vector.load %arg4[%c0_174, %c5_175, %c0_176, %c0_177] : memref<1x8x144x32xf32, #tpu.memory_space<vmem>>, vector<1x1x144x32xf32>
    %216 = vector.shape_cast %215 : vector<1x1x144x32xf32> to vector<144x32xf32>
    %c0_178 = arith.constant 0 : index
    %c4_179 = arith.constant 4 : index
    %c0_180 = arith.constant 0 : index
    %c0_181 = arith.constant 0 : index
    %217 = vector.load %arg4[%c0_178, %c4_179, %c0_180, %c0_181] : memref<1x8x144x32xf32, #tpu.memory_space<vmem>>, vector<1x1x144x32xf32>
    %218 = vector.shape_cast %217 : vector<1x1x144x32xf32> to vector<144x32xf32>
    %219 = vector.shape_cast %2 : vector<144x1xi1> to vector<144x1xi1>
    %220 = vector.broadcast %219 : vector<144x1xi1> to vector<144x32xi1>
    %221 = arith.select %220, %218, %216 : vector<144x32xi1>, vector<144x32xf32>
    %c0_182 = arith.constant 0 : index
    %c3_183 = arith.constant 3 : index
    %c0_184 = arith.constant 0 : index
    %c0_185 = arith.constant 0 : index
    %222 = vector.load %arg4[%c0_182, %c3_183, %c0_184, %c0_185] : memref<1x8x144x32xf32, #tpu.memory_space<vmem>>, vector<1x1x144x32xf32>
    %223 = vector.shape_cast %222 : vector<1x1x144x32xf32> to vector<144x32xf32>
    %224 = vector.shape_cast %4 : vector<144x1xi1> to vector<144x1xi1>
    %225 = vector.broadcast %224 : vector<144x1xi1> to vector<144x32xi1>
    %226 = arith.select %225, %223, %221 : vector<144x32xi1>, vector<144x32xf32>
    %c0_186 = arith.constant 0 : index
    %c2_187 = arith.constant 2 : index
    %c0_188 = arith.constant 0 : index
    %c0_189 = arith.constant 0 : index
    %227 = vector.load %arg4[%c0_186, %c2_187, %c0_188, %c0_189] : memref<1x8x144x32xf32, #tpu.memory_space<vmem>>, vector<1x1x144x32xf32>
    %228 = vector.shape_cast %227 : vector<1x1x144x32xf32> to vector<144x32xf32>
    %229 = vector.shape_cast %6 : vector<144x1xi1> to vector<144x1xi1>
    %230 = vector.broadcast %229 : vector<144x1xi1> to vector<144x32xi1>
    %231 = arith.select %230, %228, %226 : vector<144x32xi1>, vector<144x32xf32>
    %c0_190 = arith.constant 0 : index
    %c1_191 = arith.constant 1 : index
    %c0_192 = arith.constant 0 : index
    %c0_193 = arith.constant 0 : index
    %232 = vector.load %arg4[%c0_190, %c1_191, %c0_192, %c0_193] : memref<1x8x144x32xf32, #tpu.memory_space<vmem>>, vector<1x1x144x32xf32>
    %233 = vector.shape_cast %232 : vector<1x1x144x32xf32> to vector<144x32xf32>
    %234 = vector.shape_cast %8 : vector<144x1xi1> to vector<144x1xi1>
    %235 = vector.broadcast %234 : vector<144x1xi1> to vector<144x32xi1>
    %236 = arith.select %235, %233, %231 : vector<144x32xi1>, vector<144x32xf32>
    %c0_194 = arith.constant 0 : index
    %c0_195 = arith.constant 0 : index
    %c0_196 = arith.constant 0 : index
    %c0_197 = arith.constant 0 : index
    %237 = vector.load %arg4[%c0_194, %c0_195, %c0_196, %c0_197] : memref<1x8x144x32xf32, #tpu.memory_space<vmem>>, vector<1x1x144x32xf32>
    %238 = vector.shape_cast %237 : vector<1x1x144x32xf32> to vector<144x32xf32>
    %239 = vector.shape_cast %10 : vector<144x1xi1> to vector<144x1xi1>
    %240 = vector.broadcast %239 : vector<144x1xi1> to vector<144x32xi1>
    %241 = arith.select %240, %238, %236 : vector<144x32xi1>, vector<144x32xf32>
    %c0_198 = arith.constant 0 : index
    %c7_199 = arith.constant 7 : index
    %c0_200 = arith.constant 0 : index
    %c0_201 = arith.constant 0 : index
    %242 = vector.load %arg4[%c0_198, %c7_199, %c0_200, %c0_201] : memref<1x8x144x32xf32, #tpu.memory_space<vmem>>, vector<1x1x144x32xf32>
    %243 = vector.shape_cast %242 : vector<1x1x144x32xf32> to vector<144x32xf32>
    %244 = vector.shape_cast %12 : vector<144x1xi1> to vector<144x1xi1>
    %245 = vector.broadcast %244 : vector<144x1xi1> to vector<144x32xi1>
    %246 = arith.select %245, %243, %241 : vector<144x32xi1>, vector<144x32xf32>
    %c0_202 = arith.constant 0 : index
    %c6_203 = arith.constant 6 : index
    %c0_204 = arith.constant 0 : index
    %c0_205 = arith.constant 0 : index
    %247 = vector.load %arg4[%c0_202, %c6_203, %c0_204, %c0_205] : memref<1x8x144x32xf32, #tpu.memory_space<vmem>>, vector<1x1x144x32xf32>
    %248 = vector.shape_cast %247 : vector<1x1x144x32xf32> to vector<144x32xf32>
    %249 = vector.shape_cast %14 : vector<144x1xi1> to vector<144x1xi1>
    %250 = vector.broadcast %249 : vector<144x1xi1> to vector<144x32xi1>
    %251 = arith.select %250, %248, %246 : vector<144x32xi1>, vector<144x32xf32>
    %c0_206 = arith.constant 0 : index
    %c5_207 = arith.constant 5 : index
    %c0_208 = arith.constant 0 : index
    %c0_209 = arith.constant 0 : index
    %252 = vector.load %arg5[%c0_206, %c5_207, %c0_208, %c0_209] : memref<1x8x144x32xf32, #tpu.memory_space<vmem>>, vector<1x1x144x32xf32>
    %253 = vector.shape_cast %252 : vector<1x1x144x32xf32> to vector<144x32xf32>
    %254 = vector.shape_cast %251 : vector<144x32xf32> to vector<1x1x144x32xf32>
    tpu.vector_store %arg5[%c0_206, %c5_207, %c0_208, %c0_209], %254 {strides = array<i32>} : memref<1x8x144x32xf32, #tpu.memory_space<vmem>>, vector<1x1x144x32xf32>,
    %c0_210 = arith.constant 0 : index
    %c6_211 = arith.constant 6 : index
    %c0_212 = arith.constant 0 : index
    %c0_213 = arith.constant 0 : index
    %255 = vector.load %arg4[%c0_210, %c6_211, %c0_212, %c0_213] : memref<1x8x144x32xf32, #tpu.memory_space<vmem>>, vector<1x1x144x32xf32>
    %256 = vector.shape_cast %255 : vector<1x1x144x32xf32> to vector<144x32xf32>
    %c0_214 = arith.constant 0 : index
    %c5_215 = arith.constant 5 : index
    %c0_216 = arith.constant 0 : index
    %c0_217 = arith.constant 0 : index
    %257 = vector.load %arg4[%c0_214, %c5_215, %c0_216, %c0_217] : memref<1x8x144x32xf32, #tpu.memory_space<vmem>>, vector<1x1x144x32xf32>
    %258 = vector.shape_cast %257 : vector<1x1x144x32xf32> to vector<144x32xf32>
    %259 = vector.shape_cast %2 : vector<144x1xi1> to vector<144x1xi1>
    %260 = vector.broadcast %259 : vector<144x1xi1> to vector<144x32xi1>
    %261 = arith.select %260, %258, %256 : vector<144x32xi1>, vector<144x32xf32>
    %c0_218 = arith.constant 0 : index
    %c4_219 = arith.constant 4 : index
    %c0_220 = arith.constant 0 : index
    %c0_221 = arith.constant 0 : index
    %262 = vector.load %arg4[%c0_218, %c4_219, %c0_220, %c0_221] : memref<1x8x144x32xf32, #tpu.memory_space<vmem>>, vector<1x1x144x32xf32>
    %263 = vector.shape_cast %262 : vector<1x1x144x32xf32> to vector<144x32xf32>
    %264 = vector.shape_cast %4 : vector<144x1xi1> to vector<144x1xi1>
    %265 = vector.broadcast %264 : vector<144x1xi1> to vector<144x32xi1>
    %266 = arith.select %265, %263, %261 : vector<144x32xi1>, vector<144x32xf32>
    %c0_222 = arith.constant 0 : index
    %c3_223 = arith.constant 3 : index
    %c0_224 = arith.constant 0 : index
    %c0_225 = arith.constant 0 : index
    %267 = vector.load %arg4[%c0_222, %c3_223, %c0_224, %c0_225] : memref<1x8x144x32xf32, #tpu.memory_space<vmem>>, vector<1x1x144x32xf32>
    %268 = vector.shape_cast %267 : vector<1x1x144x32xf32> to vector<144x32xf32>
    %269 = vector.shape_cast %6 : vector<144x1xi1> to vector<144x1xi1>
    %270 = vector.broadcast %269 : vector<144x1xi1> to vector<144x32xi1>
    %271 = arith.select %270, %268, %266 : vector<144x32xi1>, vector<144x32xf32>
    %c0_226 = arith.constant 0 : index
    %c2_227 = arith.constant 2 : index
    %c0_228 = arith.constant 0 : index
    %c0_229 = arith.constant 0 : index
    %272 = vector.load %arg4[%c0_226, %c2_227, %c0_228, %c0_229] : memref<1x8x144x32xf32, #tpu.memory_space<vmem>>, vector<1x1x144x32xf32>
    %273 = vector.shape_cast %272 : vector<1x1x144x32xf32> to vector<144x32xf32>
    %274 = vector.shape_cast %8 : vector<144x1xi1> to vector<144x1xi1>
    %275 = vector.broadcast %274 : vector<144x1xi1> to vector<144x32xi1>
    %276 = arith.select %275, %273, %271 : vector<144x32xi1>, vector<144x32xf32>
    %c0_230 = arith.constant 0 : index
    %c1_231 = arith.constant 1 : index
    %c0_232 = arith.constant 0 : index
    %c0_233 = arith.constant 0 : index
    %277 = vector.load %arg4[%c0_230, %c1_231, %c0_232, %c0_233] : memref<1x8x144x32xf32, #tpu.memory_space<vmem>>, vector<1x1x144x32xf32>
    %278 = vector.shape_cast %277 : vector<1x1x144x32xf32> to vector<144x32xf32>
    %279 = vector.shape_cast %10 : vector<144x1xi1> to vector<144x1xi1>
    %280 = vector.broadcast %279 : vector<144x1xi1> to vector<144x32xi1>
    %281 = arith.select %280, %278, %276 : vector<144x32xi1>, vector<144x32xf32>
    %c0_234 = arith.constant 0 : index
    %c0_235 = arith.constant 0 : index
    %c0_236 = arith.constant 0 : index
    %c0_237 = arith.constant 0 : index
    %282 = vector.load %arg4[%c0_234, %c0_235, %c0_236, %c0_237] : memref<1x8x144x32xf32, #tpu.memory_space<vmem>>, vector<1x1x144x32xf32>
    %283 = vector.shape_cast %282 : vector<1x1x144x32xf32> to vector<144x32xf32>
    %284 = vector.shape_cast %12 : vector<144x1xi1> to vector<144x1xi1>
    %285 = vector.broadcast %284 : vector<144x1xi1> to vector<144x32xi1>
    %286 = arith.select %285, %283, %281 : vector<144x32xi1>, vector<144x32xf32>
    %c0_238 = arith.constant 0 : index
    %c7_239 = arith.constant 7 : index
    %c0_240 = arith.constant 0 : index
    %c0_241 = arith.constant 0 : index
    %287 = vector.load %arg4[%c0_238, %c7_239, %c0_240, %c0_241] : memref<1x8x144x32xf32, #tpu.memory_space<vmem>>, vector<1x1x144x32xf32>
    %288 = vector.shape_cast %287 : vector<1x1x144x32xf32> to vector<144x32xf32>
    %289 = vector.shape_cast %14 : vector<144x1xi1> to vector<144x1xi1>
    %290 = vector.broadcast %289 : vector<144x1xi1> to vector<144x32xi1>
    %291 = arith.select %290, %288, %286 : vector<144x32xi1>, vector<144x32xf32>
    %c0_242 = arith.constant 0 : index
    %c6_243 = arith.constant 6 : index
    %c0_244 = arith.constant 0 : index
    %c0_245 = arith.constant 0 : index
    %292 = vector.load %arg5[%c0_242, %c6_243, %c0_244, %c0_245] : memref<1x8x144x32xf32, #tpu.memory_space<vmem>>, vector<1x1x144x32xf32>
    %293 = vector.shape_cast %292 : vector<1x1x144x32xf32> to vector<144x32xf32>
    %294 = vector.shape_cast %291 : vector<144x32xf32> to vector<1x1x144x32xf32>
    tpu.vector_store %arg5[%c0_242, %c6_243, %c0_244, %c0_245], %294 {strides = array<i32>} : memref<1x8x144x32xf32, #tpu.memory_space<vmem>>, vector<1x1x144x32xf32>,
    %c0_246 = arith.constant 0 : index
    %c7_247 = arith.constant 7 : index
    %c0_248 = arith.constant 0 : index
    %c0_249 = arith.constant 0 : index
    %295 = vector.load %arg4[%c0_246, %c7_247, %c0_248, %c0_249] : memref<1x8x144x32xf32, #tpu.memory_space<vmem>>, vector<1x1x144x32xf32>
    %296 = vector.shape_cast %295 : vector<1x1x144x32xf32> to vector<144x32xf32>
    %c0_250 = arith.constant 0 : index
    %c6_251 = arith.constant 6 : index
    %c0_252 = arith.constant 0 : index
    %c0_253 = arith.constant 0 : index
    %297 = vector.load %arg4[%c0_250, %c6_251, %c0_252, %c0_253] : memref<1x8x144x32xf32, #tpu.memory_space<vmem>>, vector<1x1x144x32xf32>
    %298 = vector.shape_cast %297 : vector<1x1x144x32xf32> to vector<144x32xf32>
    %299 = vector.shape_cast %2 : vector<144x1xi1> to vector<144x1xi1>
    %300 = vector.broadcast %299 : vector<144x1xi1> to vector<144x32xi1>
    %301 = arith.select %300, %298, %296 : vector<144x32xi1>, vector<144x32xf32>
    %c0_254 = arith.constant 0 : index
    %c5_255 = arith.constant 5 : index
    %c0_256 = arith.constant 0 : index
    %c0_257 = arith.constant 0 : index
    %302 = vector.load %arg4[%c0_254, %c5_255, %c0_256, %c0_257] : memref<1x8x144x32xf32, #tpu.memory_space<vmem>>, vector<1x1x144x32xf32>
    %303 = vector.shape_cast %302 : vector<1x1x144x32xf32> to vector<144x32xf32>
    %304 = vector.shape_cast %4 : vector<144x1xi1> to vector<144x1xi1>
    %305 = vector.broadcast %304 : vector<144x1xi1> to vector<144x32xi1>
    %306 = arith.select %305, %303, %301 : vector<144x32xi1>, vector<144x32xf32>
    %c0_258 = arith.constant 0 : index
    %c4_259 = arith.constant 4 : index
    %c0_260 = arith.constant 0 : index
    %c0_261 = arith.constant 0 : index
    %307 = vector.load %arg4[%c0_258, %c4_259, %c0_260, %c0_261] : memref<1x8x144x32xf32, #tpu.memory_space<vmem>>, vector<1x1x144x32xf32>
    %308 = vector.shape_cast %307 : vector<1x1x144x32xf32> to vector<144x32xf32>
    %309 = vector.shape_cast %6 : vector<144x1xi1> to vector<144x1xi1>
    %310 = vector.broadcast %309 : vector<144x1xi1> to vector<144x32xi1>
    %311 = arith.select %310, %308, %306 : vector<144x32xi1>, vector<144x32xf32>
    %c0_262 = arith.constant 0 : index
    %c3_263 = arith.constant 3 : index
    %c0_264 = arith.constant 0 : index
    %c0_265 = arith.constant 0 : index
    %312 = vector.load %arg4[%c0_262, %c3_263, %c0_264, %c0_265] : memref<1x8x144x32xf32, #tpu.memory_space<vmem>>, vector<1x1x144x32xf32>
    %313 = vector.shape_cast %312 : vector<1x1x144x32xf32> to vector<144x32xf32>
    %314 = vector.shape_cast %8 : vector<144x1xi1> to vector<144x1xi1>
    %315 = vector.broadcast %314 : vector<144x1xi1> to vector<144x32xi1>
    %316 = arith.select %315, %313, %311 : vector<144x32xi1>, vector<144x32xf32>
    %c0_266 = arith.constant 0 : index
    %c2_267 = arith.constant 2 : index
    %c0_268 = arith.constant 0 : index
    %c0_269 = arith.constant 0 : index
    %317 = vector.load %arg4[%c0_266, %c2_267, %c0_268, %c0_269] : memref<1x8x144x32xf32, #tpu.memory_space<vmem>>, vector<1x1x144x32xf32>
    %318 = vector.shape_cast %317 : vector<1x1x144x32xf32> to vector<144x32xf32>
    %319 = vector.shape_cast %10 : vector<144x1xi1> to vector<144x1xi1>
    %320 = vector.broadcast %319 : vector<144x1xi1> to vector<144x32xi1>
    %321 = arith.select %320, %318, %316 : vector<144x32xi1>, vector<144x32xf32>
    %c0_270 = arith.constant 0 : index
    %c1_271 = arith.constant 1 : index
    %c0_272 = arith.constant 0 : index
    %c0_273 = arith.constant 0 : index
    %322 = vector.load %arg4[%c0_270, %c1_271, %c0_272, %c0_273] : memref<1x8x144x32xf32, #tpu.memory_space<vmem>>, vector<1x1x144x32xf32>
    %323 = vector.shape_cast %322 : vector<1x1x144x32xf32> to vector<144x32xf32>
    %324 = vector.shape_cast %12 : vector<144x1xi1> to vector<144x1xi1>
    %325 = vector.broadcast %324 : vector<144x1xi1> to vector<144x32xi1>
    %326 = arith.select %325, %323, %321 : vector<144x32xi1>, vector<144x32xf32>
    %c0_274 = arith.constant 0 : index
    %c0_275 = arith.constant 0 : index
    %c0_276 = arith.constant 0 : index
    %c0_277 = arith.constant 0 : index
    %327 = vector.load %arg4[%c0_274, %c0_275, %c0_276, %c0_277] : memref<1x8x144x32xf32, #tpu.memory_space<vmem>>, vector<1x1x144x32xf32>
    %328 = vector.shape_cast %327 : vector<1x1x144x32xf32> to vector<144x32xf32>
    %329 = vector.shape_cast %14 : vector<144x1xi1> to vector<144x1xi1>
    %330 = vector.broadcast %329 : vector<144x1xi1> to vector<144x32xi1>
    %331 = arith.select %330, %328, %326 : vector<144x32xi1>, vector<144x32xf32>
    %c0_278 = arith.constant 0 : index
    %c7_279 = arith.constant 7 : index
    %c0_280 = arith.constant 0 : index
    %c0_281 = arith.constant 0 : index
    %332 = vector.load %arg5[%c0_278, %c7_279, %c0_280, %c0_281] : memref<1x8x144x32xf32, #tpu.memory_space<vmem>>, vector<1x1x144x32xf32>
    %333 = vector.shape_cast %332 : vector<1x1x144x32xf32> to vector<144x32xf32>
    %334 = vector.shape_cast %331 : vector<144x32xf32> to vector<1x1x144x32xf32>
    tpu.vector_store %arg5[%c0_278, %c7_279, %c0_280, %c0_281], %334 {strides = array<i32>} : memref<1x8x144x32xf32, #tpu.memory_space<vmem>>, vector<1x1x144x32xf32>,
    return
  }
  func.func @transform_0(%arg0: i32, %arg1: i32, %arg2: i32) -> (i32, i32) {
    %c0_i32 = arith.constant 0 : i32
    %c0_i32_0 = arith.constant 0 : i32
    return %arg0, %c0_i32 : i32, i32
  }
  func.func @transform_1(%arg0: i32, %arg1: i32, %arg2: i32) -> (i32, i32, i32, i32) {
    %c0_i32 = arith.constant 0 : i32
    %c0_i32_0 = arith.constant 0 : i32
    return %arg1, %c0_i32, %arg0, %arg2 : i32, i32, i32, i32
  }
  func.func @transform_2(%arg0: i32, %arg1: i32, %arg2: i32) -> (i32, i32, i32, i32) {
    %c0_i32 = arith.constant 0 : i32
    %c0_i32_0 = arith.constant 0 : i32
    return %arg1, %c0_i32, %arg0, %arg2 : i32, i32, i32, i32
  }
}

</mosaic_0001>

<bundles_post_ra>
// kernel: tpu_custom_call.1
= control target key start
LH: loop header
LB: loop body
LE: loop exit
PB: predicated region body
PF: predicated region fallthrough
CT: control target
= control target key end

     0   :  { %s4660_s9 = smov 0   ;;  %s4662_s10 = smov 0   ;;  %s12594_s0 = inlined_call_operand.vmem [shape: s32[144,1], index: 0, kind: input, shape index: {}]   ;;  %s12595_s1 = inlined_call_operand.vmem [shape: f32[2,8,144,32], index: 1, kind: input, shape index: {}]   ;;  %s12596_s2 = inlined_call_operand.vmem [shape: f32[2,8,144,32], index: 2, kind: output, shape index: {}]  }
   0x1   :  { %s4664_s11 = smov 0  }
   0x2 LB: > { %s27_s12 = sadd.s32 1, %s4638_s10  ;;  %p3447_p0 = scmp.ge.s32.totalorder %s4642_s11, 1  ;;  %s4642_s11 = sphi %s4664_s11, %s12_s11   ;;  %s4638_s10 = sphi %s4662_s10, %s15184_s10   ;;  %s4634_s9 = sphi %s4660_s9, %s15183_s9  }
   0x3   : > { %p29_p1 = scmp.ge.s32.totalorder %s27_s12, 2  ;;  %p158_p2 = scmp.lt.s32.totalorder %s4642_s11, 3 }
   0x5   : > { %s15186_s12 = smov (%p29_p1, %s27_s12), 0  ;;  %p159_p3 = pnand %p3447_p0, %p158_p2 }
   0x7   : > { %162 = sbr.rel (%p159_p3) target bundleno = 905 (0x389), region = 28 }
   0xe   : > { %v4683_v0 = vld [vmem:[%s12594_s0 + $0x10] sm:$0xff]  ;;  %v4688_v1 = vld [vmem:[%s12594_s0] sm:$0xff]  ;;  %v4693_v2 = vld [vmem:[%s12594_s0 + $0x18] sm:$0xff]  ;;  %v12597_v3 = vmov 0   ;;  %p206_p4 = scmp.lt.s32.totalorder %s4634_s9, 1 }
   0xf   : > { %4613 = vset.pattern.permute.xlu1 %v12597_v3  ;;  %4612 = vset.pattern.permute.xlu0 %v12597_v3  ;;  %vm251_vm0 = vcmp.eq.s32.totalorder %v4683_v0, 1  ;;  %vm249_vm1 = vcmp.eq.s32.totalorder %v4688_v1, 1  ;;  %vm252_vm2 = vcmp.eq.s32.totalorder %v4693_v2, 1  ;;  %v4703_v4 = vld [vmem:[%s12594_s0 + $0x8] sm:$0xff]  ;;  %v4716_v8 = vld [vmem:[%s12594_s0 + $0x20] sm:$0xff]  ;;  %v4725_v11 = vld [vmem:[%s12594_s0 + $0x38] sm:$0xff] }
  0x10   : > { %v414_v5 = vsel %vm251_vm0, 1, %v12597_v3  ;;  %v412_v6 = vsel %vm249_vm1, 1, %v12597_v3  ;;  %vm250_vm3 = vcmp.eq.s32.totalorder %v4703_v4, 1  ;;  %v4711_v7 = vld [vmem:[%s12594_s0 + $0x28] sm:$0xff]  ;;  %v415_v9 = vsel %vm252_vm2, 1, %v12597_v3  ;;  %v4730_v12 = vld [vmem:[%s12594_s0 + $0x30] sm:$0xff] }
  0x11   : > { %437 = vperm.xlu1 %4613, %v414_v5   ;;  %431 = vperm.xlu0 %4612, %v412_v6   ;;  %v413_v10 = vsel %vm250_vm3, 1, %v12597_v3  ;;  %vm254_vm4 = vcmp.eq.s32.totalorder %v4711_v7, 1  ;;  %vm253_vm5 = vcmp.eq.s32.totalorder %v4716_v8, 1  ;;  %vm256_vm6 = vcmp.eq.s32.totalorder %v4725_v11, 1  ;;  %v4739_v15 = vld [vmem:[%s12594_s0 + $0x48] sm:$0xff]  ;;  %v4744_v16 = vld [vmem:[%s12594_s0 + $0x40] sm:$0xff] }
  0x12   : > { %v417_v13 = vsel %vm254_vm4, 1, %v12597_v3  ;;  %v416_v14 = vsel %vm253_vm5, 1, %v12597_v3  ;;  %vm255_vm7 = vcmp.eq.s32.totalorder %v4730_v12, 1  ;;  %v419_v17 = vsel %vm256_vm6, 1, %v12597_v3  ;;  %v4753_v19 = vld [vmem:[%s12594_s0 + $0x58] sm:$0xff]  ;;  %v4758_v20 = vld [vmem:[%s12594_s0 + $0x50] sm:$0xff] }
  0x13   : > { %v418_v18 = vsel %vm255_vm7, 1, %v12597_v3  ;;  %vm258_vm8 = vcmp.eq.s32.totalorder %v4739_v15, 1  ;;  %vm257_vm9 = vcmp.eq.s32.totalorder %v4744_v16, 1  ;;  %vm260_vm10 = vcmp.eq.s32.totalorder %v4753_v19, 1  ;;  %v4767_v23 = vld [vmem:[%s12594_s0 + $0x68] sm:$0xff]  ;;  %v4772_v24 = vld [vmem:[%s12594_s0 + $0x60] sm:$0xff] }
  0x14   : > { %v421_v21 = vsel %vm258_vm8, 1, %v12597_v3  ;;  %v420_v22 = vsel %vm257_vm9, 1, %v12597_v3  ;;  %vm259_vm11 = vcmp.eq.s32.totalorder %v4758_v20, 1  ;;  %v423_v25 = vsel %vm260_vm10, 1, %v12597_v3  ;;  %v4781_v27 = vld [vmem:[%s12594_s0 + $0x78] sm:$0xff]  ;;  %v4786_v28 = vld [vmem:[%s12594_s0 + $0x70] sm:$0xff] }
  0x15   : > { %440 = vperm.xlu1 %4613, %v415_v9   ;;  %434 = vperm.xlu0 %4612, %v413_v10   ;;  %v422_v26 = vsel %vm259_vm11, 1, %v12597_v3  ;;  %vm262_vm12 = vcmp.eq.s32.totalorder %v4767_v23, 1  ;;  %vm261_vm13 = vcmp.eq.s32.totalorder %v4772_v24, 1  ;;  %vm264_vm14 = vcmp.eq.s32.totalorder %v4781_v27, 1  ;;  %v4795_v31 = vld [vmem:[%s12594_s0 + $0x88] sm:$0xff]  ;;  %v4800_v32 = vld [vmem:[%s12594_s0 + $0x80] sm:$0xff] }
  0x16   : > { %v425_v29 = vsel %vm262_vm12, 1, %v12597_v3  ;;  %v424_v30 = vsel %vm261_vm13, 1, %v12597_v3  ;;  %vm263_vm15 = vcmp.eq.s32.totalorder %v4786_v28, 1  ;;  %v427_v33 = vsel %vm264_vm14, 1, %v12597_v3  ;;  %s15188_s9 = smov (!%p206_p4, %s4634_s9), 1 }
  0x17   : > { %v426_v34 = vsel %vm263_vm15, 1, %v12597_v3  ;;  %vm266_vm0 = vcmp.eq.s32.totalorder %v4795_v31, 1  ;;  %vm265_vm1 = vcmp.eq.s32.totalorder %v4800_v32, 1  ;;  %vm268_vm2 = vcmp.eq.s32.totalorder %v4703_v4, 2  ;;  %s4586_s25 = smul.u32 1152, %s15188_s9 }
  0x18   : > { %v429_v35 = vsel %vm266_vm0, 1, %v12597_v3  ;;  %v428_v36 = vsel %vm265_vm1, 1, %v12597_v3  ;;  %vm267_vm3 = vcmp.eq.s32.totalorder %v4688_v1, 2  ;;  %v540_v37 = vsel %vm268_vm2, 1, %v12597_v3 }
  0x19   : > { %446 = vperm.xlu1 %4613, %v417_v13   ;;  %443 = vperm.xlu0 %4612, %v416_v14   ;;  %v539_v38 = vsel %vm267_vm3, 1, %v12597_v3  ;;  %vm270_vm4 = vcmp.eq.s32.totalorder %v4693_v2, 2  ;;  %vm269_vm5 = vcmp.eq.s32.totalorder %v4683_v0, 2  ;;  %vm272_vm6 = vcmp.eq.s32.totalorder %v4711_v7, 2  ;;  %s5080_s28 = scalar_lea.vmem %s12595_s1, %s4586_s25  ;;  %s11687_s15 = scalar_lea.vmem %s12596_s2, %s4586_s25 }
  0x1a   : > { %v542_v39 = vsel %vm270_vm4, 1, %v12597_v3  ;;  %v541_v40 = vsel %vm269_vm5, 1, %v12597_v3  ;;  %vm271_vm7 = vcmp.eq.s32.totalorder %v4716_v8, 2  ;;  %v544_v41 = vsel %vm272_vm6, 1, %v12597_v3 }
  0x1b   : > { %v543_v42 = vsel %vm271_vm7, 1, %v12597_v3  ;;  %vm274_vm8 = vcmp.eq.s32.totalorder %v4725_v11, 2  ;;  %vm273_vm9 = vcmp.eq.s32.totalorder %v4730_v12, 2  ;;  %vm276_vm10 = vcmp.eq.s32.totalorder %v4739_v15, 2 }
  0x1c   : > { %v546_v43 = vsel %vm274_vm8, 1, %v12597_v3  ;;  %v545_v44 = vsel %vm273_vm9, 1, %v12597_v3  ;;  %vm275_vm11 = vcmp.eq.s32.totalorder %v4744_v16, 2  ;;  %v548_v45 = vsel %vm276_vm10, 1, %v12597_v3 }
  0x1d   : > { %452 = vperm.xlu1 %4613, %v419_v17   ;;  %449 = vperm.xlu0 %4612, %v418_v18   ;;  %v547_v46 = vsel %vm275_vm11, 1, %v12597_v3  ;;  %vm278_vm12 = vcmp.eq.s32.totalorder %v4753_v19, 2  ;;  %vm277_vm13 = vcmp.eq.s32.totalorder %v4758_v20, 2  ;;  %vm280_vm14 = vcmp.eq.s32.totalorder %v4767_v23, 2 }
  0x1e   : > { %v550_v47 = vsel %vm278_vm12, 1, %v12597_v3  ;;  %v549_v48 = vsel %vm277_vm13, 1, %v12597_v3  ;;  %vm279_vm15 = vcmp.eq.s32.totalorder %v4772_v24, 2  ;;  %v552_v49 = vsel %vm280_vm14, 1, %v12597_v3 }
  0x1f   : > { %v551_v50 = vsel %vm279_vm15, 1, %v12597_v3  ;;  %vm282_vm0 = vcmp.eq.s32.totalorder %v4781_v27, 2  ;;  %vm281_vm1 = vcmp.eq.s32.totalorder %v4786_v28, 2  ;;  %vm284_vm2 = vcmp.eq.s32.totalorder %v4795_v31, 2 }
  0x20   : > { %v554_v51 = vsel %vm282_vm0, 1, %v12597_v3  ;;  %v553_v52 = vsel %vm281_vm1, 1, %v12597_v3  ;;  %vm283_vm3 = vcmp.eq.s32.totalorder %v4800_v32, 2  ;;  %v556_v53 = vsel %vm284_vm2, 1, %v12597_v3 }
  0x21   : > { %458 = vperm.xlu1 %4613, %v421_v21   ;;  %455 = vperm.xlu0 %4612, %v420_v22   ;;  %v555_v54 = vsel %vm283_vm3, 1, %v12597_v3  ;;  %vm286_vm4 = vcmp.eq.s32.totalorder %v4703_v4, 3  ;;  %vm285_vm5 = vcmp.eq.s32.totalorder %v4688_v1, 3  ;;  %vm288_vm6 = vcmp.eq.s32.totalorder %v4693_v2, 3 }
  0x22   : > { %v667_v55 = vsel %vm286_vm4, 1, %v12597_v3  ;;  %v666_v56 = vsel %vm285_vm5, 1, %v12597_v3  ;;  %vm287_vm7 = vcmp.eq.s32.totalorder %v4683_v0, 3  ;;  %v669_v57 = vsel %vm288_vm6, 1, %v12597_v3 }
  0x23   : > { %v668_v58 = vsel %vm287_vm7, 1, %v12597_v3  ;;  %vm290_vm8 = vcmp.eq.s32.totalorder %v4711_v7, 3  ;;  %vm289_vm9 = vcmp.eq.s32.totalorder %v4716_v8, 3  ;;  %vm292_vm10 = vcmp.eq.s32.totalorder %v4725_v11, 3 }
  0x24   : > { %v671_v59 = vsel %vm290_vm8, 1, %v12597_v3  ;;  %v670_v60 = vsel %vm289_vm9, 1, %v12597_v3  ;;  %vm291_vm11 = vcmp.eq.s32.totalorder %v4730_v12, 3  ;;  %v673_v61 = vsel %vm292_vm10, 1, %v12597_v3 }
  0x25   : > { %464 = vperm.xlu1 %4613, %v423_v25   ;;  %461 = vperm.xlu0 %4612, %v422_v26   ;;  %v672_v62 = vsel %vm291_vm11, 1, %v12597_v3  ;;  %vm294_vm12 = vcmp.eq.s32.totalorder %v4739_v15, 3  ;;  %vm293_vm13 = vcmp.eq.s32.totalorder %v4744_v16, 3  ;;  %vm296_vm14 = vcmp.eq.s32.totalorder %v4753_v19, 3 }
  0x26   : > { %v675_v63 = vsel %vm294_vm12, 1, %v12597_v3  ;;  %v674_v5 = vsel %vm293_vm13, 1, %v12597_v3  ;;  %vm295_vm15 = vcmp.eq.s32.totalorder %v4758_v20, 3  ;;  %v677_v6 = vsel %vm296_vm14, 1, %v12597_v3 }
  0x27   : > { %v676_v9 = vsel %vm295_vm15, 1, %v12597_v3  ;;  %vm298_vm0 = vcmp.eq.s32.totalorder %v4767_v23, 3  ;;  %vm297_vm1 = vcmp.eq.s32.totalorder %v4772_v24, 3  ;;  %vm300_vm2 = vcmp.eq.s32.totalorder %v4781_v27, 3 }
  0x28   : > { %v679_v10 = vsel %vm298_vm0, 1, %v12597_v3  ;;  %v678_v13 = vsel %vm297_vm1, 1, %v12597_v3  ;;  %vm299_vm3 = vcmp.eq.s32.totalorder %v4786_v28, 3  ;;  %vm302_vm4 = vcmp.eq.s32.totalorder %v4795_v31, 3 }
  0x29   : > { %470 = vperm.xlu1 %4613, %v425_v29   ;;  %467 = vperm.xlu0 %4612, %v424_v30   ;;  %vm301_vm5 = vcmp.eq.s32.totalorder %v4800_v32, 3  ;;  %vm304_vm6 = vcmp.eq.s32.totalorder %v4703_v4, 4  ;;  %vm303_vm7 = vcmp.eq.s32.totalorder %v4688_v1, 4  ;;  %vm306_vm8 = vcmp.eq.s32.totalorder %v4693_v2, 4 }
  0x2a   : > { %vm305_vm9 = vcmp.eq.s32.totalorder %v4683_v0, 4  ;;  %v681_v14 = vsel %vm300_vm2, 1, %v12597_v3  ;;  %v680_v17 = vsel %vm299_vm3, 1, %v12597_v3  ;;  %vm308_vm10 = vcmp.eq.s32.totalorder %v4711_v7, 4 }
  0x2b   : > { %vm307_vm11 = vcmp.eq.s32.totalorder %v4716_v8, 4  ;;  %v683_v18 = vsel %vm302_vm4, 1, %v12597_v3  ;;  %v682_v21 = vsel %vm301_vm5, 1, %v12597_v3  ;;  %v794_v22 = vsel %vm304_vm6, 1, %v12597_v3 }
  0x2c   : > { %v793_v25 = vsel %vm303_vm7, 1, %v12597_v3  ;;  %v796_v26 = vsel %vm306_vm8, 1, %v12597_v3  ;;  %v795_v29 = vsel %vm305_vm9, 1, %v12597_v3  ;;  %vm310_vm12 = vcmp.eq.s32.totalorder %v4725_v11, 4 }
  0x2d   : > { %476 = vperm.xlu1 %4613, %v427_v33   ;;  %473 = vperm.xlu0 %4612, %v426_v34   ;;  %vm309_vm13 = vcmp.eq.s32.totalorder %v4730_v12, 4  ;;  %v4893_v30 = vsel %vm308_vm10, 1, %v12597_v3  ;;  %v4896_v33 = vsel %vm307_vm11, 1, %v12597_v3  ;;  %vm312_vm14 = vcmp.eq.s32.totalorder %v4739_v15, 4 }
  0x2e   : > { %vm311_vm15 = vcmp.eq.s32.totalorder %v4744_v16, 4  ;;  %vm314_vm0 = vcmp.eq.s32.totalorder %v4753_v19, 4  ;;  %vm313_vm1 = vcmp.eq.s32.totalorder %v4758_v20, 4  ;;  %vm316_vm2 = vcmp.eq.s32.totalorder %v4767_v23, 4 }
  0x2f   : > { %vm315_vm3 = vcmp.eq.s32.totalorder %v4772_v24, 4  ;;  %v4905_v34 = vsel %vm310_vm12, 1, %v12597_v3  ;;  %vm318_vm4 = vcmp.eq.s32.totalorder %v4781_v27, 4  ;;  %vm317_vm5 = vcmp.eq.s32.totalorder %v4786_v28, 4 }
  0x30   : > { %vm320_vm6 = vcmp.eq.s32.totalorder %v4795_v31, 4  ;;  %vm319_vm7 = vcmp.eq.s32.totalorder %v4800_v32, 4  ;;  %vm322_vm8 = vcmp.eq.s32.totalorder %v4703_v4, 5  ;;  %vm321_vm9 = vcmp.eq.s32.totalorder %v4688_v1, 5 }
  0x31   : > { %482 = vperm.xlu1 %4613, %v429_v35   ;;  %479 = vperm.xlu0 %4612, %v428_v36   ;;  %v4908_v35 = vsel %vm309_vm13, 1, %v12597_v3  ;;  %v4913_v36 = vsel %vm312_vm14, 1, %v12597_v3  ;;  %vm324_vm10 = vcmp.eq.s32.totalorder %v4693_v2, 5  ;;  %vm323_vm11 = vcmp.eq.s32.totalorder %v4683_v0, 5 }
  0x32   : > { %vm326_vm12 = vcmp.eq.s32.totalorder %v4711_v7, 5  ;;  %vm325_vm13 = vcmp.eq.s32.totalorder %v4716_v8, 5  ;;  %vm328_vm14 = vcmp.eq.s32.totalorder %v4725_v11, 5 }
  0x35   : > { %561 = vperm.xlu1 %4613, %v540_v37   ;;  %558 = vperm.xlu0 %4612, %v539_v38   ;;  %v4916_v37 = vsel %vm311_vm15, 1, %v12597_v3  ;;  %v4921_v38 = vsel %vm314_vm0, 1, %v12597_v3  ;;  %vm327_vm15 = vcmp.eq.s32.totalorder %v4730_v12, 5  ;;  %vm330_vm0 = vcmp.eq.s32.totalorder %v4739_v15, 5 }
  0x39   : > { %567 = vperm.xlu1 %4613, %v542_v39   ;;  %564 = vperm.xlu0 %4612, %v541_v40   ;;  %v4924_v39 = vsel %vm313_vm1, 1, %v12597_v3  ;;  %v4927_v40 = vsel %vm316_vm2, 1, %v12597_v3  ;;  %vm329_vm1 = vcmp.eq.s32.totalorder %v4744_v16, 5  ;;  %vm332_vm2 = vcmp.eq.s32.totalorder %v4753_v19, 5 }
  0x3d   : > { %573 = vperm.xlu1 %4613, %v544_v41   ;;  %570 = vperm.xlu0 %4612, %v543_v42   ;;  %v4930_v41 = vsel %vm315_vm3, 1, %v12597_v3  ;;  %v4933_v42 = vsel %vm318_vm4, 1, %v12597_v3  ;;  %vm331_vm3 = vcmp.eq.s32.totalorder %v4758_v20, 5  ;;  %vm334_vm4 = vcmp.eq.s32.totalorder %v4767_v23, 5 }
  0x41   : > { %579 = vperm.xlu1 %4613, %v546_v43   ;;  %576 = vperm.xlu0 %4612, %v545_v44   ;;  %v4936_v43 = vsel %vm317_vm5, 1, %v12597_v3  ;;  %v4941_v44 = vsel %vm320_vm6, 1, %v12597_v3  ;;  %vm333_vm5 = vcmp.eq.s32.totalorder %v4772_v24, 5  ;;  %vm336_vm6 = vcmp.eq.s32.totalorder %v4781_v27, 5 }
  0x45   : > { %585 = vperm.xlu1 %4613, %v548_v45   ;;  %582 = vperm.xlu0 %4612, %v547_v46   ;;  %v4944_v45 = vsel %vm319_vm7, 1, %v12597_v3  ;;  %v4953_v46 = vsel %vm322_vm8, 1, %v12597_v3  ;;  %vm335_vm7 = vcmp.eq.s32.totalorder %v4786_v28, 5  ;;  %vm338_vm8 = vcmp.eq.s32.totalorder %v4795_v31, 5 }
  0x49   : > { %591 = vperm.xlu1 %4613, %v550_v47   ;;  %588 = vperm.xlu0 %4612, %v549_v48   ;;  %v4956_v47 = vsel %vm321_vm9, 1, %v12597_v3  ;;  %v4961_v48 = vsel %vm324_vm10, 1, %v12597_v3  ;;  %vm337_vm9 = vcmp.eq.s32.totalorder %v4800_v32, 5  ;;  %vm340_vm10 = vcmp.eq.s32.totalorder %v4703_v4, 6 }
  0x4d   : > { %597 = vperm.xlu1 %4613, %v552_v49   ;;  %594 = vperm.xlu0 %4612, %v551_v50   ;;  %v4964_v49 = vsel %vm323_vm11, 1, %v12597_v3  ;;  %v4970_v50 = vsel %vm326_vm12, 1, %v12597_v3  ;;  %vm339_vm11 = vcmp.eq.s32.totalorder %v4688_v1, 6  ;;  %vm342_vm12 = vcmp.eq.s32.totalorder %v4693_v2, 6 }
  0x51   : > { %603 = vperm.xlu1 %4613, %v554_v51   ;;  %600 = vperm.xlu0 %4612, %v553_v52   ;;  %v4973_v51 = vsel %vm325_vm13, 1, %v12597_v3  ;;  %v4976_v52 = vsel %vm328_vm14, 1, %v12597_v3  ;;  %vm341_vm13 = vcmp.eq.s32.totalorder %v4683_v0, 6  ;;  %vm344_vm14 = vcmp.eq.s32.totalorder %v4711_v7, 6 }
  0x55   : > { %609 = vperm.xlu1 %4613, %v556_v53   ;;  %606 = vperm.xlu0 %4612, %v555_v54   ;;  %v4979_v53 = vsel %vm327_vm15, 1, %v12597_v3  ;;  %v4982_v54 = vsel %vm330_vm0, 1, %v12597_v3  ;;  %vm343_vm15 = vcmp.eq.s32.totalorder %v4716_v8, 6  ;;  %vm346_vm0 = vcmp.eq.s32.totalorder %v4725_v11, 6 }
  0x59   : > { %688 = vperm.xlu1 %4613, %v667_v55   ;;  %685 = vperm.xlu0 %4612, %v666_v56   ;;  %v4985_v55 = vsel %vm329_vm1, 1, %v12597_v3  ;;  %v4990_v56 = vsel %vm332_vm2, 1, %v12597_v3  ;;  %vm345_vm1 = vcmp.eq.s32.totalorder %v4730_v12, 6  ;;  %vm348_vm2 = vcmp.eq.s32.totalorder %v4739_v15, 6 }
  0x5d   : > { %694 = vperm.xlu1 %4613, %v669_v57   ;;  %691 = vperm.xlu0 %4612, %v668_v58   ;;  %v4993_v57 = vsel %vm331_vm3, 1, %v12597_v3  ;;  %v5007_v58 = vsel %vm334_vm4, 1, %v12597_v3  ;;  %vm347_vm3 = vcmp.eq.s32.totalorder %v4744_v16, 6  ;;  %vm350_vm4 = vcmp.eq.s32.totalorder %v4753_v19, 6 }
  0x61   : > { %700 = vperm.xlu1 %4613, %v671_v59   ;;  %697 = vperm.xlu0 %4612, %v670_v60   ;;  %v5010_v59 = vsel %vm333_vm5, 1, %v12597_v3  ;;  %v5015_v60 = vsel %vm336_vm6, 1, %v12597_v3  ;;  %vm349_vm5 = vcmp.eq.s32.totalorder %v4758_v20, 6  ;;  %vm352_vm6 = vcmp.eq.s32.totalorder %v4767_v23, 6 }
  0x65   : > { %706 = vperm.xlu1 %4613, %v673_v61   ;;  %703 = vperm.xlu0 %4612, %v672_v62   ;;  %v5018_v61 = vsel %vm335_vm7, 1, %v12597_v3  ;;  %v5023_v62 = vsel %vm338_vm8, 1, %v12597_v3  ;;  %vm351_vm7 = vcmp.eq.s32.totalorder %v4772_v24, 6  ;;  %vm354_vm8 = vcmp.eq.s32.totalorder %v4781_v27, 6 }
  0x66   : > { %12979 = vst [vmem:[#allocation2_spill] sm:$0xff] %v5018_v61  ;;  %12980 = vst [vmem:[#allocation3_spill] sm:$0xff] %v5023_v62  ;;  %v5083_v27 = vsel %vm350_vm4, 1, %v12597_v3  ;;  %vm366_vm4 = vcmp.eq.s32.totalorder %v4739_v15, 7  ;;  %v5203_v15 = vld [vmem:[%s5080_s28 + $0xa8] sm:$0xff]  ;;  %v5355_v62 = vld [vmem:[%s5080_s28 + $0x2f8] sm:$0xff] }
  0x67   : > { %12992 = vst [vmem:[#allocation15_spill] sm:$0xff] %v5083_v27  ;;  %v3576_v27 = vld [vmem:[%s5080_s28 + $0x90] sm:$0xff]  ;;  %13015 = vst [vmem:[#allocation37_spill] sm:$0xff] %v5203_v15  ;;  %v5452_v61 = vld [vmem:[%s5080_s28 + $0x38] sm:$0xff] }
  0x68   : > { %13048 = vst [vmem:[#allocation70_spill] sm:$0xff] %v5355_v62  ;;  %13062 = vst [vmem:[#allocation84_spill] sm:$0xff] %v5452_v61 }
  0x69   : > { %712 = vperm.xlu1 %4613, %v675_v63   ;;  %709 = vperm.xlu0 %4612, %v674_v5   ;;  %v5026_v63 = vsel %vm337_vm9, 1, %v12597_v3  ;;  %v5029_v5 = vsel %vm340_vm10, 1, %v12597_v3  ;;  %vm353_vm9 = vcmp.eq.s32.totalorder %v4786_v28, 6  ;;  %vm356_vm10 = vcmp.eq.s32.totalorder %v4795_v31, 6 }
  0x6a   : > { %12981 = vst [vmem:[#allocation4_spill] sm:$0xff] %v5026_v63  ;;  %12982 = vst [vmem:[#allocation5_spill] sm:$0xff] %v5029_v5  ;;  %v5086_v28 = vsel %vm349_vm5, 1, %v12597_v3  ;;  %v5092_v31 = vsel %vm351_vm7, 1, %v12597_v3  ;;  %vm365_vm5 = vcmp.eq.s32.totalorder %v4744_v16, 7  ;;  %vm367_vm7 = vcmp.eq.s32.totalorder %v4758_v20, 7 }
  0x6b   : > { %12993 = vst [vmem:[#allocation16_spill] sm:$0xff] %v5086_v28  ;;  %12995 = vst [vmem:[#allocation18_spill] sm:$0xff] %v5092_v31  ;;  %v4298_v31 = vld [vmem:[%s5080_s28 + $0x370] sm:$0xff]  ;;  %v5234_v20 = vld [vmem:[%s5080_s28 + $0x258] sm:$0xff] }
  0x6c   : > { %v3450_v28 = vld [vmem:[%s5080_s28 + $0x3f0] sm:$0xff]  ;;  %13024 = vst [vmem:[#allocation46_spill] sm:$0xff] %v5234_v20  ;;  %v5279_v5 = vld [vmem:[%s5080_s28 + $0x1b8] sm:$0xff] }
  0x6d   : > { %718 = vperm.xlu1 %4613, %v677_v6   ;;  %715 = vperm.xlu0 %4612, %v676_v9   ;;  %v5032_v6 = vsel %vm339_vm11, 1, %v12597_v3  ;;  %v5037_v9 = vsel %vm342_vm12, 1, %v12597_v3  ;;  %vm355_vm11 = vcmp.eq.s32.totalorder %v4800_v32, 6  ;;  %v5095_v32 = vsel %vm354_vm8, 1, %v12597_v3  ;;  %v5349_v63 = vld [vmem:[%s5080_s28 + $0x1d8] sm:$0xff] }
  0x6e   : > { %12983 = vst [vmem:[#allocation6_spill] sm:$0xff] %v5032_v6  ;;  %12984 = vst [vmem:[#allocation7_spill] sm:$0xff] %v5037_v9  ;;  %vm358_vm12 = vcmp.eq.s32.totalorder %v4703_v4, 7  ;;  %v5273_v9 = vld [vmem:[%s5080_s28 + $0x98] sm:$0xff]  ;;  %v5276_v6 = vld [vmem:[%s5080_s28 + $0x128] sm:$0xff] }
  0x6f   : > { %12996 = vst [vmem:[#allocation19_spill] sm:$0xff] %v5095_v32  ;;  %13046 = vst [vmem:[#allocation68_spill] sm:$0xff] %v5349_v63 }
  0x71   : > { %724 = vperm.xlu1 %4613, %v679_v10   ;;  %721 = vperm.xlu0 %4612, %v678_v13   ;;  %v5040_v10 = vsel %vm341_vm13, 1, %v12597_v3  ;;  %v5046_v13 = vsel %vm344_vm14, 1, %v12597_v3  ;;  %vm357_vm13 = vcmp.eq.s32.totalorder %v4688_v1, 7  ;;  %vm360_vm14 = vcmp.eq.s32.totalorder %v4693_v2, 7 }
  0x72   : > { %12985 = vst [vmem:[#allocation8_spill] sm:$0xff] %v5040_v10  ;;  %12986 = vst [vmem:[#allocation9_spill] sm:$0xff] %v5046_v13  ;;  %v5255_v10 = vld [vmem:[%s5080_s28 + $0x8] sm:$0xff] }
  0x75   : > { %730 = vperm.xlu1 %4613, %v681_v14   ;;  %727 = vperm.xlu0 %4612, %v680_v17   ;;  %v5049_v14 = vsel %vm343_vm15, 1, %v12597_v3  ;;  %v5058_v17 = vsel %vm346_vm0, 1, %v12597_v3  ;;  %vm359_vm15 = vcmp.eq.s32.totalorder %v4683_v0, 7  ;;  %vm362_vm0 = vcmp.eq.s32.totalorder %v4711_v7, 7  ;;  %v4152_v7 = vld [vmem:[%s5080_s28 + $0x2d0] sm:$0xff] }
  0x76   : > { %12987 = vst [vmem:[#allocation10_spill] sm:$0xff] %v5049_v14  ;;  %12988 = vst [vmem:[#allocation11_spill] sm:$0xff] %v5058_v17  ;;  %v5252_v14 = vld [vmem:[%s5080_s28 + $0x378] sm:$0xff] }
  0x77   : > { %13029 = vst [vmem:[#allocation51_spill] sm:$0xff] %v5252_v14 }
  0x79   : > { %736 = vperm.xlu1 %4613, %v683_v18   ;;  %733 = vperm.xlu0 %4612, %v682_v21   ;;  %v5061_v18 = vsel %vm345_vm1, 1, %v12597_v3  ;;  %v5068_v21 = vsel %vm348_vm2, 1, %v12597_v3  ;;  %vm361_vm1 = vcmp.eq.s32.totalorder %v4716_v8, 7  ;;  %vm364_vm2 = vcmp.eq.s32.totalorder %v4725_v11, 7 }
  0x7a   : > { %12989 = vst [vmem:[#allocation12_spill] sm:$0xff] %v5061_v18  ;;  %12990 = vst [vmem:[#allocation13_spill] sm:$0xff] %v5068_v21  ;;  %v3864_v21 = vld [vmem:[%s5080_s28 + $0x1b0] sm:$0xff]  ;;  %v4008_v18 = vld [vmem:[%s5080_s28 + $0x240] sm:$0xff] }
  0x7d   : > { %815 = vperm.xlu1 %4613, %v794_v22   ;;  %812 = vperm.xlu0 %4612, %v793_v25   ;;  %v5071_v22 = vsel %vm347_vm3, 1, %v12597_v3  ;;  %v5089_v25 = vsel %vm352_vm6, 1, %v12597_v3  ;;  %vm363_vm3 = vcmp.eq.s32.totalorder %v4730_v12, 7  ;;  %vm368_vm6 = vcmp.eq.s32.totalorder %v4753_v19, 7 }
  0x7e   : > { %12991 = vst [vmem:[#allocation14_spill] sm:$0xff] %v5071_v22  ;;  %12994 = vst [vmem:[#allocation17_spill] sm:$0xff] %v5089_v25  ;;  %v375_v25 = vld [vmem:[%s5080_s28] sm:$0xff] }
  0x7f   : > { %v3720_v22 = vld [vmem:[%s5080_s28 + $0x120] sm:$0xff] }
  0x81   : > { %821 = vperm.xlu1 %4613, %v796_v26   ;;  %818 = vperm.xlu0 %4612, %v795_v29   ;;  %v5098_v26 = vsel %vm353_vm9, 1, %v12597_v3  ;;  %v5103_v29 = vsel %vm356_vm10, 1, %v12597_v3 }
  0x82   : > { %12997 = vst [vmem:[#allocation20_spill] sm:$0xff] %v5098_v26  ;;  %12998 = vst [vmem:[#allocation21_spill] sm:$0xff] %v5103_v29  ;;  %v13000_v29 = vmov 0  }
  0x83   : > { %v5126_v26 = vsel %vm358_vm12, 1, %v13000_v29  ;;  %v5131_v32 = vsel %vm357_vm13, 1, %v13000_v29  ;;  %v5142_v4 = vsel %vm360_vm14, 1, %v13000_v29  ;;  %v5147_v1 = vsel %vm359_vm15, 1, %v13000_v29 }
  0x84   : > { %13001 = vst [vmem:[#allocation23_spill] sm:$0xff] %v5126_v26  ;;  %13002 = vst [vmem:[#allocation24_spill] sm:$0xff] %v5131_v32  ;;  %v5157_v2 = vsel %vm362_vm0, 1, %v13000_v29  ;;  %v5162_v0 = vsel %vm361_vm1, 1, %v13000_v29  ;;  %v5183_v8 = vsel %vm366_vm4, 1, %v13000_v29  ;;  %v5188_v11 = vsel %vm365_vm5, 1, %v13000_v29 }
  0x85   : > { %827 = vperm.xlu1 %4613, %v4893_v30   ;;  %824 = vperm.xlu0 %4612, %v4896_v33   ;;  %v5106_v30 = vsel %vm355_vm11, 1, %v12597_v3  ;;  %v377_v33 = vld [vmem:[%s5080_s28 + $0x10] sm:$0xff]  ;;  %13003 = vst [vmem:[#allocation25_spill] sm:$0xff] %v5142_v4  ;;  %13004 = vst [vmem:[#allocation26_spill] sm:$0xff] %v5147_v1  ;;  %v5167_v1 = vsel %vm364_vm2, 1, %v13000_v29  ;;  %v5172_v4 = vsel %vm363_vm3, 1, %v13000_v29 }
  0x86   : > { %12999 = vst [vmem:[#allocation22_spill] sm:$0xff] %v5106_v30  ;;  %v3722_v3 = vld [vmem:[%s5080_s28 + $0x130] sm:$0xff]  ;;  %v3866_v30 = vld [vmem:[%s5080_s28 + $0x1c0] sm:$0xff]  ;;  %13005 = vst [vmem:[#allocation27_spill] sm:$0xff] %v5157_v2  ;;  %v5211_v16 = vsel %vm368_vm6, 1, %v13000_v29  ;;  %vm370_vm12 = vcmp.eq.s32.totalorder %v4767_v23, 7 }
  0x87   : > { %13006 = vst [vmem:[#allocation28_spill] sm:$0xff] %v5162_v0  ;;  %13007 = vst [vmem:[#allocation29_spill] sm:$0xff] %v5167_v1  ;;  %v5176_v2 = vld [vmem:[%s5080_s28 + $0x360] sm:$0xff]  ;;  %vm369_vm15 = vcmp.eq.s32.totalorder %v4772_v24, 7 }
  0x88   : > { %13008 = vst [vmem:[#allocation30_spill] sm:$0xff] %v5172_v4  ;;  %13009 = vst [vmem:[#allocation31_spill] sm:$0xff] %v5183_v8  ;;  %v5197_v4 = vld [vmem:[%s5080_s28 + $0x18] sm:$0xff] }
  0x89   : > { %833 = vperm.xlu1 %4613, %v4905_v34   ;;  %830 = vperm.xlu0 %4612, %v4908_v35   ;;  %v3452_v34 = vld [vmem:[%s5080_s28 + $0x400] sm:$0xff]  ;;  %13010 = vst [vmem:[#allocation32_spill] sm:$0xff] %v5188_v11  ;;  %13013 = vst [vmem:[#allocation35_spill] sm:$0xff] %v5197_v4  ;;  %v5206_v8 = vld [vmem:[%s5080_s28 + $0x138] sm:$0xff] }
  0x8a   : > { %v3578_v35 = vld [vmem:[%s5080_s28 + $0xa0] sm:$0xff]  ;;  %13016 = vst [vmem:[#allocation38_spill] sm:$0xff] %v5206_v8  ;;  %13017 = vst [vmem:[#allocation39_spill] sm:$0xff] %v5211_v16  ;;  %v5231_v16 = vld [vmem:[%s5080_s28 + $0x1c8] sm:$0xff] }
  0x8b   : > { %13023 = vst [vmem:[#allocation45_spill] sm:$0xff] %v5231_v16 }
  0x8d   : > { %839 = vperm.xlu1 %4613, %v4913_v36   ;;  %836 = vperm.xlu0 %4612, %v4916_v37   ;;  %v4010_v36 = vld [vmem:[%s5080_s28 + $0x250] sm:$0xff]  ;;  %v4154_v37 = vld [vmem:[%s5080_s28 + $0x2e0] sm:$0xff] }
  0x90   : > { %v438_v32 = vpop.permute.xlu1 %437  ;;  %v432_v26 = vpop.permute.xlu0 %431 }
  0x91   : > { %vm486_vm8 = vcmp.eq.s32.totalorder %v438_v32, 1  ;;  %vm484_vm9 = vcmp.eq.s32.totalorder %v432_v26, 1  ;;  %845 = vperm.xlu1 %4613, %v4921_v38   ;;  %842 = vperm.xlu0 %4612, %v4924_v39   ;;  %v5200_v39 = vld [vmem:[%s5080_s28 + $0x408] sm:$0xff] }
  0x92   : > { %v5191_v12 = vsel %vm486_vm8, %v3452_v34, %v377_v33  ;;  %v5194_v38 = vsel %vm486_vm8, %v377_v33, %v3578_v35  ;;  %13014 = vst [vmem:[#allocation36_spill] sm:$0xff] %v5200_v39  ;;  %v5216_v33 = vsel %vm367_vm7, 1, %v13000_v29  ;;  %v5219_v11 = vsel %vm486_vm8, %v3578_v35, %v3722_v3 }
  0x93   : > { %13011 = vst [vmem:[#allocation33_spill] sm:$0xff] %v5191_v12  ;;  %13012 = vst [vmem:[#allocation34_spill] sm:$0xff] %v5194_v38  ;;  %v5222_v1 = vsel %vm486_vm8, %v3722_v3, %v3866_v30  ;;  %v5225_v0 = vsel %vm486_vm8, %v3866_v30, %v4010_v36  ;;  %v5228_v19 = vsel %vm486_vm8, %v4010_v36, %v4154_v37 }
  0x94   : > { %13018 = vst [vmem:[#allocation40_spill] sm:$0xff] %v5216_v33  ;;  %13019 = vst [vmem:[#allocation41_spill] sm:$0xff] %v5219_v11  ;;  %v5237_v33 = vld [vmem:[%s5080_s28 + $0x2e8] sm:$0xff]  ;;  %v5240_v35 = vsel %vm486_vm8, %v4154_v37, %v4298_v31  ;;  %v5243_v3 = vsel %vm486_vm8, %v4298_v31, %v3452_v34  ;;  %v5246_v30 = vsel %vm484_vm9, %v3450_v28, %v375_v25  ;;  %v441_v17 = vpop.permute.xlu1 %440  ;;  %v435_v13 = vpop.permute.xlu0 %434  ;;  %v5258_v37 = vld [vmem:[%s5080_s28 + $0x3f8] sm:$0xff] }
  0x95   : > { %13020 = vst [vmem:[#allocation42_spill] sm:$0xff] %v5222_v1  ;;  %13021 = vst [vmem:[#allocation43_spill] sm:$0xff] %v5225_v0  ;;  %v5249_v36 = vsel %vm484_vm9, %v375_v25, %v3576_v27  ;;  %v5261_v31 = vsel %vm484_vm9, %v3576_v27, %v3720_v22  ;;  %v5264_v32 = vsel %vm484_vm9, %v3720_v22, %v3864_v21  ;;  %851 = vperm.xlu1 %4613, %v4927_v40   ;;  %v5294_v27 = vld [vmem:[%s5080_s28 + $0x2d8] sm:$0xff] }
  0x96   : > { %13022 = vst [vmem:[#allocation44_spill] sm:$0xff] %v5228_v19  ;;  %13025 = vst [vmem:[#allocation47_spill] sm:$0xff] %v5237_v33  ;;  %v5267_v25 = vsel %vm484_vm9, %v3864_v21, %v4008_v18  ;;  %v5270_v34 = vsel %vm484_vm9, %v4008_v18, %v4152_v7  ;;  %v5284_v22 = vsel %vm484_vm9, %v4152_v7, %v5176_v2  ;;  %vm487_vm10 = vcmp.eq.s32.totalorder %v441_v17, 1  ;;  %v5291_v21 = vld [vmem:[%s5080_s28 + $0x248] sm:$0xff]  ;;  %v5381_v17 = vld [vmem:[%s5080_s28 + $0x20] sm:$0xff] }
  0x97   : > { %13026 = vst [vmem:[#allocation48_spill] sm:$0xff] %v5240_v35  ;;  %13027 = vst [vmem:[#allocation49_spill] sm:$0xff] %v5243_v3  ;;  %v5288_v18 = vsel %vm484_vm9, %v5176_v2, %v3450_v28  ;;  %vm485_vm11 = vcmp.eq.s32.totalorder %v435_v13, 1  ;;  %v5297_v3 = vld [vmem:[%s5080_s28 + $0x368] sm:$0xff]  ;;  %848 = vperm.xlu0 %4612, %v4930_v41   ;;  %v5303_v40 = vsel %vm487_vm10, %v5200_v39, %v5197_v4  ;;  %v5319_v35 = vld [vmem:[%s5080_s28 + $0x418] sm:$0xff] }
  0x98   : > { %13028 = vst [vmem:[#allocation50_spill] sm:$0xff] %v5249_v36  ;;  %13030 = vst [vmem:[#allocation52_spill] sm:$0xff] %v5261_v31  ;;  %v5308_v28 = vsel %vm487_vm10, %v5197_v4, %v5203_v15  ;;  %v5313_v26 = vsel %vm487_vm10, %v5203_v15, %v5206_v8  ;;  %v5316_v7 = vld [vmem:[%s5080_s28 + $0x28] sm:$0xff]  ;;  %v5322_v41 = vld [vmem:[%s5080_s28 + $0xb8] sm:$0xff]  ;;  %v5331_v0 = vsel %vm487_vm10, %v5206_v8, %v5231_v16  ;;  %v447_v12 = vpop.permute.xlu1 %446 }
  0x99   : > { %13031 = vst [vmem:[#allocation53_spill] sm:$0xff] %v5264_v32  ;;  %13032 = vst [vmem:[#allocation54_spill] sm:$0xff] %v5267_v25  ;;  %v5325_v19 = vld [vmem:[%s5080_s28 + $0x148] sm:$0xff]  ;;  %v5336_v1 = vsel %vm487_vm10, %v5231_v16, %v5234_v20  ;;  %v5341_v11 = vsel %vm487_vm10, %v5234_v20, %v5237_v33  ;;  %v5346_v38 = vsel %vm487_vm10, %v5237_v33, %v5252_v14  ;;  %v444_v16 = vpop.permute.xlu0 %443  ;;  %857 = vperm.xlu1 %4613, %v4933_v42   ;;  %v5408_v42 = vld [vmem:[%s5080_s28 + $0xb0] sm:$0xff] }
  0x9a   : > { %13033 = vst [vmem:[#allocation55_spill] sm:$0xff] %v5270_v34  ;;  %13034 = vst [vmem:[#allocation56_spill] sm:$0xff] %v5284_v22  ;;  %v5352_v8 = vld [vmem:[%s5080_s28 + $0x268] sm:$0xff]  ;;  %v5360_v20 = vsel %vm487_vm10, %v5252_v14, %v5200_v39  ;;  %v5365_v33 = vsel %vm485_vm11, %v5258_v37, %v5255_v10  ;;  %v5390_v15 = vsel %vm485_vm11, %v5276_v6, %v5279_v5  ;;  %v5411_v39 = vld [vmem:[%s5080_s28 + $0x140] sm:$0xff]  ;;  %vm489_vm13 = vcmp.eq.s32.totalorder %v447_v12, 1 }
  0x9b   : > { %13035 = vst [vmem:[#allocation57_spill] sm:$0xff] %v5288_v18  ;;  %13036 = vst [vmem:[#allocation58_spill] sm:$0xff] %v5303_v40  ;;  %v5400_v4 = vsel %vm485_vm11, %v5291_v21, %v5294_v27  ;;  %854 = vperm.xlu0 %4612, %v4936_v43   ;;  %v5420_v14 = vsel %vm485_vm11, %v5297_v3, %v5258_v37  ;;  %vm488_vm14 = vcmp.eq.s32.totalorder %v444_v16, 1  ;;  %v5423_v40 = vld [vmem:[%s5080_s28 + $0x260] sm:$0xff]  ;;  %v5426_v18 = vld [vmem:[%s5080_s28 + $0x2f0] sm:$0xff]  ;;  %v5434_v34 = vsel %vm370_vm12, 1, %v13000_v29 }
  0x9c   : > { %13037 = vst [vmem:[#allocation59_spill] sm:$0xff] %v5308_v28  ;;  %13038 = vst [vmem:[#allocation60_spill] sm:$0xff] %v5313_v26  ;;  %v5405_v26 = vsel %vm485_vm11, %v5294_v27, %v5297_v3  ;;  %v5414_v28 = vld [vmem:[%s5080_s28 + $0x1d0] sm:$0xff]  ;;  %v5429_v22 = vld [vmem:[%s5080_s28 + $0x380] sm:$0xff]  ;;  %v5439_v43 = vsel %vm489_vm13, %v5319_v35, %v5316_v7  ;;  %v5444_v13 = vsel %vm489_vm13, %v5316_v7, %v5322_v41  ;;  %v453_v23 = vpop.permute.xlu1 %452  ;;  %v5575_v16 = vsel %vm369_vm15, 1, %v13000_v29 }
  0x9d   : > { %13039 = vst [vmem:[#allocation61_spill] sm:$0xff] %v5316_v7  ;;  %13040 = vst [vmem:[#allocation62_spill] sm:$0xff] %v5322_v41  ;;  %v5449_v25 = vsel %vm489_vm13, %v5322_v41, %v5325_v19  ;;  %v5458_v32 = vld [vmem:[%s5080_s28 + $0xc8] sm:$0xff]  ;;  %v5463_v31 = vpop.permute.xlu0 %449  ;;  %v5469_v41 = vsel %vm489_vm13, %v5325_v19, %v5349_v63  ;;  %v5474_v7 = vsel %vm489_vm13, %v5349_v63, %v5352_v8  ;;  %863 = vperm.xlu1 %4613, %v4941_v44   ;;  %v5517_v12 = vld [vmem:[%s5080_s28 + $0x398] sm:$0xff] }
  0x9e   : > { %13041 = vst [vmem:[#allocation63_spill] sm:$0xff] %v5325_v19  ;;  %13042 = vst [vmem:[#allocation64_spill] sm:$0xff] %v5331_v0  ;;  %v5395_v0 = vsel %vm485_vm11, %v5279_v5, %v5291_v21  ;;  %v5487_v36 = vld [vmem:[%s5080_s28 + $0x1e8] sm:$0xff]  ;;  %v5490_v19 = vld [vmem:[%s5080_s28 + $0x278] sm:$0xff]  ;;  %v5514_v44 = vsel %vm488_vm14, %v5408_v42, %v5411_v39  ;;  %vm491_vm0 = vcmp.eq.s32.totalorder %v453_v23, 1  ;;  %vm490_vm1 = vcmp.eq.s32.totalorder %v5463_v31, 1 }
  0x9f   : > { %13043 = vst [vmem:[#allocation65_spill] sm:$0xff] %v5336_v1  ;;  %13044 = vst [vmem:[#allocation66_spill] sm:$0xff] %v5341_v11  ;;  %v5375_v11 = vsel %vm485_vm11, %v5273_v9, %v5276_v6  ;;  %v5378_v1 = vld [vmem:[%s5080_s28 + $0x388] sm:$0xff]  ;;  %v5523_v63 = vld [vmem:[%s5080_s28 + $0x420] sm:$0xff]  ;;  %860 = vperm.xlu0 %4612, %v4944_v45  }
  0xa0   : > { %13045 = vst [vmem:[#allocation67_spill] sm:$0xff] %v5346_v38  ;;  %13047 = vst [vmem:[#allocation69_spill] sm:$0xff] %v5352_v8  ;;  %v5370_v38 = vsel %vm485_vm11, %v5255_v10, %v5273_v9  ;;  %v5547_v45 = vld [vmem:[%s5080_s28 + $0xc0] sm:$0xff]  ;;  %v5598_v29 = vld [vmem:[%s5080_s28 + $0x48] sm:$0xff] }
  0xa1   : > { %13049 = vst [vmem:[#allocation71_spill] sm:$0xff] %v5360_v20  ;;  %13050 = vst [vmem:[#allocation72_spill] sm:$0xff] %v5381_v17  ;;  %v5384_v20 = vld [vmem:[%s5080_s28 + $0x410] sm:$0xff]  ;;  %942 = vperm.xlu1 %4613, %v4953_v46   ;;  %v5722_v31 = vld [vmem:[%s5080_s28 + $0x448] sm:$0xff] }
  0xa2   : > { %13051 = vst [vmem:[#allocation73_spill] sm:$0xff] %v5384_v20  ;;  %13052 = vst [vmem:[#allocation74_spill] sm:$0xff] %v5408_v42 }
  0xa3   : > { %13053 = vst [vmem:[#allocation75_spill] sm:$0xff] %v5411_v39  ;;  %13054 = vst [vmem:[#allocation76_spill] sm:$0xff] %v5414_v28  ;;  %939 = vperm.xlu0 %4612, %v4956_v47  }
  0xa4   : > { %13055 = vst [vmem:[#allocation77_spill] sm:$0xff] %v5423_v40  ;;  %13056 = vst [vmem:[#allocation78_spill] sm:$0xff] %v5426_v18 }
  0xa5   : > { %13057 = vst [vmem:[#allocation79_spill] sm:$0xff] %v5429_v22  ;;  %13058 = vst [vmem:[#allocation80_spill] sm:$0xff] %v5434_v34  ;;  %v5455_v34 = vld [vmem:[%s5080_s28 + $0x428] sm:$0xff]  ;;  %948 = vperm.xlu1 %4613, %v4961_v48  }
  0xa6   : > { %13059 = vst [vmem:[#allocation81_spill] sm:$0xff] %v5439_v43  ;;  %13060 = vst [vmem:[#allocation82_spill] sm:$0xff] %v5444_v13  ;;  %v5461_v43 = vld [vmem:[%s5080_s28 + $0x158] sm:$0xff]  ;;  %v5484_v13 = vsel %vm489_vm13, %v5355_v62, %v5378_v1  ;;  %v5631_v46 = vsel %vm491_vm0, %v5517_v12, %v5455_v34  ;;  %v5753_v48 = vld [vmem:[%s5080_s28 + $0x208] sm:$0xff] }
  0xa7   : > { %13061 = vst [vmem:[#allocation83_spill] sm:$0xff] %v5449_v25  ;;  %13063 = vst [vmem:[#allocation85_spill] sm:$0xff] %v5455_v34  ;;  %v5479_v25 = vsel %vm489_vm13, %v5352_v8, %v5355_v62  ;;  %v5499_v8 = vsel %vm489_vm13, %v5378_v1, %v5319_v35  ;;  %v5504_v62 = vsel %vm488_vm14, %v5384_v20, %v5381_v17  ;;  %945 = vperm.xlu0 %4612, %v4964_v49   ;;  %v5783_v49 = vld [vmem:[%s5080_s28 + $0x3b8] sm:$0xff] }
  0xa8   : > { %13064 = vst [vmem:[#allocation86_spill] sm:$0xff] %v5458_v32  ;;  %13065 = vst [vmem:[#allocation87_spill] sm:$0xff] %v5461_v43  ;;  %v5595_v24 = vsel %vm491_vm0, %v5461_v43, %v5487_v36 }
  0xa9   : > { %13066 = vst [vmem:[#allocation88_spill] sm:$0xff] %v5469_v41  ;;  %13067 = vst [vmem:[#allocation89_spill] sm:$0xff] %v5484_v13  ;;  %v5493_v41 = vld [vmem:[%s5080_s28 + $0x308] sm:$0xff]  ;;  %v5509_v13 = vsel %vm488_vm14, %v5381_v17, %v5408_v42  ;;  %v5529_v17 = vsel %vm488_vm14, %v5411_v39, %v5414_v28  ;;  %v5534_v42 = vsel %vm488_vm14, %v5414_v28, %v5423_v40  ;;  %v5550_v39 = vld [vmem:[%s5080_s28 + $0x150] sm:$0xff]  ;;  %954 = vperm.xlu1 %4613, %v4970_v50  }
  0xaa   : > { %13068 = vst [vmem:[#allocation90_spill] sm:$0xff] %v5487_v36  ;;  %13069 = vst [vmem:[#allocation91_spill] sm:$0xff] %v5490_v19  ;;  %v5558_v28 = vsel %vm488_vm14, %v5429_v22, %v5384_v20  ;;  %v5585_v20 = vsel %vm491_vm0, %v5452_v61, %v5458_v32 }
  0xab   : > { %13070 = vst [vmem:[#allocation92_spill] sm:$0xff] %v5493_v41  ;;  %13071 = vst [vmem:[#allocation93_spill] sm:$0xff] %v5499_v8  ;;  %v5520_v8 = vld [vmem:[%s5080_s28 + $0x30] sm:$0xff]  ;;  %951 = vperm.xlu0 %4612, %v4973_v51  }
  0xac   : > { %13072 = vst [vmem:[#allocation94_spill] sm:$0xff] %v5504_v62  ;;  %13073 = vst [vmem:[#allocation95_spill] sm:$0xff] %v5509_v13  ;;  %v5544_v13 = vsel %vm488_vm14, %v5426_v18, %v5429_v22  ;;  %v5590_v22 = vsel %vm491_vm0, %v5458_v32, %v5461_v43  ;;  %v5607_v62 = vld [vmem:[%s5080_s28 + $0x168] sm:$0xff]  ;;  %v5616_v43 = vsel %vm491_vm0, %v5487_v36, %v5490_v19  ;;  %v5637_v36 = vld [vmem:[%s5080_s28 + $0x318] sm:$0xff] }
  0xad   : > { %13074 = vst [vmem:[#allocation96_spill] sm:$0xff] %v5514_v44  ;;  %13075 = vst [vmem:[#allocation97_spill] sm:$0xff] %v5517_v12  ;;  %v5539_v44 = vsel %vm488_vm14, %v5423_v40, %v5426_v18  ;;  %v5562_v18 = vld [vmem:[%s5080_s28 + $0x270] sm:$0xff]  ;;  %v5565_v40 = vld [vmem:[%s5080_s28 + $0x300] sm:$0xff]  ;;  %v5621_v32 = vsel %vm491_vm0, %v5490_v19, %v5493_v41  ;;  %v5653_v23 = vsel %vm490_vm1, %v5520_v8, %v5547_v45  ;;  %960 = vperm.xlu1 %4613, %v4976_v52  }
  0xae   : > { %13076 = vst [vmem:[#allocation98_spill] sm:$0xff] %v5520_v8  ;;  %13077 = vst [vmem:[#allocation99_spill] sm:$0xff] %v5523_v63  ;;  %v5668_v19 = vld [vmem:[%s5080_s28 + $0x40] sm:$0xff] }
  0xaf   : > { %13078 = vst [vmem:[#allocation100_spill] sm:$0xff] %v5529_v17  ;;  %13079 = vst [vmem:[#allocation101_spill] sm:$0xff] %v5534_v42  ;;  %v5553_v17 = vld [vmem:[%s5080_s28 + $0x1e0] sm:$0xff]  ;;  %v5570_v42 = vpop.permute.xlu0 %455  ;;  %957 = vperm.xlu0 %4612, %v4979_v53  }
  0xb0   : > { %13080 = vst [vmem:[#allocation102_spill] sm:$0xff] %v5539_v44  ;;  %13081 = vst [vmem:[#allocation103_spill] sm:$0xff] %v5544_v13  ;;  %v5568_v13 = vld [vmem:[%s5080_s28 + $0x390] sm:$0xff]  ;;  %v459_v44 = vpop.permute.xlu1 %458  ;;  %v5665_v47 = vsel %vm490_vm1, %v5550_v39, %v5553_v17  ;;  %vm492_vm3 = vcmp.eq.s32.totalorder %v5570_v42, 1 }
  0xb1   : > { %13082 = vst [vmem:[#allocation104_spill] sm:$0xff] %v5547_v45  ;;  %13083 = vst [vmem:[#allocation105_spill] sm:$0xff] %v5550_v39  ;;  %vm493_vm2 = vcmp.eq.s32.totalorder %v459_v44, 1  ;;  %966 = vperm.xlu1 %4613, %v4982_v54  }
  0xb2   : > { %13084 = vst [vmem:[#allocation106_spill] sm:$0xff] %v5553_v17  ;;  %13085 = vst [vmem:[#allocation107_spill] sm:$0xff] %v5558_v28  ;;  %v5580_v28 = vsel %vm491_vm0, %v5455_v34, %v5452_v61  ;;  %v5610_v61 = vld [vmem:[%s5080_s28 + $0x1f8] sm:$0xff] }
  0xb3   : > { %13086 = vst [vmem:[#allocation108_spill] sm:$0xff] %v5562_v18  ;;  %13087 = vst [vmem:[#allocation109_spill] sm:$0xff] %v5565_v40  ;;  %963 = vperm.xlu0 %4612, %v4985_v55   ;;  %v6174_v55 = vld [vmem:[%s5080_s28 + $0x3d0] sm:$0xff] }
  0xb4   : > { %13088 = vst [vmem:[#allocation110_spill] sm:$0xff] %v5568_v13  ;;  %13089 = vst [vmem:[#allocation111_spill] sm:$0xff] %v5575_v16  ;;  %v5601_v16 = vld [vmem:[%s5080_s28 + $0x438] sm:$0xff] }
  0xb5   : > { %13090 = vst [vmem:[#allocation112_spill] sm:$0xff] %v5580_v28  ;;  %13091 = vst [vmem:[#allocation113_spill] sm:$0xff] %v5585_v20  ;;  %v5604_v28 = vld [vmem:[%s5080_s28 + $0xd8] sm:$0xff]  ;;  %v5750_v20 = vsel %vm493_vm2, %v5607_v62, %v5610_v61  ;;  %972 = vperm.xlu1 %4613, %v4990_v56  }
  0xb6   : > { %13092 = vst [vmem:[#allocation114_spill] sm:$0xff] %v5590_v22  ;;  %13093 = vst [vmem:[#allocation115_spill] sm:$0xff] %v5595_v24  ;;  %v5626_v24 = vsel %vm491_vm0, %v5493_v41, %v5517_v12  ;;  %v5634_v22 = vld [vmem:[%s5080_s28 + $0x288] sm:$0xff]  ;;  %v5647_v41 = vsel %vm490_vm1, %v5523_v63, %v5520_v8  ;;  %v5674_v8 = vld [vmem:[%s5080_s28 + $0xd0] sm:$0xff]  ;;  %v5745_v34 = vsel %vm493_vm2, %v5604_v28, %v5607_v62 }
  0xb7   : > { %13094 = vst [vmem:[#allocation116_spill] sm:$0xff] %v5598_v29  ;;  %13095 = vst [vmem:[#allocation117_spill] sm:$0xff] %v5604_v28  ;;  %v5759_v12 = vld [vmem:[%s5080_s28 + $0x328] sm:$0xff]  ;;  %v5801_v44 = vsel %vm492_vm3, %v5668_v19, %v5674_v8  ;;  %969 = vperm.xlu0 %4612, %v4993_v57  }
  0xb8   : > { %13096 = vst [vmem:[#allocation118_spill] sm:$0xff] %v5607_v62  ;;  %13097 = vst [vmem:[#allocation119_spill] sm:$0xff] %v5610_v61  ;;  %v5770_v62 = vsel %vm493_vm2, %v5634_v22, %v5637_v36 }
  0xb9   : > { %13098 = vst [vmem:[#allocation120_spill] sm:$0xff] %v5616_v43  ;;  %13099 = vst [vmem:[#allocation121_spill] sm:$0xff] %v5621_v32  ;;  %v5640_v43 = vld [vmem:[%s5080_s28 + $0x3a8] sm:$0xff]  ;;  %v5713_v32 = vld [vmem:[%s5080_s28 + $0x3a0] sm:$0xff]  ;;  %978 = vperm.xlu1 %4613, %v5007_v58  }
  0xba   : > { %13100 = vst [vmem:[#allocation122_spill] sm:$0xff] %v5626_v24  ;;  %13101 = vst [vmem:[#allocation123_spill] sm:$0xff] %v5631_v46  ;;  %v5659_v46 = vsel %vm490_vm1, %v5547_v45, %v5550_v39  ;;  %v5680_v24 = vld [vmem:[%s5080_s28 + $0x1f0] sm:$0xff]  ;;  %v5686_v39 = vsel %vm490_vm1, %v5553_v17, %v5562_v18  ;;  %v5692_v45 = vsel %vm490_vm1, %v5562_v18, %v5565_v40  ;;  %v5707_v17 = vld [vmem:[%s5080_s28 + $0x280] sm:$0xff]  ;;  %v465_v18 = vpop.permute.xlu1 %464 }
  0xbb   : > { %13102 = vst [vmem:[#allocation124_spill] sm:$0xff] %v5634_v22  ;;  %13103 = vst [vmem:[#allocation125_spill] sm:$0xff] %v5637_v36  ;;  %vm495_vm4 = vcmp.eq.s32.totalorder %v465_v18, 1  ;;  %975 = vperm.xlu0 %4612, %v5010_v59  }
  0xbc   : > { %13104 = vst [vmem:[#allocation126_spill] sm:$0xff] %v5647_v41  ;;  %13105 = vst [vmem:[#allocation127_spill] sm:$0xff] %v5653_v23  ;;  %v5671_v41 = vld [vmem:[%s5080_s28 + $0x430] sm:$0xff]  ;;  %v5677_v23 = vld [vmem:[%s5080_s28 + $0x160] sm:$0xff]  ;;  %v5916_v51 = vsel %vm495_vm4, %v5783_v49, %v5722_v31 }
  0xbd   : > { %13106 = vst [vmem:[#allocation128_spill] sm:$0xff] %v5659_v46  ;;  %13107 = vst [vmem:[#allocation129_spill] sm:$0xff] %v5665_v47  ;;  %v5698_v47 = vsel %vm490_vm1, %v5565_v40, %v5568_v13  ;;  %v5704_v46 = vsel %vm490_vm1, %v5568_v13, %v5523_v63  ;;  %v5719_v40 = vld [vmem:[%s5080_s28 + $0x58] sm:$0xff]  ;;  %v5735_v63 = vsel %vm493_vm2, %v5601_v16, %v5598_v29  ;;  %984 = vperm.xlu1 %4613, %v5015_v60  }
  0xbe   : > { %13108 = vst [vmem:[#allocation130_spill] sm:$0xff] %v5668_v19  ;;  %13109 = vst [vmem:[#allocation131_spill] sm:$0xff] %v5674_v8  ;;  %v5740_v13 = vsel %vm493_vm2, %v5598_v29, %v5604_v28  ;;  %v5765_v28 = vsel %vm493_vm2, %v5610_v61, %v5634_v22  ;;  %v5780_v29 = vsel %vm493_vm2, %v5640_v43, %v5601_v16  ;;  %v5786_v61 = vld [vmem:[%s5080_s28 + $0x50] sm:$0xff]  ;;  %v13252_v60 = vld [vmem:[#allocation53_spill] sm:$0xff] }
  0xbf   : > { %13110 = vst [vmem:[#allocation132_spill] sm:$0xff] %v5677_v23  ;;  %13111 = vst [vmem:[#allocation133_spill] sm:$0xff] %v5680_v24  ;;  %v5813_v22 = vsel %vm492_vm3, %v5677_v23, %v5680_v24 }
  0xc0   : > { %13112 = vst [vmem:[#allocation134_spill] sm:$0xff] %v5686_v39  ;;  %13113 = vst [vmem:[#allocation135_spill] sm:$0xff] %v5692_v45  ;;  %v5710_v39 = vld [vmem:[%s5080_s28 + $0x310] sm:$0xff]  ;;  %v5715_v45 = vpop.permute.xlu0 %461 }
  0xc1   : > { %13114 = vst [vmem:[#allocation136_spill] sm:$0xff] %v5698_v47  ;;  %13115 = vst [vmem:[#allocation137_spill] sm:$0xff] %v5704_v46  ;;  %v5725_v46 = vld [vmem:[%s5080_s28 + $0xe8] sm:$0xff]  ;;  %v5728_v47 = vld [vmem:[%s5080_s28 + $0x178] sm:$0xff]  ;;  %vm494_vm5 = vcmp.eq.s32.totalorder %v5715_v45, 1 }
  0xc2   : > { %13116 = vst [vmem:[#allocation138_spill] sm:$0xff] %v5707_v17  ;;  %13117 = vst [vmem:[#allocation139_spill] sm:$0xff] %v5710_v39  ;;  %v5870_v42 = vsel %vm495_vm4, %v5719_v40, %v5725_v46  ;;  %v5880_v50 = vsel %vm495_vm4, %v5728_v47, %v5753_v48  ;;  %v6008_v45 = vld [vmem:[%s5080_s28 + $0x468] sm:$0xff] }
  0xc3   : > { %13118 = vst [vmem:[#allocation140_spill] sm:$0xff] %v5719_v40  ;;  %13119 = vst [vmem:[#allocation141_spill] sm:$0xff] %v5722_v31 }
  0xc4   : > { %13120 = vst [vmem:[#allocation142_spill] sm:$0xff] %v5725_v46  ;;  %13121 = vst [vmem:[#allocation143_spill] sm:$0xff] %v5728_v47 }
  0xc5   : > { %13122 = vst [vmem:[#allocation144_spill] sm:$0xff] %v5735_v63  ;;  %13123 = vst [vmem:[#allocation145_spill] sm:$0xff] %v5745_v34  ;;  %v5756_v63 = vld [vmem:[%s5080_s28 + $0x298] sm:$0xff]  ;;  %v5859_v34 = vld [vmem:[%s5080_s28 + $0x3b0] sm:$0xff] }
  0xc6   : > { %13124 = vst [vmem:[#allocation146_spill] sm:$0xff] %v5750_v20  ;;  %13125 = vst [vmem:[#allocation147_spill] sm:$0xff] %v5753_v48  ;;  %v5775_v20 = vsel %vm493_vm2, %v5637_v36, %v5640_v43  ;;  %v5795_v36 = vsel %vm492_vm3, %v5671_v41, %v5668_v19  ;;  %v5824_v19 = vpop.permute.xlu1 %470 }
  0xc7   : > { %13126 = vst [vmem:[#allocation148_spill] sm:$0xff] %v5756_v63  ;;  %13127 = vst [vmem:[#allocation149_spill] sm:$0xff] %v5759_v12  ;;  %vm497_vm6 = vcmp.eq.s32.totalorder %v5824_v19, 1 }
  0xc8   : > { %13128 = vst [vmem:[#allocation150_spill] sm:$0xff] %v5765_v28  ;;  %13129 = vst [vmem:[#allocation151_spill] sm:$0xff] %v5770_v62  ;;  %v5789_v28 = vld [vmem:[%s5080_s28 + $0x440] sm:$0xff] }
  0xc9   : > { %13130 = vst [vmem:[#allocation152_spill] sm:$0xff] %v5775_v20  ;;  %13131 = vst [vmem:[#allocation153_spill] sm:$0xff] %v5780_v29  ;;  %v5807_v29 = vsel %vm492_vm3, %v5674_v8, %v5677_v23  ;;  %v5816_v20 = vld [vmem:[%s5080_s28 + $0xe0] sm:$0xff]  ;;  %v5832_v23 = vsel %vm492_vm3, %v5680_v24, %v5707_v17  ;;  %v5838_v8 = vsel %vm492_vm3, %v5707_v17, %v5710_v39  ;;  %v5853_v24 = vld [vmem:[%s5080_s28 + $0x290] sm:$0xff] }
  0xca   : > { %13132 = vst [vmem:[#allocation154_spill] sm:$0xff] %v5786_v61  ;;  %13133 = vst [vmem:[#allocation155_spill] sm:$0xff] %v5789_v28  ;;  %v5822_v62 = vld [vmem:[%s5080_s28 + $0x200] sm:$0xff]  ;;  %v5883_v17 = vld [vmem:[%s5080_s28 + $0x68] sm:$0xff]  ;;  %v5937_v18 = vsel %vm494_vm5, %v5786_v61, %v5816_v20 }
  0xcb   : > { %13134 = vst [vmem:[#allocation156_spill] sm:$0xff] %v5795_v36  ;;  %13135 = vst [vmem:[#allocation157_spill] sm:$0xff] %v5801_v44  ;;  %v5819_v36 = vld [vmem:[%s5080_s28 + $0x170] sm:$0xff]  ;;  %v5826_v44 = vpop.permute.xlu0 %467 }
  0xcc   : > { %13136 = vst [vmem:[#allocation158_spill] sm:$0xff] %v5807_v29  ;;  %13137 = vst [vmem:[#allocation159_spill] sm:$0xff] %v5813_v22  ;;  %v5844_v22 = vsel %vm492_vm3, %v5710_v39, %v5713_v32  ;;  %v5850_v29 = vsel %vm492_vm3, %v5713_v32, %v5671_v41  ;;  %v5865_v39 = vsel %vm495_vm4, %v5722_v31, %v5719_v40  ;;  %v5892_v40 = vld [vmem:[%s5080_s28 + $0x188] sm:$0xff]  ;;  %vm496_vm7 = vcmp.eq.s32.totalorder %v5826_v44, 1 }
  0xcd   : > { %13138 = vst [vmem:[#allocation160_spill] sm:$0xff] %v5816_v20  ;;  %13139 = vst [vmem:[#allocation161_spill] sm:$0xff] %v5819_v36  ;;  %v5990_v31 = vsel %vm494_vm5, %v5859_v34, %v5789_v28 }
  0xce   : > { %13140 = vst [vmem:[#allocation162_spill] sm:$0xff] %v5822_v62  ;;  %13141 = vst [vmem:[#allocation163_spill] sm:$0xff] %v5832_v23  ;;  %v5856_v23 = vld [vmem:[%s5080_s28 + $0x320] sm:$0xff] }
  0xcf   : > { %13142 = vst [vmem:[#allocation164_spill] sm:$0xff] %v5838_v8  ;;  %13143 = vst [vmem:[#allocation165_spill] sm:$0xff] %v5844_v22  ;;  %v5886_v22 = vld [vmem:[%s5080_s28 + $0x458] sm:$0xff] }
  0xd0   : > { %13144 = vst [vmem:[#allocation166_spill] sm:$0xff] %v5850_v29  ;;  %13145 = vst [vmem:[#allocation167_spill] sm:$0xff] %v5853_v24  ;;  %v5875_v29 = vsel %vm495_vm4, %v5725_v46, %v5728_v47  ;;  %v5901_v47 = vsel %vm495_vm4, %v5753_v48, %v5756_v63  ;;  %v5906_v46 = vsel %vm495_vm4, %v5756_v63, %v5759_v12  ;;  %v5922_v8 = vld [vmem:[%s5080_s28 + $0x338] sm:$0xff]  ;;  %v5925_v48 = vld [vmem:[%s5080_s28 + $0x3c8] sm:$0xff] }
  0xd1   : > { %13146 = vst [vmem:[#allocation168_spill] sm:$0xff] %v5856_v23  ;;  %13147 = vst [vmem:[#allocation169_spill] sm:$0xff] %v5865_v39  ;;  %v5889_v39 = vld [vmem:[%s5080_s28 + $0xf8] sm:$0xff]  ;;  %v5931_v63 = vsel %vm494_vm5, %v5789_v28, %v5786_v61  ;;  %v5958_v61 = vld [vmem:[%s5080_s28 + $0xf0] sm:$0xff]  ;;  %v6019_v52 = vsel %vm497_vm6, %v5886_v22, %v5883_v17 }
  0xd2   : > { %13148 = vst [vmem:[#allocation170_spill] sm:$0xff] %v5870_v42  ;;  %13149 = vst [vmem:[#allocation171_spill] sm:$0xff] %v5875_v29  ;;  %v5895_v42 = vld [vmem:[%s5080_s28 + $0x218] sm:$0xff]  ;;  %v5919_v29 = vld [vmem:[%s5080_s28 + $0x2a8] sm:$0xff] }
  0xd3   : > { %13150 = vst [vmem:[#allocation172_spill] sm:$0xff] %v5880_v50  ;;  %13151 = vst [vmem:[#allocation173_spill] sm:$0xff] %v5883_v17  ;;  %v5911_v50 = vsel %vm495_vm4, %v5759_v12, %v5783_v49  ;;  %v5943_v12 = vsel %vm494_vm5, %v5816_v20, %v5819_v36  ;;  %v477_v20 = vpop.permute.xlu1 %476  ;;  %v6037_v53 = vsel %vm497_vm6, %v5892_v40, %v5895_v42  ;;  %v6040_v28 = vld [vmem:[%s5080_s28 + $0x198] sm:$0xff] }
  0xd4   : > { %13152 = vst [vmem:[#allocation174_spill] sm:$0xff] %v5886_v22  ;;  %13153 = vst [vmem:[#allocation175_spill] sm:$0xff] %v5889_v39  ;;  %vm499_vm8 = vcmp.eq.s32.totalorder %v477_v20, 1 }
  0xd5   : > { %13154 = vst [vmem:[#allocation176_spill] sm:$0xff] %v5892_v40  ;;  %13155 = vst [vmem:[#allocation177_spill] sm:$0xff] %v5895_v42 }
  0xd6   : > { %13156 = vst [vmem:[#allocation178_spill] sm:$0xff] %v5901_v47  ;;  %13157 = vst [vmem:[#allocation179_spill] sm:$0xff] %v5906_v46  ;;  %v5964_v46 = vld [vmem:[%s5080_s28 + $0x210] sm:$0xff]  ;;  %v5984_v47 = vsel %vm494_vm5, %v5856_v23, %v5859_v34 }
  0xd7   : > { %13158 = vst [vmem:[#allocation180_spill] sm:$0xff] %v5911_v50  ;;  %13159 = vst [vmem:[#allocation181_spill] sm:$0xff] %v5916_v51  ;;  %v5949_v51 = vsel %vm494_vm5, %v5819_v36, %v5822_v62  ;;  %v5955_v50 = vld [vmem:[%s5080_s28 + $0x450] sm:$0xff]  ;;  %v5972_v36 = vsel %vm494_vm5, %v5822_v62, %v5853_v24  ;;  %v5993_v62 = vld [vmem:[%s5080_s28 + $0x2a0] sm:$0xff] }
  0xd8   : > { %13160 = vst [vmem:[#allocation182_spill] sm:$0xff] %v5919_v29  ;;  %13161 = vst [vmem:[#allocation183_spill] sm:$0xff] %v5922_v8 }
  0xd9   : > { %13162 = vst [vmem:[#allocation184_spill] sm:$0xff] %v5931_v63  ;;  %13163 = vst [vmem:[#allocation185_spill] sm:$0xff] %v5937_v18  ;;  %v5952_v63 = vld [vmem:[%s5080_s28 + $0x60] sm:$0xff] }
  0xda   : > { %13164 = vst [vmem:[#allocation186_spill] sm:$0xff] %v5943_v12  ;;  %13165 = vst [vmem:[#allocation187_spill] sm:$0xff] %v5949_v51  ;;  %v5961_v18 = vld [vmem:[%s5080_s28 + $0x180] sm:$0xff]  ;;  %v5966_v12 = vpop.permute.xlu0 %473  ;;  %v5978_v51 = vsel %vm494_vm5, %v5853_v24, %v5856_v23  ;;  %v6005_v23 = vld [vmem:[%s5080_s28 + $0x78] sm:$0xff]  ;;  %v6089_v19 = vsel %vm496_vm7, %v5955_v50, %v5952_v63 }
  0xdb   : > { %13166 = vst [vmem:[#allocation188_spill] sm:$0xff] %v5952_v63  ;;  %13167 = vst [vmem:[#allocation189_spill] sm:$0xff] %v5958_v61  ;;  %v5999_v24 = vld [vmem:[%s5080_s28 + $0x3c0] sm:$0xff]  ;;  %vm498_vm9 = vcmp.eq.s32.totalorder %v5966_v12, 1  ;;  %v6289_v12 = vld [vmem:[%s5080_s28 + $0x230] sm:$0xff] }
  0xdc   : > { %13168 = vst [vmem:[#allocation190_spill] sm:$0xff] %v5961_v18  ;;  %13169 = vst [vmem:[#allocation191_spill] sm:$0xff] %v5964_v46  ;;  %v6141_v54 = vsel %vm496_vm7, %v5999_v24, %v5955_v50 }
  0xdd   : > { %13170 = vst [vmem:[#allocation192_spill] sm:$0xff] %v5972_v36  ;;  %13171 = vst [vmem:[#allocation193_spill] sm:$0xff] %v5978_v51  ;;  %v5996_v36 = vld [vmem:[%s5080_s28 + $0x330] sm:$0xff]  ;;  %v6031_v51 = vsel %vm497_vm6, %v5889_v39, %v5892_v40  ;;  %v6058_v40 = vsel %vm497_vm6, %v5919_v29, %v5922_v8 }
  0xde   : > { %13172 = vst [vmem:[#allocation194_spill] sm:$0xff] %v5984_v47  ;;  %13173 = vst [vmem:[#allocation195_spill] sm:$0xff] %v5990_v31  ;;  %v6011_v31 = vld [vmem:[%s5080_s28 + $0x108] sm:$0xff]  ;;  %v6025_v47 = vsel %vm497_vm6, %v5883_v17, %v5889_v39  ;;  %v6046_v17 = vld [vmem:[%s5080_s28 + $0x2b8] sm:$0xff]  ;;  %v6052_v39 = vsel %vm497_vm6, %v5895_v42, %v5919_v29  ;;  %v6081_v29 = vpop.permute.xlu1 %482 }
  0xdf   : > { %13174 = vst [vmem:[#allocation196_spill] sm:$0xff] %v5993_v62  ;;  %13175 = vst [vmem:[#allocation197_spill] sm:$0xff] %v5996_v36  ;;  %v6073_v42 = vld [vmem:[%s5080_s28 + $0x348] sm:$0xff]  ;;  %v6161_v44 = vsel %vm499_vm8, %v6005_v23, %v6011_v31  ;;  %vm501_vm10 = vcmp.eq.s32.totalorder %v6081_v29, 1 }
  0xe0   : > { %13176 = vst [vmem:[#allocation198_spill] sm:$0xff] %v6005_v23  ;;  %13177 = vst [vmem:[#allocation199_spill] sm:$0xff] %v6011_v31 }
  0xe1   : > { %13178 = vst [vmem:[#allocation200_spill] sm:$0xff] %v6019_v52  ;;  %13179 = vst [vmem:[#allocation201_spill] sm:$0xff] %v6025_v47  ;;  %v6043_v52 = vld [vmem:[%s5080_s28 + $0x228] sm:$0xff]  ;;  %v6079_v47 = vld [vmem:[%s5080_s28 + $0x70] sm:$0xff] }
  0xe2   : > { %13180 = vst [vmem:[#allocation202_spill] sm:$0xff] %v6031_v51  ;;  %13181 = vst [vmem:[#allocation203_spill] sm:$0xff] %v6037_v53  ;;  %v6064_v53 = vsel %vm497_vm6, %v5922_v8, %v5925_v48  ;;  %v6070_v51 = vsel %vm497_vm6, %v5925_v48, %v5886_v22  ;;  %v6095_v8 = vsel %vm496_vm7, %v5952_v63, %v5958_v61  ;;  %v6110_v22 = vld [vmem:[%s5080_s28 + $0x460] sm:$0xff]  ;;  %v6116_v63 = vld [vmem:[%s5080_s28 + $0x190] sm:$0xff] }
  0xe3   : > { %13182 = vst [vmem:[#allocation204_spill] sm:$0xff] %v6040_v28  ;;  %13183 = vst [vmem:[#allocation205_spill] sm:$0xff] %v6043_v52  ;;  %v6219_v20 = vsel %vm498_vm9, %v6110_v22, %v6079_v47  ;;  %v6271_v56 = vsel %vm498_vm9, %v6174_v55, %v6110_v22 }
  0xe4   : > { %13184 = vst [vmem:[#allocation206_spill] sm:$0xff] %v6046_v17  ;;  %13185 = vst [vmem:[#allocation207_spill] sm:$0xff] %v6052_v39  ;;  %v6076_v39 = vld [vmem:[%s5080_s28 + $0x3d8] sm:$0xff] }
  0xe5   : > { %13186 = vst [vmem:[#allocation208_spill] sm:$0xff] %v6058_v40  ;;  %13187 = vst [vmem:[#allocation209_spill] sm:$0xff] %v6064_v53  ;;  %v6083_v40 = vpop.permute.xlu0 %479  ;;  %v6107_v53 = vsel %vm496_vm7, %v5961_v18, %v5964_v46 }
  0xe6   : > { %13188 = vst [vmem:[#allocation210_spill] sm:$0xff] %v6070_v51  ;;  %13189 = vst [vmem:[#allocation211_spill] sm:$0xff] %v6073_v42  ;;  %v6101_v51 = vsel %vm496_vm7, %v5958_v61, %v5961_v18  ;;  %v6123_v61 = vsel %vm496_vm7, %v5964_v46, %v5993_v62  ;;  %v6129_v18 = vsel %vm496_vm7, %v5993_v62, %v5996_v36  ;;  %v6144_v46 = vld [vmem:[%s5080_s28 + $0x220] sm:$0xff]  ;;  %vm500_vm11 = vcmp.eq.s32.totalorder %v6083_v40, 1 }
  0xe7   : > { %13190 = vst [vmem:[#allocation212_spill] sm:$0xff] %v6079_v47  ;;  %13191 = vst [vmem:[#allocation213_spill] sm:$0xff] %v6089_v19  ;;  %v6113_v19 = vld [vmem:[%s5080_s28 + $0x100] sm:$0xff] }
  0xe8   : > { %13192 = vst [vmem:[#allocation214_spill] sm:$0xff] %v6107_v53  ;;  %13193 = vst [vmem:[#allocation215_spill] sm:$0xff] %v6110_v22  ;;  %v6135_v53 = vsel %vm496_vm7, %v5996_v36, %v5999_v24  ;;  %v6150_v62 = vld [vmem:[%s5080_s28 + $0x340] sm:$0xff]  ;;  %v6156_v36 = vsel %vm499_vm8, %v6008_v45, %v6005_v23  ;;  %v6185_v23 = vsel %vm499_vm8, %v6043_v52, %v6046_v17 }
  0xe9   : > { %13194 = vst [vmem:[#allocation216_spill] sm:$0xff] %v6113_v19  ;;  %13195 = vst [vmem:[#allocation217_spill] sm:$0xff] %v6116_v63  ;;  %v6324_v22 = vld [vmem:[%s5080_s28 + $0x3e0] sm:$0xff] }
  0xea   : > { %13196 = vst [vmem:[#allocation218_spill] sm:$0xff] %v6123_v61  ;;  %13197 = vst [vmem:[#allocation219_spill] sm:$0xff] %v6129_v18  ;;  %v6147_v61 = vld [vmem:[%s5080_s28 + $0x2b0] sm:$0xff]  ;;  %v6177_v18 = vld [vmem:[%s5080_s28 + $0x88] sm:$0xff] }
  0xeb   : > { %13198 = vst [vmem:[#allocation220_spill] sm:$0xff] %v6135_v53  ;;  %13199 = vst [vmem:[#allocation221_spill] sm:$0xff] %v6141_v54  ;;  %v6166_v54 = vsel %vm499_vm8, %v6011_v31, %v6040_v28  ;;  %v6171_v53 = vsel %vm499_vm8, %v6040_v28, %v6043_v52  ;;  %v6190_v31 = vsel %vm499_vm8, %v6046_v17, %v6073_v42  ;;  %v6209_v52 = vld [vmem:[%s5080_s28 + $0x238] sm:$0xff]  ;;  %v6211_v17 = vpop.permute.xlu1 %561 }
  0xec   : > { %13200 = vst [vmem:[#allocation222_spill] sm:$0xff] %v6144_v46  ;;  %13201 = vst [vmem:[#allocation223_spill] sm:$0xff] %v6147_v61  ;;  %v6195_v28 = vsel %vm499_vm8, %v6073_v42, %v6076_v39  ;;  %v6225_v42 = vsel %vm498_vm9, %v6079_v47, %v6113_v19  ;;  %v6246_v47 = vld [vmem:[%s5080_s28 + $0x3e8] sm:$0xff]  ;;  %vm612_vm12 = vcmp.eq.s32.totalorder %v6211_v17, 1 }
  0xed   : > { %13202 = vst [vmem:[#allocation224_spill] sm:$0xff] %v6150_v62  ;;  %13203 = vst [vmem:[#allocation225_spill] sm:$0xff] %v6156_v36  ;;  %v6180_v36 = vld [vmem:[%s5080_s28 + $0x478] sm:$0xff]  ;;  %v6432_v40 = vsel %vm612_vm12, %v5255_v10, %v5375_v11  ;;  %v6455_v10 = vsel %vm612_vm12, %v5276_v6, %v5395_v0  ;;  %v6467_v11 = vsel %vm612_vm12, %v5291_v21, %v5405_v26  ;;  %v13248_v6 = vld [vmem:[#allocation50_spill] sm:$0xff] }
  0xee   : > { %13204 = vst [vmem:[#allocation226_spill] sm:$0xff] %v6161_v44  ;;  %13205 = vst [vmem:[#allocation227_spill] sm:$0xff] %v6166_v54  ;;  %v6203_v54 = vld [vmem:[%s5080_s28 + $0x118] sm:$0xff]  ;;  %v6206_v44 = vld [vmem:[%s5080_s28 + $0x1a8] sm:$0xff] }
  0xef   : > { %13206 = vst [vmem:[#allocation228_spill] sm:$0xff] %v6171_v53  ;;  %13207 = vst [vmem:[#allocation229_spill] sm:$0xff] %v6177_v18  ;;  %v6200_v53 = vsel %vm499_vm8, %v6076_v39, %v6008_v45  ;;  %v6303_v57 = vsel %vm501_vm10, %v6177_v18, %v6203_v54  ;;  %v13250_v0 = vld [vmem:[#allocation52_spill] sm:$0xff]  ;;  %v13257_v26 = vld [vmem:[#allocation55_spill] sm:$0xff] }
  0xf0   : > { %13208 = vst [vmem:[#allocation230_spill] sm:$0xff] %v6185_v23  ;;  %13209 = vst [vmem:[#allocation231_spill] sm:$0xff] %v6190_v31  ;;  %v6213_v31 = vpop.permute.xlu0 %558  ;;  %v6243_v23 = vld [vmem:[%s5080_s28 + $0x358] sm:$0xff] }
  0xf1   : > { %13210 = vst [vmem:[#allocation232_spill] sm:$0xff] %v6195_v28  ;;  %13211 = vst [vmem:[#allocation233_spill] sm:$0xff] %v6200_v53  ;;  %v6231_v53 = vsel %vm498_vm9, %v6113_v19, %v6116_v63  ;;  %v6237_v28 = vsel %vm498_vm9, %v6116_v63, %v6144_v46  ;;  %v6253_v19 = vsel %vm498_vm9, %v6144_v46, %v6147_v61  ;;  %v6274_v46 = vld [vmem:[%s5080_s28 + $0x80] sm:$0xff]  ;;  %vm611_vm13 = vcmp.eq.s32.totalorder %v6213_v31, 1 }
  0xf2   : > { %13212 = vst [vmem:[#allocation234_spill] sm:$0xff] %v6203_v54  ;;  %13213 = vst [vmem:[#allocation235_spill] sm:$0xff] %v6206_v44  ;;  %v6259_v63 = vsel %vm498_vm9, %v6147_v61, %v6150_v62  ;;  %v6280_v61 = vld [vmem:[%s5080_s28 + $0x110] sm:$0xff] }
  0xf3   : > { %13214 = vst [vmem:[#allocation236_spill] sm:$0xff] %v6209_v52  ;;  %13215 = vst [vmem:[#allocation237_spill] sm:$0xff] %v6219_v20  ;;  %v6240_v20 = vld [vmem:[%s5080_s28 + $0x2c8] sm:$0xff] }
  0xf4   : > { %13216 = vst [vmem:[#allocation238_spill] sm:$0xff] %v6231_v53  ;;  %13217 = vst [vmem:[#allocation239_spill] sm:$0xff] %v6237_v28  ;;  %v6265_v28 = vsel %vm498_vm9, %v6150_v62, %v6174_v55  ;;  %v6286_v62 = vld [vmem:[%s5080_s28 + $0x1a0] sm:$0xff]  ;;  %v6321_v53 = vld [vmem:[%s5080_s28 + $0x350] sm:$0xff] }
  0xf5   : > { %13218 = vst [vmem:[#allocation240_spill] sm:$0xff] %v6240_v20  ;;  %13219 = vst [vmem:[#allocation241_spill] sm:$0xff] %v6243_v23  ;;  %v6371_v29 = vsel %vm500_vm11, %v6280_v61, %v6286_v62  ;;  %v6377_v58 = vsel %vm500_vm11, %v6286_v62, %v6289_v12 }
  0xf6   : > { %13220 = vst [vmem:[#allocation242_spill] sm:$0xff] %v6253_v19  ;;  %13221 = vst [vmem:[#allocation243_spill] sm:$0xff] %v6259_v63  ;;  %v6277_v19 = vld [vmem:[%s5080_s28 + $0x470] sm:$0xff]  ;;  %v6315_v63 = vsel %vm501_vm10, %v6206_v44, %v6209_v52 }
  0xf7   : > { %13222 = vst [vmem:[#allocation244_spill] sm:$0xff] %v6265_v28  ;;  %13223 = vst [vmem:[#allocation245_spill] sm:$0xff] %v6271_v56  ;;  %v6297_v56 = vsel %vm501_vm10, %v6180_v36, %v6177_v18  ;;  %v6309_v28 = vsel %vm501_vm10, %v6203_v54, %v6206_v44  ;;  %v6326_v18 = vpop.permute.xlu1 %567  ;;  %v6334_v54 = vsel %vm501_vm10, %v6209_v52, %v6240_v20 }
  0xf8   : > { %13224 = vst [vmem:[#allocation246_spill] sm:$0xff] %v6274_v46  ;;  %13225 = vst [vmem:[#allocation247_spill] sm:$0xff] %v6280_v61  ;;  %v6340_v44 = vsel %vm501_vm10, %v6240_v20, %v6243_v23  ;;  %v6352_v52 = vsel %vm501_vm10, %v6246_v47, %v6180_v36  ;;  %v6359_v20 = vsel %vm500_vm11, %v6277_v19, %v6274_v46  ;;  %vm614_vm14 = vcmp.eq.s32.totalorder %v6326_v18, 1 }
  0xf9   : > { %13226 = vst [vmem:[#allocation248_spill] sm:$0xff] %v6286_v62  ;;  %13227 = vst [vmem:[#allocation249_spill] sm:$0xff] %v6289_v12  ;;  %v6399_v62 = vsel %vm500_vm11, %v6321_v53, %v6324_v22  ;;  %v6405_v59 = vsel %vm500_vm11, %v6324_v22, %v6277_v19 }
  0xfa   : > { %13228 = vst [vmem:[#allocation250_spill] sm:$0xff] %v6297_v56  ;;  %13229 = vst [vmem:[#allocation251_spill] sm:$0xff] %v6303_v57  ;;  %v6318_v56 = vld [vmem:[%s5080_s28 + $0x2c0] sm:$0xff]  ;;  %v6328_v57 = vpop.permute.xlu0 %564 }
  0xfb   : > { %13230 = vst [vmem:[#allocation252_spill] sm:$0xff] %v6315_v63  ;;  %13231 = vst [vmem:[#allocation253_spill] sm:$0xff] %v6318_v56  ;;  %v6346_v63 = vsel %vm501_vm10, %v6243_v23, %v6246_v47  ;;  %v6365_v23 = vsel %vm500_vm11, %v6274_v46, %v6280_v61  ;;  %v6387_v46 = vsel %vm500_vm11, %v6289_v12, %v6318_v56  ;;  %v6408_v12 = vld [vmem:[%s5080_s28] sm:$0xff]  ;;  %vm613_vm15 = vcmp.eq.s32.totalorder %v6328_v57, 1  ;;  %v13311_v57 = vld [vmem:[#allocation88_spill] sm:$0xff] }
  0xfc   : > { %13232 = vst [vmem:[#allocation254_spill] sm:$0xff] %v6321_v53  ;;  %13233 = vst [vmem:[#allocation255_spill] sm:$0xff] %v6359_v20  ;;  %v6380_v20 = vld [vmem:[%s5080_s28 + $0x3f0] sm:$0xff]  ;;  %v6393_v61 = vsel %vm500_vm11, %v6318_v56, %v6321_v53  ;;  %v6420_v56 = vsel %vm612_vm12, %v5297_v3, %v5365_v33  ;;  %v6426_v53 = vsel %vm612_vm12, %v5258_v37, %v5370_v38  ;;  %v6444_v3 = vld [vmem:[%s5080_s28 + $0x240] sm:$0xff]  ;;  %v574_v38 = vpop.permute.xlu1 %573 }
  0xfd   : > { %13234 = vst [vmem:[#allocation256_spill] sm:$0xff] %v6377_v58  ;;  %13235 = vst [vmem:[#allocation257_spill] sm:$0xff] %v6380_v20  ;;  %v6414_v58 = vld [vmem:[%s5080_s28 + $0x120] sm:$0xff]  ;;  %v6441_v33 = vld [vmem:[%s5080_s28 + $0x1b0] sm:$0xff]  ;;  %vm616_vm0 = vcmp.eq.s32.totalorder %v574_v38, 1 }
  0xfe   : > { %13236 = vst [vmem:[#allocation258_spill] sm:$0xff] %v6387_v46  ;;  %13237 = vst [vmem:[#allocation259_spill] sm:$0xff] %v6405_v59  ;;  %v6411_v46 = vld [vmem:[%s5080_s28 + $0x90] sm:$0xff]  ;;  %v6438_v59 = vsel %vm612_vm12, %v5273_v9, %v5390_v15  ;;  %v6449_v37 = vpop.permute.xlu0 %570  ;;  %v6461_v9 = vsel %vm612_vm12, %v5279_v5, %v5400_v4  ;;  %v6473_v15 = vsel %vm612_vm12, %v5294_v27, %v5420_v14 }
  0xff   : > { %13238 = vst [vmem:[#allocation260_spill] sm:$0xff] %v6408_v12  ;;  %13239 = vst [vmem:[#allocation261_spill] sm:$0xff] %v6411_v46  ;;  %v6480_v5 = vsel %vm611_vm13, %v5176_v2, %v5246_v30  ;;  %v6486_v4 = vsel %vm611_vm13, %v6380_v20, %v13248_v6  ;;  %v6492_v14 = vsel %vm611_vm13, %v6408_v12, %v13250_v0  ;;  %v13254_v2 = vld [vmem:[#allocation2_spill] sm:$0xff]  ;;  %v13259_v6 = vld [vmem:[#allocation56_spill] sm:$0xff]  ;;  %vm615_vm1 = vcmp.eq.s32.totalorder %v6449_v37, 1 }
 0x100   : > { %13240 = vst [vmem:[#allocation262_spill] sm:$0xff] %v6414_v58  ;;  %13241 = vst [vmem:[#allocation263_spill] sm:$0xff] %v6420_v56  ;;  %v6447_v56 = vld [vmem:[%s5080_s28 + $0x2d0] sm:$0xff]  ;;  %v6498_v21 = vsel %vm611_vm13, %v6411_v46, %v13252_v60  ;;  %981 = vperm.xlu0 %4612, %v13254_v2   ;;  %v13255_v30 = vld [vmem:[#allocation54_spill] sm:$0xff]  ;;  %v6511_v17 = vsel %vm611_vm13, %v6441_v33, %v13257_v26  ;;  %v6517_v0 = vsel %vm611_vm13, %v6444_v3, %v13259_v6  ;;  %v580_v31 = vpop.permute.xlu1 %579 }
 0x101   : > { %13242 = vst [vmem:[#allocation264_spill] sm:$0xff] %v6441_v33  ;;  %13243 = vst [vmem:[#allocation265_spill] sm:$0xff] %v6444_v3  ;;  %v6505_v27 = vsel %vm611_vm13, %v6414_v58, %v13255_v30  ;;  %v13261_v60 = vld [vmem:[#allocation57_spill] sm:$0xff]  ;;  %v6526_v30 = vld [vmem:[%s5080_s28 + $0x370] sm:$0xff]  ;;  %vm618_vm2 = vcmp.eq.s32.totalorder %v580_v31, 1 }
 0x102   : > { %13244 = vst [vmem:[#allocation266_spill] sm:$0xff] %v6447_v56  ;;  %13245 = vst [vmem:[#allocation267_spill] sm:$0xff] %v6467_v11  ;;  %v6523_v2 = vsel %vm611_vm13, %v6447_v56, %v13261_v60  ;;  %v6529_v58 = vld [vmem:[%s5080_s28 + $0x400] sm:$0xff]  ;;  %v6532_v26 = vld [vmem:[%s5080_s28 + $0x10] sm:$0xff]  ;;  %v6543_v60 = vpop.permute.xlu0 %576 }
 0x103   : > { %13246 = vst [vmem:[#allocation268_spill] sm:$0xff] %v6473_v15  ;;  %13247 = vst [vmem:[#allocation269_spill] sm:$0xff] %v6480_v5  ;;  %v6537_v6 = vld [vmem:[%s5080_s28 + $0xa0] sm:$0xff]  ;;  %v6540_v3 = vld [vmem:[%s5080_s28 + $0x130] sm:$0xff]  ;;  %vm617_vm3 = vcmp.eq.s32.totalorder %v6543_v60, 1 }
 0x104   : > { %13249 = vst [vmem:[#allocation50_spill] sm:$0xff] %v6486_v4  ;;  %13251 = vst [vmem:[#allocation52_spill] sm:$0xff] %v6492_v14  ;;  %v13268_v33 = vld [vmem:[#allocation51_spill] sm:$0xff]  ;;  %v13271_v46 = vld [vmem:[#allocation36_spill] sm:$0xff] }
 0x105   : > { %13253 = vst [vmem:[#allocation53_spill] sm:$0xff] %v6498_v21  ;;  %13256 = vst [vmem:[#allocation2_spill] sm:$0xff] %v6505_v27  ;;  %v13273_v12 = vld [vmem:[#allocation60_spill] sm:$0xff]  ;;  %v13274_v21 = vld [vmem:[#allocation35_spill] sm:$0xff] }
 0x106   : > { %13258 = vst [vmem:[#allocation54_spill] sm:$0xff] %v6511_v17  ;;  %13260 = vst [vmem:[#allocation55_spill] sm:$0xff] %v6517_v0  ;;  %v13270_v17 = vld [vmem:[#allocation59_spill] sm:$0xff]  ;;  %v6561_v20 = vsel %vm614_vm14, %v13274_v21, %v13273_v12  ;;  %v13276_v14 = vld [vmem:[#allocation64_spill] sm:$0xff] }
 0x107   : > { %13262 = vst [vmem:[#allocation56_spill] sm:$0xff] %v6523_v2  ;;  %13263 = vst [vmem:[#allocation57_spill] sm:$0xff] %v6529_v58  ;;  %v13267_v2 = vld [vmem:[#allocation58_spill] sm:$0xff]  ;;  %v6555_v27 = vsel %vm614_vm14, %v13271_v46, %v13270_v17  ;;  %v13277_v4 = vld [vmem:[#allocation37_spill] sm:$0xff] }
 0x108   : > { %13264 = vst [vmem:[#allocation270_spill] sm:$0xff] %v6532_v26  ;;  %13265 = vst [vmem:[#allocation271_spill] sm:$0xff] %v6537_v6  ;;  %v6549_v0 = vsel %vm614_vm14, %v13268_v33, %v13267_v2  ;;  %v6567_v56 = vsel %vm614_vm14, %v13277_v4, %v13276_v14  ;;  %v6570_v33 = vld [vmem:[%s5080_s28 + $0x1c0] sm:$0xff]  ;;  %v6573_v2 = vld [vmem:[%s5080_s28 + $0x250] sm:$0xff] }
 0x109   : > { %13266 = vst [vmem:[#allocation272_spill] sm:$0xff] %v6540_v3  ;;  %13269 = vst [vmem:[#allocation58_spill] sm:$0xff] %v6549_v0  ;;  %v6576_v0 = vld [vmem:[%s5080_s28 + $0x2e0] sm:$0xff]  ;;  %v13281_v46 = vld [vmem:[#allocation3_spill] sm:$0xff] }
 0x10a   : > { %13272 = vst [vmem:[#allocation51_spill] sm:$0xff] %v6555_v27  ;;  %13275 = vst [vmem:[#allocation59_spill] sm:$0xff] %v6561_v20  ;;  %990 = vperm.xlu1 %4613, %v13281_v46   ;;  %v13282_v17 = vld [vmem:[#allocation65_spill] sm:$0xff]  ;;  %v13283_v27 = vld [vmem:[#allocation38_spill] sm:$0xff] }
 0x10b   : > { %13278 = vst [vmem:[#allocation36_spill] sm:$0xff] %v6567_v56  ;;  %13279 = vst [vmem:[#allocation60_spill] sm:$0xff] %v6570_v33  ;;  %v6583_v12 = vsel %vm614_vm14, %v13283_v27, %v13282_v17  ;;  %v13284_v21 = vld [vmem:[#allocation66_spill] sm:$0xff]  ;;  %v13285_v20 = vld [vmem:[#allocation45_spill] sm:$0xff] }
 0x10c   : > { %13280 = vst [vmem:[#allocation35_spill] sm:$0xff] %v6573_v2  ;;  %v6589_v4 = vsel %vm614_vm14, %v13285_v20, %v13284_v21  ;;  %v13286_v14 = vld [vmem:[#allocation67_spill] sm:$0xff]  ;;  %v13287_v56 = vld [vmem:[#allocation46_spill] sm:$0xff]  ;;  %v13290_v27 = vld [vmem:[#allocation4_spill] sm:$0xff] }
 0x10d   : > { %v6595_v5 = vsel %vm614_vm14, %v13287_v56, %v13286_v14  ;;  %v13288_v15 = vld [vmem:[#allocation71_spill] sm:$0xff]  ;;  %987 = vperm.xlu0 %4612, %v13290_v27   ;;  %v13291_v17 = vld [vmem:[#allocation33_spill] sm:$0xff]  ;;  %v13292_v21 = vld [vmem:[#allocation34_spill] sm:$0xff] }
 0x10e   : > { %v13289_v46 = vld [vmem:[#allocation47_spill] sm:$0xff]  ;;  %v6608_v20 = vsel %vm613_vm15, %v6526_v30, %v13291_v17  ;;  %v6614_v56 = vsel %vm613_vm15, %v6529_v58, %v13292_v21  ;;  %v13293_v14 = vld [vmem:[#allocation41_spill] sm:$0xff]  ;;  %v13298_v21 = vld [vmem:[#allocation44_spill] sm:$0xff] }
 0x10f   : > { %v6601_v11 = vsel %vm614_vm14, %v13289_v46, %v13288_v15  ;;  %v6620_v18 = vsel %vm613_vm15, %v6532_v26, %v13293_v14  ;;  %v13294_v15 = vld [vmem:[#allocation42_spill] sm:$0xff]  ;;  %v13296_v27 = vld [vmem:[#allocation43_spill] sm:$0xff]  ;;  %v6638_v58 = vsel %vm613_vm15, %v6570_v33, %v13298_v21  ;;  %v13300_v14 = vld [vmem:[#allocation48_spill] sm:$0xff] }
 0x110   : > { %v6626_v46 = vsel %vm613_vm15, %v6537_v6, %v13294_v15  ;;  %v6632_v17 = vsel %vm613_vm15, %v6540_v3, %v13296_v27  ;;  %13299 = vst [vmem:[#allocation3_spill] sm:$0xff] %v6638_v58  ;;  %v6644_v26 = vsel %vm613_vm15, %v6573_v2, %v13300_v14  ;;  %v13302_v15 = vld [vmem:[#allocation49_spill] sm:$0xff]  ;;  %v586_v27 = vpop.permute.xlu1 %585  ;;  %v6652_v3 = vpop.permute.xlu0 %582  ;;  %v13306_v33 = vld [vmem:[#allocation82_spill] sm:$0xff]  ;;  %v13308_v14 = vld [vmem:[#allocation83_spill] sm:$0xff] }
 0x111   : > { %13295 = vst [vmem:[#allocation64_spill] sm:$0xff] %v6626_v46  ;;  %13297 = vst [vmem:[#allocation37_spill] sm:$0xff] %v6632_v17  ;;  %v6650_v6 = vsel %vm613_vm15, %v6576_v0, %v13302_v15  ;;  %v13304_v17 = vld [vmem:[#allocation81_spill] sm:$0xff]  ;;  %v6662_v58 = vsel %vm616_vm0, %v5319_v35, %v13306_v33  ;;  %v13312_v15 = vld [vmem:[#allocation62_spill] sm:$0xff]  ;;  %vm620_vm4 = vcmp.eq.s32.totalorder %v586_v27, 1  ;;  %vm619_vm5 = vcmp.eq.s32.totalorder %v6652_v3, 1 }
 0x112   : > { %13301 = vst [vmem:[#allocation65_spill] sm:$0xff] %v6644_v26  ;;  %13303 = vst [vmem:[#allocation38_spill] sm:$0xff] %v6650_v6  ;;  %v6657_v21 = vsel %vm616_vm0, %v5378_v1, %v13304_v17  ;;  %v13309_v2 = vld [vmem:[#allocation61_spill] sm:$0xff]  ;;  %v6672_v6 = vsel %vm616_vm0, %v13312_v15, %v13311_v57  ;;  %v13315_v1 = vld [vmem:[#allocation63_spill] sm:$0xff] }
 0x113   : > { %13305 = vst [vmem:[#allocation66_spill] sm:$0xff] %v6657_v21  ;;  %13307 = vst [vmem:[#allocation45_spill] sm:$0xff] %v6662_v58  ;;  %v6667_v26 = vsel %vm616_vm0, %v13309_v2, %v13308_v14  ;;  %v13314_v46 = vld [vmem:[#allocation5_spill] sm:$0xff]  ;;  %v6678_v17 = vsel %vm616_vm0, %v13315_v1, %v5474_v7  ;;  %v13317_v35 = vld [vmem:[#allocation68_spill] sm:$0xff] }
 0x114   : > { %13310 = vst [vmem:[#allocation67_spill] sm:$0xff] %v6667_v26  ;;  %13313 = vst [vmem:[#allocation46_spill] sm:$0xff] %v6672_v6  ;;  %1069 = vperm.xlu1 %4613, %v13314_v46   ;;  %v6683_v33 = vsel %vm616_vm0, %v13317_v35, %v5479_v25  ;;  %v13319_v58 = vld [vmem:[#allocation89_spill] sm:$0xff]  ;;  %v13323_v57 = vld [vmem:[#allocation70_spill] sm:$0xff] }
 0x115   : > { %13316 = vst [vmem:[#allocation71_spill] sm:$0xff] %v6678_v17  ;;  %13318 = vst [vmem:[#allocation47_spill] sm:$0xff] %v6683_v33  ;;  %v13320_v2 = vld [vmem:[#allocation69_spill] sm:$0xff]  ;;  %v13325_v46 = vld [vmem:[#allocation6_spill] sm:$0xff] }
 0x116   : > { %v6688_v14 = vsel %vm616_vm0, %v13320_v2, %v13319_v58  ;;  %v13322_v26 = vld [vmem:[#allocation93_spill] sm:$0xff]  ;;  %1066 = vperm.xlu0 %4612, %v13325_v46   ;;  %v13326_v6 = vld [vmem:[#allocation94_spill] sm:$0xff]  ;;  %v13327_v7 = vld [vmem:[#allocation79_spill] sm:$0xff] }
 0x117   : > { %13321 = vst [vmem:[#allocation4_spill] sm:$0xff] %v6688_v14  ;;  %v6693_v15 = vsel %vm616_vm0, %v13323_v57, %v13322_v26  ;;  %v6700_v1 = vsel %vm615_vm1, %v13327_v7, %v13326_v6  ;;  %v13329_v25 = vld [vmem:[#allocation95_spill] sm:$0xff]  ;;  %v13330_v35 = vld [vmem:[#allocation73_spill] sm:$0xff]  ;;  %v13332_v58 = vld [vmem:[#allocation96_spill] sm:$0xff] }
 0x118   : > { %13324 = vst [vmem:[#allocation33_spill] sm:$0xff] %v6693_v15  ;;  %13328 = vst [vmem:[#allocation34_spill] sm:$0xff] %v6700_v1  ;;  %v6706_v33 = vsel %vm615_vm1, %v13330_v35, %v13329_v25  ;;  %v13333_v2 = vld [vmem:[#allocation72_spill] sm:$0xff]  ;;  %v13336_v57 = vld [vmem:[#allocation74_spill] sm:$0xff] }
 0x119   : > { %13331 = vst [vmem:[#allocation41_spill] sm:$0xff] %v6706_v33  ;;  %v6712_v38 = vsel %vm615_vm1, %v13333_v2, %v13332_v58  ;;  %v13335_v26 = vld [vmem:[#allocation100_spill] sm:$0xff]  ;;  %v13338_v6 = vld [vmem:[#allocation101_spill] sm:$0xff]  ;;  %v13339_v7 = vld [vmem:[#allocation75_spill] sm:$0xff] }
 0x11a   : > { %13334 = vst [vmem:[#allocation42_spill] sm:$0xff] %v6712_v38  ;;  %v6718_v46 = vsel %vm615_vm1, %v13336_v57, %v13335_v26  ;;  %v6724_v1 = vsel %vm615_vm1, %v13339_v7, %v13338_v6  ;;  %v13341_v25 = vld [vmem:[#allocation102_spill] sm:$0xff]  ;;  %v13342_v35 = vld [vmem:[#allocation76_spill] sm:$0xff]  ;;  %v13344_v58 = vld [vmem:[#allocation103_spill] sm:$0xff]  ;;  %v592_v6 = vpop.permute.xlu1 %591  ;;  %v6744_v7 = vpop.permute.xlu0 %588 }
 0x11b   : > { %13337 = vst [vmem:[#allocation43_spill] sm:$0xff] %v6718_v46  ;;  %13340 = vst [vmem:[#allocation44_spill] sm:$0xff] %v6724_v1  ;;  %v6730_v33 = vsel %vm615_vm1, %v13342_v35, %v13341_v25  ;;  %v13345_v2 = vld [vmem:[#allocation77_spill] sm:$0xff]  ;;  %v13347_v26 = vld [vmem:[#allocation107_spill] sm:$0xff]  ;;  %vm622_vm6 = vcmp.eq.s32.totalorder %v592_v6, 1  ;;  %vm621_vm7 = vcmp.eq.s32.totalorder %v6744_v7, 1 }
 0x11c   : > { %13343 = vst [vmem:[#allocation48_spill] sm:$0xff] %v6730_v33  ;;  %v6736_v38 = vsel %vm615_vm1, %v13345_v2, %v13344_v58  ;;  %v13348_v57 = vld [vmem:[#allocation78_spill] sm:$0xff]  ;;  %v13350_v25 = vld [vmem:[#allocation7_spill] sm:$0xff]  ;;  %v13351_v35 = vld [vmem:[#allocation112_spill] sm:$0xff] }
 0x11d   : > { %13346 = vst [vmem:[#allocation49_spill] sm:$0xff] %v6736_v38  ;;  %v6742_v46 = vsel %vm615_vm1, %v13348_v57, %v13347_v26  ;;  %1075 = vperm.xlu1 %4613, %v13350_v25   ;;  %v13352_v58 = vld [vmem:[#allocation97_spill] sm:$0xff]  ;;  %v13357_v26 = vld [vmem:[#allocation114_spill] sm:$0xff]  ;;  %v13358_v57 = vld [vmem:[#allocation84_spill] sm:$0xff] }
 0x11e   : > { %13349 = vst [vmem:[#allocation81_spill] sm:$0xff] %v6742_v46  ;;  %v6751_v2 = vsel %vm618_vm2, %v13352_v58, %v13351_v35  ;;  %v13354_v38 = vld [vmem:[#allocation113_spill] sm:$0xff]  ;;  %v6759_v46 = vsel %vm618_vm2, %v13358_v57, %v13357_v26  ;;  %v13360_v31 = vld [vmem:[#allocation115_spill] sm:$0xff]  ;;  %v13361_v1 = vld [vmem:[#allocation86_spill] sm:$0xff] }
 0x11f   : > { %13353 = vst [vmem:[#allocation82_spill] sm:$0xff] %v6751_v2  ;;  %v13355_v33 = vld [vmem:[#allocation85_spill] sm:$0xff]  ;;  %13359 = vst [vmem:[#allocation61_spill] sm:$0xff] %v6759_v46  ;;  %v6763_v15 = vsel %vm618_vm2, %v13361_v1, %v13360_v31  ;;  %v13362_v14 = vld [vmem:[#allocation8_spill] sm:$0xff] }
 0x120   : > { %v6755_v37 = vsel %vm618_vm2, %v13355_v33, %v13354_v38  ;;  %1072 = vperm.xlu0 %4612, %v13362_v14   ;;  %v13363_v17 = vld [vmem:[#allocation120_spill] sm:$0xff]  ;;  %v13364_v25 = vld [vmem:[#allocation87_spill] sm:$0xff]  ;;  %v13365_v35 = vld [vmem:[#allocation121_spill] sm:$0xff] }
 0x121   : > { %13356 = vst [vmem:[#allocation83_spill] sm:$0xff] %v6755_v37  ;;  %v6768_v21 = vsel %vm618_vm2, %v13364_v25, %v13363_v17  ;;  %v13366_v58 = vld [vmem:[#allocation90_spill] sm:$0xff]  ;;  %v13369_v38 = vld [vmem:[#allocation91_spill] sm:$0xff]  ;;  %v13372_v57 = vld [vmem:[#allocation92_spill] sm:$0xff] }
 0x122   : > { %v6772_v2 = vsel %vm618_vm2, %v13366_v58, %v13365_v35  ;;  %v13368_v33 = vld [vmem:[#allocation122_spill] sm:$0xff]  ;;  %v13371_v26 = vld [vmem:[#allocation123_spill] sm:$0xff]  ;;  %v13380_v58 = vld [vmem:[#allocation128_spill] sm:$0xff] }
 0x123   : > { %13367 = vst [vmem:[#allocation88_spill] sm:$0xff] %v6772_v2  ;;  %v6776_v37 = vsel %vm618_vm2, %v13369_v38, %v13368_v33  ;;  %v6780_v46 = vsel %vm618_vm2, %v13372_v57, %v13371_v26  ;;  %v13374_v1 = vld [vmem:[#allocation126_spill] sm:$0xff]  ;;  %v13377_v17 = vld [vmem:[#allocation127_spill] sm:$0xff]  ;;  %v13383_v38 = vld [vmem:[#allocation129_spill] sm:$0xff] }
 0x124   : > { %13370 = vst [vmem:[#allocation62_spill] sm:$0xff] %v6776_v37  ;;  %13373 = vst [vmem:[#allocation5_spill] sm:$0xff] %v6780_v46  ;;  %v13375_v31 = vld [vmem:[#allocation110_spill] sm:$0xff]  ;;  %v13378_v25 = vld [vmem:[#allocation99_spill] sm:$0xff] }
 0x125   : > { %v6786_v14 = vsel %vm617_vm3, %v13375_v31, %v13374_v1  ;;  %v6792_v35 = vsel %vm617_vm3, %v13378_v25, %v13377_v17  ;;  %v13381_v2 = vld [vmem:[#allocation98_spill] sm:$0xff]  ;;  %v13384_v26 = vld [vmem:[#allocation104_spill] sm:$0xff]  ;;  %v598_v1 = vpop.permute.xlu1 %597  ;;  %v6806_v31 = vpop.permute.xlu0 %594  ;;  %v13387_v46 = vld [vmem:[#allocation105_spill] sm:$0xff] }
 0x126   : > { %13376 = vst [vmem:[#allocation63_spill] sm:$0xff] %v6786_v14  ;;  %13379 = vst [vmem:[#allocation68_spill] sm:$0xff] %v6792_v35  ;;  %v6798_v33 = vsel %vm617_vm3, %v13381_v2, %v13380_v58  ;;  %v6804_v57 = vsel %vm617_vm3, %v13384_v26, %v13383_v38  ;;  %v13386_v14 = vld [vmem:[#allocation134_spill] sm:$0xff]  ;;  %v13389_v25 = vld [vmem:[#allocation135_spill] sm:$0xff]  ;;  %vm624_vm8 = vcmp.eq.s32.totalorder %v598_v1, 1  ;;  %vm623_vm9 = vcmp.eq.s32.totalorder %v6806_v31, 1 }
 0x127   : > { %13382 = vst [vmem:[#allocation89_spill] sm:$0xff] %v6798_v33  ;;  %13385 = vst [vmem:[#allocation69_spill] sm:$0xff] %v6804_v57  ;;  %v6812_v17 = vsel %vm617_vm3, %v13387_v46, %v13386_v14  ;;  %v13390_v35 = vld [vmem:[#allocation106_spill] sm:$0xff]  ;;  %v13391_v58 = vld [vmem:[#allocation136_spill] sm:$0xff] }
 0x128   : > { %13388 = vst [vmem:[#allocation93_spill] sm:$0xff] %v6812_v17  ;;  %v6818_v2 = vsel %vm617_vm3, %v13390_v35, %v13389_v25  ;;  %v13392_v33 = vld [vmem:[#allocation108_spill] sm:$0xff]  ;;  %v13393_v26 = vld [vmem:[#allocation137_spill] sm:$0xff]  ;;  %v6841_v35 = vsel %vm620_vm4, %v5601_v16, %v5740_v13  ;;  %v13403_v60 = vld [vmem:[#allocation146_spill] sm:$0xff] }
 0x129   : > { %v6824_v38 = vsel %vm617_vm3, %v13392_v33, %v13391_v58  ;;  %v13394_v57 = vld [vmem:[#allocation109_spill] sm:$0xff]  ;;  %v13397_v14 = vld [vmem:[#allocation144_spill] sm:$0xff]  ;;  %13399 = vst [vmem:[#allocation94_spill] sm:$0xff] %v6841_v35  ;;  %v13410_v13 = vld [vmem:[#allocation119_spill] sm:$0xff] }
 0x12a   : > { %v6830_v37 = vsel %vm617_vm3, %v13394_v57, %v13393_v26  ;;  %v13396_v46 = vld [vmem:[#allocation9_spill] sm:$0xff]  ;;  %v6836_v17 = vsel %vm620_vm4, %v5640_v43, %v13397_v14  ;;  %v13401_v25 = vld [vmem:[#allocation116_spill] sm:$0xff]  ;;  %v13407_v43 = vld [vmem:[#allocation118_spill] sm:$0xff] }
 0x12b   : > { %13395 = vst [vmem:[#allocation70_spill] sm:$0xff] %v6830_v37  ;;  %1081 = vperm.xlu1 %4613, %v13396_v46   ;;  %13398 = vst [vmem:[#allocation6_spill] sm:$0xff] %v6836_v17  ;;  %v13400_v33 = vld [vmem:[#allocation145_spill] sm:$0xff]  ;;  %v13405_v46 = vld [vmem:[#allocation10_spill] sm:$0xff] }
 0x12c   : > { %v6846_v58 = vsel %vm620_vm4, %v13401_v25, %v13400_v33  ;;  %v13404_v57 = vld [vmem:[#allocation117_spill] sm:$0xff]  ;;  %1078 = vperm.xlu0 %4612, %v13405_v46   ;;  %v13406_v37 = vld [vmem:[#allocation150_spill] sm:$0xff]  ;;  %v13409_v17 = vld [vmem:[#allocation151_spill] sm:$0xff] }
 0x12d   : > { %13402 = vst [vmem:[#allocation79_spill] sm:$0xff] %v6846_v58  ;;  %v6851_v26 = vsel %vm620_vm4, %v13404_v57, %v13403_v60  ;;  %v6857_v14 = vsel %vm620_vm4, %v13407_v43, %v13406_v37  ;;  %v6862_v16 = vsel %vm620_vm4, %v13410_v13, %v13409_v17  ;;  %v13412_v35 = vld [vmem:[#allocation152_spill] sm:$0xff]  ;;  %v13415_v58 = vld [vmem:[#allocation153_spill] sm:$0xff]  ;;  %v13422_v13 = vld [vmem:[#allocation158_spill] sm:$0xff] }
 0x12e   : > { %13408 = vst [vmem:[#allocation95_spill] sm:$0xff] %v6857_v14  ;;  %13411 = vst [vmem:[#allocation73_spill] sm:$0xff] %v6862_v16  ;;  %v13413_v33 = vld [vmem:[#allocation124_spill] sm:$0xff]  ;;  %v13416_v60 = vld [vmem:[#allocation125_spill] sm:$0xff] }
 0x12f   : > { %v6867_v25 = vsel %vm620_vm4, %v13413_v33, %v13412_v35  ;;  %v6872_v57 = vsel %vm620_vm4, %v13416_v60, %v13415_v58  ;;  %v13418_v46 = vld [vmem:[#allocation156_spill] sm:$0xff]  ;;  %v13420_v43 = vld [vmem:[#allocation157_spill] sm:$0xff]  ;;  %v13423_v35 = vld [vmem:[#allocation130_spill] sm:$0xff] }
 0x130   : > { %13414 = vst [vmem:[#allocation96_spill] sm:$0xff] %v6867_v25  ;;  %13417 = vst [vmem:[#allocation72_spill] sm:$0xff] %v6872_v57  ;;  %v6878_v37 = vsel %vm619_vm5, %v5713_v32, %v13418_v46  ;;  %v6884_v17 = vsel %vm619_vm5, %v5671_v41, %v13420_v43  ;;  %v6890_v33 = vsel %vm619_vm5, %v13423_v35, %v13422_v13  ;;  %v13425_v27 = vld [vmem:[#allocation159_spill] sm:$0xff]  ;;  %v6898_v32 = vpop.permute.xlu1 %603  ;;  %v6900_v46 = vpop.permute.xlu0 %600  ;;  %v13429_v57 = vld [vmem:[#allocation132_spill] sm:$0xff] }
 0x131   : > { %13419 = vst [vmem:[#allocation100_spill] sm:$0xff] %v6878_v37  ;;  %13421 = vst [vmem:[#allocation74_spill] sm:$0xff] %v6884_v17  ;;  %v13426_v58 = vld [vmem:[#allocation131_spill] sm:$0xff]  ;;  %v13431_v43 = vld [vmem:[#allocation164_spill] sm:$0xff]  ;;  %vm626_vm10 = vcmp.eq.s32.totalorder %v6898_v32, 1  ;;  %vm625_vm11 = vcmp.eq.s32.totalorder %v6900_v46, 1 }
 0x132   : > { %13424 = vst [vmem:[#allocation101_spill] sm:$0xff] %v6890_v33  ;;  %v6896_v60 = vsel %vm619_vm5, %v13426_v58, %v13425_v27  ;;  %v13428_v37 = vld [vmem:[#allocation163_spill] sm:$0xff]  ;;  %v13432_v17 = vld [vmem:[#allocation133_spill] sm:$0xff]  ;;  %v13435_v33 = vld [vmem:[#allocation138_spill] sm:$0xff] }
 0x133   : > { %13427 = vst [vmem:[#allocation75_spill] sm:$0xff] %v6896_v60  ;;  %v6906_v41 = vsel %vm619_vm5, %v13429_v57, %v13428_v37  ;;  %v6912_v13 = vsel %vm619_vm5, %v13432_v17, %v13431_v43  ;;  %v13434_v35 = vld [vmem:[#allocation165_spill] sm:$0xff]  ;;  %v13437_v58 = vld [vmem:[#allocation166_spill] sm:$0xff]  ;;  %v13438_v60 = vld [vmem:[#allocation139_spill] sm:$0xff] }
 0x134   : > { %13430 = vst [vmem:[#allocation102_spill] sm:$0xff] %v6906_v41  ;;  %13433 = vst [vmem:[#allocation76_spill] sm:$0xff] %v6912_v13  ;;  %v6918_v27 = vsel %vm619_vm5, %v13435_v33, %v13434_v35  ;;  %v6924_v25 = vsel %vm619_vm5, %v13438_v60, %v13437_v58  ;;  %v13440_v57 = vld [vmem:[#allocation11_spill] sm:$0xff]  ;;  %v13441_v37 = vld [vmem:[#allocation12_spill] sm:$0xff] }
 0x135   : > { %13436 = vst [vmem:[#allocation103_spill] sm:$0xff] %v6918_v27  ;;  %13439 = vst [vmem:[#allocation77_spill] sm:$0xff] %v6924_v25  ;;  %1087 = vperm.xlu1 %4613, %v13440_v57   ;;  %1084 = vperm.xlu0 %4612, %v13441_v37   ;;  %v13442_v17 = vld [vmem:[#allocation169_spill] sm:$0xff]  ;;  %v13444_v43 = vld [vmem:[#allocation170_spill] sm:$0xff] }
 0x136   : > { %v6932_v33 = vsel %vm622_vm6, %v5783_v49, %v13442_v17  ;;  %v13445_v35 = vld [vmem:[#allocation141_spill] sm:$0xff]  ;;  %v13447_v3 = vld [vmem:[#allocation171_spill] sm:$0xff]  ;;  %v13448_v60 = vld [vmem:[#allocation140_spill] sm:$0xff] }
 0x137   : > { %13443 = vst [vmem:[#allocation107_spill] sm:$0xff] %v6932_v33  ;;  %v6936_v27 = vsel %vm622_vm6, %v13445_v35, %v13444_v43  ;;  %v6940_v58 = vsel %vm622_vm6, %v13448_v60, %v13447_v3  ;;  %v13449_v6 = vld [vmem:[#allocation172_spill] sm:$0xff]  ;;  %v13450_v57 = vld [vmem:[#allocation142_spill] sm:$0xff]  ;;  %v13452_v41 = vld [vmem:[#allocation143_spill] sm:$0xff]  ;;  %v6962_v60 = vpop.permute.xlu1 %609 }
 0x138   : > { %13446 = vst [vmem:[#allocation78_spill] sm:$0xff] %v6936_v27  ;;  %v6944_v25 = vsel %vm622_vm6, %v13450_v57, %v13449_v6  ;;  %v13451_v13 = vld [vmem:[#allocation178_spill] sm:$0xff]  ;;  %v13453_v37 = vld [vmem:[#allocation179_spill] sm:$0xff]  ;;  %v13455_v17 = vld [vmem:[#allocation180_spill] sm:$0xff]  ;;  %v6964_v6 = vpop.permute.xlu0 %606  ;;  %vm628_vm12 = vcmp.eq.s32.totalorder %v6962_v60, 1 }
 0x139   : > { %v6948_v16 = vsel %vm622_vm6, %v13452_v41, %v13451_v13  ;;  %v13454_v14 = vld [vmem:[#allocation147_spill] sm:$0xff]  ;;  %v13456_v33 = vld [vmem:[#allocation148_spill] sm:$0xff]  ;;  %v13458_v35 = vld [vmem:[#allocation181_spill] sm:$0xff]  ;;  %vm627_vm13 = vcmp.eq.s32.totalorder %v6964_v6, 1 }
 0x13a   : > { %v6952_v49 = vsel %vm622_vm6, %v13454_v14, %v13453_v37  ;;  %v6956_v43 = vsel %vm622_vm6, %v13456_v33, %v13455_v17  ;;  %v13459_v27 = vld [vmem:[#allocation149_spill] sm:$0xff]  ;;  %v13461_v57 = vld [vmem:[#allocation184_spill] sm:$0xff]  ;;  %v13464_v13 = vld [vmem:[#allocation155_spill] sm:$0xff] }
 0x13b   : > { %13457 = vst [vmem:[#allocation7_spill] sm:$0xff] %v6956_v43  ;;  %v6960_v3 = vsel %vm622_vm6, %v13459_v27, %v13458_v35  ;;  %v6970_v41 = vsel %vm621_vm7, %v5859_v34, %v13461_v57  ;;  %v13463_v14 = vld [vmem:[#allocation185_spill] sm:$0xff]  ;;  %v13466_v37 = vld [vmem:[#allocation186_spill] sm:$0xff]  ;;  %v13469_v35 = vld [vmem:[#allocation187_spill] sm:$0xff] }
 0x13c   : > { %13460 = vst [vmem:[#allocation112_spill] sm:$0xff] %v6960_v3  ;;  %13462 = vst [vmem:[#allocation97_spill] sm:$0xff] %v6970_v41  ;;  %v6976_v33 = vsel %vm621_vm7, %v13464_v13, %v13463_v14  ;;  %v13467_v17 = vld [vmem:[#allocation154_spill] sm:$0xff]  ;;  %v13470_v3 = vld [vmem:[#allocation160_spill] sm:$0xff] }
 0x13d   : > { %13465 = vst [vmem:[#allocation113_spill] sm:$0xff] %v6976_v33  ;;  %v6982_v27 = vsel %vm621_vm7, %v13467_v17, %v13466_v37  ;;  %v6988_v43 = vsel %vm621_vm7, %v13470_v3, %v13469_v35  ;;  %v13472_v34 = vld [vmem:[#allocation13_spill] sm:$0xff]  ;;  %v13473_v57 = vld [vmem:[#allocation192_spill] sm:$0xff]  ;;  %v13477_v33 = vld [vmem:[#allocation162_spill] sm:$0xff] }
 0x13e   : > { %13468 = vst [vmem:[#allocation85_spill] sm:$0xff] %v6982_v27  ;;  %13471 = vst [vmem:[#allocation114_spill] sm:$0xff] %v6988_v43  ;;  %1093 = vperm.xlu1 %4613, %v13472_v34   ;;  %v13474_v41 = vld [vmem:[#allocation161_spill] sm:$0xff]  ;;  %v13479_v17 = vld [vmem:[#allocation194_spill] sm:$0xff] }
 0x13f   : > { %v6995_v14 = vsel %vm621_vm7, %v13474_v41, %v13473_v57  ;;  %v13476_v13 = vld [vmem:[#allocation193_spill] sm:$0xff]  ;;  %v13480_v27 = vld [vmem:[#allocation167_spill] sm:$0xff]  ;;  %v13483_v34 = vld [vmem:[#allocation168_spill] sm:$0xff] }
 0x140   : > { %13475 = vst [vmem:[#allocation84_spill] sm:$0xff] %v6995_v14  ;;  %v7001_v37 = vsel %vm621_vm7, %v13477_v33, %v13476_v13  ;;  %v7007_v3 = vsel %vm621_vm7, %v13480_v27, %v13479_v17  ;;  %v13482_v35 = vld [vmem:[#allocation195_spill] sm:$0xff]  ;;  %v13485_v41 = vld [vmem:[#allocation14_spill] sm:$0xff]  ;;  %v13486_v57 = vld [vmem:[#allocation200_spill] sm:$0xff] }
 0x141   : > { %13478 = vst [vmem:[#allocation115_spill] sm:$0xff] %v7001_v37  ;;  %13481 = vst [vmem:[#allocation86_spill] sm:$0xff] %v7007_v3  ;;  %v7013_v43 = vsel %vm621_vm7, %v13483_v34, %v13482_v35  ;;  %1090 = vperm.xlu0 %4612, %v13485_v41   ;;  %v7019_v14 = vsel %vm624_vm8, %v5925_v48, %v13486_v57  ;;  %v13488_v33 = vld [vmem:[#allocation201_spill] sm:$0xff]  ;;  %v13489_v13 = vld [vmem:[#allocation174_spill] sm:$0xff] }
 0x142   : > { %13484 = vst [vmem:[#allocation8_spill] sm:$0xff] %v7013_v43  ;;  %13487 = vst [vmem:[#allocation120_spill] sm:$0xff] %v7019_v14  ;;  %v7024_v37 = vsel %vm624_vm8, %v13489_v13, %v13488_v33  ;;  %v13491_v27 = vld [vmem:[#allocation202_spill] sm:$0xff]  ;;  %v13492_v17 = vld [vmem:[#allocation173_spill] sm:$0xff] }
 0x143   : > { %13490 = vst [vmem:[#allocation87_spill] sm:$0xff] %v7024_v37  ;;  %v7029_v3 = vsel %vm624_vm8, %v13492_v17, %v13491_v27  ;;  %v13494_v7 = vld [vmem:[#allocation203_spill] sm:$0xff]  ;;  %v13498_v43 = vld [vmem:[#allocation176_spill] sm:$0xff]  ;;  %v13500_v14 = vld [vmem:[#allocation177_spill] sm:$0xff] }
 0x144   : > { %13493 = vst [vmem:[#allocation121_spill] sm:$0xff] %v7029_v3  ;;  %v13495_v35 = vld [vmem:[#allocation175_spill] sm:$0xff]  ;;  %v13499_v57 = vld [vmem:[#allocation208_spill] sm:$0xff]  ;;  %v13501_v13 = vld [vmem:[#allocation209_spill] sm:$0xff] }
 0x145   : > { %v7034_v34 = vsel %vm624_vm8, %v13495_v35, %v13494_v7  ;;  %v13497_v41 = vld [vmem:[#allocation207_spill] sm:$0xff]  ;;  %v7044_v33 = vsel %vm624_vm8, %v13500_v14, %v13499_v57  ;;  %v13502_v37 = vld [vmem:[#allocation182_spill] sm:$0xff]  ;;  %v7056_v35 = vpop.permute.xlu1 %688  ;;  %v13507_v1 = vld [vmem:[#allocation188_spill] sm:$0xff] }
 0x146   : > { %13496 = vst [vmem:[#allocation90_spill] sm:$0xff] %v7034_v34  ;;  %v7039_v48 = vsel %vm624_vm8, %v13498_v43, %v13497_v41  ;;  %v7049_v27 = vsel %vm624_vm8, %v13502_v37, %v13501_v13  ;;  %v13503_v17 = vld [vmem:[#allocation210_spill] sm:$0xff]  ;;  %v13504_v3 = vld [vmem:[#allocation183_spill] sm:$0xff]  ;;  %v7058_v34 = vpop.permute.xlu0 %685  ;;  %v13505_v43 = vld [vmem:[#allocation213_spill] sm:$0xff]  ;;  %v7070_v37 = vsel %vm623_vm9, %v5955_v50, %v6095_v8  ;;  %vm739_vm14 = vcmp.eq.s32.totalorder %v7056_v35, 1 }
 0x147   : > { %v7054_v7 = vsel %vm624_vm8, %v13504_v3, %v13503_v17  ;;  %v7064_v14 = vsel %vm623_vm9, %v5999_v24, %v13505_v43  ;;  %13506 = vst [vmem:[#allocation122_spill] sm:$0xff] %v7070_v37  ;;  %v7076_v3 = vsel %vm623_vm9, %v13507_v1, %v6101_v51  ;;  %v13509_v41 = vld [vmem:[#allocation214_spill] sm:$0xff]  ;;  %v13510_v57 = vld [vmem:[#allocation189_spill] sm:$0xff]  ;;  %v13512_v24 = vld [vmem:[#allocation15_spill] sm:$0xff]  ;;  %vm738_vm15 = vcmp.eq.s32.totalorder %v7058_v34, 1 }
 0x148   : > { %13508 = vst [vmem:[#allocation91_spill] sm:$0xff] %v7076_v3  ;;  %v7082_v13 = vsel %vm623_vm9, %v13510_v57, %v13509_v41  ;;  %1099 = vperm.xlu1 %4613, %v13512_v24   ;;  %v13513_v17 = vld [vmem:[#allocation218_spill] sm:$0xff]  ;;  %v13516_v50 = vld [vmem:[#allocation219_spill] sm:$0xff]  ;;  %v13519_v1 = vld [vmem:[#allocation220_spill] sm:$0xff] }
 0x149   : > { %13511 = vst [vmem:[#allocation123_spill] sm:$0xff] %v7082_v13  ;;  %v13514_v43 = vld [vmem:[#allocation190_spill] sm:$0xff]  ;;  %v13517_v37 = vld [vmem:[#allocation191_spill] sm:$0xff]  ;;  %v13520_v3 = vld [vmem:[#allocation196_spill] sm:$0xff] }
 0x14a   : > { %v7089_v8 = vsel %vm623_vm9, %v13514_v43, %v13513_v17  ;;  %v7095_v51 = vsel %vm623_vm9, %v13517_v37, %v13516_v50  ;;  %v7101_v41 = vsel %vm623_vm9, %v13520_v3, %v13519_v1  ;;  %v13522_v57 = vld [vmem:[#allocation221_spill] sm:$0xff]  ;;  %v13525_v17 = vld [vmem:[#allocation16_spill] sm:$0xff]  ;;  %v13528_v43 = vld [vmem:[#allocation226_spill] sm:$0xff] }
 0x14b   : > { %13515 = vst [vmem:[#allocation92_spill] sm:$0xff] %v7089_v8  ;;  %13518 = vst [vmem:[#allocation126_spill] sm:$0xff] %v7095_v51  ;;  %v13523_v24 = vld [vmem:[#allocation197_spill] sm:$0xff]  ;;  %1096 = vperm.xlu0 %4612, %v13525_v17   ;;  %v7120_v50 = vsel %vm626_vm10, %v6008_v45, %v13528_v43  ;;  %v13530_v31 = vld [vmem:[#allocation227_spill] sm:$0xff] }
 0x14c   : > { %13521 = vst [vmem:[#allocation110_spill] sm:$0xff] %v7101_v41  ;;  %v7107_v13 = vsel %vm623_vm9, %v13523_v24, %v13522_v57  ;;  %v13526_v37 = vld [vmem:[#allocation225_spill] sm:$0xff]  ;;  %13529 = vst [vmem:[#allocation128_spill] sm:$0xff] %v7120_v50  ;;  %v13531_v1 = vld [vmem:[#allocation198_spill] sm:$0xff]  ;;  %v7132_v41 = vpop.permute.xlu0 %691 }
 0x14d   : > { %13524 = vst [vmem:[#allocation127_spill] sm:$0xff] %v7107_v13  ;;  %v7116_v3 = vsel %vm626_vm10, %v6076_v39, %v13526_v37  ;;  %v7124_v57 = vsel %vm626_vm10, %v13531_v1, %v13530_v31  ;;  %v13533_v24 = vld [vmem:[#allocation228_spill] sm:$0xff]  ;;  %v13534_v32 = vld [vmem:[#allocation199_spill] sm:$0xff]  ;;  %v7130_v13 = vpop.permute.xlu1 %694  ;;  %v13536_v51 = vld [vmem:[#allocation230_spill] sm:$0xff]  ;;  %vm740_vm1 = vcmp.eq.s32.totalorder %v7132_v41, 1 }
 0x14e   : > { %13527 = vst [vmem:[#allocation99_spill] sm:$0xff] %v7116_v3  ;;  %13532 = vst [vmem:[#allocation98_spill] sm:$0xff] %v7124_v57  ;;  %v7128_v17 = vsel %vm626_vm10, %v13534_v32, %v13533_v24  ;;  %v13537_v8 = vld [vmem:[#allocation204_spill] sm:$0xff]  ;;  %v13538_v37 = vld [vmem:[#allocation231_spill] sm:$0xff]  ;;  %vm741_vm0 = vcmp.eq.s32.totalorder %v7130_v13, 1 }
 0x14f   : > { %13535 = vst [vmem:[#allocation129_spill] sm:$0xff] %v7128_v17  ;;  %v7136_v39 = vsel %vm626_vm10, %v13537_v8, %v13536_v51  ;;  %v13539_v3 = vld [vmem:[#allocation205_spill] sm:$0xff]  ;;  %v13540_v43 = vld [vmem:[#allocation232_spill] sm:$0xff]  ;;  %v13541_v50 = vld [vmem:[#allocation206_spill] sm:$0xff] }
 0x150   : > { %v7140_v45 = vsel %vm626_vm10, %v13539_v3, %v13538_v37  ;;  %v7144_v31 = vsel %vm626_vm10, %v13541_v50, %v13540_v43  ;;  %v13542_v1 = vld [vmem:[#allocation233_spill] sm:$0xff]  ;;  %v13543_v57 = vld [vmem:[#allocation211_spill] sm:$0xff]  ;;  %v13549_v50 = vld [vmem:[#allocation238_spill] sm:$0xff] }
 0x151   : > { %v7148_v24 = vsel %vm626_vm10, %v13543_v57, %v13542_v1  ;;  %v13544_v32 = vld [vmem:[#allocation17_spill] sm:$0xff]  ;;  %v13547_v51 = vld [vmem:[#allocation215_spill] sm:$0xff]  ;;  %v13550_v37 = vld [vmem:[#allocation212_spill] sm:$0xff] }
 0x152   : > { %1105 = vperm.xlu1 %4613, %v13544_v32   ;;  %v13545_v17 = vld [vmem:[#allocation237_spill] sm:$0xff]  ;;  %v7161_v3 = vsel %vm625_vm11, %v13547_v51, %v6225_v42  ;;  %v7167_v57 = vsel %vm625_vm11, %v13550_v37, %v13549_v50  ;;  %v13552_v43 = vld [vmem:[#allocation239_spill] sm:$0xff]  ;;  %v13553_v1 = vld [vmem:[#allocation216_spill] sm:$0xff] }
 0x153   : > { %v7155_v8 = vsel %vm625_vm11, %v6174_v55, %v13545_v17  ;;  %13548 = vst [vmem:[#allocation134_spill] sm:$0xff] %v7161_v3  ;;  %13551 = vst [vmem:[#allocation105_spill] sm:$0xff] %v7167_v57  ;;  %v7173_v32 = vsel %vm625_vm11, %v13553_v1, %v13552_v43  ;;  %v13555_v55 = vld [vmem:[#allocation18_spill] sm:$0xff]  ;;  %v13558_v51 = vld [vmem:[#allocation243_spill] sm:$0xff] }
 0x154   : > { %13546 = vst [vmem:[#allocation104_spill] sm:$0xff] %v7155_v8  ;;  %13554 = vst [vmem:[#allocation135_spill] sm:$0xff] %v7173_v32  ;;  %1102 = vperm.xlu0 %4612, %v13555_v55   ;;  %v13556_v17 = vld [vmem:[#allocation242_spill] sm:$0xff]  ;;  %v13557_v8 = vld [vmem:[#allocation217_spill] sm:$0xff] }
 0x155   : > { %v7180_v42 = vsel %vm625_vm11, %v13557_v8, %v13556_v17  ;;  %v13559_v3 = vld [vmem:[#allocation222_spill] sm:$0xff]  ;;  %v13560_v37 = vld [vmem:[#allocation244_spill] sm:$0xff]  ;;  %v13561_v57 = vld [vmem:[#allocation223_spill] sm:$0xff] }
 0x156   : > { %v7186_v50 = vsel %vm625_vm11, %v13559_v3, %v13558_v51  ;;  %v7192_v43 = vsel %vm625_vm11, %v13561_v57, %v13560_v37  ;;  %v13562_v1 = vld [vmem:[#allocation245_spill] sm:$0xff]  ;;  %v13563_v55 = vld [vmem:[#allocation224_spill] sm:$0xff]  ;;  %v13564_v8 = vld [vmem:[#allocation250_spill] sm:$0xff] }
 0x157   : > { %v7198_v32 = vsel %vm625_vm11, %v13563_v55, %v13562_v1  ;;  %v7204_v17 = vsel %vm628_vm12, %v6246_v47, %v13564_v8  ;;  %v13565_v3 = vld [vmem:[#allocation251_spill] sm:$0xff]  ;;  %v13566_v57 = vld [vmem:[#allocation229_spill] sm:$0xff]  ;;  %v13568_v37 = vld [vmem:[#allocation252_spill] sm:$0xff]  ;;  %v7224_v55 = vpop.permute.xlu1 %700  ;;  %v7226_v8 = vpop.permute.xlu0 %697 }
 0x158   : > { %v7210_v51 = vsel %vm628_vm12, %v6180_v36, %v13565_v3  ;;  %v7216_v46 = vsel %vm628_vm12, %v13566_v57, %v6309_v28  ;;  %v13569_v1 = vld [vmem:[#allocation234_spill] sm:$0xff]  ;;  %v13571_v36 = vld [vmem:[#allocation235_spill] sm:$0xff]  ;;  %v13572_v28 = vld [vmem:[#allocation236_spill] sm:$0xff]  ;;  %vm743_vm2 = vcmp.eq.s32.totalorder %v7224_v55, 1  ;;  %vm742_vm3 = vcmp.eq.s32.totalorder %v7226_v8, 1 }
 0x159   : > { %13567 = vst [vmem:[#allocation106_spill] sm:$0xff] %v7216_v46  ;;  %v7222_v47 = vsel %vm628_vm12, %v13569_v1, %v13568_v37  ;;  %v7232_v3 = vsel %vm628_vm12, %v13571_v36, %v6334_v54  ;;  %v7238_v57 = vsel %vm628_vm12, %v13572_v28, %v6340_v44  ;;  %v13573_v37 = vld [vmem:[#allocation240_spill] sm:$0xff]  ;;  %v7253_v54 = vld [vmem:[%s5080_s28 + $0x2d8] sm:$0xff]  ;;  %v7256_v36 = vld [vmem:[%s5080_s28 + $0x368] sm:$0xff] }
 0x15a   : > { %13570 = vst [vmem:[#allocation136_spill] sm:$0xff] %v7222_v47  ;;  %v7244_v1 = vsel %vm628_vm12, %v13573_v37, %v6346_v63  ;;  %v13575_v47 = vld [vmem:[#allocation241_spill] sm:$0xff]  ;;  %13577 = vst [vmem:[#allocation109_spill] sm:$0xff] %v7253_v54  ;;  %v13579_v44 = vld [vmem:[#allocation19_spill] sm:$0xff] }
 0x15b   : > { %13574 = vst [vmem:[#allocation108_spill] sm:$0xff] %v7244_v1  ;;  %v7250_v46 = vsel %vm628_vm12, %v13575_v47, %v6352_v52  ;;  %13578 = vst [vmem:[#allocation9_spill] sm:$0xff] %v7256_v36  ;;  %1111 = vperm.xlu1 %4613, %v13579_v44   ;;  %v13580_v28 = vld [vmem:[#allocation255_spill] sm:$0xff]  ;;  %v7269_v52 = vsel %vm627_vm13, %v6277_v19, %v6365_v23  ;;  %v13583_v60 = vld [vmem:[#allocation246_spill] sm:$0xff]  ;;  %v7333_v6 = vpop.permute.xlu1 %706 }
 0x15c   : > { %13576 = vst [vmem:[#allocation137_spill] sm:$0xff] %v7250_v46  ;;  %v7263_v63 = vsel %vm627_vm13, %v6324_v22, %v13580_v28  ;;  %13582 = vst [vmem:[#allocation145_spill] sm:$0xff] %v7269_v52  ;;  %v7275_v47 = vsel %vm627_vm13, %v13583_v60, %v6371_v29  ;;  %v13585_v37 = vld [vmem:[#allocation256_spill] sm:$0xff]  ;;  %v13586_v44 = vld [vmem:[#allocation247_spill] sm:$0xff]  ;;  %vm745_vm4 = vcmp.eq.s32.totalorder %v7333_v6, 1 }
 0x15d   : > { %13581 = vst [vmem:[#allocation144_spill] sm:$0xff] %v7263_v63  ;;  %13584 = vst [vmem:[#allocation116_spill] sm:$0xff] %v7275_v47  ;;  %v7281_v46 = vsel %vm627_vm13, %v13586_v44, %v13585_v37  ;;  %v7284_v22 = vld [vmem:[%s5080_s28 + $0x3f8] sm:$0xff]  ;;  %v7287_v28 = vld [vmem:[%s5080_s28 + $0x8] sm:$0xff] }
 0x15e   : > { %13587 = vst [vmem:[#allocation146_spill] sm:$0xff] %v7281_v46  ;;  %13588 = vst [vmem:[#allocation117_spill] sm:$0xff] %v7284_v22  ;;  %v7290_v63 = vld [vmem:[%s5080_s28 + $0x98] sm:$0xff]  ;;  %v13591_v23 = vld [vmem:[#allocation20_spill] sm:$0xff] }
 0x15f   : > { %13589 = vst [vmem:[#allocation10_spill] sm:$0xff] %v7287_v28  ;;  %13590 = vst [vmem:[#allocation150_spill] sm:$0xff] %v7290_v63  ;;  %1108 = vperm.xlu0 %4612, %v13591_v23   ;;  %v13592_v19 = vld [vmem:[#allocation258_spill] sm:$0xff]  ;;  %v13593_v52 = vld [vmem:[#allocation248_spill] sm:$0xff] }
 0x160   : > { %v7297_v29 = vsel %vm627_vm13, %v13593_v52, %v13592_v19  ;;  %v13594_v60 = vld [vmem:[#allocation249_spill] sm:$0xff]  ;;  %v13597_v47 = vld [vmem:[#allocation259_spill] sm:$0xff]  ;;  %v13598_v23 = vld [vmem:[#allocation254_spill] sm:$0xff] }
 0x161   : > { %v7303_v37 = vsel %vm627_vm13, %v13594_v60, %v6393_v61  ;;  %v13595_v44 = vld [vmem:[#allocation253_spill] sm:$0xff]  ;;  %v7315_v1 = vsel %vm627_vm13, %v13598_v23, %v13597_v47  ;;  %v7318_v52 = vld [vmem:[%s5080_s28 + $0x128] sm:$0xff]  ;;  %v7335_v47 = vpop.permute.xlu0 %703  ;;  %v7347_v23 = vsel %vm739_vm14, %v7256_v36, %v6426_v53  ;;  %v13631_v36 = vld [vmem:[#allocation260_spill] sm:$0xff] }
 0x162   : > { %v7309_v46 = vsel %vm627_vm13, %v13595_v44, %v6399_v62  ;;  %13599 = vst [vmem:[#allocation151_spill] sm:$0xff] %v7315_v1  ;;  %13600 = vst [vmem:[#allocation119_spill] sm:$0xff] %v7318_v52  ;;  %v7321_v19 = vld [vmem:[%s5080_s28 + $0x1b8] sm:$0xff]  ;;  %v7324_v61 = vld [vmem:[%s5080_s28 + $0x248] sm:$0xff]  ;;  %v7353_v1 = vsel %vm739_vm14, %v7284_v22, %v6432_v40  ;;  %v7372_v40 = vsel %vm739_vm14, %v7290_v63, %v6455_v10  ;;  %vm744_vm5 = vcmp.eq.s32.totalorder %v7335_v47, 1 }
 0x163   : > { %13596 = vst [vmem:[#allocation118_spill] sm:$0xff] %v7309_v46  ;;  %13601 = vst [vmem:[#allocation152_spill] sm:$0xff] %v7321_v19  ;;  %v7329_v62 = vld [vmem:[%s5080_s28 + $0x360] sm:$0xff]  ;;  %v13604_v60 = vld [vmem:[#allocation263_spill] sm:$0xff]  ;;  %v7359_v46 = vsel %vm739_vm14, %v7287_v28, %v6438_v59  ;;  %v7378_v59 = vsel %vm739_vm14, %v7318_v52, %v6461_v9 }
 0x164   : > { %13602 = vst [vmem:[#allocation124_spill] sm:$0xff] %v7324_v61  ;;  %13603 = vst [vmem:[#allocation153_spill] sm:$0xff] %v7329_v62  ;;  %v7341_v44 = vsel %vm739_vm14, %v7253_v54, %v13604_v60  ;;  %v7362_v60 = vld [vmem:[%s5080_s28 + $0x2e8] sm:$0xff]  ;;  %v7365_v54 = vld [vmem:[%s5080_s28 + $0x378] sm:$0xff] }
 0x165   : > { %13605 = vst [vmem:[#allocation125_spill] sm:$0xff] %v7341_v44  ;;  %13606 = vst [vmem:[#allocation156_spill] sm:$0xff] %v7347_v23  ;;  %v13611_v53 = vld [vmem:[#allocation21_spill] sm:$0xff]  ;;  %v13614_v28 = vld [vmem:[#allocation267_spill] sm:$0xff] }
 0x166   : > { %13607 = vst [vmem:[#allocation157_spill] sm:$0xff] %v7353_v1  ;;  %13608 = vst [vmem:[#allocation158_spill] sm:$0xff] %v7359_v46  ;;  %1117 = vperm.xlu1 %4613, %v13611_v53   ;;  %v7384_v22 = vsel %vm739_vm14, %v7321_v19, %v13614_v28  ;;  %v13616_v46 = vld [vmem:[#allocation268_spill] sm:$0xff]  ;;  %v7393_v10 = vld [vmem:[%s5080_s28 + $0x408] sm:$0xff] }
 0x167   : > { %13609 = vst [vmem:[#allocation130_spill] sm:$0xff] %v7362_v60  ;;  %13610 = vst [vmem:[#allocation159_spill] sm:$0xff] %v7365_v54  ;;  %v7390_v53 = vsel %vm739_vm14, %v7324_v61, %v13616_v46  ;;  %v7396_v63 = vld [vmem:[%s5080_s28 + $0x18] sm:$0xff]  ;;  %v13621_v9 = vld [vmem:[#allocation22_spill] sm:$0xff] }
 0x168   : > { %13612 = vst [vmem:[#allocation131_spill] sm:$0xff] %v7372_v40  ;;  %13613 = vst [vmem:[#allocation163_spill] sm:$0xff] %v7378_v59  ;;  %v7399_v40 = vld [vmem:[%s5080_s28 + $0xa8] sm:$0xff]  ;;  %1114 = vperm.xlu0 %4612, %v13621_v9   ;;  %v13622_v52 = vld [vmem:[#allocation269_spill] sm:$0xff] }
 0x169   : > { %13615 = vst [vmem:[#allocation132_spill] sm:$0xff] %v7384_v22  ;;  %13617 = vst [vmem:[#allocation164_spill] sm:$0xff] %v7390_v53  ;;  %v13623_v59 = vld [vmem:[#allocation266_spill] sm:$0xff]  ;;  %v13627_v46 = vld [vmem:[#allocation52_spill] sm:$0xff] }
 0x16a   : > { %13618 = vst [vmem:[#allocation133_spill] sm:$0xff] %v7393_v10  ;;  %13619 = vst [vmem:[#allocation165_spill] sm:$0xff] %v7396_v63  ;;  %v7406_v28 = vsel %vm738_vm15, %v13623_v59, %v13622_v52  ;;  %v13625_v19 = vld [vmem:[#allocation50_spill] sm:$0xff]  ;;  %v13628_v53 = vld [vmem:[#allocation257_spill] sm:$0xff] }
 0x16b   : > { %13620 = vst [vmem:[#allocation138_spill] sm:$0xff] %v7399_v40  ;;  %13624 = vst [vmem:[#allocation166_spill] sm:$0xff] %v7406_v28  ;;  %v7412_v35 = vsel %vm738_vm15, %v7329_v62, %v13625_v19  ;;  %v7418_v22 = vsel %vm738_vm15, %v13628_v53, %v13627_v46  ;;  %v13630_v9 = vld [vmem:[#allocation53_spill] sm:$0xff]  ;;  %v7430_v19 = vld [vmem:[%s5080_s28 + $0x1c8] sm:$0xff] }
 0x16c   : > { %13626 = vst [vmem:[#allocation139_spill] sm:$0xff] %v7412_v35  ;;  %13629 = vst [vmem:[#allocation11_spill] sm:$0xff] %v7418_v22  ;;  %v7424_v52 = vsel %vm738_vm15, %v13631_v36, %v13630_v9  ;;  %v7427_v59 = vld [vmem:[%s5080_s28 + $0x138] sm:$0xff]  ;;  %v13636_v35 = vld [vmem:[#allocation2_spill] sm:$0xff] }
 0x16d   : > { %13632 = vst [vmem:[#allocation12_spill] sm:$0xff] %v7424_v52  ;;  %13633 = vst [vmem:[#allocation169_spill] sm:$0xff] %v7427_v59  ;;  %v7433_v62 = vld [vmem:[%s5080_s28 + $0x258] sm:$0xff]  ;;  %v13639_v46 = vld [vmem:[#allocation54_spill] sm:$0xff] }
 0x16e   : > { %13634 = vst [vmem:[#allocation170_spill] sm:$0xff] %v7430_v19  ;;  %13635 = vst [vmem:[#allocation141_spill] sm:$0xff] %v7433_v62  ;;  %v13637_v28 = vld [vmem:[#allocation261_spill] sm:$0xff]  ;;  %v13640_v22 = vld [vmem:[#allocation262_spill] sm:$0xff] }
 0x16f   : > { %v7439_v53 = vsel %vm738_vm15, %v13637_v28, %v13636_v35  ;;  %v7445_v36 = vsel %vm738_vm15, %v13640_v22, %v13639_v46  ;;  %v13642_v9 = vld [vmem:[#allocation55_spill] sm:$0xff]  ;;  %v13643_v52 = vld [vmem:[#allocation264_spill] sm:$0xff]  ;;  %v13646_v61 = vld [vmem:[#allocation265_spill] sm:$0xff]  ;;  %v7459_v28 = vpop.permute.xlu1 %712  ;;  %v7461_v35 = vpop.permute.xlu0 %709 }
 0x170   : > { %13638 = vst [vmem:[#allocation171_spill] sm:$0xff] %v7439_v53  ;;  %13641 = vst [vmem:[#allocation140_spill] sm:$0xff] %v7445_v36  ;;  %v7451_v1 = vsel %vm738_vm15, %v13643_v52, %v13642_v9  ;;  %v13645_v23 = vld [vmem:[#allocation56_spill] sm:$0xff]  ;;  %v13648_v22 = vld [vmem:[#allocation58_spill] sm:$0xff]  ;;  %vm747_vm6 = vcmp.eq.s32.totalorder %v7459_v28, 1  ;;  %vm746_vm7 = vcmp.eq.s32.totalorder %v7461_v35, 1 }
 0x171   : > { %13644 = vst [vmem:[#allocation172_spill] sm:$0xff] %v7451_v1  ;;  %v7457_v44 = vsel %vm738_vm15, %v13646_v61, %v13645_v23  ;;  %v7467_v46 = vsel %vm741_vm0, %v7362_v60, %v13648_v22  ;;  %v13650_v52 = vld [vmem:[#allocation51_spill] sm:$0xff]  ;;  %v13654_v9 = vld [vmem:[#allocation36_spill] sm:$0xff]  ;;  %v7488_v22 = vld [vmem:[%s5080_s28 + $0x2f8] sm:$0xff] }
 0x172   : > { %13647 = vst [vmem:[#allocation142_spill] sm:$0xff] %v7457_v44  ;;  %13649 = vst [vmem:[#allocation178_spill] sm:$0xff] %v7467_v46  ;;  %v7473_v34 = vsel %vm741_vm0, %v7365_v54, %v13650_v52  ;;  %v13652_v61 = vld [vmem:[#allocation59_spill] sm:$0xff]  ;;  %v7485_v44 = vsel %vm741_vm0, %v7396_v63, %v13654_v9  ;;  %v7494_v46 = vld [vmem:[%s5080_s28 + $0x418] sm:$0xff]  ;;  %v7510_v9 = vsel %vm741_vm0, %v7427_v59, %v6589_v4 }
 0x173   : > { %13651 = vst [vmem:[#allocation143_spill] sm:$0xff] %v7473_v34  ;;  %v7479_v23 = vsel %vm741_vm0, %v7393_v10, %v13652_v61  ;;  %13655 = vst [vmem:[#allocation147_spill] sm:$0xff] %v7485_v44  ;;  %v7491_v60 = vld [vmem:[%s5080_s28 + $0x388] sm:$0xff]  ;;  %v7504_v61 = vsel %vm741_vm0, %v7399_v40, %v6583_v12  ;;  %v7516_v63 = vsel %vm741_vm0, %v7430_v19, %v6595_v5  ;;  %v7525_v12 = vld [vmem:[%s5080_s28 + $0xb8] sm:$0xff] }
 0x174   : > { %13653 = vst [vmem:[#allocation179_spill] sm:$0xff] %v7479_v23  ;;  %13656 = vst [vmem:[#allocation180_spill] sm:$0xff] %v7488_v22  ;;  %v7497_v52 = vld [vmem:[%s5080_s28 + $0x28] sm:$0xff]  ;;  %v13668_v59 = vld [vmem:[#allocation24_spill] sm:$0xff]  ;;  %v7547_v5 = vsel %vm740_vm1, %v6526_v30, %v6614_v56 }
 0x175   : > { %13657 = vst [vmem:[#allocation148_spill] sm:$0xff] %v7491_v60  ;;  %13658 = vst [vmem:[#allocation181_spill] sm:$0xff] %v7494_v46  ;;  %v13660_v54 = vld [vmem:[#allocation23_spill] sm:$0xff]  ;;  %1193 = vperm.xlu0 %4612, %v13668_v59   ;;  %v13671_v13 = vld [vmem:[#allocation57_spill] sm:$0xff] }
 0x176   : > { %13659 = vst [vmem:[#allocation149_spill] sm:$0xff] %v7497_v52  ;;  %1196 = vperm.xlu1 %4613, %v13660_v54   ;;  %13661 = vst [vmem:[#allocation184_spill] sm:$0xff] %v7504_v61  ;;  %v7522_v54 = vsel %vm741_vm0, %v7433_v62, %v6601_v11  ;;  %v7528_v40 = vld [vmem:[%s5080_s28 + $0x148] sm:$0xff]  ;;  %v7531_v61 = vld [vmem:[%s5080_s28 + $0x1d8] sm:$0xff]  ;;  %v7541_v11 = vsel %vm740_vm1, %v6576_v0, %v6608_v20  ;;  %v7553_v19 = vsel %vm740_vm1, %v13671_v13, %v6620_v18 }
 0x177   : > { %13662 = vst [vmem:[#allocation185_spill] sm:$0xff] %v7510_v9  ;;  %13663 = vst [vmem:[#allocation155_spill] sm:$0xff] %v7516_v63  ;;  %v7534_v4 = vld [vmem:[%s5080_s28 + $0x268] sm:$0xff]  ;;  %v13673_v59 = vld [vmem:[#allocation64_spill] sm:$0xff] }
 0x178   : > { %13664 = vst [vmem:[#allocation186_spill] sm:$0xff] %v7522_v54  ;;  %13665 = vst [vmem:[#allocation154_spill] sm:$0xff] %v7525_v12  ;;  %v13674_v54 = vld [vmem:[#allocation270_spill] sm:$0xff]  ;;  %v7562_v0 = vld [vmem:[%s5080_s28 + $0x2f0] sm:$0xff] }
 0x179   : > { %13666 = vst [vmem:[#allocation187_spill] sm:$0xff] %v7528_v40  ;;  %13667 = vst [vmem:[#allocation160_spill] sm:$0xff] %v7531_v61  ;;  %v7559_v63 = vsel %vm740_vm1, %v13674_v54, %v13673_v59  ;;  %v7565_v20 = vld [vmem:[%s5080_s28 + $0x380] sm:$0xff]  ;;  %v13680_v56 = vld [vmem:[#allocation37_spill] sm:$0xff] }
 0x17a   : > { %13669 = vst [vmem:[#allocation13_spill] sm:$0xff] %v7541_v11  ;;  %13670 = vst [vmem:[#allocation192_spill] sm:$0xff] %v7547_v5  ;;  %v7568_v11 = vld [vmem:[%s5080_s28 + $0x410] sm:$0xff]  ;;  %v7571_v30 = vld [vmem:[%s5080_s28 + $0x20] sm:$0xff] }
 0x17b   : > { %13672 = vst [vmem:[#allocation161_spill] sm:$0xff] %v7553_v19  ;;  %13675 = vst [vmem:[#allocation193_spill] sm:$0xff] %v7559_v63  ;;  %v13681_v5 = vld [vmem:[#allocation271_spill] sm:$0xff]  ;;  %v13684_v54 = vld [vmem:[#allocation272_spill] sm:$0xff] }
 0x17c   : > { %13676 = vst [vmem:[#allocation162_spill] sm:$0xff] %v7562_v0  ;;  %13677 = vst [vmem:[#allocation194_spill] sm:$0xff] %v7565_v20  ;;  %v7577_v18 = vsel %vm740_vm1, %v13681_v5, %v13680_v56  ;;  %v13683_v13 = vld [vmem:[#allocation3_spill] sm:$0xff]  ;;  %v13686_v63 = vld [vmem:[#allocation65_spill] sm:$0xff] }
 0x17d   : > { %13678 = vst [vmem:[#allocation167_spill] sm:$0xff] %v7568_v11  ;;  %13679 = vst [vmem:[#allocation195_spill] sm:$0xff] %v7571_v30  ;;  %v7583_v59 = vsel %vm740_vm1, %v13684_v54, %v13683_v13  ;;  %v13687_v19 = vld [vmem:[#allocation60_spill] sm:$0xff]  ;;  %v13689_v10 = vld [vmem:[#allocation38_spill] sm:$0xff]  ;;  %v7609_v54 = vpop.permute.xlu1 %718 }
 0x17e   : > { %13682 = vst [vmem:[#allocation168_spill] sm:$0xff] %v7577_v18  ;;  %13685 = vst [vmem:[#allocation14_spill] sm:$0xff] %v7583_v59  ;;  %v7589_v9 = vsel %vm740_vm1, %v13687_v19, %v13686_v63  ;;  %v13690_v44 = vld [vmem:[#allocation35_spill] sm:$0xff]  ;;  %v7598_v5 = vld [vmem:[%s5080_s28 + $0xb0] sm:$0xff]  ;;  %v7611_v63 = vpop.permute.xlu0 %715  ;;  %vm749_vm8 = vcmp.eq.s32.totalorder %v7609_v54, 1 }
 0x17f   : > { %13688 = vst [vmem:[#allocation200_spill] sm:$0xff] %v7589_v9  ;;  %v7595_v23 = vsel %vm740_vm1, %v13690_v44, %v13689_v10  ;;  %13692 = vst [vmem:[#allocation174_spill] sm:$0xff] %v7598_v5  ;;  %v7601_v56 = vld [vmem:[%s5080_s28 + $0x140] sm:$0xff]  ;;  %v7604_v18 = vld [vmem:[%s5080_s28 + $0x1d0] sm:$0xff]  ;;  %vm748_vm9 = vcmp.eq.s32.totalorder %v7611_v63, 1 }
 0x180   : > { %13691 = vst [vmem:[#allocation201_spill] sm:$0xff] %v7595_v23  ;;  %13693 = vst [vmem:[#allocation202_spill] sm:$0xff] %v7601_v56  ;;  %v7607_v13 = vld [vmem:[%s5080_s28 + $0x260] sm:$0xff]  ;;  %v7616_v41 = vld [vmem:[%s5080_s28 + $0x308] sm:$0xff] }
 0x181   : > { %13694 = vst [vmem:[#allocation173_spill] sm:$0xff] %v7604_v18  ;;  %13695 = vst [vmem:[#allocation203_spill] sm:$0xff] %v7616_v41  ;;  %v7620_v44 = vld [vmem:[%s5080_s28 + $0x398] sm:$0xff]  ;;  %v7623_v10 = vld [vmem:[%s5080_s28 + $0x428] sm:$0xff] }
 0x182   : > { %13696 = vst [vmem:[#allocation175_spill] sm:$0xff] %v7620_v44  ;;  %13697 = vst [vmem:[#allocation207_spill] sm:$0xff] %v7623_v10  ;;  %v7626_v19 = vld [vmem:[%s5080_s28 + $0x38] sm:$0xff]  ;;  %v13700_v9 = vld [vmem:[#allocation66_spill] sm:$0xff] }
 0x183   : > { %13698 = vst [vmem:[#allocation176_spill] sm:$0xff] %v7626_v19  ;;  %v13699_v23 = vld [vmem:[#allocation25_spill] sm:$0xff]  ;;  %v7634_v59 = vsel %vm743_vm2, %v7488_v22, %v13700_v9  ;;  %v13703_v1 = vld [vmem:[#allocation67_spill] sm:$0xff]  ;;  %v13705_v53 = vld [vmem:[#allocation46_spill] sm:$0xff] }
 0x184   : > { %1202 = vperm.xlu1 %4613, %v13699_v23   ;;  %v13701_v34 = vld [vmem:[#allocation45_spill] sm:$0xff]  ;;  %v7646_v36 = vsel %vm743_vm2, %v7494_v46, %v13703_v1  ;;  %v7652_v23 = vsel %vm743_vm2, %v7497_v52, %v13705_v53  ;;  %v7655_v9 = vld [vmem:[%s5080_s28 + $0xc8] sm:$0xff]  ;;  %v13715_v52 = vld [vmem:[#allocation4_spill] sm:$0xff] }
 0x185   : > { %v7640_v62 = vsel %vm743_vm2, %v7491_v60, %v13701_v34  ;;  %13704 = vst [vmem:[#allocation177_spill] sm:$0xff] %v7646_v36  ;;  %13706 = vst [vmem:[#allocation209_spill] sm:$0xff] %v7652_v23  ;;  %v7658_v22 = vld [vmem:[%s5080_s28 + $0x158] sm:$0xff]  ;;  %v7661_v34 = vld [vmem:[%s5080_s28 + $0x1e8] sm:$0xff]  ;;  %v7680_v23 = vsel %vm743_vm2, %v7531_v61, %v13715_v52 }
 0x186   : > { %13702 = vst [vmem:[#allocation208_spill] sm:$0xff] %v7640_v62  ;;  %13707 = vst [vmem:[#allocation182_spill] sm:$0xff] %v7655_v9  ;;  %v13710_v60 = vld [vmem:[#allocation26_spill] sm:$0xff]  ;;  %v13711_v62 = vld [vmem:[#allocation71_spill] sm:$0xff] }
 0x187   : > { %13708 = vst [vmem:[#allocation210_spill] sm:$0xff] %v7658_v22  ;;  %13709 = vst [vmem:[#allocation183_spill] sm:$0xff] %v7661_v34  ;;  %1199 = vperm.xlu0 %4612, %v13710_v60   ;;  %v7668_v1 = vsel %vm743_vm2, %v7525_v12, %v13711_v62  ;;  %v13713_v46 = vld [vmem:[#allocation47_spill] sm:$0xff]  ;;  %v13717_v36 = vld [vmem:[#allocation33_spill] sm:$0xff] }
 0x188   : > { %13712 = vst [vmem:[#allocation213_spill] sm:$0xff] %v7668_v1  ;;  %v7674_v53 = vsel %vm743_vm2, %v7528_v40, %v13713_v46  ;;  %13716 = vst [vmem:[#allocation214_spill] sm:$0xff] %v7680_v23  ;;  %v7686_v60 = vsel %vm743_vm2, %v7534_v4, %v13717_v36  ;;  %v7689_v62 = vld [vmem:[%s5080_s28 + $0x278] sm:$0xff]  ;;  %v7692_v12 = vld [vmem:[%s5080_s28 + $0x300] sm:$0xff] }
 0x189   : > { %13714 = vst [vmem:[#allocation188_spill] sm:$0xff] %v7674_v53  ;;  %13718 = vst [vmem:[#allocation189_spill] sm:$0xff] %v7686_v60  ;;  %v7695_v46 = vld [vmem:[%s5080_s28 + $0x390] sm:$0xff]  ;;  %v13722_v40 = vld [vmem:[#allocation34_spill] sm:$0xff] }
 0x18a   : > { %13719 = vst [vmem:[#allocation15_spill] sm:$0xff] %v7689_v62  ;;  %13720 = vst [vmem:[#allocation218_spill] sm:$0xff] %v7692_v12  ;;  %v7701_v52 = vsel %vm742_vm3, %v7562_v0, %v13722_v40  ;;  %v13724_v61 = vld [vmem:[#allocation41_spill] sm:$0xff]  ;;  %v13726_v36 = vld [vmem:[#allocation42_spill] sm:$0xff] }
 0x18b   : > { %13721 = vst [vmem:[#allocation190_spill] sm:$0xff] %v7695_v46  ;;  %13723 = vst [vmem:[#allocation219_spill] sm:$0xff] %v7701_v52  ;;  %v7707_v55 = vsel %vm742_vm3, %v7565_v20, %v13724_v61  ;;  %v7713_v60 = vsel %vm742_vm3, %v7568_v11, %v13726_v36  ;;  %v13728_v23 = vld [vmem:[#allocation43_spill] sm:$0xff]  ;;  %v7722_v40 = vld [vmem:[%s5080_s28 + $0x420] sm:$0xff]  ;;  %v7730_v61 = vpop.permute.xlu1 %724  ;;  %v7732_v20 = vpop.permute.xlu0 %721 }
 0x18c   : > { %13725 = vst [vmem:[#allocation191_spill] sm:$0xff] %v7707_v55  ;;  %13727 = vst [vmem:[#allocation220_spill] sm:$0xff] %v7713_v60  ;;  %v7719_v53 = vsel %vm742_vm3, %v7571_v30, %v13728_v23  ;;  %v7725_v0 = vld [vmem:[%s5080_s28 + $0x30] sm:$0xff]  ;;  %v7728_v52 = vld [vmem:[%s5080_s28 + $0xc0] sm:$0xff]  ;;  %vm751_vm10 = vcmp.eq.s32.totalorder %v7730_v61, 1  ;;  %vm750_vm11 = vcmp.eq.s32.totalorder %v7732_v20, 1 }
 0x18d   : > { %13729 = vst [vmem:[#allocation196_spill] sm:$0xff] %v7719_v53  ;;  %13730 = vst [vmem:[#allocation221_spill] sm:$0xff] %v7722_v40  ;;  %v13733_v36 = vld [vmem:[#allocation44_spill] sm:$0xff]  ;;  %v13736_v53 = vld [vmem:[#allocation49_spill] sm:$0xff] }
 0x18e   : > { %13731 = vst [vmem:[#allocation197_spill] sm:$0xff] %v7725_v0  ;;  %13732 = vst [vmem:[#allocation16_spill] sm:$0xff] %v7728_v52  ;;  %v7738_v23 = vsel %vm742_vm3, %v7598_v5, %v13733_v36  ;;  %v13735_v30 = vld [vmem:[#allocation48_spill] sm:$0xff]  ;;  %v7750_v60 = vsel %vm742_vm3, %v7604_v18, %v13736_v53  ;;  %v13737_v55 = vld [vmem:[#allocation81_spill] sm:$0xff] }
 0x18f   : > { %13734 = vst [vmem:[#allocation225_spill] sm:$0xff] %v7738_v23  ;;  %v7744_v11 = vsel %vm742_vm3, %v7601_v56, %v13735_v30  ;;  %v7756_v1 = vsel %vm742_vm3, %v7607_v13, %v13737_v55  ;;  %v7759_v36 = vld [vmem:[%s5080_s28 + $0x150] sm:$0xff]  ;;  %v7762_v5 = vld [vmem:[%s5080_s28 + $0x1e0] sm:$0xff]  ;;  %v13742_v30 = vld [vmem:[#allocation27_spill] sm:$0xff] }
 0x190   : > { %13738 = vst [vmem:[#allocation226_spill] sm:$0xff] %v7756_v1  ;;  %13739 = vst [vmem:[#allocation227_spill] sm:$0xff] %v7759_v36  ;;  %v7765_v23 = vld [vmem:[%s5080_s28 + $0x270] sm:$0xff]  ;;  %1208 = vperm.xlu1 %4613, %v13742_v30   ;;  %v13743_v56 = vld [vmem:[#allocation82_spill] sm:$0xff]  ;;  %v7790_v30 = vsel %vm745_vm4, %v7626_v19, %v6763_v15  ;;  %v7809_v15 = vsel %vm745_vm4, %v7655_v9, %v6768_v21 }
 0x191   : > { %13740 = vst [vmem:[#allocation198_spill] sm:$0xff] %v7762_v5  ;;  %13741 = vst [vmem:[#allocation228_spill] sm:$0xff] %v7765_v23  ;;  %v7772_v53 = vsel %vm745_vm4, %v7616_v41, %v13743_v56  ;;  %v13745_v8 = vld [vmem:[#allocation83_spill] sm:$0xff]  ;;  %v13747_v18 = vld [vmem:[#allocation61_spill] sm:$0xff] }
 0x192   : > { %13744 = vst [vmem:[#allocation199_spill] sm:$0xff] %v7772_v53  ;;  %v7778_v55 = vsel %vm745_vm4, %v7620_v44, %v13745_v8  ;;  %v7784_v1 = vsel %vm745_vm4, %v7623_v10, %v13747_v18  ;;  %13749 = vst [vmem:[#allocation231_spill] sm:$0xff] %v7790_v30  ;;  %v7793_v56 = vld [vmem:[%s5080_s28 + $0x318] sm:$0xff]  ;;  %v7796_v41 = vld [vmem:[%s5080_s28 + $0x3a8] sm:$0xff] }
 0x193   : > { %13746 = vst [vmem:[#allocation230_spill] sm:$0xff] %v7778_v55  ;;  %13748 = vst [vmem:[#allocation204_spill] sm:$0xff] %v7784_v1  ;;  %v7799_v53 = vld [vmem:[%s5080_s28 + $0x438] sm:$0xff]  ;;  %v7802_v8 = vld [vmem:[%s5080_s28 + $0x48] sm:$0xff] }
 0x194   : > { %13750 = vst [vmem:[#allocation205_spill] sm:$0xff] %v7793_v56  ;;  %13751 = vst [vmem:[#allocation232_spill] sm:$0xff] %v7796_v41  ;;  %v13754_v44 = vld [vmem:[#allocation28_spill] sm:$0xff]  ;;  %v13758_v10 = vld [vmem:[#allocation62_spill] sm:$0xff] }
 0x195   : > { %13752 = vst [vmem:[#allocation206_spill] sm:$0xff] %v7799_v53  ;;  %13753 = vst [vmem:[#allocation233_spill] sm:$0xff] %v7802_v8  ;;  %1205 = vperm.xlu0 %4612, %v13754_v44   ;;  %v13756_v18 = vld [vmem:[#allocation88_spill] sm:$0xff]  ;;  %v7821_v30 = vsel %vm745_vm4, %v7661_v34, %v13758_v10  ;;  %v13760_v44 = vld [vmem:[#allocation5_spill] sm:$0xff] }
 0x196   : > { %13755 = vst [vmem:[#allocation211_spill] sm:$0xff] %v7809_v15  ;;  %v7815_v19 = vsel %vm745_vm4, %v7658_v22, %v13756_v18  ;;  %13759 = vst [vmem:[#allocation237_spill] sm:$0xff] %v7821_v30  ;;  %v7827_v1 = vsel %vm745_vm4, %v7689_v62, %v13760_v44  ;;  %v7830_v21 = vld [vmem:[%s5080_s28 + $0xd8] sm:$0xff]  ;;  %v7833_v9 = vld [vmem:[%s5080_s28 + $0x168] sm:$0xff] }
 0x197   : > { %13757 = vst [vmem:[#allocation17_spill] sm:$0xff] %v7815_v19  ;;  %13761 = vst [vmem:[#allocation215_spill] sm:$0xff] %v7827_v1  ;;  %v7836_v15 = vld [vmem:[%s5080_s28 + $0x1f8] sm:$0xff]  ;;  %v7839_v18 = vld [vmem:[%s5080_s28 + $0x288] sm:$0xff] }
 0x198   : > { %13762 = vst [vmem:[#allocation238_spill] sm:$0xff] %v7830_v21  ;;  %13763 = vst [vmem:[#allocation212_spill] sm:$0xff] %v7833_v9  ;;  %v13766_v22 = vld [vmem:[#allocation63_spill] sm:$0xff]  ;;  %v13768_v34 = vld [vmem:[#allocation68_spill] sm:$0xff] }
 0x199   : > { %13764 = vst [vmem:[#allocation239_spill] sm:$0xff] %v7836_v15  ;;  %13765 = vst [vmem:[#allocation216_spill] sm:$0xff] %v7839_v18  ;;  %v7845_v10 = vsel %vm744_vm5, %v7692_v12, %v13766_v22  ;;  %v7851_v6 = vsel %vm744_vm5, %v7695_v46, %v13768_v34  ;;  %v13770_v44 = vld [vmem:[#allocation89_spill] sm:$0xff]  ;;  %v7866_v12 = vld [vmem:[%s5080_s28 + $0x310] sm:$0xff] }
 0x19a   : > { %13767 = vst [vmem:[#allocation18_spill] sm:$0xff] %v7845_v10  ;;  %13769 = vst [vmem:[#allocation242_spill] sm:$0xff] %v7851_v6  ;;  %v7857_v1 = vsel %vm744_vm5, %v7722_v40, %v13770_v44  ;;  %v13772_v30 = vld [vmem:[#allocation69_spill] sm:$0xff]  ;;  %v7869_v10 = vld [vmem:[%s5080_s28 + $0x3a0] sm:$0xff]  ;;  %v7877_v6 = vpop.permute.xlu1 %730  ;;  %v7879_v44 = vpop.permute.xlu0 %727 }
 0x19b   : > { %13771 = vst [vmem:[#allocation217_spill] sm:$0xff] %v7857_v1  ;;  %v7863_v22 = vsel %vm744_vm5, %v7725_v0, %v13772_v30  ;;  %13774 = vst [vmem:[#allocation222_spill] sm:$0xff] %v7866_v12  ;;  %v7872_v34 = vld [vmem:[%s5080_s28 + $0x430] sm:$0xff]  ;;  %v7875_v46 = vld [vmem:[%s5080_s28 + $0x40] sm:$0xff]  ;;  %v7891_v0 = vsel %vm744_vm5, %v7759_v36, %v6818_v2  ;;  %vm753_vm12 = vcmp.eq.s32.totalorder %v7877_v6, 1  ;;  %vm752_vm13 = vcmp.eq.s32.totalorder %v7879_v44, 1 }
 0x19c   : > { %13773 = vst [vmem:[#allocation243_spill] sm:$0xff] %v7863_v22  ;;  %13775 = vst [vmem:[#allocation244_spill] sm:$0xff] %v7869_v10  ;;  %v13778_v40 = vld [vmem:[#allocation93_spill] sm:$0xff]  ;;  %v7897_v22 = vsel %vm744_vm5, %v7762_v5, %v6824_v38  ;;  %v13782_v1 = vld [vmem:[#allocation70_spill] sm:$0xff] }
 0x19d   : > { %13776 = vst [vmem:[#allocation223_spill] sm:$0xff] %v7872_v34  ;;  %13777 = vst [vmem:[#allocation245_spill] sm:$0xff] %v7875_v46  ;;  %v7885_v30 = vsel %vm744_vm5, %v7728_v52, %v13778_v40  ;;  %v7903_v19 = vsel %vm744_vm5, %v7765_v23, %v13782_v1  ;;  %v7906_v40 = vld [vmem:[%s5080_s28 + $0xd0] sm:$0xff]  ;;  %v7909_v52 = vld [vmem:[%s5080_s28 + $0x160] sm:$0xff] }
 0x19e   : > { %13779 = vst [vmem:[#allocation224_spill] sm:$0xff] %v7885_v30  ;;  %13780 = vst [vmem:[#allocation250_spill] sm:$0xff] %v7891_v0  ;;  %v7912_v30 = vld [vmem:[%s5080_s28 + $0x1f0] sm:$0xff]  ;;  %v7915_v2 = vld [vmem:[%s5080_s28 + $0x280] sm:$0xff] }
 0x19f   : > { %13781 = vst [vmem:[#allocation251_spill] sm:$0xff] %v7897_v22  ;;  %13783 = vst [vmem:[#allocation229_spill] sm:$0xff] %v7903_v19  ;;  %v13787_v36 = vld [vmem:[#allocation29_spill] sm:$0xff]  ;;  %v7921_v38 = vld [vmem:[%s5080_s28 + $0x328] sm:$0xff] }
 0x1a0   : > { %13784 = vst [vmem:[#allocation252_spill] sm:$0xff] %v7906_v40  ;;  %13785 = vst [vmem:[#allocation234_spill] sm:$0xff] %v7909_v52  ;;  %1214 = vperm.xlu1 %4613, %v13787_v36   ;;  %v7925_v47 = vld [vmem:[%s5080_s28 + $0x3b8] sm:$0xff]  ;;  %v7928_v1 = vld [vmem:[%s5080_s28 + $0x448] sm:$0xff] }
 0x1a1   : > { %13786 = vst [vmem:[#allocation235_spill] sm:$0xff] %v7912_v30  ;;  %13788 = vst [vmem:[#allocation236_spill] sm:$0xff] %v7921_v38  ;;  %v7931_v5 = vld [vmem:[%s5080_s28 + $0x58] sm:$0xff]  ;;  %v13792_v36 = vld [vmem:[#allocation30_spill] sm:$0xff] }
 0x1a2   : > { %13789 = vst [vmem:[#allocation240_spill] sm:$0xff] %v7925_v47  ;;  %13790 = vst [vmem:[#allocation241_spill] sm:$0xff] %v7928_v1  ;;  %1211 = vperm.xlu0 %4612, %v13792_v36   ;;  %v13793_v19 = vld [vmem:[#allocation6_spill] sm:$0xff]  ;;  %v13796_v55 = vld [vmem:[#allocation79_spill] sm:$0xff]  ;;  %v7957_v36 = vsel %vm747_vm6, %v7802_v8, %v6851_v26 }
 0x1a3   : > { %13791 = vst [vmem:[#allocation19_spill] sm:$0xff] %v7931_v5  ;;  %v7939_v22 = vsel %vm747_vm6, %v7793_v56, %v13793_v19  ;;  %v13794_v0 = vld [vmem:[#allocation94_spill] sm:$0xff]  ;;  %v7951_v62 = vsel %vm747_vm6, %v7799_v53, %v13796_v55  ;;  %13798 = vst [vmem:[#allocation256_spill] sm:$0xff] %v7957_v36  ;;  %v7960_v19 = vld [vmem:[%s5080_s28 + $0xe8] sm:$0xff] }
 0x1a4   : > { %v7945_v23 = vsel %vm747_vm6, %v7796_v41, %v13794_v0  ;;  %13797 = vst [vmem:[#allocation246_spill] sm:$0xff] %v7951_v62  ;;  %13799 = vst [vmem:[#allocation247_spill] sm:$0xff] %v7960_v19  ;;  %v7963_v56 = vld [vmem:[%s5080_s28 + $0x178] sm:$0xff]  ;;  %v7966_v0 = vld [vmem:[%s5080_s28 + $0x208] sm:$0xff] }
 0x1a5   : > { %13795 = vst [vmem:[#allocation255_spill] sm:$0xff] %v7945_v23  ;;  %13800 = vst [vmem:[#allocation20_spill] sm:$0xff] %v7963_v56  ;;  %v13802_v41 = vld [vmem:[#allocation95_spill] sm:$0xff]  ;;  %v13804_v53 = vld [vmem:[#allocation73_spill] sm:$0xff] }
 0x1a6   : > { %13801 = vst [vmem:[#allocation258_spill] sm:$0xff] %v7966_v0  ;;  %v7972_v55 = vsel %vm747_vm6, %v7830_v21, %v13802_v41  ;;  %v7978_v26 = vsel %vm747_vm6, %v7833_v9, %v13804_v53  ;;  %v13806_v8 = vld [vmem:[#allocation96_spill] sm:$0xff]  ;;  %v7993_v41 = vld [vmem:[%s5080_s28 + $0x298] sm:$0xff]  ;;  %v7996_v21 = vld [vmem:[%s5080_s28 + $0x320] sm:$0xff]  ;;  %v8001_v53 = vpop.permute.xlu1 %736  ;;  %v8003_v9 = vpop.permute.xlu0 %733 }
 0x1a7   : > { %13803 = vst [vmem:[#allocation248_spill] sm:$0xff] %v7972_v55  ;;  %13805 = vst [vmem:[#allocation249_spill] sm:$0xff] %v7978_v26  ;;  %v7984_v36 = vsel %vm747_vm6, %v7836_v15, %v13806_v8  ;;  %v13808_v62 = vld [vmem:[#allocation72_spill] sm:$0xff]  ;;  %v13818_v26 = vld [vmem:[#allocation75_spill] sm:$0xff]  ;;  %vm755_vm14 = vcmp.eq.s32.totalorder %v8001_v53, 1  ;;  %vm754_vm15 = vcmp.eq.s32.totalorder %v8003_v9, 1 }
 0x1a8   : > { %13807 = vst [vmem:[#allocation253_spill] sm:$0xff] %v7984_v36  ;;  %v7990_v23 = vsel %vm747_vm6, %v7839_v18, %v13808_v62  ;;  %13810 = vst [vmem:[#allocation254_spill] sm:$0xff] %v7993_v41  ;;  %v7999_v55 = vld [vmem:[%s5080_s28 + $0x3b0] sm:$0xff]  ;;  %v13814_v62 = vld [vmem:[#allocation74_spill] sm:$0xff]  ;;  %v8027_v18 = vsel %vm746_vm7, %v7875_v46, %v13818_v26 }
 0x1a9   : > { %13809 = vst [vmem:[#allocation259_spill] sm:$0xff] %v7990_v23  ;;  %13811 = vst [vmem:[#allocation263_spill] sm:$0xff] %v7996_v21  ;;  %v13813_v8 = vld [vmem:[#allocation100_spill] sm:$0xff]  ;;  %v8015_v15 = vsel %vm746_vm7, %v7869_v10, %v13814_v62  ;;  %v13816_v23 = vld [vmem:[#allocation101_spill] sm:$0xff] }
 0x1aa   : > { %13812 = vst [vmem:[#allocation21_spill] sm:$0xff] %v7999_v55  ;;  %v8009_v28 = vsel %vm746_vm7, %v7866_v12, %v13813_v8  ;;  %13815 = vst [vmem:[#allocation267_spill] sm:$0xff] %v8015_v15  ;;  %v8021_v36 = vsel %vm746_vm7, %v7872_v34, %v13816_v23  ;;  %v8030_v8 = vld [vmem:[%s5080_s28 + $0x440] sm:$0xff]  ;;  %v8033_v12 = vld [vmem:[%s5080_s28 + $0x50] sm:$0xff] }
 0x1ab   : > { %13817 = vst [vmem:[#allocation268_spill] sm:$0xff] %v8021_v36  ;;  %13819 = vst [vmem:[#allocation22_spill] sm:$0xff] %v8027_v18  ;;  %v8036_v62 = vld [vmem:[%s5080_s28 + $0xe0] sm:$0xff]  ;;  %v13823_v10 = vld [vmem:[#allocation31_spill] sm:$0xff] }
 0x1ac   : > { %13820 = vst [vmem:[#allocation269_spill] sm:$0xff] %v8030_v8  ;;  %13821 = vst [vmem:[#allocation266_spill] sm:$0xff] %v8033_v12  ;;  %1220 = vperm.xlu1 %4613, %v13823_v10   ;;  %v13824_v15 = vld [vmem:[#allocation102_spill] sm:$0xff]  ;;  %v13825_v26 = vld [vmem:[#allocation76_spill] sm:$0xff] }
 0x1ad   : > { %13822 = vst [vmem:[#allocation50_spill] sm:$0xff] %v8036_v62  ;;  %v8043_v23 = vsel %vm746_vm7, %v7906_v40, %v13824_v15  ;;  %v8049_v46 = vsel %vm746_vm7, %v7909_v52, %v13825_v26  ;;  %v13827_v34 = vld [vmem:[#allocation103_spill] sm:$0xff]  ;;  %v13828_v10 = vld [vmem:[#allocation77_spill] sm:$0xff]  ;;  %v8064_v15 = vld [vmem:[%s5080_s28 + $0x170] sm:$0xff] }
 0x1ae   : > { %13826 = vst [vmem:[#allocation52_spill] sm:$0xff] %v8049_v46  ;;  %v8055_v18 = vsel %vm746_vm7, %v7912_v30, %v13827_v34  ;;  %v8061_v36 = vsel %vm746_vm7, %v7915_v2, %v13828_v10  ;;  %13830 = vst [vmem:[#allocation53_spill] sm:$0xff] %v8064_v15  ;;  %v8067_v40 = vld [vmem:[%s5080_s28 + $0x200] sm:$0xff]  ;;  %v8070_v26 = vld [vmem:[%s5080_s28 + $0x290] sm:$0xff]  ;;  %v8089_v30 = vsel %vm749_vm8, %v7928_v1, %v6940_v58 }
 0x1af   : > { %13829 = vst [vmem:[#allocation257_spill] sm:$0xff] %v8061_v36  ;;  %13831 = vst [vmem:[#allocation260_spill] sm:$0xff] %v8067_v40  ;;  %v13833_v52 = vld [vmem:[#allocation32_spill] sm:$0xff]  ;;  %v13834_v46 = vld [vmem:[#allocation107_spill] sm:$0xff]  ;;  %v8113_v58 = vsel %vm749_vm8, %v7960_v19, %v6948_v16 }
 0x1b0   : > { %13832 = vst [vmem:[#allocation2_spill] sm:$0xff] %v8070_v26  ;;  %1217 = vperm.xlu0 %4612, %v13833_v52   ;;  %v8077_v34 = vsel %vm749_vm8, %v7921_v38, %v13834_v46  ;;  %v13836_v35 = vld [vmem:[#allocation78_spill] sm:$0xff]  ;;  %13838 = vst [vmem:[#allocation262_spill] sm:$0xff] %v8089_v30  ;;  %v8095_v52 = vsel %vm749_vm8, %v7931_v5, %v6944_v25  ;;  %v8098_v46 = vld [vmem:[%s5080_s28 + $0x338] sm:$0xff]  ;;  %v8119_v25 = vsel %vm749_vm8, %v7963_v56, %v6952_v49  ;;  %v8145_v56 = vpop.permute.xlu1 %815 }
 0x1b1   : > { %13835 = vst [vmem:[#allocation261_spill] sm:$0xff] %v8077_v34  ;;  %v8083_v10 = vsel %vm749_vm8, %v7925_v47, %v13836_v35  ;;  %13839 = vst [vmem:[#allocation55_spill] sm:$0xff] %v8095_v52  ;;  %v8101_v38 = vld [vmem:[%s5080_s28 + $0x3c8] sm:$0xff]  ;;  %v8104_v34 = vld [vmem:[%s5080_s28 + $0x458] sm:$0xff]  ;;  %vm866_vm0 = vcmp.eq.s32.totalorder %v8145_v56, 1 }
 0x1b2   : > { %13837 = vst [vmem:[#allocation54_spill] sm:$0xff] %v8083_v10  ;;  %13840 = vst [vmem:[#allocation264_spill] sm:$0xff] %v8098_v46  ;;  %v8107_v35 = vld [vmem:[%s5080_s28 + $0x68] sm:$0xff]  ;;  %v13848_v52 = vld [vmem:[#allocation112_spill] sm:$0xff] }
 0x1b3   : > { %13841 = vst [vmem:[#allocation56_spill] sm:$0xff] %v8101_v38  ;;  %13842 = vst [vmem:[#allocation265_spill] sm:$0xff] %v8104_v34  ;;  %v13846_v5 = vld [vmem:[#allocation7_spill] sm:$0xff]  ;;  %v8131_v16 = vsel %vm749_vm8, %v7993_v41, %v13848_v52  ;;  %v8134_v19 = vld [vmem:[%s5080_s28 + $0xf8] sm:$0xff] }
 0x1b4   : > { %13843 = vst [vmem:[#allocation58_spill] sm:$0xff] %v8107_v35  ;;  %13844 = vst [vmem:[#allocation51_spill] sm:$0xff] %v8113_v58  ;;  %v8125_v1 = vsel %vm749_vm8, %v7966_v0, %v13846_v5  ;;  %v8137_v58 = vld [vmem:[%s5080_s28 + $0x188] sm:$0xff]  ;;  %v8140_v47 = vld [vmem:[%s5080_s28 + $0x218] sm:$0xff]  ;;  %v8147_v5 = vpop.permute.xlu0 %812 }
 0x1b5   : > { %13845 = vst [vmem:[#allocation59_spill] sm:$0xff] %v8119_v25  ;;  %13847 = vst [vmem:[#allocation36_spill] sm:$0xff] %v8125_v1  ;;  %v8143_v49 = vld [vmem:[%s5080_s28 + $0x2a8] sm:$0xff]  ;;  %v13853_v0 = vld [vmem:[#allocation97_spill] sm:$0xff]  ;;  %vm865_vm1 = vcmp.eq.s32.totalorder %v8147_v5, 1 }
 0x1b6   : > { %13849 = vst [vmem:[#allocation23_spill] sm:$0xff] %v8131_v16  ;;  %13850 = vst [vmem:[#allocation24_spill] sm:$0xff] %v8134_v19  ;;  %v8153_v54 = vsel %vm748_vm9, %v7996_v21, %v13853_v0  ;;  %v13855_v52 = vld [vmem:[#allocation113_spill] sm:$0xff]  ;;  %v13859_v30 = vld [vmem:[#allocation114_spill] sm:$0xff] }
 0x1b7   : > { %13851 = vst [vmem:[#allocation57_spill] sm:$0xff] %v8137_v58  ;;  %13852 = vst [vmem:[#allocation64_spill] sm:$0xff] %v8140_v47  ;;  %v8159_v16 = vsel %vm748_vm9, %v7999_v55, %v13855_v52  ;;  %v13857_v1 = vld [vmem:[#allocation85_spill] sm:$0xff]  ;;  %v8171_v10 = vsel %vm748_vm9, %v8033_v12, %v13859_v30  ;;  %v8174_v0 = vld [vmem:[%s5080_s28 + $0x330] sm:$0xff] }
 0x1b8   : > { %13854 = vst [vmem:[#allocation270_spill] sm:$0xff] %v8153_v54  ;;  %13856 = vst [vmem:[#allocation37_spill] sm:$0xff] %v8159_v16  ;;  %v8165_v25 = vsel %vm748_vm9, %v8030_v8, %v13857_v1  ;;  %v8177_v21 = vld [vmem:[%s5080_s28 + $0x3c0] sm:$0xff]  ;;  %v8180_v54 = vld [vmem:[%s5080_s28 + $0x450] sm:$0xff] }
 0x1b9   : > { %13858 = vst [vmem:[#allocation271_spill] sm:$0xff] %v8165_v25  ;;  %13860 = vst [vmem:[#allocation3_spill] sm:$0xff] %v8171_v10  ;;  %v8183_v52 = vld [vmem:[%s5080_s28 + $0x60] sm:$0xff]  ;;  %v13865_v55 = vld [vmem:[#allocation39_spill] sm:$0xff] }
 0x1ba   : > { %13861 = vst [vmem:[#allocation272_spill] sm:$0xff] %v8174_v0  ;;  %13862 = vst [vmem:[#allocation65_spill] sm:$0xff] %v8177_v21  ;;  %1226 = vperm.xlu1 %4613, %v13865_v55   ;;  %v13866_v1 = vld [vmem:[#allocation84_spill] sm:$0xff]  ;;  %v13868_v30 = vld [vmem:[#allocation115_spill] sm:$0xff] }
 0x1bb   : > { %13863 = vst [vmem:[#allocation60_spill] sm:$0xff] %v8180_v54  ;;  %13864 = vst [vmem:[#allocation38_spill] sm:$0xff] %v8183_v52  ;;  %v8190_v8 = vsel %vm748_vm9, %v8036_v62, %v13866_v1  ;;  %v8196_v12 = vsel %vm748_vm9, %v8064_v15, %v13868_v30  ;;  %v13870_v10 = vld [vmem:[#allocation86_spill] sm:$0xff]  ;;  %v13872_v16 = vld [vmem:[#allocation8_spill] sm:$0xff] }
 0x1bc   : > { %13867 = vst [vmem:[#allocation35_spill] sm:$0xff] %v8190_v8  ;;  %13869 = vst [vmem:[#allocation25_spill] sm:$0xff] %v8196_v12  ;;  %v8202_v25 = vsel %vm748_vm9, %v8067_v40, %v13870_v10  ;;  %v8208_v55 = vsel %vm748_vm9, %v8070_v26, %v13872_v16  ;;  %v8211_v1 = vld [vmem:[%s5080_s28 + $0xf0] sm:$0xff]  ;;  %v8214_v62 = vld [vmem:[%s5080_s28 + $0x180] sm:$0xff] }
 0x1bd   : > { %13871 = vst [vmem:[#allocation66_spill] sm:$0xff] %v8202_v25  ;;  %13873 = vst [vmem:[#allocation45_spill] sm:$0xff] %v8208_v55  ;;  %v8217_v30 = vld [vmem:[%s5080_s28 + $0x210] sm:$0xff]  ;;  %v8220_v15 = vld [vmem:[%s5080_s28 + $0x2a0] sm:$0xff] }
 0x1be   : > { %13874 = vst [vmem:[#allocation67_spill] sm:$0xff] %v8211_v1  ;;  %13875 = vst [vmem:[#allocation46_spill] sm:$0xff] %v8214_v62  ;;  %v13877_v12 = vld [vmem:[#allocation40_spill] sm:$0xff]  ;;  %v8226_v63 = vld [vmem:[%s5080_s28 + $0x348] sm:$0xff] }
 0x1bf   : > { %13876 = vst [vmem:[#allocation26_spill] sm:$0xff] %v8217_v30  ;;  %1223 = vperm.xlu0 %4612, %v13877_v12   ;;  %13878 = vst [vmem:[#allocation71_spill] sm:$0xff] %v8226_v63  ;;  %v8230_v10 = vld [vmem:[%s5080_s28 + $0x3d8] sm:$0xff]  ;;  %v8233_v16 = vld [vmem:[%s5080_s28 + $0x468] sm:$0xff] }
 0x1c0   : > { %13879 = vst [vmem:[#allocation47_spill] sm:$0xff] %v8230_v10  ;;  %13880 = vst [vmem:[#allocation4_spill] sm:$0xff] %v8233_v16  ;;  %v13881_v40 = vld [vmem:[#allocation120_spill] sm:$0xff]  ;;  %v13883_v55 = vld [vmem:[#allocation87_spill] sm:$0xff] }
 0x1c1   : > { %v8240_v12 = vsel %vm751_vm10, %v8098_v46, %v13881_v40  ;;  %v8246_v25 = vsel %vm751_vm10, %v8101_v38, %v13883_v55  ;;  %v13884_v8 = vld [vmem:[#allocation121_spill] sm:$0xff]  ;;  %v13885_v41 = vld [vmem:[#allocation90_spill] sm:$0xff]  ;;  %v8264_v46 = vld [vmem:[%s5080_s28 + $0x108] sm:$0xff]  ;;  %v8269_v55 = vpop.permute.xlu1 %821  ;;  %v8271_v38 = vpop.permute.xlu0 %818 }
 0x1c2   : > { %13882 = vst [vmem:[#allocation33_spill] sm:$0xff] %v8240_v12  ;;  %v8252_v26 = vsel %vm751_vm10, %v8104_v34, %v13884_v8  ;;  %v8258_v36 = vsel %vm751_vm10, %v8107_v35, %v13885_v41  ;;  %v8261_v40 = vld [vmem:[%s5080_s28 + $0x78] sm:$0xff]  ;;  %13887 = vst [vmem:[#allocation41_spill] sm:$0xff] %v8264_v46  ;;  %v8277_v8 = vsel %vm751_vm10, %v8134_v19, %v7039_v48  ;;  %v8298_v48 = vld [vmem:[%s5080_s28 + $0x228] sm:$0xff]  ;;  %vm868_vm3 = vcmp.eq.s32.totalorder %v8269_v55, 1 }
 0x1c3   : > { %13886 = vst [vmem:[#allocation34_spill] sm:$0xff] %v8261_v40  ;;  %v8267_v12 = vld [vmem:[%s5080_s28 + $0x198] sm:$0xff]  ;;  %v8283_v41 = vsel %vm751_vm10, %v8137_v58, %v7044_v33  ;;  %v8289_v35 = vsel %vm751_vm10, %v8140_v47, %v7049_v27  ;;  %v8295_v34 = vsel %vm751_vm10, %v8143_v49, %v7054_v7  ;;  %13891 = vst [vmem:[#allocation48_spill] sm:$0xff] %v8298_v48  ;;  %v8304_v33 = vld [vmem:[%s5080_s28 + $0x340] sm:$0xff]  ;;  %vm867_vm4 = vcmp.eq.s32.totalorder %v8271_v38, 1 }
 0x1c4   : > { %13888 = vst [vmem:[#allocation42_spill] sm:$0xff] %v8267_v12  ;;  %13889 = vst [vmem:[#allocation43_spill] sm:$0xff] %v8289_v35  ;;  %v8301_v19 = vld [vmem:[%s5080_s28 + $0x2b8] sm:$0xff]  ;;  %v13893_v58 = vld [vmem:[#allocation80_spill] sm:$0xff]  ;;  %v8311_v27 = vsel %vm750_vm11, %v8174_v0, %v7064_v14 }
 0x1c5   : > { %13890 = vst [vmem:[#allocation44_spill] sm:$0xff] %v8295_v34  ;;  %13892 = vst [vmem:[#allocation49_spill] sm:$0xff] %v8304_v33  ;;  %1232 = vperm.xlu1 %4613, %v13893_v58   ;;  %v13894_v61 = vld [vmem:[#allocation122_spill] sm:$0xff]  ;;  %v13896_v47 = vld [vmem:[#allocation91_spill] sm:$0xff] }
 0x1c6   : > { %v8317_v7 = vsel %vm750_vm11, %v8177_v21, %v13894_v61  ;;  %v8323_v34 = vsel %vm750_vm11, %v8180_v54, %v13896_v47  ;;  %v13898_v35 = vld [vmem:[#allocation123_spill] sm:$0xff]  ;;  %v8332_v14 = vld [vmem:[%s5080_s28 + $0x3d0] sm:$0xff]  ;;  %v8335_v0 = vld [vmem:[%s5080_s28 + $0x460] sm:$0xff] }
 0x1c7   : > { %13895 = vst [vmem:[#allocation81_spill] sm:$0xff] %v8317_v7  ;;  %13897 = vst [vmem:[#allocation27_spill] sm:$0xff] %v8323_v34  ;;  %v8329_v58 = vsel %vm750_vm11, %v8183_v52, %v13898_v35  ;;  %v8338_v61 = vld [vmem:[%s5080_s28 + $0x70] sm:$0xff]  ;;  %v13902_v21 = vld [vmem:[#allocation111_spill] sm:$0xff] }
 0x1c8   : > { %13899 = vst [vmem:[#allocation82_spill] sm:$0xff] %v8329_v58  ;;  %13900 = vst [vmem:[#allocation83_spill] sm:$0xff] %v8335_v0  ;;  %1229 = vperm.xlu0 %4612, %v13902_v21   ;;  %v13903_v7 = vld [vmem:[#allocation92_spill] sm:$0xff]  ;;  %v13904_v54 = vld [vmem:[#allocation126_spill] sm:$0xff] }
 0x1c9   : > { %13901 = vst [vmem:[#allocation61_spill] sm:$0xff] %v8338_v61  ;;  %v8345_v47 = vsel %vm750_vm11, %v8211_v1, %v13903_v7  ;;  %v8351_v35 = vsel %vm750_vm11, %v8214_v62, %v13904_v54  ;;  %v13906_v52 = vld [vmem:[#allocation110_spill] sm:$0xff]  ;;  %v13908_v34 = vld [vmem:[#allocation127_spill] sm:$0xff]  ;;  %v8369_v1 = vld [vmem:[%s5080_s28 + $0x190] sm:$0xff] }
 0x1ca   : > { %13905 = vst [vmem:[#allocation28_spill] sm:$0xff] %v8351_v35  ;;  %v8357_v58 = vsel %vm750_vm11, %v8217_v30, %v13906_v52  ;;  %v8363_v21 = vsel %vm750_vm11, %v8220_v15, %v13908_v34  ;;  %v8366_v7 = vld [vmem:[%s5080_s28 + $0x100] sm:$0xff]  ;;  %13911 = vst [vmem:[#allocation63_spill] sm:$0xff] %v8369_v1  ;;  %v13913_v62 = vld [vmem:[#allocation99_spill] sm:$0xff] }
 0x1cb   : > { %13907 = vst [vmem:[#allocation88_spill] sm:$0xff] %v8357_v58  ;;  %13909 = vst [vmem:[#allocation62_spill] sm:$0xff] %v8363_v21  ;;  %v8372_v54 = vld [vmem:[%s5080_s28 + $0x220] sm:$0xff]  ;;  %v8378_v52 = vsel %vm753_vm12, %v8226_v63, %v13913_v62  ;;  %v13914_v30 = vld [vmem:[#allocation128_spill] sm:$0xff] }
 0x1cc   : > { %13910 = vst [vmem:[#allocation5_spill] sm:$0xff] %v8366_v7  ;;  %13912 = vst [vmem:[#allocation68_spill] sm:$0xff] %v8372_v54  ;;  %v8384_v20 = vsel %vm753_vm12, %v8230_v10, %v13914_v30  ;;  %v13916_v34 = vld [vmem:[#allocation98_spill] sm:$0xff]  ;;  %v13917_v58 = vld [vmem:[#allocation129_spill] sm:$0xff]  ;;  %v8407_v10 = vpop.permute.xlu1 %827 }
 0x1cd   : > { %13915 = vst [vmem:[#allocation89_spill] sm:$0xff] %v8384_v20  ;;  %v8390_v21 = vsel %vm753_vm12, %v8233_v16, %v13916_v34  ;;  %v8396_v35 = vsel %vm753_vm12, %v8261_v40, %v13917_v58  ;;  %v8399_v62 = vld [vmem:[%s5080_s28 + $0x2b0] sm:$0xff]  ;;  %v8402_v63 = vld [vmem:[%s5080_s28 + $0x358] sm:$0xff]  ;;  %v8405_v30 = vld [vmem:[%s5080_s28 + $0x3e8] sm:$0xff]  ;;  %v8409_v20 = vpop.permute.xlu0 %824  ;;  %v8415_v34 = vsel %vm753_vm12, %v8264_v46, %v7136_v39  ;;  %v8421_v58 = vsel %vm753_vm12, %v8267_v12, %v7140_v45 }
 0x1ce   : > { %13918 = vst [vmem:[#allocation69_spill] sm:$0xff] %v8402_v63  ;;  %13919 = vst [vmem:[#allocation93_spill] sm:$0xff] %v8405_v30  ;;  %v8427_v40 = vsel %vm753_vm12, %v8298_v48, %v7144_v31  ;;  %v8433_v16 = vsel %vm753_vm12, %v8301_v19, %v7148_v24  ;;  %v8436_v39 = vld [vmem:[%s5080_s28 + $0x478] sm:$0xff]  ;;  %v8439_v46 = vld [vmem:[%s5080_s28 + $0x88] sm:$0xff]  ;;  %vm870_vm5 = vcmp.eq.s32.totalorder %v8407_v10, 1  ;;  %vm869_vm6 = vcmp.eq.s32.totalorder %v8409_v20, 1 }
 0x1cf   : > { %13920 = vst [vmem:[#allocation70_spill] sm:$0xff] %v8421_v58  ;;  %13921 = vst [vmem:[#allocation29_spill] sm:$0xff] %v8427_v40  ;;  %v8442_v45 = vld [vmem:[%s5080_s28 + $0x118] sm:$0xff]  ;;  %v13926_v12 = vld [vmem:[#allocation104_spill] sm:$0xff] }
 0x1d0   : > { %13922 = vst [vmem:[#allocation30_spill] sm:$0xff] %v8433_v16  ;;  %13923 = vst [vmem:[#allocation6_spill] sm:$0xff] %v8436_v39  ;;  %v8448_v31 = vsel %vm752_vm13, %v8304_v33, %v13926_v12  ;;  %v13928_v48 = vld [vmem:[#allocation134_spill] sm:$0xff]  ;;  %v13929_v6 = vld [vmem:[#allocation105_spill] sm:$0xff] }
 0x1d1   : > { %13924 = vst [vmem:[#allocation94_spill] sm:$0xff] %v8439_v46  ;;  %13925 = vst [vmem:[#allocation79_spill] sm:$0xff] %v8442_v45  ;;  %v8454_v24 = vsel %vm752_vm13, %v8332_v14, %v13928_v48  ;;  %v8460_v16 = vsel %vm752_vm13, %v8335_v0, %v13929_v6  ;;  %v13930_v40 = vld [vmem:[#allocation135_spill] sm:$0xff]  ;;  %v8481_v48 = vsel %vm752_vm13, %v8366_v7, %v7180_v42  ;;  %v8502_v42 = vld [vmem:[%s5080_s28 + $0x350] sm:$0xff]  ;;  %v8522_v44 = vpop.permute.xlu0 %830 }
 0x1d2   : > { %13927 = vst [vmem:[#allocation95_spill] sm:$0xff] %v8448_v31  ;;  %v8466_v12 = vsel %vm752_vm13, %v8338_v61, %v13930_v40  ;;  %v8469_v33 = vld [vmem:[%s5080_s28 + $0x1a8] sm:$0xff]  ;;  %v8472_v31 = vld [vmem:[%s5080_s28 + $0x238] sm:$0xff]  ;;  %13933 = vst [vmem:[#allocation72_spill] sm:$0xff] %v8481_v48  ;;  %v8487_v6 = vsel %vm752_vm13, %v8369_v1, %v7186_v50  ;;  %v8493_v40 = vsel %vm752_vm13, %v8372_v54, %v7192_v43  ;;  %vm871_vm9 = vcmp.eq.s32.totalorder %v8522_v44, 1 }
 0x1d3   : > { %13931 = vst [vmem:[#allocation73_spill] sm:$0xff] %v8469_v33  ;;  %13932 = vst [vmem:[#allocation96_spill] sm:$0xff] %v8472_v31  ;;  %v8475_v58 = vld [vmem:[%s5080_s28 + $0x2c8] sm:$0xff]  ;;  %v8499_v61 = vsel %vm752_vm13, %v8399_v62, %v7198_v32  ;;  %v8505_v7 = vld [vmem:[%s5080_s28 + $0x3e0] sm:$0xff]  ;;  %v8520_v32 = vpop.permute.xlu1 %833  ;;  %v8534_v1 = vsel %vm755_vm14, %v8405_v30, %v7210_v51 }
 0x1d4   : > { %13934 = vst [vmem:[#allocation100_spill] sm:$0xff] %v8487_v6  ;;  %13935 = vst [vmem:[#allocation74_spill] sm:$0xff] %v8493_v40  ;;  %v8508_v50 = vld [vmem:[%s5080_s28 + $0x470] sm:$0xff]  ;;  %v8513_v43 = vld [vmem:[%s5080_s28 + $0x80] sm:$0xff]  ;;  %vm872_vm8 = vcmp.eq.s32.totalorder %v8520_v32, 1 }
 0x1d5   : > { %13936 = vst [vmem:[#allocation101_spill] sm:$0xff] %v8499_v61  ;;  %13937 = vst [vmem:[#allocation75_spill] sm:$0xff] %v8502_v42  ;;  %v8516_v54 = vld [vmem:[%s5080_s28 + $0x110] sm:$0xff]  ;;  %v8528_v61 = vsel %vm755_vm14, %v8402_v63, %v7204_v17  ;;  %v13942_v40 = vld [vmem:[#allocation106_spill] sm:$0xff] }
 0x1d6   : > { %13938 = vst [vmem:[#allocation31_spill] sm:$0xff] %v8505_v7  ;;  %13939 = vst [vmem:[#allocation102_spill] sm:$0xff] %v8508_v50  ;;  %v8540_v6 = vsel %vm755_vm14, %v8436_v39, %v13942_v40  ;;  %v13943_v48 = vld [vmem:[#allocation136_spill] sm:$0xff]  ;;  %v8549_v17 = vld [vmem:[%s5080_s28 + $0x1a0] sm:$0xff]  ;;  %v8561_v40 = vsel %vm755_vm14, %v8442_v45, %v7232_v3 }
 0x1d7   : > { %13940 = vst [vmem:[#allocation76_spill] sm:$0xff] %v8513_v43  ;;  %13941 = vst [vmem:[#allocation103_spill] sm:$0xff] %v8516_v54  ;;  %v8546_v0 = vsel %vm755_vm14, %v8439_v46, %v13943_v48  ;;  %v8552_v63 = vld [vmem:[%s5080_s28 + $0x230] sm:$0xff]  ;;  %v8555_v51 = vld [vmem:[%s5080_s28 + $0x2c0] sm:$0xff]  ;;  %v8567_v48 = vsel %vm755_vm14, %v8469_v33, %v7238_v57 }
 0x1d8   : > { %13944 = vst [vmem:[#allocation77_spill] sm:$0xff] %v8546_v0  ;;  %13945 = vst [vmem:[#allocation32_spill] sm:$0xff] %v8549_v17  ;;  %v13950_v46 = vld [vmem:[#allocation108_spill] sm:$0xff]  ;;  %v13952_v0 = vld [vmem:[#allocation137_spill] sm:$0xff] }
 0x1d9   : > { %13946 = vst [vmem:[#allocation107_spill] sm:$0xff] %v8552_v63  ;;  %13947 = vst [vmem:[#allocation78_spill] sm:$0xff] %v8555_v51  ;;  %v8573_v39 = vsel %vm755_vm14, %v8472_v31, %v13950_v46  ;;  %v8579_v30 = vsel %vm755_vm14, %v8475_v58, %v13952_v0  ;;  %v13954_v3 = vld [vmem:[#allocation144_spill] sm:$0xff]  ;;  %v13956_v57 = vld [vmem:[#allocation145_spill] sm:$0xff] }
 0x1da   : > { %13948 = vst [vmem:[#allocation7_spill] sm:$0xff] %v8561_v40  ;;  %13949 = vst [vmem:[#allocation112_spill] sm:$0xff] %v8567_v48  ;;  %v8585_v45 = vsel %vm754_vm15, %v8502_v42, %v13954_v3  ;;  %v8591_v33 = vsel %vm754_vm15, %v8505_v7, %v13956_v57  ;;  %v13958_v46 = vld [vmem:[#allocation116_spill] sm:$0xff]  ;;  %v13960_v53 = vld [vmem:[#allocation146_spill] sm:$0xff]  ;;  %v8612_v57 = vsel %vm754_vm15, %v8516_v54, %v7297_v29 }
 0x1db   : > { %13951 = vst [vmem:[#allocation97_spill] sm:$0xff] %v8573_v39  ;;  %13953 = vst [vmem:[#allocation113_spill] sm:$0xff] %v8579_v30  ;;  %v8597_v31 = vsel %vm754_vm15, %v8508_v50, %v13958_v46  ;;  %v8603_v0 = vsel %vm754_vm15, %v8513_v43, %v13960_v53  ;;  %v8606_v3 = vld [vmem:[%s5080_s28 + $0x240] sm:$0xff]  ;;  %v8618_v46 = vsel %vm754_vm15, %v8549_v17, %v7303_v37  ;;  %v13967_v43 = vld [vmem:[#allocation151_spill] sm:$0xff]  ;;  %v8641_v37 = vpop.permute.xlu1 %839  ;;  %v8643_v17 = vpop.permute.xlu0 %836 }
 0x1dc   : > { %13955 = vst [vmem:[#allocation85_spill] sm:$0xff] %v8585_v45  ;;  %13957 = vst [vmem:[#allocation114_spill] sm:$0xff] %v8591_v33  ;;  %v13965_v50 = vld [vmem:[#allocation118_spill] sm:$0xff]  ;;  %v8633_v29 = vld [vmem:[%s5080_s28 + $0x2d0] sm:$0xff]  ;;  %vm874_vm12 = vcmp.eq.s32.totalorder %v8641_v37, 1  ;;  %vm873_vm13 = vcmp.eq.s32.totalorder %v8643_v17, 1 }
 0x1dd   : > { %13959 = vst [vmem:[#allocation39_spill] sm:$0xff] %v8597_v31  ;;  %13961 = vst [vmem:[#allocation84_spill] sm:$0xff] %v8603_v0  ;;  %v8624_v53 = vsel %vm754_vm15, %v8552_v63, %v13965_v50  ;;  %v8630_v0 = vsel %vm754_vm15, %v8555_v51, %v13967_v43  ;;  %v8636_v54 = vld [vmem:[%s5080_s28 + $0x3f0] sm:$0xff]  ;;  %v13976_v9 = vld [vmem:[#allocation109_spill] sm:$0xff] }
 0x1de   : > { %13962 = vst [vmem:[#allocation115_spill] sm:$0xff] %v8606_v3  ;;  %13963 = vst [vmem:[#allocation86_spill] sm:$0xff] %v8612_v57  ;;  %v8639_v57 = vld [vmem:[%s5080_s28] sm:$0xff]  ;;  %v13973_v7 = vld [vmem:[#allocation124_spill] sm:$0xff] }
 0x1df   : > { %13964 = vst [vmem:[#allocation8_spill] sm:$0xff] %v8618_v46  ;;  %13966 = vst [vmem:[#allocation40_spill] sm:$0xff] %v8624_v53  ;;  %v13972_v46 = vld [vmem:[#allocation125_spill] sm:$0xff]  ;;  %v13975_v63 = vld [vmem:[#allocation156_spill] sm:$0xff] }
 0x1e0   : > { %13968 = vst [vmem:[#allocation120_spill] sm:$0xff] %v8630_v0  ;;  %13969 = vst [vmem:[#allocation87_spill] sm:$0xff] %v8633_v29  ;;  %v8649_v50 = vsel %vm866_vm0, %v13973_v7, %v13972_v46  ;;  %v8655_v43 = vsel %vm866_vm0, %v13976_v9, %v13975_v63  ;;  %v13978_v0 = vld [vmem:[#allocation157_spill] sm:$0xff]  ;;  %v13981_v42 = vld [vmem:[#allocation158_spill] sm:$0xff] }
 0x1e1   : > { %13970 = vst [vmem:[#allocation121_spill] sm:$0xff] %v8636_v54  ;;  %13971 = vst [vmem:[#allocation90_spill] sm:$0xff] %v8639_v57  ;;  %v13979_v53 = vld [vmem:[#allocation9_spill] sm:$0xff]  ;;  %v8670_v7 = vld [vmem:[%s5080_s28 + $0x90] sm:$0xff] }
 0x1e2   : > { %13974 = vst [vmem:[#allocation80_spill] sm:$0xff] %v8649_v50  ;;  %13977 = vst [vmem:[#allocation122_spill] sm:$0xff] %v8655_v43  ;;  %v8661_v31 = vsel %vm866_vm0, %v13979_v53, %v13978_v0  ;;  %v13982_v33 = vld [vmem:[#allocation117_spill] sm:$0xff]  ;;  %v8673_v46 = vld [vmem:[%s5080_s28 + $0x120] sm:$0xff] }
 0x1e3   : > { %13980 = vst [vmem:[#allocation91_spill] sm:$0xff] %v8661_v31  ;;  %v8667_v51 = vsel %vm866_vm0, %v13982_v33, %v13981_v42  ;;  %13984 = vst [vmem:[#allocation111_spill] sm:$0xff] %v8670_v7  ;;  %v8676_v50 = vld [vmem:[%s5080_s28 + $0x1b0] sm:$0xff]  ;;  %v13987_v63 = vld [vmem:[#allocation131_spill] sm:$0xff] }
 0x1e4   : > { %13983 = vst [vmem:[#allocation123_spill] sm:$0xff] %v8667_v51  ;;  %13985 = vst [vmem:[#allocation92_spill] sm:$0xff] %v8673_v46  ;;  %v13988_v9 = vld [vmem:[#allocation10_spill] sm:$0xff]  ;;  %v13990_v53 = vld [vmem:[#allocation163_spill] sm:$0xff] }
 0x1e5   : > { %13986 = vst [vmem:[#allocation126_spill] sm:$0xff] %v8676_v50  ;;  %v8682_v0 = vsel %vm866_vm0, %v13988_v9, %v13987_v63  ;;  %v13991_v31 = vld [vmem:[#allocation150_spill] sm:$0xff]  ;;  %v13993_v42 = vld [vmem:[#allocation132_spill] sm:$0xff]  ;;  %v13994_v51 = vld [vmem:[#allocation119_spill] sm:$0xff] }
 0x1e6   : > { %13989 = vst [vmem:[#allocation110_spill] sm:$0xff] %v8682_v0  ;;  %v8688_v33 = vsel %vm866_vm0, %v13991_v31, %v13990_v53  ;;  %v8694_v43 = vsel %vm866_vm0, %v13994_v51, %v13993_v42  ;;  %v13996_v45 = vld [vmem:[#allocation164_spill] sm:$0xff]  ;;  %v13999_v63 = vld [vmem:[#allocation166_spill] sm:$0xff]  ;;  %v14001_v31 = vld [vmem:[#allocation139_spill] sm:$0xff] }
 0x1e7   : > { %13992 = vst [vmem:[#allocation127_spill] sm:$0xff] %v8688_v33  ;;  %13995 = vst [vmem:[#allocation99_spill] sm:$0xff] %v8694_v43  ;;  %v13997_v30 = vld [vmem:[#allocation152_spill] sm:$0xff]  ;;  %v8706_v9 = vsel %vm865_vm1, %v8606_v3, %v13999_v63  ;;  %v8712_v53 = vsel %vm865_vm1, %v8633_v29, %v14001_v31  ;;  %v14003_v51 = vld [vmem:[#allocation11_spill] sm:$0xff] }
 0x1e8   : > { %v8700_v39 = vsel %vm866_vm0, %v13997_v30, %v13996_v45  ;;  %14000 = vst [vmem:[#allocation98_spill] sm:$0xff] %v8706_v9  ;;  %14002 = vst [vmem:[#allocation129_spill] sm:$0xff] %v8712_v53  ;;  %v14004_v42 = vld [vmem:[#allocation153_spill] sm:$0xff]  ;;  %v14006_v30 = vld [vmem:[#allocation12_spill] sm:$0xff] }
 0x1e9   : > { %13998 = vst [vmem:[#allocation128_spill] sm:$0xff] %v8700_v39  ;;  %v8718_v56 = vsel %vm865_vm1, %v14004_v42, %v14003_v51  ;;  %v8724_v45 = vsel %vm865_vm1, %v8636_v54, %v14006_v30  ;;  %v4614_v63 = vld [vmem:[%s12594_s0 + $0x78] sm:$0xff]  ;;  %v14008_v31 = vld [vmem:[#allocation171_spill] sm:$0xff]  ;;  %v14010_v51 = vld [vmem:[#allocation140_spill] sm:$0xff] }
 0x1ea   : > { %14005 = vst [vmem:[#allocation104_spill] sm:$0xff] %v8718_v56  ;;  %14007 = vst [vmem:[#allocation134_spill] sm:$0xff] %v8724_v45  ;;  %vm372_vm2 = vcmp.eq.s32.totalorder %v4614_v63, 7  ;;  %v8733_v29 = vsel %vm865_vm1, %v8639_v57, %v14008_v31  ;;  %v8739_v42 = vsel %vm865_vm1, %v8670_v7, %v14010_v51  ;;  %v14012_v56 = vld [vmem:[#allocation172_spill] sm:$0xff]  ;;  %v14014_v54 = vld [vmem:[#allocation142_spill] sm:$0xff]  ;;  %v8762_v7 = vpop.permute.xlu1 %845 }
 0x1eb   : > { %14009 = vst [vmem:[#allocation105_spill] sm:$0xff] %v8733_v29  ;;  %14011 = vst [vmem:[#allocation135_spill] sm:$0xff] %v8739_v42  ;;  %v8745_v30 = vsel %vm865_vm1, %v8673_v46, %v14012_v56  ;;  %v8751_v45 = vsel %vm865_vm1, %v8676_v50, %v14014_v54  ;;  %v8754_v31 = vld [vmem:[%s5080_s28 + $0x250] sm:$0xff]  ;;  %v8757_v57 = vld [vmem:[%s5080_s28 + $0x2e0] sm:$0xff]  ;;  %v8764_v42 = vpop.permute.xlu0 %842  ;;  %vm876_vm14 = vcmp.eq.s32.totalorder %v8762_v7, 1 }
 0x1ec   : > { %14013 = vst [vmem:[#allocation106_spill] sm:$0xff] %v8745_v30  ;;  %14015 = vst [vmem:[#allocation136_spill] sm:$0xff] %v8751_v45  ;;  %v8760_v51 = vld [vmem:[%s5080_s28 + $0x370] sm:$0xff]  ;;  %v8769_v5 = vld [vmem:[%s5080_s28 + $0x400] sm:$0xff]  ;;  %vm875_vm15 = vcmp.eq.s32.totalorder %v8764_v42, 1 }
 0x1ed   : > { %14016 = vst [vmem:[#allocation108_spill] sm:$0xff] %v8757_v57  ;;  %14017 = vst [vmem:[#allocation137_spill] sm:$0xff] %v8760_v51  ;;  %v8772_v54 = vld [vmem:[%s5080_s28 + $0x10] sm:$0xff]  ;;  %v14020_v56 = vld [vmem:[#allocation178_spill] sm:$0xff] }
 0x1ee   : > { %14018 = vst [vmem:[#allocation144_spill] sm:$0xff] %v8769_v5  ;;  %14019 = vst [vmem:[#allocation145_spill] sm:$0xff] %v8772_v54  ;;  %v14021_v46 = vld [vmem:[#allocation141_spill] sm:$0xff]  ;;  %v14023_v30 = vld [vmem:[#allocation143_spill] sm:$0xff] }
 0x1ef   : > { %v8780_v45 = vsel %vm868_vm3, %v14021_v46, %v14020_v56  ;;  %v14024_v29 = vld [vmem:[#allocation130_spill] sm:$0xff]  ;;  %v14026_v53 = vld [vmem:[#allocation179_spill] sm:$0xff]  ;;  %v14030_v43 = vld [vmem:[#allocation133_spill] sm:$0xff] }
 0x1f0   : > { %14022 = vst [vmem:[#allocation116_spill] sm:$0xff] %v8780_v45  ;;  %v8786_v3 = vsel %vm868_vm3, %v14024_v29, %v14023_v30  ;;  %v14027_v50 = vld [vmem:[#allocation159_spill] sm:$0xff]  ;;  %v8801_v46 = vld [vmem:[%s5080_s28 + $0xa0] sm:$0xff]  ;;  %v8804_v56 = vld [vmem:[%s5080_s28 + $0x130] sm:$0xff] }
 0x1f1   : > { %14025 = vst [vmem:[#allocation146_spill] sm:$0xff] %v8786_v3  ;;  %v8792_v9 = vsel %vm868_vm3, %v14027_v50, %v14026_v53  ;;  %v14029_v39 = vld [vmem:[#allocation147_spill] sm:$0xff]  ;;  %14032 = vst [vmem:[#allocation125_spill] sm:$0xff] %v8801_v46  ;;  %v8807_v45 = vld [vmem:[%s5080_s28 + $0x1c0] sm:$0xff] }
 0x1f2   : > { %14028 = vst [vmem:[#allocation118_spill] sm:$0xff] %v8792_v9  ;;  %v8798_v33 = vsel %vm868_vm3, %v14030_v43, %v14029_v39  ;;  %14033 = vst [vmem:[#allocation124_spill] sm:$0xff] %v8804_v56  ;;  %v14034_v29 = vld [vmem:[#allocation184_spill] sm:$0xff]  ;;  %v14035_v30 = vld [vmem:[#allocation165_spill] sm:$0xff] }
 0x1f3   : > { %14031 = vst [vmem:[#allocation151_spill] sm:$0xff] %v8798_v33  ;;  %v8813_v3 = vsel %vm868_vm3, %v14035_v30, %v14034_v29  ;;  %v14036_v50 = vld [vmem:[#allocation185_spill] sm:$0xff]  ;;  %v14037_v53 = vld [vmem:[#allocation138_spill] sm:$0xff]  ;;  %v14038_v39 = vld [vmem:[#allocation155_spill] sm:$0xff] }
 0x1f4   : > { %v8819_v9 = vsel %vm868_vm3, %v14037_v53, %v14036_v50  ;;  %v14039_v43 = vld [vmem:[#allocation169_spill] sm:$0xff]  ;;  %v14040_v0 = vld [vmem:[#allocation186_spill] sm:$0xff]  ;;  %v14043_v50 = vld [vmem:[#allocation192_spill] sm:$0xff] }
 0x1f5   : > { %v8825_v33 = vsel %vm868_vm3, %v14039_v43, %v14038_v39  ;;  %v14041_v48 = vld [vmem:[#allocation170_spill] sm:$0xff]  ;;  %v14042_v29 = vld [vmem:[#allocation13_spill] sm:$0xff]  ;;  %v8843_v53 = vsel %vm867_vm4, %v8757_v57, %v14043_v50  ;;  %v14085_v10 = vld [vmem:[#allocation196_spill] sm:$0xff] }
 0x1f6   : > { %v8831_v40 = vsel %vm868_vm3, %v14041_v48, %v14040_v0  ;;  %v8837_v30 = vsel %vm867_vm4, %v8754_v31, %v14042_v29  ;;  %v14044_v39 = vld [vmem:[#allocation161_spill] sm:$0xff]  ;;  %v8857_v0 = vpop.permute.xlu1 %851  ;;  %v14047_v29 = vld [vmem:[#allocation168_spill] sm:$0xff]  ;;  %v14049_v57 = vld [vmem:[#allocation14_spill] sm:$0xff] }
 0x1f7   : > { %v8849_v43 = vsel %vm867_vm4, %v8760_v51, %v14044_v39  ;;  %v14045_v55 = vld [vmem:[#allocation193_spill] sm:$0xff]  ;;  %v8863_v50 = vsel %vm867_vm4, %v8772_v54, %v14047_v29  ;;  %v8869_v39 = vsel %vm867_vm4, %v8801_v46, %v14049_v57  ;;  %v14051_v51 = vld [vmem:[#allocation200_spill] sm:$0xff]  ;;  %v8883_v29 = vpop.permute.xlu0 %848  ;;  %v8889_v57 = vsel %vm870_vm5, %v7534_v4, %v7634_v59  ;;  %v14099_v20 = vld [vmem:[#allocation199_spill] sm:$0xff] }
 0x1f8   : > { %v8855_v48 = vsel %vm867_vm4, %v8769_v5, %v14045_v55  ;;  %14048 = vst [vmem:[#allocation109_spill] sm:$0xff] %v8863_v50  ;;  %14050 = vst [vmem:[#allocation157_spill] sm:$0xff] %v8869_v39  ;;  %v8875_v55 = vsel %vm867_vm4, %v8804_v56, %v14051_v51  ;;  %v14053_v5 = vld [vmem:[#allocation201_spill] sm:$0xff]  ;;  %v14056_v46 = vld [vmem:[#allocation208_spill] sm:$0xff]  ;;  %vm878_vm0 = vcmp.eq.s32.totalorder %v8857_v0, 1  ;;  %vm877_vm1 = vcmp.eq.s32.totalorder %v8883_v29, 1 }
 0x1f9   : > { %14046 = vst [vmem:[#allocation156_spill] sm:$0xff] %v8855_v48  ;;  %14052 = vst [vmem:[#allocation9_spill] sm:$0xff] %v8875_v55  ;;  %v8881_v48 = vsel %vm867_vm4, %v8807_v45, %v14053_v5  ;;  %v14057_v54 = vld [vmem:[#allocation180_spill] sm:$0xff]  ;;  %v14059_v56 = vld [vmem:[#allocation177_spill] sm:$0xff] }
 0x1fa   : > { %14054 = vst [vmem:[#allocation158_spill] sm:$0xff] %v8881_v48  ;;  %14055 = vst [vmem:[#allocation117_spill] sm:$0xff] %v8889_v57  ;;  %v8895_v51 = vsel %vm870_vm5, %v14057_v54, %v14056_v46  ;;  %v14060_v55 = vld [vmem:[#allocation148_spill] sm:$0xff]  ;;  %v14062_v5 = vld [vmem:[#allocation209_spill] sm:$0xff] }
 0x1fb   : > { %14058 = vst [vmem:[#allocation131_spill] sm:$0xff] %v8895_v51  ;;  %v8901_v38 = vsel %vm870_vm5, %v14060_v55, %v14059_v56  ;;  %v14063_v48 = vld [vmem:[#allocation181_spill] sm:$0xff]  ;;  %v14068_v54 = vld [vmem:[#allocation188_spill] sm:$0xff]  ;;  %v14069_v46 = vld [vmem:[#allocation154_spill] sm:$0xff] }
 0x1fc   : > { %14061 = vst [vmem:[#allocation10_spill] sm:$0xff] %v8901_v38  ;;  %v8907_v39 = vsel %vm870_vm5, %v14063_v48, %v14062_v5  ;;  %v14065_v4 = vld [vmem:[#allocation213_spill] sm:$0xff]  ;;  %v8919_v51 = vsel %vm870_vm5, %v14069_v46, %v14068_v54  ;;  %v14071_v56 = vld [vmem:[#allocation214_spill] sm:$0xff]  ;;  %v14072_v55 = vld [vmem:[#allocation187_spill] sm:$0xff] }
 0x1fd   : > { %14064 = vst [vmem:[#allocation163_spill] sm:$0xff] %v8907_v39  ;;  %v14066_v59 = vld [vmem:[#allocation149_spill] sm:$0xff]  ;;  %14070 = vst [vmem:[#allocation132_spill] sm:$0xff] %v8919_v51  ;;  %v8925_v38 = vsel %vm870_vm5, %v14072_v55, %v14071_v56  ;;  %v14075_v5 = vld [vmem:[#allocation160_spill] sm:$0xff] }
 0x1fe   : > { %v8913_v57 = vsel %vm870_vm5, %v14066_v59, %v14065_v4  ;;  %14073 = vst [vmem:[#allocation119_spill] sm:$0xff] %v8925_v38  ;;  %v14074_v48 = vld [vmem:[#allocation189_spill] sm:$0xff]  ;;  %v14077_v4 = vld [vmem:[#allocation219_spill] sm:$0xff]  ;;  %v14080_v46 = vld [vmem:[#allocation162_spill] sm:$0xff] }
 0x1ff   : > { %14067 = vst [vmem:[#allocation150_spill] sm:$0xff] %v8913_v57  ;;  %v8931_v39 = vsel %vm870_vm5, %v14075_v5, %v14074_v48  ;;  %v8937_v59 = vsel %vm869_vm6, %v7607_v13, %v14077_v4  ;;  %v14079_v54 = vld [vmem:[#allocation191_spill] sm:$0xff]  ;;  %v14082_v56 = vld [vmem:[#allocation220_spill] sm:$0xff]  ;;  %v14083_v55 = vld [vmem:[#allocation194_spill] sm:$0xff]  ;;  %v8957_v13 = vpop.permute.xlu1 %857 }
 0x200   : > { %14076 = vst [vmem:[#allocation164_spill] sm:$0xff] %v8931_v39  ;;  %14078 = vst [vmem:[#allocation152_spill] sm:$0xff] %v8937_v59  ;;  %v8943_v51 = vsel %vm869_vm6, %v14080_v46, %v14079_v54  ;;  %v8949_v38 = vsel %vm869_vm6, %v14083_v55, %v14082_v56  ;;  %v14086_v48 = vld [vmem:[#allocation167_spill] sm:$0xff]  ;;  %v14088_v4 = vld [vmem:[#allocation225_spill] sm:$0xff] }
 0x201   : > { %14081 = vst [vmem:[#allocation166_spill] sm:$0xff] %v8943_v51  ;;  %14084 = vst [vmem:[#allocation139_spill] sm:$0xff] %v8949_v38  ;;  %v8955_v5 = vsel %vm869_vm6, %v14086_v48, %v14085_v10  ;;  %v14089_v59 = vld [vmem:[#allocation195_spill] sm:$0xff]  ;;  %v14091_v46 = vld [vmem:[#allocation174_spill] sm:$0xff] }
 0x202   : > { %14087 = vst [vmem:[#allocation11_spill] sm:$0xff] %v8955_v5  ;;  %v8963_v54 = vsel %vm869_vm6, %v14089_v59, %v14088_v4  ;;  %v8969_v56 = vsel %vm869_vm6, %v14091_v46, %v7744_v11  ;;  %v14093_v55 = vld [vmem:[#allocation202_spill] sm:$0xff]  ;;  %v14096_v5 = vld [vmem:[#allocation173_spill] sm:$0xff]  ;;  %v8983_v59 = vpop.permute.xlu0 %854  ;;  %v14098_v4 = vmov 0   ;;  %v4615_v11 = vld [vmem:[%s12594_s0 + $0x70] sm:$0xff] }
 0x203   : > { %14090 = vst [vmem:[#allocation153_spill] sm:$0xff] %v8963_v54  ;;  %14092 = vst [vmem:[#allocation12_spill] sm:$0xff] %v8969_v56  ;;  %v8975_v10 = vsel %vm869_vm6, %v14093_v55, %v7750_v60  ;;  %v14095_v48 = vld [vmem:[#allocation226_spill] sm:$0xff]  ;;  %v1189_v54 = vsel %vm372_vm2, 1, %v14098_v4  ;;  %vm371_vm7 = vcmp.eq.s32.totalorder %v4615_v11, 7  ;;  %v14107_v11 = vld [vmem:[#allocation231_spill] sm:$0xff] }
 0x204   : > { %14094 = vst [vmem:[#allocation171_spill] sm:$0xff] %v8975_v10  ;;  %v8981_v38 = vsel %vm869_vm6, %v14096_v5, %v14095_v48  ;;  %1238 = vperm.xlu1 %4613, %v1189_v54   ;;  %v1188_v60 = vsel %vm371_vm7, 1, %v14098_v4  ;;  %v14100_v5 = vld [vmem:[#allocation15_spill] sm:$0xff]  ;;  %v14102_v55 = vld [vmem:[#allocation230_spill] sm:$0xff]  ;;  %v14110_v39 = vld [vmem:[#allocation176_spill] sm:$0xff]  ;;  %vm880_vm2 = vcmp.eq.s32.totalorder %v8957_v13, 1 }
 0x205   : > { %14097 = vst [vmem:[#allocation140_spill] sm:$0xff] %v8981_v38  ;;  %v8995_v46 = vsel %vm872_vm8, %v14100_v5, %v14099_v20  ;;  %v14103_v48 = vld [vmem:[#allocation203_spill] sm:$0xff]  ;;  %v14105_v38 = vld [vmem:[#allocation204_spill] sm:$0xff]  ;;  %1235 = vperm.xlu0 %4612, %v1188_v60   ;;  %v14112_v50 = vld [vmem:[#allocation17_spill] sm:$0xff]  ;;  %vm879_vm3 = vcmp.eq.s32.totalorder %v8983_v59, 1 }
 0x206   : > { %14101 = vst [vmem:[#allocation172_spill] sm:$0xff] %v8995_v46  ;;  %v8999_v63 = vsel %vm872_vm8, %v14103_v48, %v14102_v55  ;;  %v14106_v10 = vld [vmem:[#allocation175_spill] sm:$0xff]  ;;  %v14113_v20 = vld [vmem:[#allocation182_spill] sm:$0xff]  ;;  %v14115_v46 = vld [vmem:[#allocation237_spill] sm:$0xff]  ;;  %v9396_v59 = vsel %vm879_vm3, %v8332_v14, %v8460_v16 }
 0x207   : > { %14104 = vst [vmem:[#allocation142_spill] sm:$0xff] %v8999_v63  ;;  %v9003_v56 = vsel %vm872_vm8, %v14106_v10, %v14105_v38  ;;  %v14108_v32 = vld [vmem:[#allocation207_spill] sm:$0xff]  ;;  %v9015_v5 = vsel %vm872_vm8, %v14113_v20, %v14112_v50  ;;  %v14116_v55 = vld [vmem:[#allocation210_spill] sm:$0xff]  ;;  %v9021_v63 = vpop.permute.xlu1 %863  ;;  %v14145_v44 = vld [vmem:[#allocation216_spill] sm:$0xff] }
 0x208   : > { %v9007_v51 = vsel %vm872_vm8, %v14108_v32, %v14107_v11  ;;  %v14109_v54 = vld [vmem:[#allocation211_spill] sm:$0xff]  ;;  %14114 = vst [vmem:[#allocation141_spill] sm:$0xff] %v9015_v5  ;;  %v9019_v48 = vsel %vm872_vm8, %v14116_v55, %v14115_v46  ;;  %v14121_v11 = vld [vmem:[#allocation18_spill] sm:$0xff]  ;;  %v14122_v32 = vld [vmem:[#allocation228_spill] sm:$0xff]  ;;  %vm882_vm4 = vcmp.eq.s32.totalorder %v9021_v63, 1 }
 0x209   : > { %v9011_v57 = vsel %vm872_vm8, %v14110_v39, %v14109_v54  ;;  %14117 = vst [vmem:[#allocation143_spill] sm:$0xff] %v9019_v48  ;;  %v14118_v38 = vld [vmem:[#allocation215_spill] sm:$0xff]  ;;  %v9031_v39 = vsel %vm871_vm9, %v14122_v32, %v14121_v11  ;;  %v14124_v54 = vld [vmem:[#allocation242_spill] sm:$0xff]  ;;  %v14127_v46 = vld [vmem:[#allocation217_spill] sm:$0xff] }
 0x20a   : > { %14111 = vst [vmem:[#allocation178_spill] sm:$0xff] %v9011_v57  ;;  %v14119_v10 = vld [vmem:[#allocation183_spill] sm:$0xff]  ;;  %14123 = vst [vmem:[#allocation179_spill] sm:$0xff] %v9031_v39  ;;  %v14125_v57 = vld [vmem:[#allocation218_spill] sm:$0xff] }
 0x20b   : > { %v9025_v60 = vsel %vm872_vm8, %v14119_v10, %v14118_v38  ;;  %v9037_v50 = vsel %vm871_vm9, %v14125_v57, %v14124_v54  ;;  %v14128_v20 = vld [vmem:[#allocation190_spill] sm:$0xff]  ;;  %v9045_v38 = vpop.permute.xlu0 %860  ;;  %v14130_v10 = vld [vmem:[#allocation243_spill] sm:$0xff]  ;;  %v14133_v32 = vld [vmem:[#allocation224_spill] sm:$0xff]  ;;  %14278 = vst [vmem:[#allocation173_spill] sm:$0xff] %v9396_v59 }
 0x20c   : > { %14120 = vst [vmem:[#allocation130_spill] sm:$0xff] %v9025_v60  ;;  %14126 = vst [vmem:[#allocation159_spill] sm:$0xff] %v9037_v50  ;;  %v9043_v55 = vsel %vm871_vm9, %v14128_v20, %v14127_v46  ;;  %v14131_v60 = vld [vmem:[#allocation221_spill] sm:$0xff]  ;;  %v14136_v54 = vld [vmem:[#allocation250_spill] sm:$0xff]  ;;  %vm881_vm5 = vcmp.eq.s32.totalorder %v9045_v38, 1 }
 0x20d   : > { %14129 = vst [vmem:[#allocation147_spill] sm:$0xff] %v9043_v55  ;;  %v9051_v11 = vsel %vm871_vm9, %v14131_v60, %v14130_v10  ;;  %v14134_v39 = vld [vmem:[#allocation197_spill] sm:$0xff]  ;;  %v14137_v50 = vld [vmem:[#allocation16_spill] sm:$0xff]  ;;  %v14139_v20 = vld [vmem:[#allocation251_spill] sm:$0xff] }
 0x20e   : > { %14132 = vst [vmem:[#allocation133_spill] sm:$0xff] %v9051_v11  ;;  %v9057_v57 = vsel %vm871_vm9, %v14134_v39, %v14133_v32  ;;  %v9063_v46 = vsel %vm871_vm9, %v14137_v50, %v14136_v54  ;;  %v14140_v55 = vld [vmem:[#allocation227_spill] sm:$0xff]  ;;  %v14142_v60 = vld [vmem:[#allocation229_spill] sm:$0xff]  ;;  %v14143_v10 = vld [vmem:[#allocation198_spill] sm:$0xff]  ;;  %v9088_v54 = vsel %vm874_vm12, %v14145_v44, %v7939_v22 }
 0x20f   : > { %14135 = vst [vmem:[#allocation184_spill] sm:$0xff] %v9057_v57  ;;  %14138 = vst [vmem:[#allocation165_spill] sm:$0xff] %v9063_v46  ;;  %v9069_v48 = vsel %vm871_vm9, %v14140_v55, %v14139_v20  ;;  %v9075_v11 = vsel %vm871_vm9, %v14143_v10, %v14142_v60  ;;  %v4616_v39 = vld [vmem:[%s12594_s0 + $0x88] sm:$0xff]  ;;  %v4617_v50 = vld [vmem:[%s12594_s0 + $0x80] sm:$0xff]  ;;  %v9109_v44 = vpop.permute.xlu0 %939 }
 0x210   : > { %14141 = vst [vmem:[#allocation185_spill] sm:$0xff] %v9069_v48  ;;  %14144 = vst [vmem:[#allocation138_spill] sm:$0xff] %v9075_v11  ;;  %vm374_vm10 = vcmp.eq.s32.totalorder %v4616_v39, 7  ;;  %vm373_vm11 = vcmp.eq.s32.totalorder %v4617_v50, 7  ;;  %v14146_v20 = vld [vmem:[#allocation255_spill] sm:$0xff]  ;;  %v14147_v60 = vld [vmem:[#allocation205_spill] sm:$0xff]  ;;  %v9094_v39 = vpop.permute.xlu1 %942 }
 0x211   : > { %v1191_v55 = vsel %vm374_vm10, 1, %v14098_v4  ;;  %v1190_v32 = vsel %vm373_vm11, 1, %v14098_v4  ;;  %v9092_v10 = vsel %vm874_vm12, %v14147_v60, %v14146_v20  ;;  %v14149_v11 = vld [vmem:[#allocation246_spill] sm:$0xff]  ;;  %v14150_v50 = vld [vmem:[#allocation232_spill] sm:$0xff]  ;;  %v14156_v5 = vld [vmem:[#allocation233_spill] sm:$0xff]  ;;  %vm993_vm6 = vcmp.eq.s32.totalorder %v9094_v39, 1 }
 0x212   : > { %14148 = vst [vmem:[#allocation155_spill] sm:$0xff] %v9092_v10  ;;  %1244 = vperm.xlu1 %4613, %v1191_v55   ;;  %1241 = vperm.xlu0 %4612, %v1190_v32   ;;  %v9098_v48 = vsel %vm874_vm12, %v14150_v50, %v14149_v11  ;;  %v14152_v37 = vld [vmem:[#allocation256_spill] sm:$0xff]  ;;  %v14153_v46 = vld [vmem:[#allocation206_spill] sm:$0xff]  ;;  %v14158_v20 = vld [vmem:[#allocation249_spill] sm:$0xff]  ;;  %vm992_vm7 = vcmp.eq.s32.totalorder %v9109_v44, 1 }
 0x213   : > { %14151 = vst [vmem:[#allocation169_spill] sm:$0xff] %v9098_v48  ;;  %v9102_v57 = vsel %vm874_vm12, %v14153_v46, %v14152_v37  ;;  %v14155_v4 = vld [vmem:[#allocation248_spill] sm:$0xff]  ;;  %v14159_v60 = vld [vmem:[#allocation238_spill] sm:$0xff]  ;;  %v14161_v32 = vld [vmem:[#allocation253_spill] sm:$0xff] }
 0x214   : > { %14154 = vst [vmem:[#allocation186_spill] sm:$0xff] %v9102_v57  ;;  %v9106_v22 = vsel %vm874_vm12, %v14156_v5, %v14155_v4  ;;  %v9113_v55 = vsel %vm874_vm12, %v14159_v60, %v14158_v20  ;;  %v14162_v10 = vld [vmem:[#allocation212_spill] sm:$0xff]  ;;  %v14163_v50 = vld [vmem:[#allocation259_spill] sm:$0xff]  ;;  %v9125_v5 = vsel %vm873_vm13, %v7915_v2, %v8009_v28  ;;  %v14167_v17 = vld [vmem:[#allocation222_spill] sm:$0xff] }
 0x215   : > { %14157 = vst [vmem:[#allocation170_spill] sm:$0xff] %v9106_v22  ;;  %14160 = vst [vmem:[#allocation13_spill] sm:$0xff] %v9113_v55  ;;  %v9117_v11 = vsel %vm874_vm12, %v14162_v10, %v14161_v32  ;;  %v14164_v48 = vld [vmem:[#allocation239_spill] sm:$0xff]  ;;  %v14169_v22 = vld [vmem:[#allocation268_spill] sm:$0xff] }
 0x216   : > { %v9121_v46 = vsel %vm874_vm12, %v14164_v48, %v14163_v50  ;;  %v14166_v37 = vld [vmem:[#allocation267_spill] sm:$0xff]  ;;  %v14170_v57 = vld [vmem:[#allocation244_spill] sm:$0xff]  ;;  %v14171_v60 = vld [vmem:[#allocation22_spill] sm:$0xff] }
 0x217   : > { %14165 = vst [vmem:[#allocation192_spill] sm:$0xff] %v9121_v46  ;;  %v9129_v4 = vsel %vm873_vm13, %v14167_v17, %v14166_v37  ;;  %v9133_v20 = vsel %vm873_vm13, %v14170_v57, %v14169_v22  ;;  %v14172_v55 = vld [vmem:[#allocation223_spill] sm:$0xff]  ;;  %v14174_v32 = vld [vmem:[#allocation245_spill] sm:$0xff]  ;;  %v14176_v50 = vld [vmem:[#allocation52_spill] sm:$0xff]  ;;  %v9156_v22 = vpop.permute.xlu1 %948 }
 0x218   : > { %14168 = vst [vmem:[#allocation161_spill] sm:$0xff] %v9129_v4  ;;  %v9137_v10 = vsel %vm873_vm13, %v14172_v55, %v14171_v60  ;;  %v9141_v48 = vsel %vm873_vm13, %v14174_v32, %v8043_v23  ;;  %v14177_v46 = vld [vmem:[#allocation252_spill] sm:$0xff]  ;;  %v14179_v28 = vld [vmem:[#allocation234_spill] sm:$0xff]  ;;  %v14181_v17 = vld [vmem:[#allocation257_spill] sm:$0xff]  ;;  %vm995_vm8 = vcmp.eq.s32.totalorder %v9156_v22, 1 }
 0x219   : > { %14173 = vst [vmem:[#allocation193_spill] sm:$0xff] %v9137_v10  ;;  %14175 = vst [vmem:[#allocation168_spill] sm:$0xff] %v9141_v48  ;;  %v9145_v2 = vsel %vm873_vm13, %v14177_v46, %v14176_v50  ;;  %v9149_v37 = vsel %vm873_vm13, %v14179_v28, %v8055_v18  ;;  %v14182_v4 = vld [vmem:[#allocation235_spill] sm:$0xff]  ;;  %v14184_v55 = vld [vmem:[#allocation261_spill] sm:$0xff] }
 0x21a   : > { %14178 = vst [vmem:[#allocation14_spill] sm:$0xff] %v9145_v2  ;;  %14180 = vst [vmem:[#allocation200_spill] sm:$0xff] %v9149_v37  ;;  %v9153_v57 = vsel %vm873_vm13, %v14182_v4, %v14181_v17  ;;  %v14185_v60 = vld [vmem:[#allocation254_spill] sm:$0xff]  ;;  %v14188_v48 = vld [vmem:[#allocation236_spill] sm:$0xff]  ;;  %v9174_v17 = vpop.permute.xlu0 %945 }
 0x21b   : > { %14183 = vst [vmem:[#allocation201_spill] sm:$0xff] %v9153_v57  ;;  %v9160_v23 = vsel %vm876_vm14, %v14185_v60, %v14184_v55  ;;  %v14187_v32 = vld [vmem:[#allocation54_spill] sm:$0xff]  ;;  %v14191_v2 = vld [vmem:[#allocation240_spill] sm:$0xff]  ;;  %v14193_v28 = vld [vmem:[#allocation55_spill] sm:$0xff]  ;;  %vm994_vm9 = vcmp.eq.s32.totalorder %v9174_v17, 1 }
 0x21c   : > { %14186 = vst [vmem:[#allocation208_spill] sm:$0xff] %v9160_v23  ;;  %v9164_v46 = vsel %vm876_vm14, %v14188_v48, %v14187_v32  ;;  %v14190_v50 = vld [vmem:[#allocation262_spill] sm:$0xff]  ;;  %v14194_v37 = vld [vmem:[#allocation241_spill] sm:$0xff]  ;;  %v14196_v7 = vld [vmem:[#allocation51_spill] sm:$0xff] }
 0x21d   : > { %14189 = vst [vmem:[#allocation180_spill] sm:$0xff] %v9164_v46  ;;  %v9168_v18 = vsel %vm876_vm14, %v14191_v2, %v14190_v50  ;;  %v9172_v4 = vsel %vm876_vm14, %v14194_v37, %v14193_v28  ;;  %v14197_v57 = vld [vmem:[#allocation19_spill] sm:$0xff]  ;;  %v14202_v48 = vld [vmem:[#allocation36_spill] sm:$0xff]  ;;  %v14206_v50 = vld [vmem:[#allocation258_spill] sm:$0xff] }
 0x21e   : > { %14192 = vst [vmem:[#allocation177_spill] sm:$0xff] %v9168_v18  ;;  %14195 = vst [vmem:[#allocation148_spill] sm:$0xff] %v9172_v4  ;;  %v9178_v10 = vsel %vm876_vm14, %v14197_v57, %v14196_v7  ;;  %v14199_v55 = vld [vmem:[#allocation59_spill] sm:$0xff]  ;;  %v14203_v32 = vld [vmem:[#allocation20_spill] sm:$0xff] }
 0x21f   : > { %14198 = vst [vmem:[#allocation209_spill] sm:$0xff] %v9178_v10  ;;  %v14200_v60 = vld [vmem:[#allocation247_spill] sm:$0xff]  ;;  %v9186_v46 = vsel %vm876_vm14, %v14203_v32, %v14202_v48  ;;  %v14208_v37 = vld [vmem:[#allocation270_spill] sm:$0xff]  ;;  %v14211_v7 = vld [vmem:[#allocation37_spill] sm:$0xff] }
 0x220   : > { %v9182_v23 = vsel %vm876_vm14, %v14200_v60, %v14199_v55  ;;  %14204 = vst [vmem:[#allocation213_spill] sm:$0xff] %v9186_v46  ;;  %v14205_v2 = vld [vmem:[#allocation23_spill] sm:$0xff]  ;;  %v14209_v57 = vld [vmem:[#allocation2_spill] sm:$0xff]  ;;  %v14215_v32 = vld [vmem:[#allocation21_spill] sm:$0xff]  ;;  %v9212_v46 = vpop.permute.xlu1 %954 }
 0x221   : > { %14201 = vst [vmem:[#allocation181_spill] sm:$0xff] %v9182_v23  ;;  %v9190_v18 = vsel %vm876_vm14, %v14206_v50, %v14205_v2  ;;  %v9198_v28 = vsel %vm875_vm15, %v14209_v57, %v14208_v37  ;;  %v14212_v55 = vld [vmem:[#allocation263_spill] sm:$0xff]  ;;  %v14218_v42 = vld [vmem:[#allocation269_spill] sm:$0xff]  ;;  %v14220_v10 = vld [vmem:[#allocation266_spill] sm:$0xff]  ;;  %vm997_vm10 = vcmp.eq.s32.totalorder %v9212_v46, 1 }
 0x222   : > { %14207 = vst [vmem:[#allocation149_spill] sm:$0xff] %v9190_v18  ;;  %14210 = vst [vmem:[#allocation188_spill] sm:$0xff] %v9198_v28  ;;  %v9202_v60 = vsel %vm875_vm15, %v14212_v55, %v14211_v7  ;;  %v14214_v48 = vld [vmem:[#allocation271_spill] sm:$0xff]  ;;  %v14221_v37 = vld [vmem:[#allocation25_spill] sm:$0xff] }
 0x223   : > { %14213 = vst [vmem:[#allocation154_spill] sm:$0xff] %v9202_v60  ;;  %v9206_v2 = vsel %vm875_vm15, %v14215_v32, %v14214_v48  ;;  %v14217_v50 = vld [vmem:[#allocation3_spill] sm:$0xff]  ;;  %v14222_v57 = vld [vmem:[#allocation50_spill] sm:$0xff]  ;;  %v14224_v55 = vld [vmem:[#allocation53_spill] sm:$0xff] }
 0x224   : > { %14216 = vst [vmem:[#allocation214_spill] sm:$0xff] %v9206_v2  ;;  %v9210_v18 = vsel %vm875_vm15, %v14218_v42, %v14217_v50  ;;  %v14219_v23 = vld [vmem:[#allocation35_spill] sm:$0xff]  ;;  %v9220_v28 = vsel %vm875_vm15, %v14222_v57, %v14221_v37  ;;  %v14223_v7 = vld [vmem:[#allocation66_spill] sm:$0xff]  ;;  %v14225_v48 = vld [vmem:[#allocation45_spill] sm:$0xff]  ;;  %v9230_v50 = vpop.permute.xlu0 %951 }
 0x225   : > { %v9216_v4 = vsel %vm875_vm15, %v14220_v10, %v14219_v23  ;;  %v9224_v60 = vsel %vm875_vm15, %v14224_v55, %v14223_v7  ;;  %v14226_v32 = vld [vmem:[#allocation260_spill] sm:$0xff]  ;;  %v14227_v42 = vld [vmem:[#allocation33_spill] sm:$0xff]  ;;  %v14246_v0 = vld [vmem:[#allocation82_spill] sm:$0xff]  ;;  %vm996_vm11 = vcmp.eq.s32.totalorder %v9230_v50, 1 }
 0x226   : > { %v9228_v2 = vsel %vm875_vm15, %v14226_v32, %v14225_v48  ;;  %v9236_v10 = vsel %vm878_vm0, %v8143_v49, %v14227_v42  ;;  %v14228_v23 = vld [vmem:[#allocation264_spill] sm:$0xff]  ;;  %v14230_v55 = vld [vmem:[#allocation265_spill] sm:$0xff]  ;;  %v14232_v49 = vld [vmem:[#allocation58_spill] sm:$0xff] }
 0x227   : > { %v9242_v37 = vsel %vm878_vm0, %v14228_v23, %v8246_v25  ;;  %v14229_v57 = vld [vmem:[#allocation56_spill] sm:$0xff]  ;;  %v9254_v48 = vsel %vm878_vm0, %v14230_v55, %v8258_v36  ;;  %v9260_v32 = vsel %vm878_vm0, %v14232_v49, %v8277_v8  ;;  %v14235_v23 = vld [vmem:[#allocation57_spill] sm:$0xff]  ;;  %v9284_v8 = vsel %vm877_vm1, %v8220_v15, %v8311_v27  ;;  %v9304_v15 = vpop.permute.xlu1 %960  ;;  %v14249_v27 = vld [vmem:[#allocation38_spill] sm:$0xff] }
 0x228   : > { %v9248_v7 = vsel %vm878_vm0, %v14229_v57, %v8252_v26  ;;  %14231 = vst [vmem:[#allocation187_spill] sm:$0xff] %v9254_v48  ;;  %v14233_v25 = vld [vmem:[#allocation24_spill] sm:$0xff]  ;;  %v14234_v26 = vld [vmem:[#allocation43_spill] sm:$0xff]  ;;  %14239 = vst [vmem:[#allocation160_spill] sm:$0xff] %v9284_v8  ;;  %vm999_vm12 = vcmp.eq.s32.totalorder %v9304_v15, 1 }
 0x229   : > { %v9266_v42 = vsel %vm878_vm0, %v14233_v25, %v8283_v41  ;;  %v9272_v57 = vsel %vm878_vm0, %v14235_v23, %v14234_v26  ;;  %v14237_v36 = vld [vmem:[#allocation44_spill] sm:$0xff]  ;;  %v14240_v41 = vld [vmem:[#allocation81_spill] sm:$0xff]  ;;  %v14243_v26 = vld [vmem:[#allocation27_spill] sm:$0xff] }
 0x22a   : > { %14236 = vst [vmem:[#allocation189_spill] sm:$0xff] %v9272_v57  ;;  %v14238_v55 = vld [vmem:[#allocation64_spill] sm:$0xff]  ;;  %v14244_v23 = vld [vmem:[#allocation65_spill] sm:$0xff]  ;;  %v14288_v16 = vld [vmem:[#allocation63_spill] sm:$0xff] }
 0x22b   : > { %v9278_v48 = vsel %vm878_vm0, %v14238_v55, %v14237_v36  ;;  %v14241_v49 = vld [vmem:[#allocation272_spill] sm:$0xff]  ;;  %v9296_v57 = vsel %vm877_vm1, %v14244_v23, %v14243_v26  ;;  %v14276_v13 = vld [vmem:[#allocation49_spill] sm:$0xff]  ;;  %v9612_v39 = vld [vmem:[%s5080_s28 + $0x408] sm:$0xff] }
 0x22c   : > { %v9290_v25 = vsel %vm877_vm1, %v14241_v49, %v14240_v41  ;;  %14245 = vst [vmem:[#allocation191_spill] sm:$0xff] %v9296_v57  ;;  %v14247_v36 = vld [vmem:[#allocation60_spill] sm:$0xff]  ;;  %v9310_v41 = vsel %vm877_vm1, %v14249_v27, %v8345_v47  ;;  %v14253_v57 = vld [vmem:[#allocation46_spill] sm:$0xff]  ;;  %v9330_v47 = vpop.permute.xlu0 %957  ;;  %v14256_v27 = vld [vmem:[#allocation89_spill] sm:$0xff] }
 0x22d   : > { %14242 = vst [vmem:[#allocation219_spill] sm:$0xff] %v9290_v25  ;;  %v9302_v55 = vsel %vm877_vm1, %v14247_v36, %v14246_v0  ;;  %v14250_v49 = vld [vmem:[#allocation28_spill] sm:$0xff]  ;;  %v14251_v25 = vld [vmem:[#allocation67_spill] sm:$0xff]  ;;  %v14254_v36 = vld [vmem:[#allocation62_spill] sm:$0xff]  ;;  %vm998_vm13 = vcmp.eq.s32.totalorder %v9330_v47, 1 }
 0x22e   : > { %14248 = vst [vmem:[#allocation162_spill] sm:$0xff] %v9302_v55  ;;  %v9316_v26 = vsel %vm877_vm1, %v14251_v25, %v14250_v49  ;;  %v14252_v23 = vld [vmem:[#allocation88_spill] sm:$0xff]  ;;  %v14255_v55 = vld [vmem:[#allocation26_spill] sm:$0xff]  ;;  %v9336_v25 = vsel %vm880_vm2, %v8301_v19, %v8378_v52  ;;  %v14257_v49 = vld [vmem:[#allocation71_spill] sm:$0xff] }
 0x22f   : > { %v9322_v0 = vsel %vm877_vm1, %v14253_v57, %v14252_v23  ;;  %v9328_v8 = vsel %vm877_vm1, %v14255_v55, %v14254_v36  ;;  %v9342_v57 = vsel %vm880_vm2, %v14257_v49, %v14256_v27  ;;  %v14259_v23 = vld [vmem:[#allocation47_spill] sm:$0xff]  ;;  %v14261_v55 = vld [vmem:[#allocation4_spill] sm:$0xff]  ;;  %v14263_v19 = vld [vmem:[#allocation34_spill] sm:$0xff]  ;;  %14366 = vst [vmem:[#allocation238_spill] sm:$0xff] %v9612_v39 }
 0x230   : > { %14258 = vst [vmem:[#allocation220_spill] sm:$0xff] %v9342_v57  ;;  %v9348_v29 = vsel %vm880_vm2, %v14259_v23, %v8390_v21  ;;  %v9354_v36 = vsel %vm880_vm2, %v14261_v55, %v8396_v35  ;;  %v9360_v52 = vsel %vm880_vm2, %v14263_v19, %v8415_v34  ;;  %v14265_v27 = vld [vmem:[#allocation70_spill] sm:$0xff]  ;;  %v14266_v49 = vld [vmem:[#allocation41_spill] sm:$0xff]  ;;  %v14272_v55 = vld [vmem:[#allocation48_spill] sm:$0xff]  ;;  %v9384_v34 = vpop.permute.xlu1 %966 }
 0x231   : > { %14260 = vst [vmem:[#allocation194_spill] sm:$0xff] %v9348_v29  ;;  %14262 = vst [vmem:[#allocation196_spill] sm:$0xff] %v9354_v36  ;;  %v9366_v57 = vsel %vm880_vm2, %v14266_v49, %v14265_v27  ;;  %v14268_v21 = vld [vmem:[#allocation29_spill] sm:$0xff]  ;;  %v14269_v23 = vld [vmem:[#allocation42_spill] sm:$0xff]  ;;  %v9392_v49 = vsel %vm879_vm3, %v14276_v13, %v8454_v24  ;;  %vm1001_vm14 = vcmp.eq.s32.totalorder %v9384_v34, 1 }
 0x232   : > { %14264 = vst [vmem:[#allocation167_spill] sm:$0xff] %v9360_v52  ;;  %14267 = vst [vmem:[#allocation225_spill] sm:$0xff] %v9366_v57  ;;  %v9372_v29 = vsel %vm880_vm2, %v14269_v23, %v14268_v21  ;;  %v14271_v35 = vld [vmem:[#allocation30_spill] sm:$0xff]  ;;  %v14274_v19 = vld [vmem:[#allocation95_spill] sm:$0xff] }
 0x233   : > { %14270 = vst [vmem:[#allocation195_spill] sm:$0xff] %v9372_v29  ;;  %v9378_v36 = vsel %vm880_vm2, %v14272_v55, %v14271_v35  ;;  %v9388_v27 = vsel %vm879_vm3, %v8399_v62, %v14274_v19  ;;  %14277 = vst [vmem:[#allocation226_spill] sm:$0xff] %v9392_v49  ;;  %v14279_v21 = vld [vmem:[#allocation83_spill] sm:$0xff]  ;;  %v9402_v35 = vpop.permute.xlu0 %963  ;;  %v14281_v55 = vld [vmem:[#allocation72_spill] sm:$0xff] }
 0x234   : > { %14273 = vst [vmem:[#allocation174_spill] sm:$0xff] %v9378_v36  ;;  %14275 = vst [vmem:[#allocation202_spill] sm:$0xff] %v9388_v27  ;;  %v9400_v23 = vsel %vm879_vm3, %v14279_v21, %v8466_v12  ;;  %v14282_v36 = vld [vmem:[#allocation61_spill] sm:$0xff]  ;;  %v14284_v19 = vld [vmem:[#allocation100_spill] sm:$0xff]  ;;  %vm1000_vm15 = vcmp.eq.s32.totalorder %v9402_v35, 1 }
 0x235   : > { %14280 = vst [vmem:[#allocation199_spill] sm:$0xff] %v9400_v23  ;;  %v9406_v62 = vsel %vm879_vm3, %v14282_v36, %v14281_v55  ;;  %v14285_v27 = vld [vmem:[#allocation5_spill] sm:$0xff]  ;;  %v14287_v13 = vld [vmem:[#allocation74_spill] sm:$0xff]  ;;  %v14291_v12 = vld [vmem:[#allocation68_spill] sm:$0xff]  ;;  %v9424_v23 = vsel %vm882_vm4, %v8475_v58, %v8528_v61 }
 0x236   : > { %14283 = vst [vmem:[#allocation15_spill] sm:$0xff] %v9406_v62  ;;  %v9410_v24 = vsel %vm879_vm3, %v14285_v27, %v14284_v19  ;;  %v9414_v14 = vsel %vm879_vm3, %v14288_v16, %v14287_v13  ;;  %v14290_v59 = vld [vmem:[#allocation101_spill] sm:$0xff]  ;;  %14293 = vst [vmem:[#allocation175_spill] sm:$0xff] %v9424_v23  ;;  %v14299_v13 = vld [vmem:[#allocation6_spill] sm:$0xff] }
 0x237   : > { %14286 = vst [vmem:[#allocation230_spill] sm:$0xff] %v9410_v24  ;;  %14289 = vst [vmem:[#allocation203_spill] sm:$0xff] %v9414_v14  ;;  %v9418_v21 = vsel %vm879_vm3, %v14291_v12, %v14290_v59  ;;  %v14294_v36 = vld [vmem:[#allocation69_spill] sm:$0xff]  ;;  %v9448_v58 = vld [vmem:[%s5080_s28 + $0x248] sm:$0xff] }
 0x238   : > { %14292 = vst [vmem:[#allocation204_spill] sm:$0xff] %v9418_v21  ;;  %v9430_v27 = vsel %vm882_vm4, %v14294_v36, %v8534_v1  ;;  %v14296_v55 = vld [vmem:[#allocation93_spill] sm:$0xff]  ;;  %14302 = vst [vmem:[#allocation17_spill] sm:$0xff] %v9448_v58  ;;  %v14303_v1 = vld [vmem:[#allocation7_spill] sm:$0xff] }
 0x239   : > { %14295 = vst [vmem:[#allocation231_spill] sm:$0xff] %v9430_v27  ;;  %v9436_v19 = vsel %vm882_vm4, %v14296_v55, %v8540_v6  ;;  %v14298_v59 = vld [vmem:[#allocation77_spill] sm:$0xff]  ;;  %v14304_v12 = vld [vmem:[#allocation94_spill] sm:$0xff]  ;;  %v14306_v6 = vld [vmem:[#allocation112_spill] sm:$0xff] }
 0x23a   : > { %14297 = vst [vmem:[#allocation207_spill] sm:$0xff] %v9436_v19  ;;  %v9442_v16 = vsel %vm882_vm4, %v14299_v13, %v14298_v59  ;;  %v9445_v61 = vld [vmem:[%s5080_s28 + $0x1b8] sm:$0xff]  ;;  %v9454_v36 = vsel %vm882_vm4, %v14304_v12, %v14303_v1  ;;  %v14307_v55 = vld [vmem:[#allocation79_spill] sm:$0xff]  ;;  %v14313_v23 = vld [vmem:[#allocation96_spill] sm:$0xff] }
 0x23b   : > { %14300 = vst [vmem:[#allocation211_spill] sm:$0xff] %v9442_v16  ;;  %14301 = vst [vmem:[#allocation176_spill] sm:$0xff] %v9445_v61  ;;  %v9460_v19 = vsel %vm882_vm4, %v14307_v55, %v14306_v6  ;;  %v14309_v59 = vld [vmem:[#allocation97_spill] sm:$0xff]  ;;  %v9478_v12 = vld [vmem:[%s5080_s28 + $0x368] sm:$0xff]  ;;  %v9483_v6 = vpop.permute.xlu1 %972 }
 0x23c   : > { %14305 = vst [vmem:[#allocation182_spill] sm:$0xff] %v9454_v36  ;;  %14308 = vst [vmem:[#allocation237_spill] sm:$0xff] %v9460_v19  ;;  %v14310_v13 = vld [vmem:[#allocation73_spill] sm:$0xff]  ;;  %v14319_v19 = vld [vmem:[#allocation78_spill] sm:$0xff]  ;;  %vm1003_vm0 = vcmp.eq.s32.totalorder %v9483_v6, 1 }
 0x23d   : > { %v9466_v16 = vsel %vm882_vm4, %v14310_v13, %v14309_v59  ;;  %v14312_v27 = vld [vmem:[#allocation113_spill] sm:$0xff]  ;;  %14316 = vst [vmem:[#allocation18_spill] sm:$0xff] %v9478_v12  ;;  %v14321_v13 = vld [vmem:[#allocation114_spill] sm:$0xff]  ;;  %v14327_v14 = vld [vmem:[#allocation84_spill] sm:$0xff] }
 0x23e   : > { %14311 = vst [vmem:[#allocation210_spill] sm:$0xff] %v9466_v16  ;;  %v9472_v21 = vsel %vm882_vm4, %v14313_v23, %v14312_v27  ;;  %v9475_v1 = vld [vmem:[%s5080_s28 + $0x2d8] sm:$0xff]  ;;  %v14322_v16 = vld [vmem:[#allocation75_spill] sm:$0xff]  ;;  %v14328_v24 = vld [vmem:[#allocation102_spill] sm:$0xff] }
 0x23f   : > { %14314 = vst [vmem:[#allocation215_spill] sm:$0xff] %v9472_v21  ;;  %14315 = vst [vmem:[#allocation183_spill] sm:$0xff] %v9475_v1  ;;  %v9481_v36 = vld [vmem:[%s5080_s28 + $0x3f8] sm:$0xff]  ;;  %v9495_v63 = vsel %vm881_vm5, %v14322_v16, %v14321_v13  ;;  %v14324_v23 = vld [vmem:[#allocation39_spill] sm:$0xff]  ;;  %v9507_v62 = vsel %vm881_vm5, %v14328_v24, %v14327_v14  ;;  %v9518_v16 = vpop.permute.xlu0 %969 }
 0x240   : > { %14317 = vst [vmem:[#allocation228_spill] sm:$0xff] %v9481_v36  ;;  %v14318_v55 = vld [vmem:[#allocation85_spill] sm:$0xff]  ;;  %14323 = vst [vmem:[#allocation218_spill] sm:$0xff] %v9495_v63  ;;  %v14325_v27 = vld [vmem:[#allocation31_spill] sm:$0xff]  ;;  %vm1002_vm1 = vcmp.eq.s32.totalorder %v9518_v16, 1 }
 0x241   : > { %v9489_v59 = vsel %vm881_vm5, %v14319_v19, %v14318_v55  ;;  %v9501_v21 = vsel %vm881_vm5, %v14325_v27, %v14324_v23  ;;  %14329 = vst [vmem:[#allocation190_spill] sm:$0xff] %v9507_v62  ;;  %v9510_v19 = vld [vmem:[%s5080_s28 + $0x8] sm:$0xff]  ;;  %v9513_v55 = vld [vmem:[%s5080_s28 + $0x98] sm:$0xff]  ;;  %v14333_v13 = vld [vmem:[#allocation86_spill] sm:$0xff] }
 0x242   : > { %14320 = vst [vmem:[#allocation242_spill] sm:$0xff] %v9489_v59  ;;  %14326 = vst [vmem:[#allocation217_spill] sm:$0xff] %v9501_v21  ;;  %v9516_v59 = vld [vmem:[%s5080_s28 + $0x128] sm:$0xff]  ;;  %v14334_v63 = vld [vmem:[#allocation76_spill] sm:$0xff] }
 0x243   : > { %14330 = vst [vmem:[#allocation243_spill] sm:$0xff] %v9510_v19  ;;  %14331 = vst [vmem:[#allocation221_spill] sm:$0xff] %v9513_v55  ;;  %v9524_v23 = vsel %vm881_vm5, %v14334_v63, %v14333_v13  ;;  %v14336_v27 = vld [vmem:[#allocation8_spill] sm:$0xff]  ;;  %v14337_v24 = vld [vmem:[#allocation103_spill] sm:$0xff] }
 0x244   : > { %14332 = vst [vmem:[#allocation224_spill] sm:$0xff] %v9516_v59  ;;  %14335 = vst [vmem:[#allocation197_spill] sm:$0xff] %v9524_v23  ;;  %v9530_v14 = vsel %vm881_vm5, %v14337_v24, %v14336_v27  ;;  %v14339_v62 = vld [vmem:[#allocation40_spill] sm:$0xff]  ;;  %v14343_v57 = vld [vmem:[#allocation107_spill] sm:$0xff] }
 0x245   : > { %14338 = vst [vmem:[#allocation250_spill] sm:$0xff] %v9530_v14  ;;  %v14340_v21 = vld [vmem:[#allocation32_spill] sm:$0xff]  ;;  %v14347_v27 = vld [vmem:[#allocation122_spill] sm:$0xff]  ;;  %v14440_v17 = vld [vmem:[#allocation131_spill] sm:$0xff] }
 0x246   : > { %v9536_v49 = vsel %vm881_vm5, %v14340_v21, %v14339_v62  ;;  %v14342_v29 = vld [vmem:[#allocation120_spill] sm:$0xff]  ;;  %v9554_v62 = vsel %vm993_vm6, %v9448_v58, %v14347_v27  ;;  %v14349_v21 = vld [vmem:[#allocation91_spill] sm:$0xff]  ;;  %v9569_v24 = vld [vmem:[%s5080_s28 + $0x360] sm:$0xff] }
 0x247   : > { %14341 = vst [vmem:[#allocation16_spill] sm:$0xff] %v9536_v49  ;;  %v9542_v52 = vsel %vm881_vm5, %v14343_v57, %v14342_v29  ;;  %v14345_v63 = vld [vmem:[#allocation80_spill] sm:$0xff]  ;;  %14348 = vst [vmem:[#allocation229_spill] sm:$0xff] %v9554_v62  ;;  %v9560_v38 = vsel %vm993_vm6, %v9475_v1, %v14349_v21  ;;  %v14351_v57 = vld [vmem:[#allocation123_spill] sm:$0xff] }
 0x248   : > { %14344 = vst [vmem:[#allocation251_spill] sm:$0xff] %v9542_v52  ;;  %v9548_v13 = vsel %vm993_vm6, %v9445_v61, %v14345_v63  ;;  %14350 = vst [vmem:[#allocation198_spill] sm:$0xff] %v9560_v38  ;;  %v9566_v29 = vsel %vm993_vm6, %v9478_v12, %v14351_v57  ;;  %v14354_v63 = vld [vmem:[#allocation110_spill] sm:$0xff]  ;;  %v14356_v58 = vld [vmem:[#allocation127_spill] sm:$0xff] }
 0x249   : > { %14346 = vst [vmem:[#allocation227_spill] sm:$0xff] %v9548_v13  ;;  %14352 = vst [vmem:[#allocation216_spill] sm:$0xff] %v9566_v29  ;;  %v9575_v27 = vsel %vm993_vm6, %v9481_v36, %v14354_v63  ;;  %v9581_v21 = vsel %vm993_vm6, %v9510_v19, %v14356_v58  ;;  %v14358_v1 = vld [vmem:[#allocation99_spill] sm:$0xff]  ;;  %v14360_v12 = vld [vmem:[#allocation128_spill] sm:$0xff]  ;;  %v9604_v19 = vpop.permute.xlu1 %978 }
 0x24a   : > { %14353 = vst [vmem:[#allocation255_spill] sm:$0xff] %v9569_v24  ;;  %14355 = vst [vmem:[#allocation205_spill] sm:$0xff] %v9575_v27  ;;  %v9587_v57 = vsel %vm993_vm6, %v9513_v55, %v14358_v1  ;;  %v9593_v29 = vsel %vm993_vm6, %v9516_v59, %v14360_v12  ;;  %v9596_v63 = vld [vmem:[%s5080_s28 + $0x1c8] sm:$0xff]  ;;  %v9599_v36 = vld [vmem:[%s5080_s28 + $0x258] sm:$0xff]  ;;  %v9616_v12 = vpop.permute.xlu0 %975  ;;  %vm1005_vm2 = vcmp.eq.s32.totalorder %v9604_v19, 1 }
 0x24b   : > { %14357 = vst [vmem:[#allocation246_spill] sm:$0xff] %v9581_v21  ;;  %14359 = vst [vmem:[#allocation232_spill] sm:$0xff] %v9587_v57  ;;  %v9602_v58 = vld [vmem:[%s5080_s28 + $0x2e8] sm:$0xff]  ;;  %v9609_v1 = vld [vmem:[%s5080_s28 + $0x378] sm:$0xff]  ;;  %vm1004_vm3 = vcmp.eq.s32.totalorder %v9616_v12, 1 }
 0x24c   : > { %14361 = vst [vmem:[#allocation256_spill] sm:$0xff] %v9593_v29  ;;  %14362 = vst [vmem:[#allocation206_spill] sm:$0xff] %v9596_v63  ;;  %v14367_v55 = vld [vmem:[#allocation98_spill] sm:$0xff]  ;;  %v14370_v21 = vld [vmem:[#allocation129_spill] sm:$0xff] }
 0x24d   : > { %14363 = vst [vmem:[#allocation248_spill] sm:$0xff] %v9599_v36  ;;  %14364 = vst [vmem:[#allocation233_spill] sm:$0xff] %v9602_v58  ;;  %v14368_v29 = vld [vmem:[#allocation126_spill] sm:$0xff]  ;;  %v14371_v27 = vld [vmem:[#allocation115_spill] sm:$0xff] }
 0x24e   : > { %14365 = vst [vmem:[#allocation249_spill] sm:$0xff] %v9609_v1  ;;  %v9622_v57 = vsel %vm992_vm7, %v14368_v29, %v14367_v55  ;;  %v9628_v38 = vsel %vm992_vm7, %v14371_v27, %v14370_v21  ;;  %v14373_v61 = vld [vmem:[#allocation104_spill] sm:$0xff]  ;;  %v14374_v62 = vld [vmem:[#allocation87_spill] sm:$0xff]  ;;  %v14376_v13 = vld [vmem:[#allocation134_spill] sm:$0xff] }
 0x24f   : > { %14369 = vst [vmem:[#allocation253_spill] sm:$0xff] %v9622_v57  ;;  %14372 = vst [vmem:[#allocation212_spill] sm:$0xff] %v9628_v38  ;;  %v9634_v59 = vsel %vm992_vm7, %v14374_v62, %v14373_v61  ;;  %v9640_v55 = vsel %vm992_vm7, %v9569_v24, %v14376_v13  ;;  %v9643_v29 = vld [vmem:[%s5080_s28 + $0x18] sm:$0xff]  ;;  %v9646_v57 = vld [vmem:[%s5080_s28 + $0xa8] sm:$0xff] }
 0x250   : > { %14375 = vst [vmem:[#allocation259_spill] sm:$0xff] %v9634_v59  ;;  %14377 = vst [vmem:[#allocation239_spill] sm:$0xff] %v9640_v55  ;;  %v9649_v27 = vld [vmem:[%s5080_s28 + $0x138] sm:$0xff]  ;;  %v14383_v62 = vld [vmem:[#allocation135_spill] sm:$0xff] }
 0x251   : > { %14378 = vst [vmem:[#allocation267_spill] sm:$0xff] %v9643_v29  ;;  %14379 = vst [vmem:[#allocation222_spill] sm:$0xff] %v9646_v57  ;;  %v14381_v21 = vld [vmem:[#allocation105_spill] sm:$0xff]  ;;  %v14384_v59 = vld [vmem:[#allocation90_spill] sm:$0xff] }
 0x252   : > { %14380 = vst [vmem:[#allocation268_spill] sm:$0xff] %v9649_v27  ;;  %v14382_v38 = vld [vmem:[#allocation121_spill] sm:$0xff]  ;;  %v9661_v52 = vsel %vm992_vm7, %v14384_v59, %v14383_v62  ;;  %v14386_v13 = vld [vmem:[#allocation106_spill] sm:$0xff]  ;;  %v14387_v24 = vld [vmem:[#allocation111_spill] sm:$0xff] }
 0x253   : > { %v9655_v61 = vsel %vm992_vm7, %v14382_v38, %v14381_v21  ;;  %14385 = vst [vmem:[#allocation244_spill] sm:$0xff] %v9661_v52  ;;  %v9667_v55 = vsel %vm992_vm7, %v14387_v24, %v14386_v13  ;;  %v14389_v49 = vld [vmem:[#allocation136_spill] sm:$0xff]  ;;  %v9676_v38 = vld [vmem:[%s5080_s28 + $0x1d8] sm:$0xff]  ;;  %v9679_v21 = vld [vmem:[%s5080_s28 + $0x268] sm:$0xff] }
 0x254   : > { %14388 = vst [vmem:[#allocation22_spill] sm:$0xff] %v9667_v55  ;;  %v14390_v14 = vld [vmem:[#allocation92_spill] sm:$0xff]  ;;  %14392 = vst [vmem:[#allocation245_spill] sm:$0xff] %v9676_v38  ;;  %v14396_v24 = vld [vmem:[#allocation146_spill] sm:$0xff] }
 0x255   : > { %v9673_v23 = vsel %vm992_vm7, %v14390_v14, %v14389_v49  ;;  %14393 = vst [vmem:[#allocation52_spill] sm:$0xff] %v9679_v21  ;;  %v14394_v59 = vld [vmem:[#allocation116_spill] sm:$0xff]  ;;  %v9691_v44 = vsel %vm995_vm8, %v9599_v36, %v14396_v24  ;;  %v14398_v49 = vld [vmem:[#allocation118_spill] sm:$0xff]  ;;  %v14400_v13 = vld [vmem:[#allocation151_spill] sm:$0xff]  ;;  %v9714_v36 = vpop.permute.xlu1 %984 }
 0x256   : > { %14391 = vst [vmem:[#allocation223_spill] sm:$0xff] %v9673_v23  ;;  %v9685_v62 = vsel %vm995_vm8, %v9596_v63, %v14394_v59  ;;  %14397 = vst [vmem:[#allocation234_spill] sm:$0xff] %v9691_v44  ;;  %v9697_v14 = vsel %vm995_vm8, %v9602_v58, %v14398_v49  ;;  %v9703_v23 = vsel %vm995_vm8, %v9609_v1, %v14400_v13  ;;  %v9706_v59 = vld [vmem:[%s5080_s28 + $0x2f8] sm:$0xff]  ;;  %v9709_v63 = vld [vmem:[%s5080_s28 + $0x388] sm:$0xff]  ;;  %vm1007_vm4 = vcmp.eq.s32.totalorder %v9714_v36, 1 }
 0x257   : > { %14395 = vst [vmem:[#allocation252_spill] sm:$0xff] %v9685_v62  ;;  %14399 = vst [vmem:[#allocation257_spill] sm:$0xff] %v9697_v14  ;;  %v9712_v24 = vld [vmem:[%s5080_s28 + $0x418] sm:$0xff]  ;;  %v9720_v49 = vsel %vm995_vm8, %v9612_v39, %v8813_v3  ;;  %v9726_v13 = vsel %vm995_vm8, %v9643_v29, %v8819_v9  ;;  %v9732_v1 = vsel %vm995_vm8, %v9646_v57, %v8825_v33  ;;  %v9741_v3 = vld [vmem:[%s5080_s28 + $0x28] sm:$0xff]  ;;  %v9749_v29 = vpop.permute.xlu0 %981 }
 0x258   : > { %14401 = vst [vmem:[#allocation235_spill] sm:$0xff] %v9703_v23  ;;  %14402 = vst [vmem:[#allocation261_spill] sm:$0xff] %v9706_v59  ;;  %v9738_v58 = vsel %vm995_vm8, %v9649_v27, %v8831_v40  ;;  %v9744_v39 = vld [vmem:[%s5080_s28 + $0xb8] sm:$0xff]  ;;  %v9747_v9 = vld [vmem:[%s5080_s28 + $0x148] sm:$0xff]  ;;  %v9755_v33 = vsel %vm994_vm9, %v8807_v45, %v8837_v30  ;;  %v9761_v40 = vsel %vm994_vm9, %v8754_v31, %v8843_v53  ;;  %vm1006_vm5 = vcmp.eq.s32.totalorder %v9749_v29, 1 }
 0x259   : > { %14403 = vst [vmem:[#allocation254_spill] sm:$0xff] %v9709_v63  ;;  %14404 = vst [vmem:[#allocation54_spill] sm:$0xff] %v9712_v24  ;;  %v14414_v22 = vld [vmem:[#allocation108_spill] sm:$0xff]  ;;  %v9779_v30 = vld [vmem:[%s5080_s28 + $0x260] sm:$0xff] }
 0x25a   : > { %14405 = vst [vmem:[#allocation236_spill] sm:$0xff] %v9720_v49  ;;  %14406 = vst [vmem:[#allocation262_spill] sm:$0xff] %v9726_v13  ;;  %v9767_v57 = vsel %vm994_vm9, %v14414_v22, %v8849_v43  ;;  %v9776_v45 = vld [vmem:[%s5080_s28 + $0x1d0] sm:$0xff]  ;;  %v9785_v53 = vld [vmem:[%s5080_s28 + $0x380] sm:$0xff] }
 0x25b   : > { %14407 = vst [vmem:[#allocation240_spill] sm:$0xff] %v9732_v1  ;;  %14408 = vst [vmem:[#allocation55_spill] sm:$0xff] %v9738_v58  ;;  %v14416_v58 = vld [vmem:[#allocation156_spill] sm:$0xff]  ;;  %v14417_v1 = vld [vmem:[#allocation137_spill] sm:$0xff] }
 0x25c   : > { %14409 = vst [vmem:[#allocation241_spill] sm:$0xff] %v9741_v3  ;;  %14410 = vst [vmem:[#allocation51_spill] sm:$0xff] %v9744_v39  ;;  %v9773_v13 = vsel %vm994_vm9, %v14417_v1, %v14416_v58  ;;  %v9782_v31 = vld [vmem:[%s5080_s28 + $0x2f0] sm:$0xff]  ;;  %v14426_v58 = vld [vmem:[#allocation157_spill] sm:$0xff] }
 0x25d   : > { %14411 = vst [vmem:[#allocation19_spill] sm:$0xff] %v9747_v9  ;;  %14412 = vst [vmem:[#allocation59_spill] sm:$0xff] %v9755_v33  ;;  %v14424_v43 = vld [vmem:[#allocation144_spill] sm:$0xff]  ;;  %v14427_v1 = vld [vmem:[#allocation145_spill] sm:$0xff] }
 0x25e   : > { %14413 = vst [vmem:[#allocation247_spill] sm:$0xff] %v9761_v40  ;;  %14415 = vst [vmem:[#allocation36_spill] sm:$0xff] %v9767_v57  ;;  %v14423_v40 = vld [vmem:[#allocation109_spill] sm:$0xff]  ;;  %v14432_v23 = vld [vmem:[#allocation158_spill] sm:$0xff] }
 0x25f   : > { %14418 = vst [vmem:[#allocation20_spill] sm:$0xff] %v9773_v13  ;;  %14419 = vst [vmem:[#allocation23_spill] sm:$0xff] %v9776_v45  ;;  %v9791_v22 = vsel %vm994_vm9, %v14424_v43, %v14423_v40  ;;  %v9797_v13 = vsel %vm994_vm9, %v14427_v1, %v14426_v58  ;;  %v14429_v57 = vld [vmem:[#allocation9_spill] sm:$0xff]  ;;  %v14433_v14 = vld [vmem:[#allocation124_spill] sm:$0xff] }
 0x260   : > { %14420 = vst [vmem:[#allocation258_spill] sm:$0xff] %v9779_v30  ;;  %14421 = vst [vmem:[#allocation270_spill] sm:$0xff] %v9782_v31  ;;  %v14430_v33 = vld [vmem:[#allocation125_spill] sm:$0xff]  ;;  %v9809_v44 = vsel %vm994_vm9, %v14433_v14, %v14432_v23  ;;  %v9812_v40 = vld [vmem:[%s5080_s28 + $0x410] sm:$0xff]  ;;  %v9833_v23 = vsel %vm997_vm10, %v9679_v21, %v14440_v17  ;;  %v9859_v21 = vpop.permute.xlu1 %990 }
 0x261   : > { %14422 = vst [vmem:[#allocation2_spill] sm:$0xff] %v9785_v53  ;;  %14425 = vst [vmem:[#allocation37_spill] sm:$0xff] %v9791_v22  ;;  %v9803_v49 = vsel %vm994_vm9, %v14430_v33, %v14429_v57  ;;  %v9815_v43 = vld [vmem:[%s5080_s28 + $0x20] sm:$0xff]  ;;  %v9818_v22 = vld [vmem:[%s5080_s28 + $0xb0] sm:$0xff]  ;;  %vm1009_vm6 = vcmp.eq.s32.totalorder %v9859_v21, 1 }
 0x262   : > { %14428 = vst [vmem:[#allocation263_spill] sm:$0xff] %v9797_v13  ;;  %14431 = vst [vmem:[#allocation271_spill] sm:$0xff] %v9803_v49  ;;  %v9821_v58 = vld [vmem:[%s5080_s28 + $0x140] sm:$0xff]  ;;  %v14438_v1 = vld [vmem:[#allocation117_spill] sm:$0xff] }
 0x263   : > { %14434 = vst [vmem:[#allocation21_spill] sm:$0xff] %v9809_v44  ;;  %14435 = vst [vmem:[#allocation3_spill] sm:$0xff] %v9812_v40  ;;  %v9827_v57 = vsel %vm997_vm10, %v9676_v38, %v14438_v1  ;;  %v14442_v14 = vld [vmem:[#allocation10_spill] sm:$0xff]  ;;  %v14444_v44 = vld [vmem:[#allocation163_spill] sm:$0xff] }
 0x264   : > { %14436 = vst [vmem:[#allocation269_spill] sm:$0xff] %v9815_v43  ;;  %14437 = vst [vmem:[#allocation35_spill] sm:$0xff] %v9818_v22  ;;  %v9839_v33 = vsel %vm997_vm10, %v9706_v59, %v14442_v14  ;;  %v9845_v49 = vsel %vm997_vm10, %v9709_v63, %v14444_v44  ;;  %v9848_v1 = vld [vmem:[%s5080_s28 + $0x1e8] sm:$0xff]  ;;  %v9851_v38 = vld [vmem:[%s5080_s28 + $0x278] sm:$0xff] }
 0x265   : > { %14439 = vst [vmem:[#allocation266_spill] sm:$0xff] %v9827_v57  ;;  %14441 = vst [vmem:[#allocation25_spill] sm:$0xff] %v9833_v23  ;;  %v9854_v57 = vld [vmem:[%s5080_s28 + $0x308] sm:$0xff]  ;;  %v9857_v17 = vld [vmem:[%s5080_s28 + $0x398] sm:$0xff] }
 0x266   : > { %14443 = vst [vmem:[#allocation50_spill] sm:$0xff] %v9839_v33  ;;  %14445 = vst [vmem:[#allocation66_spill] sm:$0xff] %v9845_v49  ;;  %v14450_v14 = vld [vmem:[#allocation150_spill] sm:$0xff]  ;;  %v14452_v63 = vld [vmem:[#allocation132_spill] sm:$0xff] }
 0x267   : > { %14446 = vst [vmem:[#allocation53_spill] sm:$0xff] %v9848_v1  ;;  %14447 = vst [vmem:[#allocation45_spill] sm:$0xff] %v9851_v38  ;;  %v9865_v44 = vsel %vm997_vm10, %v9712_v24, %v14450_v14  ;;  %v9871_v59 = vsel %vm997_vm10, %v9741_v3, %v14452_v63  ;;  %v14454_v49 = vld [vmem:[#allocation119_spill] sm:$0xff]  ;;  %v14456_v23 = vld [vmem:[#allocation164_spill] sm:$0xff]  ;;  %v9897_v3 = vpop.permute.xlu0 %987 }
 0x268   : > { %14448 = vst [vmem:[#allocation260_spill] sm:$0xff] %v9854_v57  ;;  %14449 = vst [vmem:[#allocation33_spill] sm:$0xff] %v9857_v17  ;;  %v9877_v33 = vsel %vm997_vm10, %v9744_v39, %v14454_v49  ;;  %v9883_v13 = vsel %vm997_vm10, %v9747_v9, %v14456_v23  ;;  %v9886_v14 = vld [vmem:[%s5080_s28 + $0x428] sm:$0xff]  ;;  %v9889_v24 = vld [vmem:[%s5080_s28 + $0x38] sm:$0xff]  ;;  %vm1008_vm7 = vcmp.eq.s32.totalorder %v9897_v3, 1 }
 0x269   : > { %14451 = vst [vmem:[#allocation264_spill] sm:$0xff] %v9865_v44  ;;  %14453 = vst [vmem:[#allocation56_spill] sm:$0xff] %v9871_v59  ;;  %v9892_v44 = vld [vmem:[%s5080_s28 + $0xc8] sm:$0xff]  ;;  %v9895_v63 = vld [vmem:[%s5080_s28 + $0x158] sm:$0xff] }
 0x26a   : > { %14455 = vst [vmem:[#allocation265_spill] sm:$0xff] %v9877_v33  ;;  %14457 = vst [vmem:[#allocation58_spill] sm:$0xff] %v9883_v13  ;;  %v9902_v46 = vld [vmem:[%s5080_s28 + $0x1e0] sm:$0xff]  ;;  %v9906_v49 = vld [vmem:[%s5080_s28 + $0x270] sm:$0xff] }
 0x26b   : > { %14458 = vst [vmem:[#allocation24_spill] sm:$0xff] %v9886_v14  ;;  %14459 = vst [vmem:[#allocation43_spill] sm:$0xff] %v9889_v24  ;;  %v9909_v23 = vld [vmem:[%s5080_s28 + $0x300] sm:$0xff]  ;;  %v9912_v39 = vld [vmem:[%s5080_s28 + $0x390] sm:$0xff] }
 0x26c   : > { %14460 = vst [vmem:[#allocation57_spill] sm:$0xff] %v9892_v44  ;;  %14461 = vst [vmem:[#allocation44_spill] sm:$0xff] %v9902_v46  ;;  %v14465_v13 = vld [vmem:[#allocation152_spill] sm:$0xff]  ;;  %v14466_v59 = vld [vmem:[#allocation166_spill] sm:$0xff] }
 0x26d   : > { %14462 = vst [vmem:[#allocation64_spill] sm:$0xff] %v9906_v49  ;;  %14463 = vst [vmem:[#allocation81_spill] sm:$0xff] %v9909_v23  ;;  %v9919_v33 = vsel %vm996_vm11, %v9776_v45, %v14465_v13  ;;  %v9925_v9 = vsel %vm996_vm11, %v9779_v30, %v14466_v59  ;;  %v14468_v27 = vld [vmem:[#allocation139_spill] sm:$0xff]  ;;  %v9940_v13 = vld [vmem:[%s5080_s28 + $0x420] sm:$0xff] }
 0x26e   : > { %14464 = vst [vmem:[#allocation272_spill] sm:$0xff] %v9912_v39  ;;  %14467 = vst [vmem:[#allocation27_spill] sm:$0xff] %v9925_v9  ;;  %v9931_v62 = vsel %vm996_vm11, %v9782_v31, %v14468_v27  ;;  %v14470_v55 = vld [vmem:[#allocation11_spill] sm:$0xff]  ;;  %v9943_v45 = vld [vmem:[%s5080_s28 + $0x30] sm:$0xff] }
 0x26f   : > { %14469 = vst [vmem:[#allocation65_spill] sm:$0xff] %v9931_v62  ;;  %v9937_v52 = vsel %vm996_vm11, %v9785_v53, %v14470_v55  ;;  %14472 = vst [vmem:[#allocation60_spill] sm:$0xff] %v9940_v13  ;;  %v9946_v59 = vld [vmem:[%s5080_s28 + $0xc0] sm:$0xff]  ;;  %v14475_v30 = vld [vmem:[#allocation153_spill] sm:$0xff] }
 0x270   : > { %14471 = vst [vmem:[#allocation82_spill] sm:$0xff] %v9937_v52  ;;  %14473 = vst [vmem:[#allocation38_spill] sm:$0xff] %v9943_v45  ;;  %v9952_v27 = vsel %vm996_vm11, %v9812_v40, %v14475_v30  ;;  %v14476_v31 = vld [vmem:[#allocation12_spill] sm:$0xff]  ;;  %v14478_v53 = vld [vmem:[#allocation171_spill] sm:$0xff] }
 0x271   : > { %14474 = vst [vmem:[#allocation28_spill] sm:$0xff] %v9946_v59  ;;  %v9958_v55 = vsel %vm996_vm11, %v9815_v43, %v14476_v31  ;;  %v9964_v52 = vsel %vm996_vm11, %v9818_v22, %v14478_v53  ;;  %v14479_v62 = vld [vmem:[#allocation140_spill] sm:$0xff]  ;;  %v9976_v40 = vld [vmem:[%s5080_s28 + $0x1f8] sm:$0xff]  ;;  %v9979_v31 = vld [vmem:[%s5080_s28 + $0x288] sm:$0xff]  ;;  %v9981_v43 = vpop.permute.xlu1 %1069  ;;  %v9999_v22 = vsel %vm999_vm12, %v9854_v57, %v9003_v56 }
 0x272   : > { %14477 = vst [vmem:[#allocation67_spill] sm:$0xff] %v9958_v55  ;;  %v9970_v9 = vsel %vm996_vm11, %v9821_v58, %v14479_v62  ;;  %v9973_v30 = vld [vmem:[%s5080_s28 + $0x150] sm:$0xff]  ;;  %14482 = vst [vmem:[#allocation62_spill] sm:$0xff] %v9976_v40  ;;  %v14486_v50 = vld [vmem:[#allocation142_spill] sm:$0xff]  ;;  %v10129_v47 = vsel %vm1001_vm14, %v9976_v40, %v9088_v54  ;;  %vm1120_vm8 = vcmp.eq.s32.totalorder %v9981_v43, 1 }
 0x273   : > { %14480 = vst [vmem:[#allocation88_spill] sm:$0xff] %v9970_v9  ;;  %14481 = vst [vmem:[#allocation46_spill] sm:$0xff] %v9973_v30  ;;  %v14484_v55 = vld [vmem:[#allocation172_spill] sm:$0xff]  ;;  %v9993_v62 = vsel %vm999_vm12, %v9851_v38, %v14486_v50  ;;  %v10005_v9 = vsel %vm999_vm12, %v9857_v17, %v9007_v51  ;;  %v10014_v50 = vld [vmem:[%s5080_s28 + $0x438] sm:$0xff]  ;;  %v10016_v38 = vpop.permute.xlu0 %1066 }
 0x274   : > { %14483 = vst [vmem:[#allocation26_spill] sm:$0xff] %v9979_v31  ;;  %v9987_v53 = vsel %vm999_vm12, %v9848_v1, %v14484_v55  ;;  %14487 = vst [vmem:[#allocation71_spill] sm:$0xff] %v9993_v62  ;;  %v10008_v55 = vld [vmem:[%s5080_s28 + $0x318] sm:$0xff]  ;;  %v10011_v1 = vld [vmem:[%s5080_s28 + $0x3a8] sm:$0xff]  ;;  %vm1119_vm9 = vcmp.eq.s32.totalorder %v10016_v38, 1 }
 0x275   : > { %14485 = vst [vmem:[#allocation89_spill] sm:$0xff] %v9987_v53  ;;  %14488 = vst [vmem:[#allocation47_spill] sm:$0xff] %v9999_v22  ;;  %v14493_v56 = vld [vmem:[#allocation178_spill] sm:$0xff]  ;;  %v14494_v51 = vld [vmem:[#allocation141_spill] sm:$0xff] }
 0x276   : > { %14489 = vst [vmem:[#allocation4_spill] sm:$0xff] %v10005_v9  ;;  %14490 = vst [vmem:[#allocation34_spill] sm:$0xff] %v10008_v55  ;;  %v10022_v57 = vsel %vm999_vm12, %v9886_v14, %v14493_v56  ;;  %v10028_v17 = vsel %vm999_vm12, %v9889_v24, %v14494_v51  ;;  %v14496_v9 = vld [vmem:[#allocation143_spill] sm:$0xff]  ;;  %v14498_v62 = vld [vmem:[#allocation130_spill] sm:$0xff] }
 0x277   : > { %14491 = vst [vmem:[#allocation70_spill] sm:$0xff] %v10011_v1  ;;  %14492 = vst [vmem:[#allocation41_spill] sm:$0xff] %v10014_v50  ;;  %v10034_v22 = vsel %vm999_vm12, %v9892_v44, %v14496_v9  ;;  %v10040_v53 = vsel %vm999_vm12, %v9895_v63, %v14498_v62  ;;  %v10043_v56 = vld [vmem:[%s5080_s28 + $0x48] sm:$0xff]  ;;  %v10046_v14 = vld [vmem:[%s5080_s28 + $0xd8] sm:$0xff] }
 0x278   : > { %14495 = vst [vmem:[#allocation29_spill] sm:$0xff] %v10028_v17  ;;  %14497 = vst [vmem:[#allocation42_spill] sm:$0xff] %v10034_v22  ;;  %v10049_v51 = vld [vmem:[%s5080_s28 + $0x168] sm:$0xff]  ;;  %v14509_v22 = vld [vmem:[#allocation133_spill] sm:$0xff] }
 0x279   : > { %14499 = vst [vmem:[#allocation30_spill] sm:$0xff] %v10040_v53  ;;  %14500 = vst [vmem:[#allocation48_spill] sm:$0xff] %v10043_v56  ;;  %v14503_v24 = vld [vmem:[#allocation179_spill] sm:$0xff]  ;;  %v10073_v17 = vsel %vm998_vm13, %v9912_v39, %v14509_v22  ;;  %v14519_v39 = vld [vmem:[#allocation185_spill] sm:$0xff] }
 0x27a   : > { %14501 = vst [vmem:[#allocation95_spill] sm:$0xff] %v10046_v14  ;;  %14502 = vst [vmem:[#allocation49_spill] sm:$0xff] %v10049_v51  ;;  %v10055_v9 = vsel %vm998_vm13, %v9902_v46, %v14503_v24  ;;  %v14505_v44 = vld [vmem:[#allocation159_spill] sm:$0xff]  ;;  %v10076_v24 = vld [vmem:[%s5080_s28 + $0x1f0] sm:$0xff] }
 0x27b   : > { %14504 = vst [vmem:[#allocation83_spill] sm:$0xff] %v10055_v9  ;;  %v10061_v15 = vsel %vm998_vm13, %v9906_v49, %v14505_v44  ;;  %v14507_v62 = vld [vmem:[#allocation147_spill] sm:$0xff]  ;;  %14510 = vst [vmem:[#allocation100_spill] sm:$0xff] %v10073_v17  ;;  %v10079_v46 = vld [vmem:[%s5080_s28 + $0x280] sm:$0xff]  ;;  %v10103_v17 = vsel %vm998_vm13, %v9946_v59, %v14519_v39 }
 0x27c   : > { %14506 = vst [vmem:[#allocation72_spill] sm:$0xff] %v10061_v15  ;;  %v10067_v53 = vsel %vm998_vm13, %v9909_v23, %v14507_v62  ;;  %14511 = vst [vmem:[#allocation5_spill] sm:$0xff] %v10076_v24  ;;  %v10082_v9 = vld [vmem:[%s5080_s28 + $0x310] sm:$0xff]  ;;  %v10085_v44 = vld [vmem:[%s5080_s28 + $0x3a0] sm:$0xff] }
 0x27d   : > { %14508 = vst [vmem:[#allocation61_spill] sm:$0xff] %v10067_v53  ;;  %14512 = vst [vmem:[#allocation74_spill] sm:$0xff] %v10079_v46  ;;  %v14515_v49 = vld [vmem:[#allocation184_spill] sm:$0xff]  ;;  %v14517_v23 = vld [vmem:[#allocation165_spill] sm:$0xff] }
 0x27e   : > { %14513 = vst [vmem:[#allocation63_spill] sm:$0xff] %v10082_v9  ;;  %14514 = vst [vmem:[#allocation101_spill] sm:$0xff] %v10085_v44  ;;  %v10091_v62 = vsel %vm998_vm13, %v9940_v13, %v14515_v49  ;;  %v10097_v22 = vsel %vm998_vm13, %v9943_v45, %v14517_v23  ;;  %v14521_v53 = vld [vmem:[#allocation138_spill] sm:$0xff]  ;;  %v10112_v49 = vld [vmem:[%s5080_s28 + $0x430] sm:$0xff]  ;;  %v10123_v45 = vpop.permute.xlu1 %1075 }
 0x27f   : > { %14516 = vst [vmem:[#allocation68_spill] sm:$0xff] %v10091_v62  ;;  %14518 = vst [vmem:[#allocation69_spill] sm:$0xff] %v10097_v22  ;;  %v10109_v15 = vsel %vm998_vm13, %v9973_v30, %v14521_v53  ;;  %v10115_v13 = vld [vmem:[%s5080_s28 + $0x40] sm:$0xff]  ;;  %v10118_v62 = vld [vmem:[%s5080_s28 + $0xd0] sm:$0xff]  ;;  %vm1122_vm10 = vcmp.eq.s32.totalorder %v10123_v45, 1 }
 0x280   : > { %14520 = vst [vmem:[#allocation93_spill] sm:$0xff] %v10103_v17  ;;  %14522 = vst [vmem:[#allocation77_spill] sm:$0xff] %v10109_v15  ;;  %v10121_v23 = vld [vmem:[%s5080_s28 + $0x160] sm:$0xff]  ;;  %v14527_v39 = vld [vmem:[#allocation155_spill] sm:$0xff] }
 0x281   : > { %14523 = vst [vmem:[#allocation6_spill] sm:$0xff] %v10112_v49  ;;  %14524 = vst [vmem:[#allocation7_spill] sm:$0xff] %v10115_v13  ;;  %v10135_v53 = vsel %vm1001_vm14, %v9979_v31, %v14527_v39  ;;  %v14529_v59 = vld [vmem:[#allocation169_spill] sm:$0xff]  ;;  %v14531_v17 = vld [vmem:[#allocation186_spill] sm:$0xff] }
 0x282   : > { %14525 = vst [vmem:[#allocation94_spill] sm:$0xff] %v10118_v62  ;;  %14526 = vst [vmem:[#allocation112_spill] sm:$0xff] %v10129_v47  ;;  %v10141_v15 = vsel %vm1001_vm14, %v10008_v55, %v14529_v59  ;;  %v10147_v22 = vsel %vm1001_vm14, %v10011_v1, %v14531_v17  ;;  %v10150_v54 = vld [vmem:[%s5080_s28 + $0x208] sm:$0xff]  ;;  %v10153_v40 = vld [vmem:[%s5080_s28 + $0x298] sm:$0xff]  ;;  %v10161_v59 = vpop.permute.xlu0 %1072 }
 0x283   : > { %14528 = vst [vmem:[#allocation79_spill] sm:$0xff] %v10135_v53  ;;  %14530 = vst [vmem:[#allocation97_spill] sm:$0xff] %v10141_v15  ;;  %v10156_v39 = vld [vmem:[%s5080_s28 + $0x328] sm:$0xff]  ;;  %v10159_v31 = vld [vmem:[%s5080_s28 + $0x3b8] sm:$0xff]  ;;  %v10179_v15 = vsel %vm1001_vm14, %v10046_v14, %v9117_v11  ;;  %vm1121_vm11 = vcmp.eq.s32.totalorder %v10161_v59, 1 }
 0x284   : > { %14532 = vst [vmem:[#allocation73_spill] sm:$0xff] %v10147_v22  ;;  %14533 = vst [vmem:[#allocation113_spill] sm:$0xff] %v10150_v54  ;;  %v14537_v55 = vld [vmem:[#allocation170_spill] sm:$0xff]  ;;  %v14539_v1 = vld [vmem:[#allocation13_spill] sm:$0xff] }
 0x285   : > { %14534 = vst [vmem:[#allocation96_spill] sm:$0xff] %v10153_v40  ;;  %14535 = vst [vmem:[#allocation85_spill] sm:$0xff] %v10156_v39  ;;  %v10167_v17 = vsel %vm1001_vm14, %v10014_v50, %v14537_v55  ;;  %v10173_v22 = vsel %vm1001_vm14, %v10043_v56, %v14539_v1  ;;  %v14542_v53 = vld [vmem:[#allocation192_spill] sm:$0xff]  ;;  %v10188_v55 = vld [vmem:[%s5080_s28 + $0x448] sm:$0xff] }
 0x286   : > { %14536 = vst [vmem:[#allocation78_spill] sm:$0xff] %v10159_v31  ;;  %14538 = vst [vmem:[#allocation114_spill] sm:$0xff] %v10167_v17  ;;  %v10185_v47 = vsel %vm1001_vm14, %v10049_v51, %v14542_v53  ;;  %v10191_v50 = vld [vmem:[%s5080_s28 + $0x58] sm:$0xff]  ;;  %v10194_v1 = vld [vmem:[%s5080_s28 + $0xe8] sm:$0xff]  ;;  %v10231_v17 = vsel %vm1000_vm15, %v10082_v9, %v9133_v20 }
 0x287   : > { %14540 = vst [vmem:[#allocation75_spill] sm:$0xff] %v10173_v22  ;;  %14541 = vst [vmem:[#allocation39_spill] sm:$0xff] %v10179_v15  ;;  %v10197_v56 = vld [vmem:[%s5080_s28 + $0x178] sm:$0xff]  ;;  %v10202_v11 = vld [vmem:[%s5080_s28 + $0x200] sm:$0xff] }
 0x288   : > { %14543 = vst [vmem:[#allocation31_spill] sm:$0xff] %v10185_v47  ;;  %14544 = vst [vmem:[#allocation84_spill] sm:$0xff] %v10188_v55  ;;  %v10206_v34 = vld [vmem:[%s5080_s28 + $0x290] sm:$0xff]  ;;  %v10209_v53 = vld [vmem:[%s5080_s28 + $0x320] sm:$0xff]  ;;  %v10219_v47 = vsel %vm1000_vm15, %v10076_v24, %v9125_v5 }
 0x289   : > { %14545 = vst [vmem:[#allocation102_spill] sm:$0xff] %v10191_v50  ;;  %14546 = vst [vmem:[#allocation86_spill] sm:$0xff] %v10194_v1  ;;  %v10212_v14 = vld [vmem:[%s5080_s28 + $0x3b0] sm:$0xff]  ;;  %v14552_v15 = vld [vmem:[#allocation161_spill] sm:$0xff] }
 0x28a   : > { %14547 = vst [vmem:[#allocation76_spill] sm:$0xff] %v10202_v11  ;;  %14548 = vst [vmem:[#allocation8_spill] sm:$0xff] %v10206_v34  ;;  %v10225_v22 = vsel %vm1000_vm15, %v10079_v46, %v14552_v15  ;;  %v14555_v51 = vld [vmem:[#allocation193_spill] sm:$0xff]  ;;  %v10240_v5 = vld [vmem:[%s5080_s28 + $0x440] sm:$0xff]  ;;  %v10248_v46 = vpop.permute.xlu1 %1081 }
 0x28b   : > { %14549 = vst [vmem:[#allocation103_spill] sm:$0xff] %v10209_v53  ;;  %14550 = vst [vmem:[#allocation40_spill] sm:$0xff] %v10212_v14  ;;  %v10237_v30 = vsel %vm1000_vm15, %v10085_v44, %v14555_v51  ;;  %v10243_v24 = vld [vmem:[%s5080_s28 + $0x50] sm:$0xff]  ;;  %v10246_v15 = vld [vmem:[%s5080_s28 + $0xe0] sm:$0xff]  ;;  %vm1124_vm12 = vcmp.eq.s32.totalorder %v10248_v46, 1 }
 0x28c   : > { %14551 = vst [vmem:[#allocation32_spill] sm:$0xff] %v10219_v47  ;;  %14553 = vst [vmem:[#allocation120_spill] sm:$0xff] %v10225_v22  ;;  %v14559_v22 = vld [vmem:[#allocation168_spill] sm:$0xff]  ;;  %v14561_v9 = vld [vmem:[#allocation14_spill] sm:$0xff] }
 0x28d   : > { %14554 = vst [vmem:[#allocation107_spill] sm:$0xff] %v10231_v17  ;;  %14556 = vst [vmem:[#allocation80_spill] sm:$0xff] %v10237_v30  ;;  %v10254_v20 = vsel %vm1000_vm15, %v10112_v49, %v14559_v22  ;;  %v10260_v51 = vsel %vm1000_vm15, %v10115_v13, %v14561_v9  ;;  %v14563_v44 = vld [vmem:[#allocation200_spill] sm:$0xff]  ;;  %v14565_v17 = vld [vmem:[#allocation201_spill] sm:$0xff]  ;;  %v10283_v13 = vpop.permute.xlu0 %1078 }
 0x28e   : > { %14557 = vst [vmem:[#allocation122_spill] sm:$0xff] %v10240_v5  ;;  %14558 = vst [vmem:[#allocation91_spill] sm:$0xff] %v10246_v15  ;;  %v10266_v30 = vsel %vm1000_vm15, %v10118_v62, %v14563_v44  ;;  %v10272_v47 = vsel %vm1000_vm15, %v10121_v23, %v14565_v17  ;;  %v10275_v22 = vld [vmem:[%s5080_s28 + $0x170] sm:$0xff]  ;;  %v10278_v49 = vld [vmem:[%s5080_s28 + $0x218] sm:$0xff]  ;;  %vm1123_vm13 = vcmp.eq.s32.totalorder %v10283_v13, 1 }
 0x28f   : > { %14560 = vst [vmem:[#allocation123_spill] sm:$0xff] %v10254_v20  ;;  %14562 = vst [vmem:[#allocation110_spill] sm:$0xff] %v10260_v51  ;;  %v10281_v9 = vld [vmem:[%s5080_s28 + $0x2a8] sm:$0xff]  ;;  %v14569_v51 = vld [vmem:[#allocation208_spill] sm:$0xff] }
 0x290   : > { %14564 = vst [vmem:[#allocation127_spill] sm:$0xff] %v10266_v30  ;;  %14566 = vst [vmem:[#allocation99_spill] sm:$0xff] %v10272_v47  ;;  %v10289_v44 = vsel %vm1003_vm0, %v10150_v54, %v14569_v51  ;;  %v14570_v35 = vld [vmem:[#allocation180_spill] sm:$0xff]  ;;  %v14572_v62 = vld [vmem:[#allocation177_spill] sm:$0xff] }
 0x291   : > { %14567 = vst [vmem:[#allocation128_spill] sm:$0xff] %v10278_v49  ;;  %14568 = vst [vmem:[#allocation98_spill] sm:$0xff] %v10281_v9  ;;  %v10295_v17 = vsel %vm1003_vm0, %v10153_v40, %v14570_v35  ;;  %v10301_v47 = vsel %vm1003_vm0, %v10156_v39, %v14572_v62  ;;  %v14574_v30 = vld [vmem:[#allocation148_spill] sm:$0xff]  ;;  %v10310_v51 = vld [vmem:[%s5080_s28 + $0x338] sm:$0xff] }
 0x292   : > { %14571 = vst [vmem:[#allocation126_spill] sm:$0xff] %v10295_v17  ;;  %14573 = vst [vmem:[#allocation129_spill] sm:$0xff] %v10301_v47  ;;  %v10307_v20 = vsel %vm1003_vm0, %v10159_v31, %v14574_v30  ;;  %v10313_v54 = vld [vmem:[%s5080_s28 + $0x3c8] sm:$0xff]  ;;  %v10316_v35 = vld [vmem:[%s5080_s28 + $0x458] sm:$0xff]  ;;  %v10439_v16 = vsel %vm1005_vm2, %v10310_v51, %v9248_v7  ;;  %v10461_v7 = vpop.permute.xlu0 %1084 }
 0x293   : > { %14575 = vst [vmem:[#allocation115_spill] sm:$0xff] %v10307_v20  ;;  %14576 = vst [vmem:[#allocation104_spill] sm:$0xff] %v10310_v51  ;;  %v14579_v40 = vld [vmem:[#allocation209_spill] sm:$0xff]  ;;  %v14630_v12 = vld [vmem:[#allocation194_spill] sm:$0xff]  ;;  %vm1125_vm15 = vcmp.eq.s32.totalorder %v10461_v7, 1 }
 0x294   : > { %14577 = vst [vmem:[#allocation87_spill] sm:$0xff] %v10313_v54  ;;  %14578 = vst [vmem:[#allocation134_spill] sm:$0xff] %v10316_v35  ;;  %v10322_v62 = vsel %vm1003_vm0, %v10188_v55, %v14579_v40  ;;  %v14580_v39 = vld [vmem:[#allocation181_spill] sm:$0xff]  ;;  %v10343_v40 = vld [vmem:[%s5080_s28 + $0x68] sm:$0xff] }
 0x295   : > { %v10328_v30 = vsel %vm1003_vm0, %v10191_v50, %v14580_v39  ;;  %v14581_v31 = vld [vmem:[#allocation213_spill] sm:$0xff]  ;;  %14585 = vst [vmem:[#allocation135_spill] sm:$0xff] %v10343_v40  ;;  %v10349_v39 = vld [vmem:[%s5080_s28 + $0x188] sm:$0xff]  ;;  %v14588_v50 = vld [vmem:[#allocation188_spill] sm:$0xff] }
 0x296   : > { %v10334_v20 = vsel %vm1003_vm0, %v10194_v1, %v14581_v31  ;;  %v14583_v47 = vld [vmem:[#allocation149_spill] sm:$0xff]  ;;  %14587 = vst [vmem:[#allocation106_spill] sm:$0xff] %v10349_v39  ;;  %v10355_v31 = vsel %vm1002_vm1, %v10202_v11, %v14588_v50  ;;  %v14589_v1 = vld [vmem:[#allocation154_spill] sm:$0xff]  ;;  %v10376_v50 = vld [vmem:[%s5080_s28 + $0x210] sm:$0xff] }
 0x297   : > { %14582 = vst [vmem:[#allocation105_spill] sm:$0xff] %v10334_v20  ;;  %v10340_v17 = vsel %vm1003_vm0, %v10197_v56, %v14583_v47  ;;  %v10346_v55 = vld [vmem:[%s5080_s28 + $0xf8] sm:$0xff]  ;;  %v10361_v6 = vsel %vm1002_vm1, %v10206_v34, %v14589_v1  ;;  %v14590_v47 = vld [vmem:[#allocation214_spill] sm:$0xff]  ;;  %v10373_v20 = vsel %vm1002_vm1, %v10212_v14, %v9210_v18  ;;  %14591 = vst [vmem:[#allocation111_spill] sm:$0xff] %v10376_v50 }
 0x298   : > { %14584 = vst [vmem:[#allocation121_spill] sm:$0xff] %v10340_v17  ;;  %14586 = vst [vmem:[#allocation90_spill] sm:$0xff] %v10346_v55  ;;  %v10367_v17 = vsel %vm1002_vm1, %v10209_v53, %v14590_v47  ;;  %v10379_v11 = vld [vmem:[%s5080_s28 + $0x2a0] sm:$0xff]  ;;  %v10382_v1 = vld [vmem:[%s5080_s28 + $0x330] sm:$0xff]  ;;  %v10391_v47 = vsel %vm1002_vm1, %v10240_v5, %v9216_v4  ;;  %v10397_v18 = vsel %vm1002_vm1, %v10243_v24, %v9220_v28 }
 0x299   : > { %14592 = vst [vmem:[#allocation136_spill] sm:$0xff] %v10382_v1  ;;  %v10385_v34 = vld [vmem:[%s5080_s28 + $0x3c0] sm:$0xff]  ;;  %14594 = vst [vmem:[#allocation116_spill] sm:$0xff] %v10391_v47  ;;  %v10403_v14 = vsel %vm1002_vm1, %v10246_v15, %v9224_v60  ;;  %v10409_v53 = vsel %vm1002_vm1, %v10275_v22, %v9228_v2  ;;  %v10412_v4 = vld [vmem:[%s5080_s28 + $0x450] sm:$0xff]  ;;  %v10427_v60 = vsel %vm1005_vm2, %v10278_v49, %v9236_v10 }
 0x29a   : > { %14593 = vst [vmem:[#allocation92_spill] sm:$0xff] %v10385_v34  ;;  %14595 = vst [vmem:[#allocation146_spill] sm:$0xff] %v10409_v53  ;;  %v10415_v5 = vld [vmem:[%s5080_s28 + $0x60] sm:$0xff]  ;;  %v10418_v47 = vld [vmem:[%s5080_s28 + $0xf0] sm:$0xff]  ;;  %v10433_v2 = vsel %vm1005_vm2, %v10281_v9, %v9242_v37 }
 0x29b   : > { %14596 = vst [vmem:[#allocation118_spill] sm:$0xff] %v10412_v4  ;;  %14597 = vst [vmem:[#allocation151_spill] sm:$0xff] %v10415_v5  ;;  %v10421_v28 = vld [vmem:[%s5080_s28 + $0x180] sm:$0xff]  ;;  %v14601_v15 = vld [vmem:[#allocation187_spill] sm:$0xff] }
 0x29c   : > { %14598 = vst [vmem:[#allocation108_spill] sm:$0xff] %v10418_v47  ;;  %14599 = vst [vmem:[#allocation156_spill] sm:$0xff] %v10433_v2  ;;  %v10445_v53 = vsel %vm1005_vm2, %v10313_v54, %v14601_v15  ;;  %v10448_v10 = vld [vmem:[%s5080_s28 + $0x228] sm:$0xff]  ;;  %v10451_v49 = vld [vmem:[%s5080_s28 + $0x2b8] sm:$0xff]  ;;  %v10459_v2 = vpop.permute.xlu1 %1087  ;;  %v10467_v15 = vsel %vm1005_vm2, %v10316_v35, %v9260_v32  ;;  %v10473_v54 = vsel %vm1005_vm2, %v10343_v40, %v9266_v42 }
 0x29d   : > { %14600 = vst [vmem:[#allocation137_spill] sm:$0xff] %v10439_v16  ;;  %14602 = vst [vmem:[#allocation109_spill] sm:$0xff] %v10445_v53  ;;  %v10454_v37 = vld [vmem:[%s5080_s28 + $0x348] sm:$0xff]  ;;  %v10457_v9 = vld [vmem:[%s5080_s28 + $0x3d8] sm:$0xff]  ;;  %v10485_v32 = vsel %vm1005_vm2, %v10349_v39, %v9278_v48  ;;  %vm1126_vm14 = vcmp.eq.s32.totalorder %v10459_v2, 1 }
 0x29e   : > { %14603 = vst [vmem:[#allocation144_spill] sm:$0xff] %v10448_v10  ;;  %14604 = vst [vmem:[#allocation157_spill] sm:$0xff] %v10451_v49  ;;  %v14609_v51 = vld [vmem:[#allocation189_spill] sm:$0xff]  ;;  %v10488_v35 = vld [vmem:[%s5080_s28 + $0x468] sm:$0xff] }
 0x29f   : > { %14605 = vst [vmem:[#allocation145_spill] sm:$0xff] %v10454_v37  ;;  %14606 = vst [vmem:[#allocation9_spill] sm:$0xff] %v10457_v9  ;;  %v10479_v53 = vsel %vm1005_vm2, %v10346_v55, %v14609_v51  ;;  %v10494_v42 = vld [vmem:[%s5080_s28 + $0x108] sm:$0xff]  ;;  %v10499_v51 = vld [vmem:[%s5080_s28 + $0x198] sm:$0xff] }
 0x2a0   : > { %14607 = vst [vmem:[#allocation125_spill] sm:$0xff] %v10467_v15  ;;  %14608 = vst [vmem:[#allocation158_spill] sm:$0xff] %v10473_v54  ;;  %v10491_v15 = vld [vmem:[%s5080_s28 + $0x78] sm:$0xff]  ;;  %v10502_v55 = vld [vmem:[%s5080_s28 + $0x220] sm:$0xff] }
 0x2a1   : > { %14610 = vst [vmem:[#allocation124_spill] sm:$0xff] %v10479_v53  ;;  %14611 = vst [vmem:[#allocation117_spill] sm:$0xff] %v10485_v32  ;;  %v14616_v48 = vld [vmem:[#allocation160_spill] sm:$0xff]  ;;  %v14617_v32 = vld [vmem:[#allocation219_spill] sm:$0xff] }
 0x2a2   : > { %14612 = vst [vmem:[#allocation131_spill] sm:$0xff] %v10488_v35  ;;  %14613 = vst [vmem:[#allocation10_spill] sm:$0xff] %v10491_v15  ;;  %v10510_v19 = vsel %vm1004_vm3, %v10376_v50, %v14616_v48  ;;  %v10516_v40 = vsel %vm1004_vm3, %v10379_v11, %v14617_v32  ;;  %v14618_v53 = vld [vmem:[#allocation191_spill] sm:$0xff]  ;;  %v14619_v16 = vld [vmem:[#allocation162_spill] sm:$0xff] }
 0x2a3   : > { %14614 = vst [vmem:[#allocation163_spill] sm:$0xff] %v10494_v42  ;;  %14615 = vst [vmem:[#allocation150_spill] sm:$0xff] %v10502_v55  ;;  %v10522_v54 = vsel %vm1004_vm3, %v10382_v1, %v14618_v53  ;;  %v10528_v39 = vsel %vm1004_vm3, %v10385_v34, %v14619_v16  ;;  %v10531_v48 = vld [vmem:[%s5080_s28 + $0x2b0] sm:$0xff]  ;;  %v10534_v50 = vld [vmem:[%s5080_s28 + $0x340] sm:$0xff]  ;;  %v10543_v53 = vsel %vm1004_vm3, %v10412_v4, %v9310_v41 }
 0x2a4   : > { %14620 = vst [vmem:[#allocation132_spill] sm:$0xff] %v10531_v48  ;;  %14621 = vst [vmem:[#allocation119_spill] sm:$0xff] %v10534_v50  ;;  %v10537_v32 = vld [vmem:[%s5080_s28 + $0x3d0] sm:$0xff]  ;;  %v10549_v16 = vsel %vm1004_vm3, %v10415_v5, %v9316_v26  ;;  %v10555_v34 = vsel %vm1004_vm3, %v10418_v47, %v9322_v0  ;;  %v10561_v1 = vsel %vm1004_vm3, %v10421_v28, %v9328_v8  ;;  %v10564_v41 = vld [vmem:[%s5080_s28 + $0x460] sm:$0xff] }
 0x2a5   : > { %14622 = vst [vmem:[#allocation164_spill] sm:$0xff] %v10537_v32  ;;  %14623 = vst [vmem:[#allocation152_spill] sm:$0xff] %v10555_v34  ;;  %v10567_v4 = vld [vmem:[%s5080_s28 + $0x70] sm:$0xff]  ;;  %v10570_v26 = vld [vmem:[%s5080_s28 + $0x100] sm:$0xff]  ;;  %v10576_v0 = vsel %vm1007_vm4, %v10448_v10, %v9336_v25 }
 0x2a6   : > { %14624 = vst [vmem:[#allocation166_spill] sm:$0xff] %v10561_v1  ;;  %14625 = vst [vmem:[#allocation139_spill] sm:$0xff] %v10564_v41  ;;  %v14628_v47 = vld [vmem:[#allocation220_spill] sm:$0xff]  ;;  %v10588_v1 = vsel %vm1007_vm4, %v10454_v37, %v14630_v12  ;;  %v10600_v10 = vld [vmem:[%s5080_s28 + $0x238] sm:$0xff] }
 0x2a7   : > { %14626 = vst [vmem:[#allocation11_spill] sm:$0xff] %v10567_v4  ;;  %14627 = vst [vmem:[#allocation153_spill] sm:$0xff] %v10570_v26  ;;  %v10582_v8 = vsel %vm1007_vm4, %v10451_v49, %v14628_v47  ;;  %v14632_v5 = vld [vmem:[#allocation196_spill] sm:$0xff]  ;;  %v10603_v47 = vld [vmem:[%s5080_s28 + $0x2c8] sm:$0xff] }
 0x2a8   : > { %14629 = vst [vmem:[#allocation12_spill] sm:$0xff] %v10582_v8  ;;  %14631 = vst [vmem:[#allocation171_spill] sm:$0xff] %v10588_v1  ;;  %v10594_v34 = vsel %vm1007_vm4, %v10457_v9, %v14632_v5  ;;  %v10597_v25 = vld [vmem:[%s5080_s28 + $0x190] sm:$0xff]  ;;  %v14636_v49 = vld [vmem:[#allocation167_spill] sm:$0xff] }
 0x2a9   : > { %14633 = vst [vmem:[#allocation140_spill] sm:$0xff] %v10594_v34  ;;  %14634 = vst [vmem:[#allocation172_spill] sm:$0xff] %v10600_v10  ;;  %v10609_v12 = vsel %vm1007_vm4, %v10488_v35, %v14636_v49  ;;  %v14638_v37 = vld [vmem:[#allocation225_spill] sm:$0xff]  ;;  %v14640_v9 = vld [vmem:[#allocation195_spill] sm:$0xff] }
 0x2aa   : > { %14635 = vst [vmem:[#allocation142_spill] sm:$0xff] %v10603_v47  ;;  %14637 = vst [vmem:[#allocation178_spill] sm:$0xff] %v10609_v12  ;;  %v10615_v5 = vsel %vm1007_vm4, %v10491_v15, %v14638_v37  ;;  %v10621_v34 = vsel %vm1007_vm4, %v10494_v42, %v14640_v9  ;;  %v14642_v1 = vld [vmem:[#allocation174_spill] sm:$0xff]  ;;  %v10630_v49 = vld [vmem:[%s5080_s28 + $0x358] sm:$0xff]  ;;  %v10638_v15 = vpop.permute.xlu1 %1093 }
 0x2ab   : > { %14639 = vst [vmem:[#allocation141_spill] sm:$0xff] %v10615_v5  ;;  %14641 = vst [vmem:[#allocation143_spill] sm:$0xff] %v10621_v34  ;;  %v10627_v8 = vsel %vm1007_vm4, %v10499_v51, %v14642_v1  ;;  %v10633_v35 = vld [vmem:[%s5080_s28 + $0x3e8] sm:$0xff]  ;;  %v10636_v37 = vld [vmem:[%s5080_s28 + $0x478] sm:$0xff]  ;;  %v10640_v5 = vpop.permute.xlu0 %1090  ;;  %vm1128_vm0 = vcmp.eq.s32.totalorder %v10638_v15, 1 }
 0x2ac   : > { %14643 = vst [vmem:[#allocation130_spill] sm:$0xff] %v10627_v8  ;;  %14644 = vst [vmem:[#allocation179_spill] sm:$0xff] %v10630_v49  ;;  %v14647_v9 = vld [vmem:[#allocation202_spill] sm:$0xff]  ;;  %v14650_v8 = vld [vmem:[#allocation173_spill] sm:$0xff]  ;;  %vm1127_vm1 = vcmp.eq.s32.totalorder %v10640_v5, 1 }
 0x2ad   : > { %14645 = vst [vmem:[#allocation159_spill] sm:$0xff] %v10633_v35  ;;  %14646 = vst [vmem:[#allocation147_spill] sm:$0xff] %v10636_v37  ;;  %v10646_v42 = vsel %vm1006_vm5, %v10502_v55, %v14647_v9  ;;  %v14649_v36 = vld [vmem:[#allocation226_spill] sm:$0xff]  ;;  %v10658_v34 = vsel %vm1006_vm5, %v10534_v50, %v14650_v8  ;;  %v14652_v12 = vld [vmem:[#allocation199_spill] sm:$0xff] }
 0x2ae   : > { %14648 = vst [vmem:[#allocation133_spill] sm:$0xff] %v10646_v42  ;;  %v10652_v1 = vsel %vm1006_vm5, %v10531_v48, %v14649_v36  ;;  %14651 = vst [vmem:[#allocation184_spill] sm:$0xff] %v10658_v34  ;;  %v10664_v9 = vsel %vm1006_vm5, %v10537_v32, %v14652_v12  ;;  %v10667_v55 = vld [vmem:[%s5080_s28 + $0x88] sm:$0xff]  ;;  %v10670_v42 = vld [vmem:[%s5080_s28 + $0x118] sm:$0xff] }
 0x2af   : > { %14653 = vst [vmem:[#allocation165_spill] sm:$0xff] %v10664_v9  ;;  %14654 = vst [vmem:[#allocation185_spill] sm:$0xff] %v10667_v55  ;;  %v10673_v36 = vld [vmem:[%s5080_s28 + $0x1a8] sm:$0xff]  ;;  %v14658_v50 = vld [vmem:[#allocation230_spill] sm:$0xff] }
 0x2b0   : > { %14655 = vst [vmem:[#allocation138_spill] sm:$0xff] %v10670_v42  ;;  %v14656_v48 = vld [vmem:[#allocation15_spill] sm:$0xff]  ;;  %v10685_v34 = vsel %vm1006_vm5, %v10567_v4, %v14658_v50  ;;  %v14661_v9 = vld [vmem:[#allocation204_spill] sm:$0xff]  ;;  %v14687_v21 = vld [vmem:[#allocation218_spill] sm:$0xff] }
 0x2b1   : > { %v10679_v8 = vsel %vm1006_vm5, %v10564_v41, %v14656_v48  ;;  %v14659_v12 = vld [vmem:[#allocation203_spill] sm:$0xff]  ;;  %v10697_v48 = vsel %vm1006_vm5, %v10597_v25, %v14661_v9  ;;  %v10700_v41 = vld [vmem:[%s5080_s28 + $0x230] sm:$0xff]  ;;  %v14691_v3 = vld [vmem:[#allocation190_spill] sm:$0xff] }
 0x2b2   : > { %14657 = vst [vmem:[#allocation155_spill] sm:$0xff] %v10679_v8  ;;  %v10691_v32 = vsel %vm1006_vm5, %v10570_v26, %v14659_v12  ;;  %14662 = vst [vmem:[#allocation186_spill] sm:$0xff] %v10697_v48  ;;  %v10703_v8 = vld [vmem:[%s5080_s28 + $0x2c0] sm:$0xff]  ;;  %v14665_v50 = vld [vmem:[#allocation175_spill] sm:$0xff] }
 0x2b3   : > { %14660 = vst [vmem:[#allocation169_spill] sm:$0xff] %v10691_v32  ;;  %14663 = vst [vmem:[#allocation170_spill] sm:$0xff] %v10700_v41  ;;  %v10709_v4 = vsel %vm1009_vm6, %v10600_v10, %v14665_v50  ;;  %v14667_v12 = vld [vmem:[#allocation231_spill] sm:$0xff]  ;;  %v10730_v50 = vld [vmem:[%s5080_s28 + $0x350] sm:$0xff] }
 0x2b4   : > { %14664 = vst [vmem:[#allocation13_spill] sm:$0xff] %v10703_v8  ;;  %14666 = vst [vmem:[#allocation192_spill] sm:$0xff] %v10709_v4  ;;  %v10715_v26 = vsel %vm1009_vm6, %v10603_v47, %v14667_v12  ;;  %v14669_v29 = vld [vmem:[#allocation207_spill] sm:$0xff]  ;;  %v10733_v10 = vld [vmem:[%s5080_s28 + $0x3e0] sm:$0xff] }
 0x2b5   : > { %14668 = vst [vmem:[#allocation161_spill] sm:$0xff] %v10715_v26  ;;  %v10721_v9 = vsel %vm1009_vm6, %v10630_v49, %v14669_v29  ;;  %v14671_v48 = vld [vmem:[#allocation211_spill] sm:$0xff]  ;;  %14673 = vst [vmem:[#allocation14_spill] sm:$0xff] %v10730_v50  ;;  %v10736_v4 = vld [vmem:[%s5080_s28 + $0x470] sm:$0xff] }
 0x2b6   : > { %14670 = vst [vmem:[#allocation193_spill] sm:$0xff] %v10721_v9  ;;  %v10727_v32 = vsel %vm1009_vm6, %v10633_v35, %v14671_v48  ;;  %14674 = vst [vmem:[#allocation200_spill] sm:$0xff] %v10733_v10  ;;  %v14676_v12 = vld [vmem:[#allocation182_spill] sm:$0xff]  ;;  %v14678_v29 = vld [vmem:[#allocation237_spill] sm:$0xff] }
 0x2b7   : > { %14672 = vst [vmem:[#allocation168_spill] sm:$0xff] %v10727_v32  ;;  %14675 = vst [vmem:[#allocation201_spill] sm:$0xff] %v10736_v4  ;;  %v10742_v47 = vsel %vm1009_vm6, %v10636_v37, %v14676_v12  ;;  %v10748_v49 = vsel %vm1009_vm6, %v10667_v55, %v14678_v29  ;;  %v14680_v48 = vld [vmem:[#allocation210_spill] sm:$0xff]  ;;  %v14682_v32 = vld [vmem:[#allocation215_spill] sm:$0xff]  ;;  %v10784_v55 = vsel %vm1008_vm7, %v10733_v10, %v14691_v3 }
 0x2b8   : > { %14677 = vst [vmem:[#allocation208_spill] sm:$0xff] %v10742_v47  ;;  %14679 = vst [vmem:[#allocation180_spill] sm:$0xff] %v10748_v49  ;;  %v10754_v35 = vsel %vm1009_vm6, %v10670_v42, %v14680_v48  ;;  %v10760_v9 = vsel %vm1009_vm6, %v10673_v36, %v14682_v32  ;;  %v2635_v12 = vld [vmem:[%s5080_s28 + $0x80] sm:$0xff]  ;;  %v4402_v37 = vld [vmem:[%s5080_s28 + $0x110] sm:$0xff]  ;;  %v10776_v32 = vsel %vm1008_vm7, %v10703_v8, %v14687_v21  ;;  %v10788_v49 = vpop.permute.xlu0 %1096 }
 0x2b9   : > { %14681 = vst [vmem:[#allocation177_spill] sm:$0xff] %v10754_v35  ;;  %14683 = vst [vmem:[#allocation148_spill] sm:$0xff] %v10760_v9  ;;  %v10765_v47 = vld [vmem:[%s5080_s28 + $0x1a0] sm:$0xff]  ;;  %v14689_v42 = vld [vmem:[#allocation217_spill] sm:$0xff]  ;;  %v10786_v35 = vpop.permute.xlu1 %1099  ;;  %vm1129_vm3 = vcmp.eq.s32.totalorder %v10788_v49, 1 }
 0x2ba   : > { %14684 = vst [vmem:[#allocation209_spill] sm:$0xff] %v10765_v47  ;;  %v14685_v29 = vld [vmem:[#allocation242_spill] sm:$0xff]  ;;  %14688 = vst [vmem:[#allocation213_spill] sm:$0xff] %v10776_v32  ;;  %v10780_v9 = vsel %vm1008_vm7, %v10730_v50, %v14689_v42  ;;  %v14693_v26 = vld [vmem:[#allocation197_spill] sm:$0xff]  ;;  %vm1130_vm2 = vcmp.eq.s32.totalorder %v10786_v35, 1 }
 0x2bb   : > { %v10772_v48 = vsel %vm1008_vm7, %v10700_v41, %v14685_v29  ;;  %14690 = vst [vmem:[#allocation149_spill] sm:$0xff] %v10780_v9  ;;  %14692 = vst [vmem:[#allocation188_spill] sm:$0xff] %v10784_v55  ;;  %v10792_v29 = vsel %vm1008_vm7, %v10736_v4, %v14693_v26  ;;  %v14695_v41 = vld [vmem:[#allocation250_spill] sm:$0xff]  ;;  %v14697_v8 = vld [vmem:[#allocation16_spill] sm:$0xff] }
 0x2bc   : > { %14686 = vst [vmem:[#allocation181_spill] sm:$0xff] %v10772_v48  ;;  %14694 = vst [vmem:[#allocation154_spill] sm:$0xff] %v10792_v29  ;;  %v10795_v21 = vsel %vm1008_vm7, %v2635_v12, %v14695_v41  ;;  %v10798_v42 = vsel %vm1008_vm7, %v4402_v37, %v14697_v8  ;;  %v14699_v50 = vld [vmem:[#allocation251_spill] sm:$0xff]  ;;  %v10805_v10 = vld [vmem:[%s5080_s28 + $0x120] sm:$0xff] }
 0x2bd   : > { %14696 = vst [vmem:[#allocation214_spill] sm:$0xff] %v10795_v21  ;;  %14698 = vst [vmem:[#allocation187_spill] sm:$0xff] %v10798_v42  ;;  %v10802_v3 = vsel %vm1008_vm7, %v10765_v47, %v14699_v50  ;;  %v10808_v55 = vld [vmem:[%s5080_s28 + $0x1b0] sm:$0xff]  ;;  %v14703_v9 = vld [vmem:[#allocation227_spill] sm:$0xff] }
 0x2be   : > { %14700 = vst [vmem:[#allocation189_spill] sm:$0xff] %v10802_v3  ;;  %14701 = vst [vmem:[#allocation160_spill] sm:$0xff] %v10805_v10  ;;  %v14704_v32 = vld [vmem:[#allocation224_spill] sm:$0xff]  ;;  %v14706_v41 = vld [vmem:[#allocation229_spill] sm:$0xff] }
 0x2bf   : > { %14702 = vst [vmem:[#allocation219_spill] sm:$0xff] %v10808_v55  ;;  %v10814_v26 = vsel %vm1120_vm8, %v14704_v32, %v14703_v9  ;;  %v14707_v12 = vld [vmem:[#allocation176_spill] sm:$0xff]  ;;  %v10823_v8 = vld [vmem:[%s5080_s28 + $0x240] sm:$0xff]  ;;  %v14713_v4 = vld [vmem:[#allocation17_spill] sm:$0xff] }
 0x2c0   : > { %14705 = vst [vmem:[#allocation191_spill] sm:$0xff] %v10814_v26  ;;  %v10820_v37 = vsel %vm1120_vm8, %v14707_v12, %v14706_v41  ;;  %14709 = vst [vmem:[#allocation220_spill] sm:$0xff] %v10823_v8  ;;  %v10826_v50 = vld [vmem:[%s5080_s28 + $0x2d0] sm:$0xff]  ;;  %v14712_v42 = vld [vmem:[#allocation198_spill] sm:$0xff] }
 0x2c1   : > { %14708 = vst [vmem:[#allocation162_spill] sm:$0xff] %v10820_v37  ;;  %14710 = vst [vmem:[#allocation194_spill] sm:$0xff] %v10826_v50  ;;  %v10829_v3 = vld [vmem:[%s5080_s28 + $0x3f0] sm:$0xff]  ;;  %v10836_v9 = vsel %vm1120_vm8, %v14713_v4, %v14712_v42  ;;  %v14716_v26 = vld [vmem:[#allocation183_spill] sm:$0xff] }
 0x2c2   : > { %14711 = vst [vmem:[#allocation196_spill] sm:$0xff] %v10829_v3  ;;  %14714 = vst [vmem:[#allocation167_spill] sm:$0xff] %v10836_v9  ;;  %v14715_v32 = vld [vmem:[#allocation216_spill] sm:$0xff]  ;;  %v14718_v12 = vld [vmem:[#allocation205_spill] sm:$0xff] }
 0x2c3   : > { %v10842_v41 = vsel %vm1120_vm8, %v14716_v26, %v14715_v32  ;;  %v14719_v37 = vld [vmem:[#allocation18_spill] sm:$0xff]  ;;  %v14722_v47 = vld [vmem:[#allocation228_spill] sm:$0xff]  ;;  %v14727_v32 = vld [vmem:[#allocation243_spill] sm:$0xff] }
 0x2c4   : > { %14717 = vst [vmem:[#allocation225_spill] sm:$0xff] %v10842_v41  ;;  %v10848_v21 = vsel %vm1120_vm8, %v14719_v37, %v14718_v12  ;;  %v14721_v29 = vld [vmem:[#allocation246_spill] sm:$0xff]  ;;  %v10860_v42 = vld [vmem:[%s5080_s28 + $0x90] sm:$0xff]  ;;  %v14729_v12 = vld [vmem:[#allocation221_spill] sm:$0xff] }
 0x2c5   : > { %14720 = vst [vmem:[#allocation195_spill] sm:$0xff] %v10848_v21  ;;  %v10854_v48 = vsel %vm1120_vm8, %v14722_v47, %v14721_v29  ;;  %v10857_v4 = vld [vmem:[%s5080_s28] sm:$0xff]  ;;  %14725 = vst [vmem:[#allocation226_spill] sm:$0xff] %v10860_v42  ;;  %v14726_v26 = vld [vmem:[#allocation232_spill] sm:$0xff] }
 0x2c6   : > { %14723 = vst [vmem:[#allocation174_spill] sm:$0xff] %v10854_v48  ;;  %14724 = vst [vmem:[#allocation202_spill] sm:$0xff] %v10857_v4  ;;  %v10866_v41 = vsel %vm1120_vm8, %v14727_v32, %v14726_v26  ;;  %v14728_v37 = vld [vmem:[#allocation256_spill] sm:$0xff]  ;;  %v14730_v47 = vld [vmem:[#allocation253_spill] sm:$0xff] }
 0x2c7   : > { %v10872_v21 = vsel %vm1120_vm8, %v14729_v12, %v14728_v37  ;;  %v10878_v29 = vsel %vm1119_vm9, %v10805_v10, %v14730_v47  ;;  %v14732_v48 = vld [vmem:[#allocation212_spill] sm:$0xff]  ;;  %v14734_v26 = vld [vmem:[#allocation259_spill] sm:$0xff]  ;;  %v14764_v10 = vld [vmem:[#allocation262_spill] sm:$0xff] }
 0x2c8   : > { %14731 = vst [vmem:[#allocation173_spill] sm:$0xff] %v10878_v29  ;;  %v10884_v9 = vsel %vm1119_vm9, %v10808_v55, %v14732_v48  ;;  %v10890_v32 = vsel %vm1119_vm9, %v10823_v8, %v14734_v26  ;;  %v14736_v43 = vld [vmem:[#allocation239_spill] sm:$0xff]  ;;  %v14740_v48 = vld [vmem:[#allocation244_spill] sm:$0xff]  ;;  %v14742_v8 = vld [vmem:[#allocation22_spill] sm:$0xff] }
 0x2c9   : > { %14733 = vst [vmem:[#allocation199_spill] sm:$0xff] %v10884_v9  ;;  %14735 = vst [vmem:[#allocation15_spill] sm:$0xff] %v10890_v32  ;;  %v10896_v37 = vsel %vm1119_vm9, %v10826_v50, %v14736_v43  ;;  %v14738_v12 = vld [vmem:[#allocation255_spill] sm:$0xff]  ;;  %v10908_v26 = vsel %vm1119_vm9, %v10829_v3, %v14740_v48  ;;  %v10914_v43 = vsel %vm1119_vm9, %v10857_v4, %v14742_v8  ;;  %v14749_v48 = vld [vmem:[#allocation234_spill] sm:$0xff] }
 0x2ca   : > { %14737 = vst [vmem:[#allocation230_spill] sm:$0xff] %v10896_v37  ;;  %v10902_v47 = vsel %vm1119_vm9, %v14738_v12, %v9655_v61  ;;  %14741 = vst [vmem:[#allocation204_spill] sm:$0xff] %v10908_v26  ;;  %v14744_v50 = vld [vmem:[#allocation223_spill] sm:$0xff]  ;;  %v14746_v12 = vld [vmem:[#allocation252_spill] sm:$0xff] }
 0x2cb   : > { %14739 = vst [vmem:[#allocation203_spill] sm:$0xff] %v10902_v47  ;;  %14743 = vst [vmem:[#allocation175_spill] sm:$0xff] %v10914_v43  ;;  %v10920_v61 = vsel %vm1119_vm9, %v10860_v42, %v14744_v50  ;;  %v14747_v47 = vld [vmem:[#allocation268_spill] sm:$0xff]  ;;  %v14750_v3 = vld [vmem:[#allocation206_spill] sm:$0xff]  ;;  %v10943_v50 = vpop.permute.xlu1 %1105 }
 0x2cc   : > { %14745 = vst [vmem:[#allocation231_spill] sm:$0xff] %v10920_v61  ;;  %v10926_v37 = vsel %vm1122_vm10, %v14747_v47, %v14746_v12  ;;  %v10932_v26 = vsel %vm1122_vm10, %v14750_v3, %v14749_v48  ;;  %v10935_v8 = vld [vmem:[%s5080_s28 + $0x130] sm:$0xff]  ;;  %v10938_v4 = vld [vmem:[%s5080_s28 + $0x1c0] sm:$0xff]  ;;  %v10945_v61 = vpop.permute.xlu0 %1102  ;;  %v14755_v47 = vld [vmem:[#allocation257_spill] sm:$0xff]  ;;  %vm1132_vm4 = vcmp.eq.s32.totalorder %v10943_v50, 1 }
 0x2cd   : > { %14748 = vst [vmem:[#allocation207_spill] sm:$0xff] %v10926_v37  ;;  %14751 = vst [vmem:[#allocation211_spill] sm:$0xff] %v10932_v26  ;;  %v10941_v38 = vld [vmem:[%s5080_s28 + $0x250] sm:$0xff]  ;;  %v14758_v3 = vld [vmem:[#allocation235_spill] sm:$0xff]  ;;  %vm1131_vm5 = vcmp.eq.s32.totalorder %v10945_v61, 1 }
 0x2ce   : > { %14752 = vst [vmem:[#allocation182_spill] sm:$0xff] %v10935_v8  ;;  %14753 = vst [vmem:[#allocation237_spill] sm:$0xff] %v10938_v4  ;;  %v14756_v12 = vld [vmem:[#allocation248_spill] sm:$0xff]  ;;  %v14759_v48 = vld [vmem:[#allocation233_spill] sm:$0xff] }
 0x2cf   : > { %14754 = vst [vmem:[#allocation210_spill] sm:$0xff] %v10941_v38  ;;  %v10951_v37 = vsel %vm1122_vm10, %v14756_v12, %v14755_v47  ;;  %v10957_v26 = vsel %vm1122_vm10, %v14759_v48, %v14758_v3  ;;  %v14761_v43 = vld [vmem:[#allocation236_spill] sm:$0xff]  ;;  %v14762_v55 = vld [vmem:[#allocation249_spill] sm:$0xff]  ;;  %v14765_v9 = vld [vmem:[#allocation238_spill] sm:$0xff] }
 0x2d0   : > { %14757 = vst [vmem:[#allocation215_spill] sm:$0xff] %v10951_v37  ;;  %14760 = vst [vmem:[#allocation242_spill] sm:$0xff] %v10957_v26  ;;  %v10963_v32 = vsel %vm1122_vm10, %v14762_v55, %v14761_v43  ;;  %v10969_v42 = vsel %vm1122_vm10, %v14765_v9, %v14764_v10  ;;  %v10972_v47 = vld [vmem:[%s5080_s28 + $0x2e0] sm:$0xff]  ;;  %v10975_v12 = vld [vmem:[%s5080_s28 + $0x370] sm:$0xff] }
 0x2d1   : > { %14763 = vst [vmem:[#allocation218_spill] sm:$0xff] %v10963_v32  ;;  %14766 = vst [vmem:[#allocation217_spill] sm:$0xff] %v10969_v42  ;;  %v10978_v37 = vld [vmem:[%s5080_s28 + $0x400] sm:$0xff]  ;;  %v14769_v3 = vld [vmem:[#allocation240_spill] sm:$0xff] }
 0x2d2   : > { %14767 = vst [vmem:[#allocation190_spill] sm:$0xff] %v10975_v12  ;;  %14768 = vst [vmem:[#allocation197_spill] sm:$0xff] %v10978_v37  ;;  %v14770_v48 = vld [vmem:[#allocation267_spill] sm:$0xff]  ;;  %v14772_v43 = vld [vmem:[#allocation222_spill] sm:$0xff] }
 0x2d3   : > { %v10984_v26 = vsel %vm1122_vm10, %v14770_v48, %v14769_v3  ;;  %v14771_v55 = vld [vmem:[#allocation55_spill] sm:$0xff]  ;;  %v10994_v10 = vld [vmem:[%s5080_s28 + $0x10] sm:$0xff]  ;;  %v10997_v9 = vld [vmem:[%s5080_s28 + $0xa0] sm:$0xff] }
 0x2d4   : > { %v10990_v32 = vsel %vm1122_vm10, %v14772_v43, %v14771_v55  ;;  %14774 = vst [vmem:[#allocation16_spill] sm:$0xff] %v10994_v10  ;;  %v14775_v42 = vld [vmem:[#allocation59_spill] sm:$0xff]  ;;  %v14779_v45 = vld [vmem:[#allocation36_spill] sm:$0xff]  ;;  %v14818_v46 = vld [vmem:[#allocation82_spill] sm:$0xff]  ;;  %vm1282_vm10 = vcmask 261120  }
 0x2d5   : > { %14773 = vst [vmem:[#allocation250_spill] sm:$0xff] %v10990_v32  ;;  %v11002_v29 = vsel %vm1121_vm11, %v10935_v8, %v14775_v42  ;;  %v14777_v3 = vld [vmem:[#allocation247_spill] sm:$0xff]  ;;  %v11012_v59 = vsel %vm1121_vm11, %v10941_v38, %v14779_v45  ;;  %v14781_v55 = vld [vmem:[#allocation20_spill] sm:$0xff]  ;;  %v14782_v32 = vld [vmem:[#allocation37_spill] sm:$0xff] }
 0x2d6   : > { %14776 = vst [vmem:[#allocation251_spill] sm:$0xff] %v11002_v29  ;;  %v11006_v48 = vsel %vm1121_vm11, %v10938_v4, %v14777_v3  ;;  %14780 = vst [vmem:[#allocation224_spill] sm:$0xff] %v11012_v59  ;;  %v11016_v43 = vsel %vm1121_vm11, %v10972_v47, %v14781_v55  ;;  %v11020_v42 = vsel %vm1121_vm11, %v10975_v12, %v14782_v32  ;;  %v14783_v8 = vld [vmem:[#allocation263_spill] sm:$0xff]  ;;  %v14787_v29 = vld [vmem:[#allocation21_spill] sm:$0xff] }
 0x2d7   : > { %14778 = vst [vmem:[#allocation227_spill] sm:$0xff] %v11006_v48  ;;  %v11024_v3 = vsel %vm1121_vm11, %v10978_v37, %v14783_v8  ;;  %v14785_v4 = vld [vmem:[#allocation271_spill] sm:$0xff]  ;;  %v11032_v45 = vsel %vm1121_vm11, %v10997_v9, %v14787_v29  ;;  %v14789_v38 = vld [vmem:[#allocation266_spill] sm:$0xff]  ;;  %v14792_v32 = vld [vmem:[#allocation25_spill] sm:$0xff] }
 0x2d8   : > { %14784 = vst [vmem:[#allocation229_spill] sm:$0xff] %v11024_v3  ;;  %v11028_v48 = vsel %vm1121_vm11, %v10994_v10, %v14785_v4  ;;  %14788 = vst [vmem:[#allocation198_spill] sm:$0xff] %v11032_v45  ;;  %v14790_v59 = vld [vmem:[#allocation19_spill] sm:$0xff]  ;;  %v14793_v12 = vld [vmem:[#allocation245_spill] sm:$0xff] }
 0x2d9   : > { %14786 = vst [vmem:[#allocation176_spill] sm:$0xff] %v11028_v48  ;;  %v11038_v55 = vsel %vm1124_vm12, %v14790_v59, %v14789_v38  ;;  %v11044_v8 = vsel %vm1124_vm12, %v14793_v12, %v14792_v32  ;;  %v14795_v37 = vld [vmem:[#allocation50_spill] sm:$0xff]  ;;  %v14796_v3 = vld [vmem:[#allocation52_spill] sm:$0xff]  ;;  %v14799_v10 = vld [vmem:[#allocation261_spill] sm:$0xff] }
 0x2da   : > { %14791 = vst [vmem:[#allocation17_spill] sm:$0xff] %v11038_v55  ;;  %14794 = vst [vmem:[#allocation216_spill] sm:$0xff] %v11044_v8  ;;  %v11050_v4 = vsel %vm1124_vm12, %v14796_v3, %v14795_v37  ;;  %v14798_v29 = vld [vmem:[#allocation66_spill] sm:$0xff]  ;;  %v14801_v38 = vld [vmem:[#allocation264_spill] sm:$0xff]  ;;  %v11070_v37 = vpop.permute.xlu1 %1111  ;;  %v11072_v3 = vpop.permute.xlu0 %1108 }
 0x2db   : > { %14797 = vst [vmem:[#allocation183_spill] sm:$0xff] %v11050_v4  ;;  %v11056_v45 = vsel %vm1124_vm12, %v14799_v10, %v14798_v29  ;;  %v14802_v59 = vld [vmem:[#allocation254_spill] sm:$0xff]  ;;  %v14803_v12 = vld [vmem:[#allocation56_spill] sm:$0xff]  ;;  %v14806_v4 = vld [vmem:[#allocation265_spill] sm:$0xff]  ;;  %vm1134_vm6 = vcmp.eq.s32.totalorder %v11070_v37, 1  ;;  %vm1133_vm7 = vcmp.eq.s32.totalorder %v11072_v3, 1 }
 0x2dc   : > { %14800 = vst [vmem:[#allocation205_spill] sm:$0xff] %v11056_v45  ;;  %v11062_v55 = vsel %vm1124_vm12, %v14802_v59, %v14801_v38  ;;  %v14804_v32 = vld [vmem:[#allocation54_spill] sm:$0xff]  ;;  %v14807_v48 = vld [vmem:[#allocation241_spill] sm:$0xff]  ;;  %v14810_v45 = vld [vmem:[#allocation51_spill] sm:$0xff]  ;;  %v11090_v59 = vsel %vm1123_vm13, %v9821_v58, %v9919_v33 }
 0x2dd   : > { %v11068_v8 = vsel %vm1124_vm12, %v14804_v32, %v14803_v12  ;;  %v11078_v10 = vsel %vm1124_vm12, %v14807_v48, %v14806_v4  ;;  %v14809_v29 = vld [vmem:[#allocation58_spill] sm:$0xff]  ;;  %14811 = vst [vmem:[#allocation228_spill] sm:$0xff] %v11090_v59  ;;  %v14812_v12 = vld [vmem:[#allocation27_spill] sm:$0xff]  ;;  %v14815_v48 = vld [vmem:[#allocation65_spill] sm:$0xff] }
 0x2de   : > { %14805 = vst [vmem:[#allocation18_spill] sm:$0xff] %v11068_v8  ;;  %14808 = vst [vmem:[#allocation246_spill] sm:$0xff] %v11078_v10  ;;  %v11084_v38 = vsel %vm1124_vm12, %v14810_v45, %v14809_v29  ;;  %v14813_v32 = vld [vmem:[#allocation23_spill] sm:$0xff]  ;;  %v14816_v4 = vld [vmem:[#allocation258_spill] sm:$0xff]  ;;  %v11196_v2 = vpop.permute.xlu0 %1114 }
 0x2df   : > { %v11096_v8 = vsel %vm1123_vm13, %v14813_v32, %v14812_v12  ;;  %v11102_v10 = vsel %vm1123_vm13, %v14816_v4, %v14815_v48  ;;  %v14819_v45 = vld [vmem:[#allocation270_spill] sm:$0xff]  ;;  %v14823_v12 = vld [vmem:[#allocation67_spill] sm:$0xff]  ;;  %v14826_v48 = vld [vmem:[#allocation269_spill] sm:$0xff]  ;;  %14859 = vst [vmem:[#allocation248_spill] sm:$0xff] %v11196_v2  ;;  %vm1135_vm9 = vcmp.eq.s32.totalorder %v11196_v2, 1 }
 0x2e0   : > { %14814 = vst [vmem:[#allocation232_spill] sm:$0xff] %v11096_v8  ;;  %14817 = vst [vmem:[#allocation243_spill] sm:$0xff] %v11102_v10  ;;  %v11108_v29 = vsel %vm1123_vm13, %v14819_v45, %v14818_v46  ;;  %v14821_v58 = vld [vmem:[#allocation2_spill] sm:$0xff]  ;;  %v14824_v32 = vld [vmem:[#allocation3_spill] sm:$0xff]  ;;  %v11126_v4 = vsel %vm1123_vm13, %v14826_v48, %v9964_v52 }
 0x2e1   : > { %14820 = vst [vmem:[#allocation256_spill] sm:$0xff] %v11108_v29  ;;  %v11114_v33 = vsel %vm1123_vm13, %v14821_v58, %v9952_v27  ;;  %v11120_v8 = vsel %vm1123_vm13, %v14824_v32, %v14823_v12  ;;  %14827 = vst [vmem:[#allocation212_spill] sm:$0xff] %v11126_v4  ;;  %v14828_v46 = vld [vmem:[#allocation88_spill] sm:$0xff]  ;;  %v14829_v45 = vld [vmem:[#allocation35_spill] sm:$0xff] }
 0x2e2   : > { %14822 = vst [vmem:[#allocation221_spill] sm:$0xff] %v11114_v33  ;;  %14825 = vst [vmem:[#allocation253_spill] sm:$0xff] %v11120_v8  ;;  %v11132_v29 = vsel %vm1123_vm13, %v14829_v45, %v14828_v46  ;;  %v14831_v27 = vld [vmem:[#allocation89_spill] sm:$0xff]  ;;  %v14833_v12 = vld [vmem:[#allocation71_spill] sm:$0xff] }
 0x2e3   : > { %14830 = vst [vmem:[#allocation259_spill] sm:$0xff] %v11132_v29  ;;  %v11138_v58 = vsel %vm1126_vm14, %v9895_v63, %v14831_v27  ;;  %v14834_v32 = vld [vmem:[#allocation53_spill] sm:$0xff]  ;;  %v14836_v52 = vld [vmem:[#allocation47_spill] sm:$0xff]  ;;  %v14839_v13 = vld [vmem:[#allocation4_spill] sm:$0xff] }
 0x2e4   : > { %14832 = vst [vmem:[#allocation239_spill] sm:$0xff] %v11138_v58  ;;  %v11144_v8 = vsel %vm1126_vm14, %v14834_v32, %v14833_v12  ;;  %v14837_v48 = vld [vmem:[#allocation45_spill] sm:$0xff]  ;;  %v14840_v46 = vld [vmem:[#allocation260_spill] sm:$0xff]  ;;  %v14870_v29 = vld [vmem:[#allocation38_spill] sm:$0xff] }
 0x2e5   : > { %14835 = vst [vmem:[#allocation255_spill] sm:$0xff] %v11144_v8  ;;  %v11150_v4 = vsel %vm1126_vm14, %v14837_v48, %v14836_v52  ;;  %v11156_v45 = vsel %vm1126_vm14, %v14840_v46, %v14839_v13  ;;  %v14842_v63 = vld [vmem:[#allocation33_spill] sm:$0xff]  ;;  %v14845_v32 = vld [vmem:[#allocation24_spill] sm:$0xff]  ;;  %v14847_v52 = vld [vmem:[#allocation42_spill] sm:$0xff] }
 0x2e6   : > { %14838 = vst [vmem:[#allocation244_spill] sm:$0xff] %v11150_v4  ;;  %14841 = vst [vmem:[#allocation22_spill] sm:$0xff] %v11156_v45  ;;  %v11162_v27 = vsel %vm1126_vm14, %v14842_v63, %v10022_v57  ;;  %v14844_v12 = vld [vmem:[#allocation29_spill] sm:$0xff]  ;;  %v14848_v48 = vld [vmem:[#allocation43_spill] sm:$0xff] }
 0x2e7   : > { %14843 = vst [vmem:[#allocation223_spill] sm:$0xff] %v11162_v27  ;;  %v11168_v8 = vsel %vm1126_vm14, %v14845_v32, %v14844_v12  ;;  %v11174_v4 = vsel %vm1126_vm14, %v14848_v48, %v14847_v52  ;;  %v14850_v13 = vld [vmem:[#allocation30_spill] sm:$0xff]  ;;  %v14851_v46 = vld [vmem:[#allocation57_spill] sm:$0xff]  ;;  %v14853_v57 = vld [vmem:[#allocation83_spill] sm:$0xff]  ;;  %v11194_v52 = vpop.permute.xlu1 %1117 }
 0x2e8   : > { %14846 = vst [vmem:[#allocation252_spill] sm:$0xff] %v11168_v8  ;;  %14849 = vst [vmem:[#allocation268_spill] sm:$0xff] %v11174_v4  ;;  %v11180_v45 = vsel %vm1126_vm14, %v14851_v46, %v14850_v13  ;;  %v14854_v63 = vld [vmem:[#allocation46_spill] sm:$0xff]  ;;  %v14856_v32 = vld [vmem:[#allocation72_spill] sm:$0xff]  ;;  %vm1136_vm8 = vcmp.eq.s32.totalorder %v11194_v52, 1 }
 0x2e9   : > { %14852 = vst [vmem:[#allocation234_spill] sm:$0xff] %v11180_v45  ;;  %v11186_v12 = vsel %vm1125_vm15, %v14854_v63, %v14853_v57  ;;  %v14857_v8 = vld [vmem:[#allocation44_spill] sm:$0xff]  ;;  %v14860_v48 = vld [vmem:[#allocation61_spill] sm:$0xff]  ;;  %v14934_v49 = vld [vmem:[#allocation103_spill] sm:$0xff] }
 0x2ea   : > { %14855 = vst [vmem:[#allocation206_spill] sm:$0xff] %v11186_v12  ;;  %v11190_v27 = vsel %vm1125_vm15, %v14857_v8, %v14856_v32  ;;  %v14861_v7 = vld [vmem:[#allocation64_spill] sm:$0xff]  ;;  %v14864_v45 = vld [vmem:[#allocation81_spill] sm:$0xff] }
 0x2eb   : > { %14858 = vst [vmem:[#allocation257_spill] sm:$0xff] %v11190_v27  ;;  %v11200_v13 = vsel %vm1125_vm15, %v14861_v7, %v14860_v48  ;;  %v14863_v46 = vld [vmem:[#allocation100_spill] sm:$0xff]  ;;  %v14867_v32 = vld [vmem:[#allocation69_spill] sm:$0xff] }
 0x2ec   : > { %14862 = vst [vmem:[#allocation235_spill] sm:$0xff] %v11200_v13  ;;  %v11204_v57 = vsel %vm1125_vm15, %v14864_v45, %v14863_v46  ;;  %v14865_v63 = vld [vmem:[#allocation68_spill] sm:$0xff]  ;;  %v14869_v58 = vld [vmem:[#allocation93_spill] sm:$0xff]  ;;  %v14877_v46 = vld [vmem:[#allocation62_spill] sm:$0xff] }
 0x2ed   : > { %v14866_v12 = vld [vmem:[#allocation272_spill] sm:$0xff]  ;;  %v11216_v33 = vsel %vm1125_vm15, %v14870_v29, %v14869_v58  ;;  %v14871_v10 = vld [vmem:[#allocation77_spill] sm:$0xff] }
 0x2ee   : > { %v11208_v8 = vsel %vm1125_vm15, %v14866_v12, %v14865_v63  ;;  %v14868_v27 = vld [vmem:[#allocation60_spill] sm:$0xff]  ;;  %v14874_v13 = vld [vmem:[#allocation49_spill] sm:$0xff]  ;;  %v14876_v12 = vld [vmem:[#allocation79_spill] sm:$0xff] }
 0x2ef   : > { %v11212_v4 = vsel %vm1125_vm15, %v14868_v27, %v14867_v32  ;;  %v14872_v59 = vld [vmem:[#allocation28_spill] sm:$0xff]  ;;  %v11232_v27 = vsel %vm1128_vm0, %v14877_v46, %v14876_v12  ;;  %v14879_v63 = vld [vmem:[#allocation97_spill] sm:$0xff]  ;;  %v14880_v32 = vld [vmem:[#allocation26_spill] sm:$0xff] }
 0x2f0   : > { %v11220_v48 = vsel %vm1125_vm15, %v14872_v59, %v14871_v10  ;;  %v14873_v7 = vld [vmem:[#allocation112_spill] sm:$0xff]  ;;  %14878 = vst [vmem:[#allocation236_spill] sm:$0xff] %v11232_v27  ;;  %v11238_v29 = vsel %vm1128_vm0, %v14880_v32, %v14879_v63  ;;  %v14882_v10 = vld [vmem:[#allocation73_spill] sm:$0xff]  ;;  %v14883_v59 = vld [vmem:[#allocation34_spill] sm:$0xff] }
 0x2f1   : > { %v11226_v45 = vsel %vm1128_vm0, %v14874_v13, %v14873_v7  ;;  %14881 = vst [vmem:[#allocation249_spill] sm:$0xff] %v11238_v29  ;;  %v11244_v58 = vsel %vm1128_vm0, %v14883_v59, %v14882_v10  ;;  %v14885_v13 = vld [vmem:[#allocation114_spill] sm:$0xff]  ;;  %v14887_v12 = vld [vmem:[#allocation75_spill] sm:$0xff]  ;;  %v14888_v46 = vld [vmem:[#allocation41_spill] sm:$0xff] }
 0x2f2   : > { %14875 = vst [vmem:[#allocation233_spill] sm:$0xff] %v11226_v45  ;;  %14884 = vst [vmem:[#allocation262_spill] sm:$0xff] %v11244_v58  ;;  %v14886_v7 = vld [vmem:[#allocation70_spill] sm:$0xff]  ;;  %v11256_v27 = vsel %vm1128_vm0, %v14888_v46, %v14887_v12  ;;  %v14890_v63 = vld [vmem:[#allocation39_spill] sm:$0xff] }
 0x2f3   : > { %v11250_v45 = vsel %vm1128_vm0, %v14886_v7, %v14885_v13  ;;  %14889 = vst [vmem:[#allocation238_spill] sm:$0xff] %v11256_v27  ;;  %v14891_v32 = vld [vmem:[#allocation48_spill] sm:$0xff]  ;;  %v14893_v10 = vld [vmem:[#allocation31_spill] sm:$0xff]  ;;  %v14898_v46 = vld [vmem:[#allocation5_spill] sm:$0xff] }
 0x2f4   : > { %v11262_v29 = vsel %vm1128_vm0, %v14891_v32, %v14890_v63  ;;  %v14894_v59 = vld [vmem:[#allocation95_spill] sm:$0xff]  ;;  %v14895_v13 = vld [vmem:[#allocation32_spill] sm:$0xff]  ;;  %v14901_v32 = vld [vmem:[#allocation74_spill] sm:$0xff] }
 0x2f5   : > { %14892 = vst [vmem:[#allocation240_spill] sm:$0xff] %v11262_v29  ;;  %v11268_v58 = vsel %vm1128_vm0, %v14894_v59, %v14893_v10  ;;  %v11274_v7 = vsel %vm1127_vm1, %v10121_v23, %v14895_v13  ;;  %v14897_v12 = vld [vmem:[#allocation120_spill] sm:$0xff]  ;;  %v14900_v63 = vld [vmem:[#allocation107_spill] sm:$0xff]  ;;  %v14907_v13 = vld [vmem:[#allocation101_spill] sm:$0xff] }
 0x2f6   : > { %14896 = vst [vmem:[#allocation267_spill] sm:$0xff] %v11274_v7  ;;  %v11280_v27 = vsel %vm1127_vm1, %v14898_v46, %v14897_v12  ;;  %v11286_v29 = vsel %vm1127_vm1, %v14901_v32, %v14900_v63  ;;  %v14903_v15 = vld [vmem:[#allocation80_spill] sm:$0xff]  ;;  %v14904_v10 = vld [vmem:[#allocation63_spill] sm:$0xff]  ;;  %v14908_v12 = vld [vmem:[#allocation110_spill] sm:$0xff] }
 0x2f7   : > { %14899 = vst [vmem:[#allocation55_spill] sm:$0xff] %v11280_v27  ;;  %14902 = vst [vmem:[#allocation222_spill] sm:$0xff] %v11286_v29  ;;  %v11292_v59 = vsel %vm1127_vm1, %v14904_v10, %v14903_v15  ;;  %v14906_v23 = vld [vmem:[#allocation123_spill] sm:$0xff]  ;;  %v14909_v46 = vld [vmem:[#allocation6_spill] sm:$0xff] }
 0x2f8   : > { %14905 = vst [vmem:[#allocation59_spill] sm:$0xff] %v11292_v59  ;;  %v11298_v7 = vsel %vm1127_vm1, %v14907_v13, %v14906_v23  ;;  %v11304_v27 = vsel %vm1127_vm1, %v14909_v46, %v14908_v12  ;;  %v14910_v63 = vld [vmem:[#allocation127_spill] sm:$0xff]  ;;  %v14914_v10 = vld [vmem:[#allocation94_spill] sm:$0xff]  ;;  %v11322_v23 = vsel %vm1130_vm2, %v10197_v56, %v10289_v44  ;;  %v14917_v12 = vld [vmem:[#allocation113_spill] sm:$0xff] }
 0x2f9   : > { %v14911_v32 = vld [vmem:[#allocation7_spill] sm:$0xff]  ;;  %v14916_v13 = vld [vmem:[#allocation126_spill] sm:$0xff]  ;;  %v14920_v5 = vld [vmem:[#allocation96_spill] sm:$0xff] }
 0x2fa   : > { %v11310_v29 = vsel %vm1127_vm1, %v14911_v32, %v14910_v63  ;;  %v14913_v15 = vld [vmem:[#allocation99_spill] sm:$0xff]  ;;  %v11328_v46 = vsel %vm1130_vm2, %v14917_v12, %v14916_v13  ;;  %v11330_v63 = vpop.permute.xlu1 %1196  ;;  %v11332_v32 = vpop.permute.xlu0 %1193  ;;  %v14925_v44 = vld [vmem:[#allocation78_spill] sm:$0xff]  ;;  %v14926_v12 = vld [vmem:[#allocation84_spill] sm:$0xff] }
 0x2fb   : > { %14912 = vst [vmem:[#allocation247_spill] sm:$0xff] %v11310_v29  ;;  %v11316_v59 = vsel %vm1127_vm1, %v14914_v10, %v14913_v15  ;;  %14918 = vst [vmem:[#allocation20_spill] sm:$0xff] %v11328_v46  ;;  %v14919_v29 = vld [vmem:[#allocation129_spill] sm:$0xff]  ;;  %v14922_v10 = vld [vmem:[#allocation115_spill] sm:$0xff]  ;;  %v11350_v13 = vsel %vm1130_vm2, %v14925_v44, %v10322_v62  ;;  %v11356_v46 = vsel %vm1130_vm2, %v14926_v12, %v10328_v30  ;;  %vm1247_vm11 = vcmp.eq.s32.totalorder %v11330_v63, 1 }
 0x2fc   : > { %14915 = vst [vmem:[#allocation36_spill] sm:$0xff] %v11316_v59  ;;  %v11338_v15 = vsel %vm1130_vm2, %v14920_v5, %v14919_v29  ;;  %v14923_v59 = vld [vmem:[#allocation85_spill] sm:$0xff]  ;;  %v14928_v5 = vld [vmem:[#allocation102_spill] sm:$0xff]  ;;  %v11374_v62 = vsel %vm1129_vm3, %v10275_v22, %v10355_v31  ;;  %v14931_v30 = vld [vmem:[#allocation76_spill] sm:$0xff]  ;;  %vm1246_vm12 = vcmp.eq.s32.totalorder %v11332_v32, 1 }
 0x2fd   : > { %14921 = vst [vmem:[#allocation37_spill] sm:$0xff] %v11338_v15  ;;  %v11344_v56 = vsel %vm1130_vm2, %v14923_v59, %v14922_v10  ;;  %v14927_v29 = vld [vmem:[#allocation105_spill] sm:$0xff]  ;;  %v14930_v10 = vld [vmem:[#allocation86_spill] sm:$0xff]  ;;  %v11378_v44 = vsel %vm1129_vm3, %v14931_v30, %v10361_v6  ;;  %v14933_v35 = vld [vmem:[#allocation8_spill] sm:$0xff] }
 0x2fe   : > { %14924 = vst [vmem:[#allocation263_spill] sm:$0xff] %v11344_v56  ;;  %v11362_v15 = vsel %vm1130_vm2, %v14928_v5, %v14927_v29  ;;  %v14929_v59 = vld [vmem:[#allocation121_spill] sm:$0xff]  ;;  %14932 = vst [vmem:[#allocation271_spill] sm:$0xff] %v11378_v44  ;;  %v11384_v12 = vsel %vm1129_vm3, %v14933_v35, %v10367_v17  ;;  %v11388_v29 = vsel %vm1129_vm3, %v14934_v49, %v10373_v20  ;;  %v14935_v5 = vld [vmem:[#allocation116_spill] sm:$0xff] }
 0x2ff   : > { %v11368_v56 = vsel %vm1130_vm2, %v14930_v10, %v14929_v59  ;;  %v14936_v59 = vld [vmem:[#allocation40_spill] sm:$0xff]  ;;  %v14937_v31 = vld [vmem:[#allocation122_spill] sm:$0xff]  ;;  %v11400_v10 = vsel %vm1129_vm3, %v10243_v24, %v10403_v14  ;;  %v14939_v44 = vld [vmem:[#allocation91_spill] sm:$0xff] }
 0x300   : > { %v11392_v22 = vsel %vm1129_vm3, %v14936_v59, %v14935_v5  ;;  %v11396_v6 = vsel %vm1129_vm3, %v14937_v31, %v10397_v18  ;;  %v14938_v30 = vld [vmem:[#allocation146_spill] sm:$0xff]  ;;  %v14943_v49 = vld [vmem:[#allocation156_spill] sm:$0xff]  ;;  %v14946_v59 = vld [vmem:[#allocation137_spill] sm:$0xff] }
 0x301   : > { %v11404_v17 = vsel %vm1129_vm3, %v14939_v44, %v14938_v30  ;;  %v14941_v35 = vld [vmem:[#allocation106_spill] sm:$0xff]  ;;  %v14944_v5 = vld [vmem:[#allocation128_spill] sm:$0xff]  ;;  %v14949_v24 = vld [vmem:[#allocation109_spill] sm:$0xff] }
 0x302   : > { %14940 = vst [vmem:[#allocation21_spill] sm:$0xff] %v11404_v17  ;;  %v11410_v20 = vsel %vm1132_vm4, %v14941_v35, %v10427_v60  ;;  %v11416_v18 = vsel %vm1132_vm4, %v14944_v5, %v14943_v49  ;;  %v14947_v31 = vld [vmem:[#allocation98_spill] sm:$0xff]  ;;  %v14950_v44 = vld [vmem:[#allocation104_spill] sm:$0xff]  ;;  %v14952_v60 = vld [vmem:[#allocation125_spill] sm:$0xff] }
 0x303   : > { %14942 = vst [vmem:[#allocation266_spill] sm:$0xff] %v11410_v20  ;;  %14945 = vst [vmem:[#allocation19_spill] sm:$0xff] %v11416_v18  ;;  %v11422_v14 = vsel %vm1132_vm4, %v14947_v31, %v14946_v59  ;;  %v11428_v30 = vsel %vm1132_vm4, %v14950_v44, %v14949_v24  ;;  %v14953_v35 = vld [vmem:[#allocation87_spill] sm:$0xff]  ;;  %v14954_v49 = vld [vmem:[#allocation158_spill] sm:$0xff]  ;;  %v11442_v59 = vpop.permute.xlu1 %1202  ;;  %v11444_v31 = vpop.permute.xlu0 %1199 }
 0x304   : > { %14948 = vst [vmem:[#allocation25_spill] sm:$0xff] %v11422_v14  ;;  %14951 = vst [vmem:[#allocation245_spill] sm:$0xff] %v11428_v30  ;;  %v11434_v20 = vsel %vm1132_vm4, %v14953_v35, %v14952_v60  ;;  %v14955_v5 = vld [vmem:[#allocation134_spill] sm:$0xff]  ;;  %v14956_v14 = vld [vmem:[#allocation124_spill] sm:$0xff]  ;;  %v11462_v35 = vsel %vm1131_vm5, %v10421_v28, %v10510_v19  ;;  %vm1249_vm13 = vcmp.eq.s32.totalorder %v11442_v59, 1  ;;  %vm1248_vm14 = vcmp.eq.s32.totalorder %v11444_v31, 1 }
 0x305   : > { %v11440_v18 = vsel %vm1132_vm4, %v14955_v5, %v14954_v49  ;;  %v14957_v17 = vld [vmem:[#allocation135_spill] sm:$0xff]  ;;  %v14958_v44 = vld [vmem:[#allocation117_spill] sm:$0xff]  ;;  %v14959_v30 = vld [vmem:[#allocation90_spill] sm:$0xff] }
 0x306   : > { %v11450_v24 = vsel %vm1132_vm4, %v14957_v17, %v14956_v14  ;;  %v11456_v60 = vsel %vm1132_vm4, %v14959_v30, %v14958_v44  ;;  %v14960_v49 = vld [vmem:[#allocation111_spill] sm:$0xff]  ;;  %v11474_v17 = vsel %vm1131_vm5, %v10379_v11, %v10522_v54  ;;  %v14962_v50 = vld [vmem:[#allocation136_spill] sm:$0xff] }
 0x307   : > { %v11468_v5 = vsel %vm1131_vm5, %v14960_v49, %v10516_v40  ;;  %14961 = vst [vmem:[#allocation50_spill] sm:$0xff] %v11474_v17  ;;  %v11480_v14 = vsel %vm1131_vm5, %v14962_v50, %v10528_v39  ;;  %v14964_v28 = vld [vmem:[#allocation92_spill] sm:$0xff]  ;;  %v14966_v40 = vld [vmem:[#allocation118_spill] sm:$0xff]  ;;  %v14969_v11 = vld [vmem:[#allocation151_spill] sm:$0xff]  ;;  %v11565_v37 = vpop.permute.xlu1 %1208 }
 0x308   : > { %14963 = vst [vmem:[#allocation52_spill] sm:$0xff] %v11480_v14  ;;  %v11486_v19 = vsel %vm1131_vm5, %v14964_v28, %v10543_v53  ;;  %v11492_v30 = vsel %vm1131_vm5, %v14966_v40, %v10549_v16  ;;  %v14968_v54 = vld [vmem:[#allocation152_spill] sm:$0xff]  ;;  %v14971_v39 = vld [vmem:[#allocation166_spill] sm:$0xff]  ;;  %v11510_v53 = vsel %vm1134_vm6, %v10499_v51, %v10576_v0  ;;  %v14985_v0 = vld [vmem:[#allocation9_spill] sm:$0xff]  ;;  %vm1251_vm15 = vcmp.eq.s32.totalorder %v11565_v37, 1 }
 0x309   : > { %14965 = vst [vmem:[#allocation66_spill] sm:$0xff] %v11486_v19  ;;  %14967 = vst [vmem:[#allocation261_spill] sm:$0xff] %v11492_v30  ;;  %v11498_v44 = vsel %vm1131_vm5, %v14969_v11, %v14968_v54  ;;  %v14972_v49 = vld [vmem:[#allocation108_spill] sm:$0xff]  ;;  %v14978_v54 = vld [vmem:[#allocation171_spill] sm:$0xff] }
 0x30a   : > { %14970 = vst [vmem:[#allocation264_spill] sm:$0xff] %v11498_v44  ;;  %v11504_v50 = vsel %vm1131_vm5, %v14972_v49, %v14971_v39  ;;  %14974 = vst [vmem:[#allocation56_spill] sm:$0xff] %v11510_v53  ;;  %v14975_v16 = vld [vmem:[#allocation12_spill] sm:$0xff]  ;;  %v14979_v11 = vld [vmem:[#allocation157_spill] sm:$0xff] }
 0x30b   : > { %14973 = vst [vmem:[#allocation254_spill] sm:$0xff] %v11504_v50  ;;  %v14976_v28 = vld [vmem:[#allocation144_spill] sm:$0xff]  ;;  %v11522_v44 = vsel %vm1134_vm6, %v14979_v11, %v14978_v54  ;;  %v14982_v39 = vld [vmem:[#allocation145_spill] sm:$0xff]  ;;  %v14984_v51 = vld [vmem:[#allocation178_spill] sm:$0xff] }
 0x30c   : > { %v11516_v40 = vsel %vm1134_vm6, %v14976_v28, %v14975_v16  ;;  %14980 = vst [vmem:[#allocation265_spill] sm:$0xff] %v11522_v44  ;;  %v14981_v61 = vld [vmem:[#allocation140_spill] sm:$0xff]  ;;  %v11534_v53 = vsel %vm1134_vm6, %v14985_v0, %v14984_v51  ;;  %v14987_v16 = vld [vmem:[#allocation141_spill] sm:$0xff]  ;;  %v14988_v28 = vld [vmem:[#allocation131_spill] sm:$0xff] }
 0x30d   : > { %14977 = vst [vmem:[#allocation54_spill] sm:$0xff] %v11516_v40  ;;  %v11528_v49 = vsel %vm1134_vm6, %v14982_v39, %v14981_v61  ;;  %14986 = vst [vmem:[#allocation58_spill] sm:$0xff] %v11534_v53  ;;  %v11540_v40 = vsel %vm1134_vm6, %v14988_v28, %v14987_v16  ;;  %v14990_v54 = vld [vmem:[#allocation143_spill] sm:$0xff]  ;;  %v14991_v11 = vld [vmem:[#allocation10_spill] sm:$0xff] }
 0x30e   : > { %14983 = vst [vmem:[#allocation241_spill] sm:$0xff] %v11528_v49  ;;  %14989 = vst [vmem:[#allocation51_spill] sm:$0xff] %v11540_v40  ;;  %v11546_v44 = vsel %vm1134_vm6, %v14991_v11, %v14990_v54  ;;  %v14993_v61 = vld [vmem:[#allocation130_spill] sm:$0xff]  ;;  %v14994_v39 = vld [vmem:[#allocation163_spill] sm:$0xff]  ;;  %v11567_v54 = vpop.permute.xlu0 %1205 }
 0x30f   : > { %14992 = vst [vmem:[#allocation27_spill] sm:$0xff] %v11546_v44  ;;  %v11552_v49 = vsel %vm1134_vm6, %v14994_v39, %v14993_v61  ;;  %v14996_v51 = vld [vmem:[#allocation133_spill] sm:$0xff]  ;;  %v14998_v16 = vld [vmem:[#allocation150_spill] sm:$0xff]  ;;  %v15000_v3 = vld [vmem:[#allocation184_spill] sm:$0xff]  ;;  %vm1250_vm0 = vcmp.eq.s32.totalorder %v11567_v54, 1 }
 0x310   : > { %14995 = vst [vmem:[#allocation23_spill] sm:$0xff] %v11552_v49  ;;  %v11558_v0 = vsel %vm1133_vm7, %v10597_v25, %v14996_v51  ;;  %v11562_v28 = vsel %vm1133_vm7, %v14998_v16, %v10652_v1  ;;  %v15001_v11 = vld [vmem:[#allocation132_spill] sm:$0xff]  ;;  %v15003_v39 = vld [vmem:[#allocation165_spill] sm:$0xff]  ;;  %v15004_v25 = vld [vmem:[#allocation119_spill] sm:$0xff] }
 0x311   : > { %14997 = vst [vmem:[#allocation65_spill] sm:$0xff] %v11558_v0  ;;  %14999 = vst [vmem:[#allocation258_spill] sm:$0xff] %v11562_v28  ;;  %v11571_v61 = vsel %vm1133_vm7, %v15001_v11, %v15000_v3  ;;  %v11575_v51 = vsel %vm1133_vm7, %v15004_v25, %v15003_v39  ;;  %v15006_v0 = vld [vmem:[#allocation155_spill] sm:$0xff]  ;;  %v15007_v1 = vld [vmem:[#allocation164_spill] sm:$0xff] }
 0x312   : > { %15002 = vst [vmem:[#allocation82_spill] sm:$0xff] %v11571_v61  ;;  %15005 = vst [vmem:[#allocation270_spill] sm:$0xff] %v11575_v51  ;;  %v11579_v16 = vsel %vm1133_vm7, %v15007_v1, %v15006_v0  ;;  %v15009_v28 = vld [vmem:[#allocation139_spill] sm:$0xff]  ;;  %v15011_v44 = vld [vmem:[#allocation169_spill] sm:$0xff] }
 0x313   : > { %15008 = vst [vmem:[#allocation2_spill] sm:$0xff] %v11579_v16  ;;  %v11583_v49 = vsel %vm1133_vm7, %v15009_v28, %v10685_v34  ;;  %v15012_v40 = vld [vmem:[#allocation11_spill] sm:$0xff]  ;;  %v15014_v3 = vld [vmem:[#allocation186_spill] sm:$0xff]  ;;  %v15015_v11 = vld [vmem:[#allocation153_spill] sm:$0xff] }
 0x314   : > { %15010 = vst [vmem:[#allocation67_spill] sm:$0xff] %v11583_v49  ;;  %v11587_v53 = vsel %vm1133_vm7, %v15012_v40, %v15011_v44  ;;  %v11591_v61 = vsel %vm1133_vm7, %v15015_v11, %v15014_v3  ;;  %v15017_v39 = vld [vmem:[#allocation192_spill] sm:$0xff]  ;;  %v15019_v25 = vld [vmem:[#allocation161_spill] sm:$0xff]  ;;  %v15023_v44 = vld [vmem:[#allocation142_spill] sm:$0xff] }
 0x315   : > { %15013 = vst [vmem:[#allocation3_spill] sm:$0xff] %v11587_v53  ;;  %15016 = vst [vmem:[#allocation269_spill] sm:$0xff] %v11591_v61  ;;  %v11597_v0 = vsel %vm1136_vm8, %v10673_v36, %v15017_v39  ;;  %v15020_v1 = vld [vmem:[#allocation172_spill] sm:$0xff]  ;;  %v15022_v28 = vld [vmem:[#allocation193_spill] sm:$0xff] }
 0x316   : > { %15018 = vst [vmem:[#allocation88_spill] sm:$0xff] %v11597_v0  ;;  %v11603_v34 = vsel %vm1136_vm8, %v15020_v1, %v15019_v25  ;;  %v11609_v40 = vsel %vm1136_vm8, %v15023_v44, %v15022_v28  ;;  %v15025_v3 = vld [vmem:[#allocation168_spill] sm:$0xff]  ;;  %v15026_v11 = vld [vmem:[#allocation179_spill] sm:$0xff]  ;;  %v3559_v44 = vld [vmem:[%s5080_s28 + $0x98] sm:$0xff] }
 0x317   : > { %15021 = vst [vmem:[#allocation35_spill] sm:$0xff] %v11603_v34  ;;  %15024 = vst [vmem:[#allocation89_spill] sm:$0xff] %v11609_v40  ;;  %v11615_v61 = vsel %vm1136_vm8, %v15026_v11, %v15025_v3  ;;  %v15028_v36 = vld [vmem:[#allocation208_spill] sm:$0xff]  ;;  %v15029_v39 = vld [vmem:[#allocation159_spill] sm:$0xff] }
 0x318   : > { %15027 = vst [vmem:[#allocation71_spill] sm:$0xff] %v11615_v61  ;;  %v11621_v0 = vsel %vm1136_vm8, %v15029_v39, %v15028_v36  ;;  %v15031_v25 = vld [vmem:[#allocation180_spill] sm:$0xff]  ;;  %v15032_v1 = vld [vmem:[#allocation147_spill] sm:$0xff]  ;;  %v15034_v3 = vld [vmem:[#allocation177_spill] sm:$0xff] }
 0x319   : > { %15030 = vst [vmem:[#allocation53_spill] sm:$0xff] %v11621_v0  ;;  %v11627_v28 = vsel %vm1136_vm8, %v15032_v1, %v15031_v25  ;;  %v3685_v40 = vld [vmem:[%s5080_s28 + $0x128] sm:$0xff]  ;;  %v15035_v11 = vld [vmem:[#allocation185_spill] sm:$0xff]  ;;  %v15037_v34 = vld [vmem:[#allocation148_spill] sm:$0xff] }
 0x31a   : > { %15033 = vst [vmem:[#allocation47_spill] sm:$0xff] %v11627_v28  ;;  %v11635_v61 = vsel %vm1136_vm8, %v15035_v11, %v15034_v3  ;;  %v15038_v36 = vld [vmem:[#allocation138_spill] sm:$0xff]  ;;  %v15040_v0 = vld [vmem:[#allocation181_spill] sm:$0xff]  ;;  %v3973_v11 = vld [vmem:[%s5080_s28 + $0x248] sm:$0xff] }
 0x31b   : > { %15036 = vst [vmem:[#allocation45_spill] sm:$0xff] %v11635_v61  ;;  %v11641_v39 = vsel %vm1136_vm8, %v15038_v36, %v15037_v34  ;;  %v15041_v53 = vld [vmem:[#allocation209_spill] sm:$0xff]  ;;  %v15044_v28 = vld [vmem:[#allocation170_spill] sm:$0xff]  ;;  %v15049_v34 = vld [vmem:[#allocation188_spill] sm:$0xff] }
 0x31c   : > { %15039 = vst [vmem:[#allocation4_spill] sm:$0xff] %v11641_v39  ;;  %v11647_v25 = vsel %vm1135_vm9, %v15041_v53, %v15040_v0  ;;  %v15043_v1 = vld [vmem:[#allocation213_spill] sm:$0xff]  ;;  %v15050_v36 = vld [vmem:[#allocation14_spill] sm:$0xff]  ;;  %v3561_v30 = vld [vmem:[%s5080_s28 + $0xa8] sm:$0xff] }
 0x31d   : > { %15042 = vst [vmem:[#allocation260_spill] sm:$0xff] %v11647_v25  ;;  %v11653_v49 = vsel %vm1135_vm9, %v15044_v28, %v15043_v1  ;;  %v3829_v3 = vld [vmem:[%s5080_s28 + $0x1b8] sm:$0xff]  ;;  %v11668_v53 = vsel %vm1135_vm9, %v15050_v36, %v15049_v34  ;;  %v15052_v0 = vld [vmem:[#allocation154_spill] sm:$0xff]  ;;  %v15053_v25 = vld [vmem:[#allocation200_spill] sm:$0xff]  ;;  %v11698_v34 = vpop.permute.xlu0 %1211 }
 0x31e   : > { %15045 = vst [vmem:[#allocation33_spill] sm:$0xff] %v11653_v49  ;;  %v4117_v61 = vld [vmem:[%s5080_s28 + $0x2d8] sm:$0xff]  ;;  %15051 = vst [vmem:[#allocation24_spill] sm:$0xff] %v11668_v53  ;;  %v11674_v28 = vsel %vm1135_vm9, %v15053_v25, %v15052_v0  ;;  %v15055_v1 = vld [vmem:[#allocation214_spill] sm:$0xff]  ;;  %vm1252_vm2 = vcmp.eq.s32.totalorder %v11698_v34, 1 }
 0x31f   : > { %v15046_v16 = vld [vmem:[#allocation149_spill] sm:$0xff]  ;;  %15054 = vst [vmem:[#allocation42_spill] sm:$0xff] %v11674_v28  ;;  %v3270_v25 = vld [vmem:[%s5080_s28 + $0x8] sm:$0xff]  ;;  %v4260_v50 = vld [vmem:[%s5080_s28 + $0x360] sm:$0xff] }
 0x320   : > { %v15047_v51 = vld [vmem:[#allocation13_spill] sm:$0xff]  ;;  %v15058_v36 = vld [vmem:[#allocation191_spill] sm:$0xff] }
 0x321   : > { %v11662_v52 = vsel %vm1135_vm9, %v15047_v51, %v15046_v16  ;;  %v15056_v49 = vld [vmem:[#allocation201_spill] sm:$0xff]  ;;  %v4261_v51 = vld [vmem:[%s5080_s28 + $0x368] sm:$0xff]  ;;  %v1265_v0 = vsel %vm1247_vm11, %v3559_v44, %v15058_v36 }
 0x322   : > { %15048 = vst [vmem:[#allocation29_spill] sm:$0xff] %v11662_v52  ;;  %v11680_v39 = vsel %vm1135_vm9, %v15056_v49, %v15055_v1  ;;  %v4405_v16 = vld [vmem:[%s5080_s28 + $0x3f8] sm:$0xff]  ;;  %v11696_v49 = vpop.permute.xlu1 %1214  ;;  %v15059_v1 = vld [vmem:[#allocation162_spill] sm:$0xff]  ;;  %v15060_v28 = vld [vmem:[#allocation167_spill] sm:$0xff] }
 0x323   : > { %15057 = vst [vmem:[#allocation43_spill] sm:$0xff] %v11680_v39  ;;  %v1554_v39 = vsel %vm1247_vm11, %v3685_v40, %v15059_v1  ;;  %v1843_v53 = vsel %vm1247_vm11, %v3829_v3, %v15060_v28  ;;  %v15061_v52 = vld [vmem:[#allocation225_spill] sm:$0xff]  ;;  %1284 = vst.msk [vmem:[%s11687_s15 + $0x8] sm:$0xff] %vm1282_vm10, %v1265_v0  ;;  %v15062_v40 = vld [vmem:[#allocation195_spill] sm:$0xff]  ;;  %v2999_v28 = vsel %vm1247_vm11, %v4405_v16, %v10866_v41  ;;  %vm1253_vm1 = vcmp.eq.s32.totalorder %v11696_v49, 1 }
 0x324   : > { %v2132_v2 = vsel %vm1247_vm11, %v3973_v11, %v15061_v52  ;;  %v3687_v44 = vld [vmem:[%s5080_s28 + $0x138] sm:$0xff]  ;;  %3703 = vst.msk [vmem:[%s11687_s15 + $0x98] sm:$0xff] %vm1282_vm10, %v1554_v39  ;;  %3847 = vst.msk [vmem:[%s11687_s15 + $0x128] sm:$0xff] %vm1282_vm10, %v1843_v53  ;;  %v2421_v3 = vsel %vm1247_vm11, %v4117_v61, %v15062_v40  ;;  %v15063_v11 = vld [vmem:[#allocation174_spill] sm:$0xff] }
 0x325   : > { %3991 = vst.msk [vmem:[%s11687_s15 + $0x1b8] sm:$0xff] %vm1282_vm10, %v2132_v2  ;;  %v2710_v52 = vsel %vm1247_vm11, %v4261_v51, %v15063_v11  ;;  %v3288_v2 = vsel %vm1247_vm11, %v3270_v25, %v10872_v21  ;;  %v3831_v39 = vld [vmem:[%s5080_s28 + $0x1c8] sm:$0xff]  ;;  %v3975_v53 = vld [vmem:[%s5080_s28 + $0x258] sm:$0xff]  ;;  %4135 = vst.msk [vmem:[%s11687_s15 + $0x248] sm:$0xff] %vm1282_vm10, %v2421_v3 }
 0x326   : > { %v4119_v61 = vld [vmem:[%s5080_s28 + $0x2e8] sm:$0xff]  ;;  %4279 = vst.msk [vmem:[%s11687_s15 + $0x2d8] sm:$0xff] %vm1282_vm10, %v2710_v52  ;;  %4423 = vst.msk [vmem:[%s11687_s15 + $0x368] sm:$0xff] %vm1282_vm10, %v2999_v28  ;;  %v15064_v41 = vld [vmem:[#allocation173_spill] sm:$0xff] }
 0x327   : > { %4567 = vst.msk [vmem:[%s11687_s15 + $0x3f8] sm:$0xff] %vm1282_vm10, %v3288_v2  ;;  %v15065_v51 = vld [vmem:[#allocation226_spill] sm:$0xff]  ;;  %v15066_v63 = vld [vmem:[#allocation199_spill] sm:$0xff]  ;;  %v15067_v16 = vld [vmem:[#allocation160_spill] sm:$0xff] }
 0x328   : > { %v1264_v21 = vsel %vm1246_vm12, %v15065_v51, %v15064_v41  ;;  %v1553_v25 = vsel %vm1246_vm12, %v15067_v16, %v15066_v63  ;;  %v15068_v36 = vld [vmem:[#allocation15_spill] sm:$0xff]  ;;  %v15070_v40 = vld [vmem:[#allocation230_spill] sm:$0xff]  ;;  %v15071_v3 = vld [vmem:[#allocation220_spill] sm:$0xff] }
 0x329   : > { %v15069_v0 = vld [vmem:[#allocation219_spill] sm:$0xff]  ;;  %v2131_v11 = vsel %vm1246_vm12, %v15071_v3, %v15070_v40  ;;  %v4263_v52 = vld [vmem:[%s5080_s28 + $0x378] sm:$0xff]  ;;  %1283 = vst.msk [vmem:[%s11687_s15] sm:$0xff] %vm1282_vm10, %v1264_v21  ;;  %3702 = vst.msk [vmem:[%s11687_s15 + $0x90] sm:$0xff] %vm1282_vm10, %v1553_v25 }
 0x32a   : > { %v1842_v1 = vsel %vm1246_vm12, %v15069_v0, %v15068_v36  ;;  %v4407_v28 = vld [vmem:[%s5080_s28 + $0x408] sm:$0xff]  ;;  %v3272_v2 = vld [vmem:[%s5080_s28 + $0x18] sm:$0xff]  ;;  %3990 = vst.msk [vmem:[%s11687_s15 + $0x1b0] sm:$0xff] %vm1282_vm10, %v2131_v11  ;;  %v15073_v51 = vld [vmem:[#allocation194_spill] sm:$0xff] }
 0x32b   : > { %3846 = vst.msk [vmem:[%s11687_s15 + $0x120] sm:$0xff] %vm1282_vm10, %v1842_v1  ;;  %v15072_v41 = vld [vmem:[#allocation203_spill] sm:$0xff]  ;;  %v15074_v16 = vld [vmem:[#allocation204_spill] sm:$0xff]  ;;  %v15078_v40 = vld [vmem:[#allocation202_spill] sm:$0xff] }
 0x32c   : > { %v2420_v63 = vsel %vm1246_vm12, %v15073_v51, %v15072_v41  ;;  %v2709_v21 = vsel %vm1246_vm12, %v4260_v50, %v15074_v16  ;;  %v15075_v36 = vld [vmem:[#allocation175_spill] sm:$0xff]  ;;  %v15076_v0 = vld [vmem:[#allocation196_spill] sm:$0xff]  ;;  %v15082_v16 = vld [vmem:[#allocation242_spill] sm:$0xff] }
 0x32d   : > { %v2998_v25 = vsel %vm1246_vm12, %v15076_v0, %v15075_v36  ;;  %v15077_v1 = vld [vmem:[#allocation231_spill] sm:$0xff]  ;;  %4134 = vst.msk [vmem:[%s11687_s15 + $0x240] sm:$0xff] %vm1282_vm10, %v2420_v63  ;;  %4278 = vst.msk [vmem:[%s11687_s15 + $0x2d0] sm:$0xff] %vm1282_vm10, %v2709_v21  ;;  %v2134_v21 = vsel %vm1249_vm13, %v3975_v53, %v15082_v16  ;;  %v3563_v36 = vld [vmem:[%s5080_s28 + $0xb8] sm:$0xff] }
 0x32e   : > { %v3287_v3 = vsel %vm1246_vm12, %v15078_v40, %v15077_v1  ;;  %4422 = vst.msk [vmem:[%s11687_s15 + $0x360] sm:$0xff] %vm1282_vm10, %v2998_v25  ;;  %v15079_v50 = vld [vmem:[#allocation207_spill] sm:$0xff]  ;;  %v3833_v25 = vld [vmem:[%s5080_s28 + $0x1d8] sm:$0xff]  ;;  %3993 = vst.msk [vmem:[%s11687_s15 + $0x1c8] sm:$0xff] %vm1282_vm10, %v2134_v21  ;;  %v3001_v40 = vsel %vm1249_vm13, %v4407_v28, %v10984_v26 }
 0x32f   : > { %4566 = vst.msk [vmem:[%s11687_s15 + $0x3f0] sm:$0xff] %vm1282_vm10, %v3287_v3  ;;  %v1267_v11 = vsel %vm1249_vm13, %v3561_v30, %v15079_v50  ;;  %v15080_v41 = vld [vmem:[#allocation211_spill] sm:$0xff]  ;;  %v15084_v53 = vld [vmem:[#allocation217_spill] sm:$0xff]  ;;  %v15085_v3 = vld [vmem:[#allocation250_spill] sm:$0xff] }
 0x330   : > { %v1556_v32 = vsel %vm1249_vm13, %v3687_v44, %v15080_v41  ;;  %v15081_v51 = vld [vmem:[#allocation215_spill] sm:$0xff]  ;;  %1286 = vst.msk [vmem:[%s11687_s15 + $0x18] sm:$0xff] %vm1282_vm10, %v1267_v11  ;;  %v15083_v44 = vld [vmem:[#allocation218_spill] sm:$0xff]  ;;  %v2712_v1 = vsel %vm1249_vm13, %v4263_v52, %v15084_v53  ;;  %v3290_v50 = vsel %vm1249_vm13, %v3272_v2, %v15085_v3  ;;  %v4121_v11 = vld [vmem:[%s5080_s28 + $0x2f8] sm:$0xff]  ;;  %v11838_v52 = vpop.permute.xlu0 %1217 }
 0x331   : > { %v1845_v63 = vsel %vm1249_vm13, %v3831_v39, %v15081_v51  ;;  %v3689_v0 = vld [vmem:[%s5080_s28 + $0x148] sm:$0xff]  ;;  %3705 = vst.msk [vmem:[%s11687_s15 + $0xa8] sm:$0xff] %vm1282_vm10, %v1556_v32  ;;  %v2423_v39 = vsel %vm1249_vm13, %v4119_v61, %v15083_v44  ;;  %v4409_v32 = vld [vmem:[%s5080_s28 + $0x418] sm:$0xff]  ;;  %v11836_v51 = vpop.permute.xlu1 %1220  ;;  %4281 = vst.msk [vmem:[%s11687_s15 + $0x2e8] sm:$0xff] %vm1282_vm10, %v2712_v1  ;;  %vm1254_vm4 = vcmp.eq.s32.totalorder %v11838_v52, 1 }
 0x332   : > { %v3977_v30 = vld [vmem:[%s5080_s28 + $0x268] sm:$0xff]  ;;  %3849 = vst.msk [vmem:[%s11687_s15 + $0x138] sm:$0xff] %vm1282_vm10, %v1845_v63  ;;  %4137 = vst.msk [vmem:[%s11687_s15 + $0x258] sm:$0xff] %vm1282_vm10, %v2423_v39  ;;  %v15088_v2 = vld [vmem:[#allocation182_spill] sm:$0xff]  ;;  %vm1255_vm3 = vcmp.eq.s32.totalorder %v11836_v51, 1 }
 0x333   : > { %v4265_v41 = vld [vmem:[%s5080_s28 + $0x388] sm:$0xff]  ;;  %4425 = vst.msk [vmem:[%s11687_s15 + $0x378] sm:$0xff] %vm1282_vm10, %v3001_v40  ;;  %4569 = vst.msk [vmem:[%s11687_s15 + $0x408] sm:$0xff] %vm1282_vm10, %v3290_v50  ;;  %v15089_v16 = vld [vmem:[#allocation224_spill] sm:$0xff] }
 0x334   : > { %v3274_v61 = vld [vmem:[%s5080_s28 + $0x28] sm:$0xff]  ;;  %v15090_v21 = vld [vmem:[#allocation237_spill] sm:$0xff]  ;;  %v15091_v39 = vld [vmem:[#allocation210_spill] sm:$0xff] }
 0x335   : > { %v15086_v26 = vld [vmem:[#allocation251_spill] sm:$0xff]  ;;  %v1844_v44 = vsel %vm1248_vm14, %v15090_v21, %v15089_v16  ;;  %v2133_v53 = vsel %vm1248_vm14, %v15091_v39, %v11016_v43  ;;  %v3688_v1 = vld [vmem:[%s5080_s28 + $0x140] sm:$0xff]  ;;  %v3832_v40 = vld [vmem:[%s5080_s28 + $0x1d0] sm:$0xff]  ;;  %v2422_v43 = vsel %vm1248_vm14, %v10972_v47, %v11020_v42 }
 0x336   : > { %v1266_v59 = vsel %vm1248_vm14, %v10997_v9, %v15086_v26  ;;  %v15087_v28 = vld [vmem:[#allocation227_spill] sm:$0xff]  ;;  %v3562_v9 = vld [vmem:[%s5080_s28 + $0xb0] sm:$0xff]  ;;  %v3976_v3 = vld [vmem:[%s5080_s28 + $0x260] sm:$0xff]  ;;  %3848 = vst.msk [vmem:[%s11687_s15 + $0x130] sm:$0xff] %vm1282_vm10, %v1844_v44 }
 0x337   : > { %v1555_v63 = vsel %vm1248_vm14, %v15088_v2, %v15087_v28  ;;  %1285 = vst.msk [vmem:[%s11687_s15 + $0x10] sm:$0xff] %vm1282_vm10, %v1266_v59  ;;  %3992 = vst.msk [vmem:[%s11687_s15 + $0x1c0] sm:$0xff] %vm1282_vm10, %v2133_v53  ;;  %v15092_v50 = vld [vmem:[#allocation229_spill] sm:$0xff]  ;;  %v15093_v26 = vld [vmem:[#allocation190_spill] sm:$0xff] }
 0x338   : > { %3704 = vst.msk [vmem:[%s11687_s15 + $0xa0] sm:$0xff] %vm1282_vm10, %v1555_v63  ;;  %v2711_v28 = vsel %vm1248_vm14, %v15093_v26, %v15092_v50  ;;  %v15094_v2 = vld [vmem:[#allocation176_spill] sm:$0xff]  ;;  %v15095_v59 = vld [vmem:[#allocation197_spill] sm:$0xff]  ;;  %v15096_v16 = vld [vmem:[#allocation198_spill] sm:$0xff] }
 0x339   : > { %v3000_v63 = vsel %vm1248_vm14, %v15095_v59, %v15094_v2  ;;  %v15097_v21 = vld [vmem:[#allocation16_spill] sm:$0xff]  ;;  %v4264_v47 = vld [vmem:[%s5080_s28 + $0x380] sm:$0xff]  ;;  %4136 = vst.msk [vmem:[%s11687_s15 + $0x250] sm:$0xff] %vm1282_vm10, %v2422_v43  ;;  %4280 = vst.msk [vmem:[%s11687_s15 + $0x2e0] sm:$0xff] %vm1282_vm10, %v2711_v28 }
 0x33a   : > { %v3289_v44 = vsel %vm1248_vm14, %v15097_v21, %v15096_v16  ;;  %v4120_v39 = vld [vmem:[%s5080_s28 + $0x2f0] sm:$0xff]  ;;  %v3273_v53 = vld [vmem:[%s5080_s28 + $0x20] sm:$0xff]  ;;  %4424 = vst.msk [vmem:[%s11687_s15 + $0x370] sm:$0xff] %vm1282_vm10, %v3000_v63  ;;  %v3565_v31 = vld [vmem:[%s5080_s28 + $0xc8] sm:$0xff] }
 0x33b   : > { %v4408_v42 = vld [vmem:[%s5080_s28 + $0x410] sm:$0xff]  ;;  %4568 = vst.msk [vmem:[%s11687_s15 + $0x400] sm:$0xff] %vm1282_vm10, %v3289_v44  ;;  %v3691_v43 = vld [vmem:[%s5080_s28 + $0x158] sm:$0xff]  ;;  %v3835_v50 = vld [vmem:[%s5080_s28 + $0x1e8] sm:$0xff] }
 0x33c   : > { %v3979_v26 = vld [vmem:[%s5080_s28 + $0x278] sm:$0xff]  ;;  %v15099_v59 = vld [vmem:[#allocation216_spill] sm:$0xff]  ;;  %v15100_v16 = vld [vmem:[#allocation183_spill] sm:$0xff] }
 0x33d   : > { %v15098_v28 = vld [vmem:[#allocation17_spill] sm:$0xff]  ;;  %v1558_v63 = vsel %vm1251_vm15, %v3689_v0, %v15099_v59  ;;  %v1847_v21 = vsel %vm1251_vm15, %v3833_v25, %v15100_v16  ;;  %v4123_v14 = vld [vmem:[%s5080_s28 + $0x308] sm:$0xff]  ;;  %v2425_v0 = vsel %vm1251_vm15, %v4121_v11, %v11062_v55  ;;  %v15102_v25 = vld [vmem:[#allocation18_spill] sm:$0xff]  ;;  %v3292_v59 = vsel %vm1251_vm15, %v3274_v61, %v11084_v38 }
 0x33e   : > { %v1269_v2 = vsel %vm1251_vm15, %v3563_v36, %v15098_v28  ;;  %v15101_v44 = vld [vmem:[#allocation205_spill] sm:$0xff]  ;;  %v4411_v36 = vld [vmem:[%s5080_s28 + $0x428] sm:$0xff]  ;;  %3707 = vst.msk [vmem:[%s11687_s15 + $0xb8] sm:$0xff] %vm1282_vm10, %v1558_v63  ;;  %3851 = vst.msk [vmem:[%s11687_s15 + $0x148] sm:$0xff] %vm1282_vm10, %v1847_v21 }
 0x33f   : > { %v2136_v19 = vsel %vm1251_vm15, %v3977_v30, %v15101_v44  ;;  %v4267_v17 = vld [vmem:[%s5080_s28 + $0x398] sm:$0xff]  ;;  %1288 = vst.msk [vmem:[%s11687_s15 + $0x28] sm:$0xff] %vm1282_vm10, %v1269_v2  ;;  %v2714_v30 = vsel %vm1251_vm15, %v4265_v41, %v15102_v25  ;;  %v15103_v28 = vld [vmem:[#allocation246_spill] sm:$0xff]  ;;  %v3690_v16 = vld [vmem:[%s5080_s28 + $0x150] sm:$0xff]  ;;  %v11973_v25 = vpop.permute.xlu1 %1226 }
 0x340   : > { %3995 = vst.msk [vmem:[%s11687_s15 + $0x1d8] sm:$0xff] %vm1282_vm10, %v2136_v19  ;;  %v3003_v2 = vsel %vm1251_vm15, %v4409_v32, %v15103_v28  ;;  %v3276_v19 = vld [vmem:[%s5080_s28 + $0x38] sm:$0xff]  ;;  %v3564_v63 = vld [vmem:[%s5080_s28 + $0xc0] sm:$0xff]  ;;  %4139 = vst.msk [vmem:[%s11687_s15 + $0x268] sm:$0xff] %vm1282_vm10, %v2425_v0  ;;  %vm1257_vm5 = vcmp.eq.s32.totalorder %v11973_v25, 1 }
 0x341   : > { %4283 = vst.msk [vmem:[%s11687_s15 + $0x2f8] sm:$0xff] %vm1282_vm10, %v2714_v30  ;;  %4427 = vst.msk [vmem:[%s11687_s15 + $0x388] sm:$0xff] %vm1282_vm10, %v3003_v2  ;;  %v15104_v55 = vld [vmem:[#allocation228_spill] sm:$0xff]  ;;  %v15106_v41 = vld [vmem:[#allocation243_spill] sm:$0xff] }
 0x342   : > { %4571 = vst.msk [vmem:[%s11687_s15 + $0x418] sm:$0xff] %vm1282_vm10, %v3292_v59  ;;  %v1268_v37 = vsel %vm1250_vm0, %v3562_v9, %v15104_v55  ;;  %v15105_v38 = vld [vmem:[#allocation232_spill] sm:$0xff]  ;;  %v1846_v32 = vsel %vm1250_vm0, %v3832_v40, %v15106_v41  ;;  %v3834_v44 = vld [vmem:[%s5080_s28 + $0x1e0] sm:$0xff]  ;;  %v15108_v40 = vld [vmem:[#allocation221_spill] sm:$0xff] }
 0x343   : > { %v1557_v11 = vsel %vm1250_vm0, %v3688_v1, %v15105_v38  ;;  %v15107_v61 = vld [vmem:[#allocation256_spill] sm:$0xff]  ;;  %v4122_v9 = vld [vmem:[%s5080_s28 + $0x300] sm:$0xff]  ;;  %v11975_v1 = vpop.permute.xlu0 %1223  ;;  %1287 = vst.msk [vmem:[%s11687_s15 + $0x20] sm:$0xff] %vm1282_vm10, %v1268_v37  ;;  %3850 = vst.msk [vmem:[%s11687_s15 + $0x140] sm:$0xff] %vm1282_vm10, %v1846_v32  ;;  %v12112_v34 = vpop.permute.xlu1 %1232 }
 0x344   : > { %v2135_v21 = vsel %vm1250_vm0, %v3976_v3, %v15107_v61  ;;  %v3978_v0 = vld [vmem:[%s5080_s28 + $0x270] sm:$0xff]  ;;  %3706 = vst.msk [vmem:[%s11687_s15 + $0xb0] sm:$0xff] %vm1282_vm10, %v1557_v11  ;;  %v2424_v3 = vsel %vm1250_vm0, %v4120_v39, %v15108_v40  ;;  %v15109_v30 = vld [vmem:[#allocation253_spill] sm:$0xff]  ;;  %v15111_v55 = vld [vmem:[#allocation259_spill] sm:$0xff]  ;;  %vm1256_vm6 = vcmp.eq.s32.totalorder %v11975_v1, 1  ;;  %vm1259_vm7 = vcmp.eq.s32.totalorder %v12112_v34, 1 }
 0x345   : > { %3994 = vst.msk [vmem:[%s11687_s15 + $0x1d0] sm:$0xff] %vm1282_vm10, %v2135_v21  ;;  %v2713_v28 = vsel %vm1250_vm0, %v4264_v47, %v15109_v30  ;;  %v15110_v2 = vld [vmem:[#allocation212_spill] sm:$0xff]  ;;  %v3291_v37 = vsel %vm1250_vm0, %v3273_v53, %v15111_v55  ;;  %v4410_v11 = vld [vmem:[%s5080_s28 + $0x420] sm:$0xff]  ;;  %4138 = vst.msk [vmem:[%s11687_s15 + $0x260] sm:$0xff] %vm1282_vm10, %v2424_v3 }
 0x346   : > { %v3002_v59 = vsel %vm1250_vm0, %v4408_v42, %v15110_v2  ;;  %v4266_v38 = vld [vmem:[%s5080_s28 + $0x390] sm:$0xff]  ;;  %4282 = vst.msk [vmem:[%s11687_s15 + $0x2f0] sm:$0xff] %vm1282_vm10, %v2713_v28  ;;  %4570 = vst.msk [vmem:[%s11687_s15 + $0x410] sm:$0xff] %vm1282_vm10, %v3291_v37  ;;  %v15112_v47 = vld [vmem:[#allocation239_spill] sm:$0xff] }
 0x347   : > { %v3275_v39 = vld [vmem:[%s5080_s28 + $0x30] sm:$0xff]  ;;  %4426 = vst.msk [vmem:[%s11687_s15 + $0x380] sm:$0xff] %vm1282_vm10, %v3002_v59  ;;  %v1271_v54 = vsel %vm1253_vm1, %v3565_v31, %v15112_v47  ;;  %v15113_v42 = vld [vmem:[#allocation255_spill] sm:$0xff]  ;;  %v15115_v61 = vld [vmem:[#allocation22_spill] sm:$0xff] }
 0x348   : > { %v1560_v53 = vsel %vm1253_vm1, %v3691_v43, %v15113_v42  ;;  %v15114_v41 = vld [vmem:[#allocation244_spill] sm:$0xff]  ;;  %v2138_v21 = vsel %vm1253_vm1, %v3979_v26, %v15115_v61  ;;  %v3567_v40 = vld [vmem:[%s5080_s28 + $0xd8] sm:$0xff]  ;;  %v3693_v3 = vld [vmem:[%s5080_s28 + $0x168] sm:$0xff]  ;;  %1290 = vst.msk [vmem:[%s11687_s15 + $0x38] sm:$0xff] %vm1282_vm10, %v1271_v54 }
 0x349   : > { %v1849_v32 = vsel %vm1253_vm1, %v3835_v50, %v15114_v41  ;;  %v3837_v31 = vld [vmem:[%s5080_s28 + $0x1f8] sm:$0xff]  ;;  %v3981_v30 = vld [vmem:[%s5080_s28 + $0x288] sm:$0xff]  ;;  %3709 = vst.msk [vmem:[%s11687_s15 + $0xc8] sm:$0xff] %vm1282_vm10, %v1560_v53  ;;  %3997 = vst.msk [vmem:[%s11687_s15 + $0x1e8] sm:$0xff] %vm1282_vm10, %v2138_v21 }
 0x34a   : > { %3853 = vst.msk [vmem:[%s11687_s15 + $0x158] sm:$0xff] %vm1282_vm10, %v1849_v32  ;;  %v15116_v43 = vld [vmem:[#allocation223_spill] sm:$0xff]  ;;  %v15117_v26 = vld [vmem:[#allocation252_spill] sm:$0xff]  ;;  %v15119_v55 = vld [vmem:[#allocation234_spill] sm:$0xff]  ;;  %v2137_v32 = vsel %vm1252_vm2, %v3978_v0, %v11204_v57  ;;  %v2426_v57 = vsel %vm1252_vm2, %v4122_v9, %v11208_v8  ;;  %v3293_v0 = vsel %vm1252_vm2, %v3275_v39, %v11220_v48  ;;  %v12114_v9 = vpop.permute.xlu0 %1229 }
 0x34b   : > { %v2427_v50 = vsel %vm1253_vm1, %v4123_v14, %v15116_v43  ;;  %v2716_v28 = vsel %vm1253_vm1, %v4267_v17, %v15117_v26  ;;  %v15118_v2 = vld [vmem:[#allocation268_spill] sm:$0xff]  ;;  %v3294_v37 = vsel %vm1253_vm1, %v3276_v19, %v15119_v55  ;;  %v4125_v47 = vld [vmem:[%s5080_s28 + $0x318] sm:$0xff]  ;;  %v4269_v54 = vld [vmem:[%s5080_s28 + $0x3a8] sm:$0xff]  ;;  %3996 = vst.msk [vmem:[%s11687_s15 + $0x1e0] sm:$0xff] %vm1282_vm10, %v2137_v32  ;;  %vm1258_vm8 = vcmp.eq.s32.totalorder %v12114_v9, 1 }
 0x34c   : > { %v3005_v59 = vsel %vm1253_vm1, %v4411_v36, %v15118_v2  ;;  %v4413_v14 = vld [vmem:[%s5080_s28 + $0x438] sm:$0xff]  ;;  %v3278_v42 = vld [vmem:[%s5080_s28 + $0x48] sm:$0xff]  ;;  %4141 = vst.msk [vmem:[%s11687_s15 + $0x278] sm:$0xff] %vm1282_vm10, %v2427_v50  ;;  %4285 = vst.msk [vmem:[%s11687_s15 + $0x308] sm:$0xff] %vm1282_vm10, %v2716_v28 }
 0x34d   : > { %4429 = vst.msk [vmem:[%s11687_s15 + $0x398] sm:$0xff] %vm1282_vm10, %v3005_v59  ;;  %4573 = vst.msk [vmem:[%s11687_s15 + $0x428] sm:$0xff] %vm1282_vm10, %v3294_v37  ;;  %v15120_v17 = vld [vmem:[#allocation206_spill] sm:$0xff]  ;;  %v15121_v36 = vld [vmem:[#allocation257_spill] sm:$0xff]  ;;  %v3296_v32 = vsel %vm1255_vm3, %v3278_v42, %v11268_v58 }
 0x34e   : > { %v1270_v49 = vsel %vm1252_vm2, %v3564_v63, %v15120_v17  ;;  %v1559_v19 = vsel %vm1252_vm2, %v3690_v16, %v15121_v36  ;;  %v15122_v53 = vld [vmem:[#allocation235_spill] sm:$0xff]  ;;  %v3566_v61 = vld [vmem:[%s5080_s28 + $0xd0] sm:$0xff]  ;;  %v3692_v21 = vld [vmem:[%s5080_s28 + $0x160] sm:$0xff]  ;;  %v2715_v16 = vsel %vm1252_vm2, %v4266_v38, %v11212_v4  ;;  %4140 = vst.msk [vmem:[%s11687_s15 + $0x270] sm:$0xff] %vm1282_vm10, %v2426_v57 }
 0x34f   : > { %v1848_v41 = vsel %vm1252_vm2, %v3834_v44, %v15122_v53  ;;  %v3836_v63 = vld [vmem:[%s5080_s28 + $0x1f0] sm:$0xff]  ;;  %v3980_v43 = vld [vmem:[%s5080_s28 + $0x280] sm:$0xff]  ;;  %1289 = vst.msk [vmem:[%s11687_s15 + $0x30] sm:$0xff] %vm1282_vm10, %v1270_v49  ;;  %3708 = vst.msk [vmem:[%s11687_s15 + $0xc0] sm:$0xff] %vm1282_vm10, %v1559_v19  ;;  %v3004_v44 = vsel %vm1252_vm2, %v4410_v11, %v11216_v33 }
 0x350   : > { %3852 = vst.msk [vmem:[%s11687_s15 + $0x150] sm:$0xff] %vm1282_vm10, %v1848_v41  ;;  %v4124_v50 = vld [vmem:[%s5080_s28 + $0x310] sm:$0xff]  ;;  %v4268_v26 = vld [vmem:[%s5080_s28 + $0x3a0] sm:$0xff]  ;;  %4284 = vst.msk [vmem:[%s11687_s15 + $0x300] sm:$0xff] %vm1282_vm10, %v2715_v16 }
 0x351   : > { %v4412_v28 = vld [vmem:[%s5080_s28 + $0x430] sm:$0xff]  ;;  %v3277_v2 = vld [vmem:[%s5080_s28 + $0x40] sm:$0xff]  ;;  %4428 = vst.msk [vmem:[%s11687_s15 + $0x390] sm:$0xff] %vm1282_vm10, %v3004_v44  ;;  %4572 = vst.msk [vmem:[%s11687_s15 + $0x420] sm:$0xff] %vm1282_vm10, %v3293_v0 }
 0x352   : > { %v3569_v33 = vld [vmem:[%s5080_s28 + $0xe8] sm:$0xff]  ;;  %v3695_v4 = vld [vmem:[%s5080_s28 + $0x178] sm:$0xff]  ;;  %v15124_v39 = vld [vmem:[#allocation236_spill] sm:$0xff]  ;;  %4575 = vst.msk [vmem:[%s11687_s15 + $0x438] sm:$0xff] %vm1282_vm10, %v3296_v32 }
 0x353   : > { %v3839_v8 = vld [vmem:[%s5080_s28 + $0x208] sm:$0xff]  ;;  %v3983_v48 = vld [vmem:[%s5080_s28 + $0x298] sm:$0xff]  ;;  %v1562_v59 = vsel %vm1255_vm3, %v3693_v3, %v15124_v39  ;;  %v15126_v17 = vld [vmem:[#allocation262_spill] sm:$0xff]  ;;  %v2429_v3 = vsel %vm1255_vm3, %v4125_v47, %v11250_v45 }
 0x354   : > { %v15123_v38 = vld [vmem:[#allocation233_spill] sm:$0xff]  ;;  %v2140_v49 = vsel %vm1255_vm3, %v3981_v30, %v15126_v17  ;;  %v4127_v36 = vld [vmem:[%s5080_s28 + $0x328] sm:$0xff]  ;;  %3711 = vst.msk [vmem:[%s11687_s15 + $0xd8] sm:$0xff] %vm1282_vm10, %v1562_v59  ;;  %v15128_v53 = vld [vmem:[#allocation240_spill] sm:$0xff] }
 0x355   : > { %v1273_v11 = vsel %vm1255_vm3, %v3567_v40, %v15123_v38  ;;  %v15125_v55 = vld [vmem:[#allocation249_spill] sm:$0xff]  ;;  %v4415_v40 = vld [vmem:[%s5080_s28 + $0x448] sm:$0xff]  ;;  %3999 = vst.msk [vmem:[%s11687_s15 + $0x1f8] sm:$0xff] %vm1282_vm10, %v2140_v49  ;;  %v3007_v41 = vsel %vm1255_vm3, %v4413_v14, %v15128_v53  ;;  %v3568_v16 = vld [vmem:[%s5080_s28 + $0xe0] sm:$0xff] }
 0x356   : > { %v1851_v37 = vsel %vm1255_vm3, %v3837_v31, %v15125_v55  ;;  %v4271_v19 = vld [vmem:[%s5080_s28 + $0x3b8] sm:$0xff]  ;;  %1292 = vst.msk [vmem:[%s11687_s15 + $0x48] sm:$0xff] %vm1282_vm10, %v1273_v11  ;;  %v15127_v31 = vld [vmem:[#allocation238_spill] sm:$0xff]  ;;  %v3694_v45 = vld [vmem:[%s5080_s28 + $0x170] sm:$0xff] }
 0x357   : > { %3855 = vst.msk [vmem:[%s11687_s15 + $0x168] sm:$0xff] %vm1282_vm10, %v1851_v37  ;;  %v2718_v30 = vsel %vm1255_vm3, %v4269_v54, %v15127_v31  ;;  %v3280_v57 = vld [vmem:[%s5080_s28 + $0x58] sm:$0xff]  ;;  %4143 = vst.msk [vmem:[%s11687_s15 + $0x288] sm:$0xff] %vm1282_vm10, %v2429_v3  ;;  %v15129_v47 = vld [vmem:[#allocation267_spill] sm:$0xff] }
 0x358   : > { %4287 = vst.msk [vmem:[%s11687_s15 + $0x318] sm:$0xff] %vm1282_vm10, %v2718_v30  ;;  %4431 = vst.msk [vmem:[%s11687_s15 + $0x3a8] sm:$0xff] %vm1282_vm10, %v3007_v41  ;;  %v1272_v51 = vsel %vm1254_vm4, %v3566_v61, %v15129_v47  ;;  %v15130_v58 = vld [vmem:[#allocation55_spill] sm:$0xff]  ;;  %v15131_v14 = vld [vmem:[#allocation222_spill] sm:$0xff] }
 0x359   : > { %v1561_v54 = vsel %vm1254_vm4, %v3692_v21, %v15130_v58  ;;  %v1850_v42 = vsel %vm1254_vm4, %v3836_v63, %v15131_v14  ;;  %v15132_v44 = vld [vmem:[#allocation59_spill] sm:$0xff]  ;;  %v3838_v38 = vld [vmem:[%s5080_s28 + $0x200] sm:$0xff]  ;;  %v3982_v11 = vld [vmem:[%s5080_s28 + $0x290] sm:$0xff]  ;;  %1291 = vst.msk [vmem:[%s11687_s15 + $0x40] sm:$0xff] %vm1282_vm10, %v1272_v51  ;;  %v2428_v21 = vsel %vm1254_vm4, %v4124_v50, %v11298_v7  ;;  %v2717_v63 = vsel %vm1254_vm4, %v4268_v26, %v11304_v27 }
 0x35a   : > { %v2139_v0 = vsel %vm1254_vm4, %v3980_v43, %v15132_v44  ;;  %v4126_v61 = vld [vmem:[%s5080_s28 + $0x320] sm:$0xff]  ;;  %3710 = vst.msk [vmem:[%s11687_s15 + $0xd0] sm:$0xff] %vm1282_vm10, %v1561_v54  ;;  %3854 = vst.msk [vmem:[%s11687_s15 + $0x160] sm:$0xff] %vm1282_vm10, %v1850_v42  ;;  %v15133_v43 = vld [vmem:[#allocation247_spill] sm:$0xff]  ;;  %v1275_v27 = vsel %vm1257_vm5, %v3569_v33, %v11322_v23  ;;  %v2431_v33 = vsel %vm1257_vm5, %v4127_v36, %v11350_v13  ;;  %v12248_v36 = vpop.permute.xlu1 %1238 }
 0x35b   : > { %3998 = vst.msk [vmem:[%s11687_s15 + $0x1f0] sm:$0xff] %vm1282_vm10, %v2139_v0  ;;  %v3006_v39 = vsel %vm1254_vm4, %v4412_v28, %v15133_v43  ;;  %v15134_v59 = vld [vmem:[#allocation36_spill] sm:$0xff]  ;;  %v4414_v17 = vld [vmem:[%s5080_s28 + $0x440] sm:$0xff]  ;;  %4142 = vst.msk [vmem:[%s11687_s15 + $0x280] sm:$0xff] %vm1282_vm10, %v2428_v21  ;;  %vm1261_vm11 = vcmp.eq.s32.totalorder %v12248_v36, 1 }
 0x35c   : > { %v3295_v55 = vsel %vm1254_vm4, %v3277_v2, %v15134_v59  ;;  %v4270_v37 = vld [vmem:[%s5080_s28 + $0x3b0] sm:$0xff]  ;;  %4286 = vst.msk [vmem:[%s11687_s15 + $0x310] sm:$0xff] %vm1282_vm10, %v2717_v63  ;;  %4430 = vst.msk [vmem:[%s11687_s15 + $0x3a0] sm:$0xff] %vm1282_vm10, %v3006_v39  ;;  %v15136_v26 = vld [vmem:[#allocation37_spill] sm:$0xff] }
 0x35d   : > { %v3279_v7 = vld [vmem:[%s5080_s28 + $0x50] sm:$0xff]  ;;  %4574 = vst.msk [vmem:[%s11687_s15 + $0x430] sm:$0xff] %vm1282_vm10, %v3295_v55  ;;  %v1853_v28 = vsel %vm1257_vm5, %v3839_v8, %v15136_v26  ;;  %v15137_v2 = vld [vmem:[#allocation263_spill] sm:$0xff]  ;;  %v3571_v3 = vld [vmem:[%s5080_s28 + $0xf8] sm:$0xff]  ;;  %v3009_v8 = vsel %vm1257_vm5, %v4415_v40, %v11362_v15  ;;  %v1274_v15 = vsel %vm1256_vm6, %v3568_v16, %v11374_v62  ;;  %v2141_v40 = vsel %vm1256_vm6, %v3982_v11, %v11388_v29 }
 0x35e   : > { %v15135_v52 = vld [vmem:[#allocation20_spill] sm:$0xff]  ;;  %v2142_v49 = vsel %vm1257_vm5, %v3983_v48, %v15137_v2  ;;  %v3697_v31 = vld [vmem:[%s5080_s28 + $0x188] sm:$0xff]  ;;  %v3841_v30 = vld [vmem:[%s5080_s28 + $0x218] sm:$0xff]  ;;  %1294 = vst.msk [vmem:[%s11687_s15 + $0x58] sm:$0xff] %vm1282_vm10, %v1275_v27  ;;  %v3298_v48 = vsel %vm1257_vm5, %v3280_v57, %v11368_v56  ;;  %v2719_v29 = vsel %vm1256_vm6, %v4270_v37, %v11396_v6 }
 0x35f   : > { %v1564_v50 = vsel %vm1257_vm5, %v3695_v4, %v15135_v52  ;;  %v3985_v23 = vld [vmem:[%s5080_s28 + $0x2a8] sm:$0xff]  ;;  %3857 = vst.msk [vmem:[%s11687_s15 + $0x178] sm:$0xff] %vm1282_vm10, %v1853_v28  ;;  %4001 = vst.msk [vmem:[%s11687_s15 + $0x208] sm:$0xff] %vm1282_vm10, %v2142_v49  ;;  %v2720_v4 = vsel %vm1257_vm5, %v4271_v19, %v11356_v46  ;;  %v4129_v53 = vld [vmem:[%s5080_s28 + $0x338] sm:$0xff]  ;;  %v12250_v46 = vpop.permute.xlu0 %1235  ;;  %v1852_v19 = vsel %vm1256_vm6, %v3838_v38, %v11384_v12 }
 0x360   : > { %3713 = vst.msk [vmem:[%s11687_s15 + $0xe8] sm:$0xff] %vm1282_vm10, %v1564_v50  ;;  %v4273_v41 = vld [vmem:[%s5080_s28 + $0x3c8] sm:$0xff]  ;;  %v4417_v32 = vld [vmem:[%s5080_s28 + $0x458] sm:$0xff]  ;;  %4145 = vst.msk [vmem:[%s11687_s15 + $0x298] sm:$0xff] %vm1282_vm10, %v2431_v33  ;;  %v2430_v12 = vsel %vm1256_vm6, %v4126_v61, %v11392_v22  ;;  %vm1260_vm12 = vcmp.eq.s32.totalorder %v12250_v46, 1  ;;  %v2433_v55 = vsel %vm1259_vm7, %v4129_v53, %v11434_v20 }
 0x361   : > { %v3282_v13 = vld [vmem:[%s5080_s28 + $0x68] sm:$0xff]  ;;  %4289 = vst.msk [vmem:[%s11687_s15 + $0x328] sm:$0xff] %vm1282_vm10, %v2720_v4  ;;  %4433 = vst.msk [vmem:[%s11687_s15 + $0x3b8] sm:$0xff] %vm1282_vm10, %v3009_v8  ;;  %v3570_v57 = vld [vmem:[%s5080_s28 + $0xf0] sm:$0xff]  ;;  %v2722_v37 = vsel %vm1259_vm7, %v4273_v41, %v11440_v18 }
 0x362   : > { %4577 = vst.msk [vmem:[%s11687_s15 + $0x448] sm:$0xff] %vm1282_vm10, %v3298_v48  ;;  %v15138_v56 = vld [vmem:[#allocation271_spill] sm:$0xff]  ;;  %v3696_v47 = vld [vmem:[%s5080_s28 + $0x180] sm:$0xff]  ;;  %v3840_v62 = vld [vmem:[%s5080_s28 + $0x210] sm:$0xff]  ;;  %v1276_v18 = vsel %vm1258_vm8, %v3570_v57, %v11462_v35 }
 0x363   : > { %v1563_v25 = vsel %vm1256_vm6, %v3694_v45, %v15138_v56  ;;  %v3984_v16 = vld [vmem:[%s5080_s28 + $0x2a0] sm:$0xff]  ;;  %1293 = vst.msk [vmem:[%s11687_s15 + $0x50] sm:$0xff] %vm1282_vm10, %v1274_v15  ;;  %3856 = vst.msk [vmem:[%s11687_s15 + $0x170] sm:$0xff] %vm1282_vm10, %v1852_v19  ;;  %v3008_v45 = vsel %vm1256_vm6, %v4414_v17, %v11400_v10  ;;  %v15139_v51 = vld [vmem:[#allocation21_spill] sm:$0xff]  ;;  %v3011_v17 = vsel %vm1259_vm7, %v4417_v32, %v11450_v24 }
 0x364   : > { %3712 = vst.msk [vmem:[%s11687_s15 + $0xe0] sm:$0xff] %vm1282_vm10, %v1563_v25  ;;  %4000 = vst.msk [vmem:[%s11687_s15 + $0x200] sm:$0xff] %vm1282_vm10, %v2141_v40  ;;  %v3297_v58 = vsel %vm1256_vm6, %v3279_v7, %v15139_v51  ;;  %v4128_v54 = vld [vmem:[%s5080_s28 + $0x330] sm:$0xff]  ;;  %v4272_v14 = vld [vmem:[%s5080_s28 + $0x3c0] sm:$0xff]  ;;  %v3300_v7 = vsel %vm1259_vm7, %v3282_v13, %v11456_v60  ;;  %v1565_v24 = vsel %vm1258_vm8, %v3696_v47, %v11468_v5 }
 0x365   : > { %v4416_v42 = vld [vmem:[%s5080_s28 + $0x450] sm:$0xff]  ;;  %v3281_v44 = vld [vmem:[%s5080_s28 + $0x60] sm:$0xff]  ;;  %4144 = vst.msk [vmem:[%s11687_s15 + $0x290] sm:$0xff] %vm1282_vm10, %v2430_v12  ;;  %4288 = vst.msk [vmem:[%s11687_s15 + $0x320] sm:$0xff] %vm1282_vm10, %v2719_v29 }
 0x366   : > { %4432 = vst.msk [vmem:[%s11687_s15 + $0x3b0] sm:$0xff] %vm1282_vm10, %v3008_v45  ;;  %4576 = vst.msk [vmem:[%s11687_s15 + $0x440] sm:$0xff] %vm1282_vm10, %v3297_v58  ;;  %v3573_v22 = vld [vmem:[%s5080_s28 + $0x108] sm:$0xff]  ;;  %v3699_v6 = vld [vmem:[%s5080_s28 + $0x198] sm:$0xff] }
 0x367   : > { %v15140_v10 = vld [vmem:[#allocation266_spill] sm:$0xff]  ;;  %v15141_v0 = vld [vmem:[#allocation19_spill] sm:$0xff]  ;;  %v15142_v11 = vld [vmem:[#allocation25_spill] sm:$0xff]  ;;  %4147 = vst.msk [vmem:[%s11687_s15 + $0x2a8] sm:$0xff] %vm1282_vm10, %v2433_v55 }
 0x368   : > { %v1277_v1 = vsel %vm1259_vm7, %v3571_v3, %v15140_v10  ;;  %v1566_v38 = vsel %vm1259_vm7, %v3697_v31, %v15141_v0  ;;  %v1855_v61 = vsel %vm1259_vm7, %v3841_v30, %v15142_v11  ;;  %v15143_v21 = vld [vmem:[#allocation245_spill] sm:$0xff]  ;;  %v3843_v43 = vld [vmem:[%s5080_s28 + $0x228] sm:$0xff]  ;;  %4291 = vst.msk [vmem:[%s11687_s15 + $0x338] sm:$0xff] %vm1282_vm10, %v2722_v37  ;;  %4435 = vst.msk [vmem:[%s11687_s15 + $0x3c8] sm:$0xff] %vm1282_vm10, %v3011_v17 }
 0x369   : > { %v2144_v63 = vsel %vm1259_vm7, %v3985_v23, %v15143_v21  ;;  %v3987_v39 = vld [vmem:[%s5080_s28 + $0x2b8] sm:$0xff]  ;;  %v4131_v59 = vld [vmem:[%s5080_s28 + $0x348] sm:$0xff]  ;;  %1296 = vst.msk [vmem:[%s11687_s15 + $0x68] sm:$0xff] %vm1282_vm10, %v1277_v1  ;;  %3715 = vst.msk [vmem:[%s11687_s15 + $0xf8] sm:$0xff] %vm1282_vm10, %v1566_v38 }
 0x36a   : > { %3859 = vst.msk [vmem:[%s11687_s15 + $0x188] sm:$0xff] %vm1282_vm10, %v1855_v61  ;;  %4003 = vst.msk [vmem:[%s11687_s15 + $0x218] sm:$0xff] %vm1282_vm10, %v2144_v63  ;;  %v4275_v27 = vld [vmem:[%s5080_s28 + $0x3d8] sm:$0xff]  ;;  %v4419_v52 = vld [vmem:[%s5080_s28 + $0x468] sm:$0xff] }
 0x36b   : > { %v3284_v20 = vld [vmem:[%s5080_s28 + $0x78] sm:$0xff]  ;;  %4579 = vst.msk [vmem:[%s11687_s15 + $0x458] sm:$0xff] %vm1282_vm10, %v3300_v7  ;;  %v15144_v60 = vld [vmem:[#allocation50_spill] sm:$0xff]  ;;  %v15145_v50 = vld [vmem:[#allocation52_spill] sm:$0xff] }
 0x36c   : > { %v1854_v34 = vsel %vm1258_vm8, %v3840_v62, %v15144_v60  ;;  %v2143_v26 = vsel %vm1258_vm8, %v3984_v16, %v15145_v50  ;;  %v3572_v28 = vld [vmem:[%s5080_s28 + $0x100] sm:$0xff]  ;;  %v3698_v2 = vld [vmem:[%s5080_s28 + $0x190] sm:$0xff]  ;;  %1295 = vst.msk [vmem:[%s11687_s15 + $0x60] sm:$0xff] %vm1282_vm10, %v1276_v18  ;;  %3714 = vst.msk [vmem:[%s11687_s15 + $0xf0] sm:$0xff] %vm1282_vm10, %v1565_v24 }
 0x36d   : > { %v3842_v35 = vld [vmem:[%s5080_s28 + $0x220] sm:$0xff]  ;;  %3858 = vst.msk [vmem:[%s11687_s15 + $0x180] sm:$0xff] %vm1282_vm10, %v1854_v34  ;;  %4002 = vst.msk [vmem:[%s11687_s15 + $0x210] sm:$0xff] %vm1282_vm10, %v2143_v26  ;;  %v15147_v3 = vld [vmem:[#allocation261_spill] sm:$0xff] }
 0x36e   : > { %v15146_v5 = vld [vmem:[#allocation66_spill] sm:$0xff]  ;;  %v2721_v31 = vsel %vm1258_vm8, %v4272_v14, %v15147_v3  ;;  %v15148_v30 = vld [vmem:[#allocation264_spill] sm:$0xff]  ;;  %v15152_v15 = vld [vmem:[#allocation265_spill] sm:$0xff]  ;;  %v1245_v14 = vpop.permute.xlu1 %1244 }
 0x36f   : > { %v2432_v49 = vsel %vm1258_vm8, %v4128_v54, %v15146_v5  ;;  %v3010_v23 = vsel %vm1258_vm8, %v4416_v42, %v15148_v30  ;;  %v15149_v33 = vld [vmem:[#allocation254_spill] sm:$0xff]  ;;  %v3986_v8 = vld [vmem:[%s5080_s28 + $0x2b0] sm:$0xff]  ;;  %4290 = vst.msk [vmem:[%s11687_s15 + $0x330] sm:$0xff] %vm1282_vm10, %v2721_v31  ;;  %v1857_v56 = vsel %vm1261_vm11, %v3843_v43, %v15152_v15  ;;  %v15153_v25 = vld [vmem:[#allocation241_spill] sm:$0xff]  ;;  %vm1263_vm13 = vcmp.eq.s32.totalorder %v1245_v14, 1 }
 0x370   : > { %v3299_v4 = vsel %vm1258_vm8, %v3281_v44, %v15149_v33  ;;  %v4130_v48 = vld [vmem:[%s5080_s28 + $0x340] sm:$0xff]  ;;  %v4274_v53 = vld [vmem:[%s5080_s28 + $0x3d0] sm:$0xff]  ;;  %4146 = vst.msk [vmem:[%s11687_s15 + $0x2a0] sm:$0xff] %vm1282_vm10, %v2432_v49  ;;  %4434 = vst.msk [vmem:[%s11687_s15 + $0x3c0] sm:$0xff] %vm1282_vm10, %v3010_v23  ;;  %v2146_v19 = vsel %vm1261_vm11, %v3987_v39, %v15153_v25 }
 0x371   : > { %4578 = vst.msk [vmem:[%s11687_s15 + $0x450] sm:$0xff] %vm1282_vm10, %v3299_v4  ;;  %v15150_v41 = vld [vmem:[#allocation56_spill] sm:$0xff]  ;;  %v15151_v32 = vld [vmem:[#allocation54_spill] sm:$0xff]  ;;  %v3575_v47 = vld [vmem:[%s5080_s28 + $0x118] sm:$0xff] }
 0x372   : > { %v1279_v9 = vsel %vm1261_vm11, %v3573_v22, %v15150_v41  ;;  %v1568_v13 = vsel %vm1261_vm11, %v3699_v6, %v15151_v32  ;;  %v4418_v40 = vld [vmem:[%s5080_s28 + $0x460] sm:$0xff]  ;;  %v3283_v57 = vld [vmem:[%s5080_s28 + $0x70] sm:$0xff]  ;;  %3861 = vst.msk [vmem:[%s11687_s15 + $0x198] sm:$0xff] %vm1282_vm10, %v1857_v56  ;;  %4005 = vst.msk [vmem:[%s11687_s15 + $0x228] sm:$0xff] %vm1282_vm10, %v2146_v19  ;;  %v12444_v6 = vpop.permute.xlu0 %1241 }
 0x373   : > { %1298 = vst.msk [vmem:[%s11687_s15 + $0x78] sm:$0xff] %vm1282_vm10, %v1279_v9  ;;  %3717 = vst.msk [vmem:[%s11687_s15 + $0x108] sm:$0xff] %vm1282_vm10, %v1568_v13  ;;  %v15154_v62 = vld [vmem:[#allocation58_spill] sm:$0xff]  ;;  %v15155_v12 = vld [vmem:[#allocation51_spill] sm:$0xff]  ;;  %vm1262_vm14 = vcmp.eq.s32.totalorder %v12444_v6, 1 }
 0x374   : > { %v2435_v16 = vsel %vm1261_vm11, %v4131_v59, %v15154_v62  ;;  %v2724_v29 = vsel %vm1261_vm11, %v4275_v27, %v15155_v12  ;;  %v15156_v45 = vld [vmem:[#allocation27_spill] sm:$0xff]  ;;  %v3845_v44 = vld [vmem:[%s5080_s28 + $0x238] sm:$0xff]  ;;  %v15159_v1 = vld [vmem:[#allocation258_spill] sm:$0xff] }
 0x375   : > { %v3013_v51 = vsel %vm1261_vm11, %v4419_v52, %v15156_v45  ;;  %v15157_v58 = vld [vmem:[#allocation23_spill] sm:$0xff]  ;;  %4149 = vst.msk [vmem:[%s11687_s15 + $0x2b8] sm:$0xff] %vm1282_vm10, %v2435_v16  ;;  %4293 = vst.msk [vmem:[%s11687_s15 + $0x348] sm:$0xff] %vm1282_vm10, %v2724_v29  ;;  %v15158_v36 = vld [vmem:[#allocation65_spill] sm:$0xff]  ;;  %v1567_v0 = vsel %vm1260_vm12, %v3698_v2, %v15159_v1 }
 0x376   : > { %v3302_v54 = vsel %vm1261_vm11, %v3284_v20, %v15157_v58  ;;  %v3701_v42 = vld [vmem:[%s5080_s28 + $0x1a8] sm:$0xff]  ;;  %4437 = vst.msk [vmem:[%s11687_s15 + $0x3d8] sm:$0xff] %vm1282_vm10, %v3013_v51  ;;  %v1278_v10 = vsel %vm1260_vm12, %v3572_v28, %v15158_v36  ;;  %v15160_v38 = vld [vmem:[#allocation82_spill] sm:$0xff]  ;;  %v4133_v63 = vld [vmem:[%s5080_s28 + $0x358] sm:$0xff] }
 0x377   : > { %v3989_v22 = vld [vmem:[%s5080_s28 + $0x2c8] sm:$0xff]  ;;  %4581 = vst.msk [vmem:[%s11687_s15 + $0x468] sm:$0xff] %vm1282_vm10, %v3302_v54  ;;  %v1856_v11 = vsel %vm1260_vm12, %v3842_v35, %v15160_v38  ;;  %v15161_v61 = vld [vmem:[#allocation270_spill] sm:$0xff]  ;;  %v4421_v39 = vld [vmem:[%s5080_s28 + $0x478] sm:$0xff] }
 0x378   : > { %v2145_v21 = vsel %vm1260_vm12, %v3986_v8, %v15161_v61  ;;  %v4277_v43 = vld [vmem:[%s5080_s28 + $0x3e8] sm:$0xff]  ;;  %1297 = vst.msk [vmem:[%s11687_s15 + $0x70] sm:$0xff] %vm1282_vm10, %v1278_v10  ;;  %3716 = vst.msk [vmem:[%s11687_s15 + $0x100] sm:$0xff] %vm1282_vm10, %v1567_v0  ;;  %v15162_v59 = vld [vmem:[#allocation2_spill] sm:$0xff] }
 0x379   : > { %3860 = vst.msk [vmem:[%s11687_s15 + $0x190] sm:$0xff] %vm1282_vm10, %v1856_v11  ;;  %4004 = vst.msk [vmem:[%s11687_s15 + $0x220] sm:$0xff] %vm1282_vm10, %v2145_v21  ;;  %v2434_v55 = vsel %vm1260_vm12, %v4130_v48, %v15162_v59  ;;  %v15163_v37 = vld [vmem:[#allocation67_spill] sm:$0xff]  ;;  %v15165_v52 = vld [vmem:[#allocation269_spill] sm:$0xff] }
 0x37a   : > { %v2723_v17 = vsel %vm1260_vm12, %v4274_v53, %v15163_v37  ;;  %v15164_v7 = vld [vmem:[#allocation3_spill] sm:$0xff]  ;;  %v3301_v20 = vsel %vm1260_vm12, %v3283_v57, %v15165_v52  ;;  %v3574_v24 = vld [vmem:[%s5080_s28 + $0x110] sm:$0xff]  ;;  %v3700_v60 = vld [vmem:[%s5080_s28 + $0x1a0] sm:$0xff]  ;;  %4148 = vst.msk [vmem:[%s11687_s15 + $0x2b0] sm:$0xff] %vm1282_vm10, %v2434_v55 }
 0x37b   : > { %v3012_v27 = vsel %vm1260_vm12, %v4418_v40, %v15164_v7  ;;  %v3286_v18 = vld [vmem:[%s5080_s28 + $0x88] sm:$0xff]  ;;  %v4618_v34 = vld [vmem:[%s5080_s28 + $0x80] sm:$0xff]  ;;  %v4619_v2 = vld [vmem:[%s5080_s28 + $0x110] sm:$0xff]  ;;  %4292 = vst.msk [vmem:[%s11687_s15 + $0x340] sm:$0xff] %vm1282_vm10, %v2723_v17 }
 0x37c   : > { %v15166_v50 = vld [vmem:[#allocation187_spill] sm:$0xff]  ;;  %v15168_v35 = vld [vmem:[#allocation189_spill] sm:$0xff]  ;;  %4436 = vst.msk [vmem:[%s11687_s15 + $0x3d0] sm:$0xff] %vm1282_vm10, %v3012_v27  ;;  %4580 = vst.msk [vmem:[%s11687_s15 + $0x460] sm:$0xff] %vm1282_vm10, %v3301_v20 }
 0x37d   : > { %v2978_v28 = vsel %vm1135_vm9, %v4618_v34, %v15166_v50  ;;  %v3267_v5 = vsel %vm1135_vm9, %v4619_v2, %v15168_v35  ;;  %v3844_v46 = vld [vmem:[%s5080_s28 + $0x230] sm:$0xff]  ;;  %v3988_v49 = vld [vmem:[%s5080_s28 + $0x2c0] sm:$0xff]  ;;  %v15170_v23 = vld [vmem:[#allocation35_spill] sm:$0xff] }
 0x37e   : > { %v4132_v3 = vld [vmem:[%s5080_s28 + $0x350] sm:$0xff]  ;;  %v1570_v33 = vsel %vm1263_vm13, %v3701_v42, %v15170_v23  ;;  %v15171_v4 = vld [vmem:[#allocation89_spill] sm:$0xff]  ;;  %v15172_v48 = vld [vmem:[#allocation71_spill] sm:$0xff] }
 0x37f   : > { %v15169_v31 = vld [vmem:[#allocation88_spill] sm:$0xff]  ;;  %v1859_v8 = vsel %vm1263_vm13, %v3845_v44, %v15171_v4  ;;  %v2148_v53 = vsel %vm1263_vm13, %v3989_v22, %v15172_v48  ;;  %v4276_v41 = vld [vmem:[%s5080_s28 + $0x3e0] sm:$0xff]  ;;  %3719 = vst.msk [vmem:[%s11687_s15 + $0x118] sm:$0xff] %vm1282_vm10, %v1570_v33  ;;  %v15173_v13 = vld [vmem:[#allocation53_spill] sm:$0xff] }
 0x380   : > { %v1281_v30 = vsel %vm1263_vm13, %v3575_v47, %v15169_v31  ;;  %v4420_v9 = vld [vmem:[%s5080_s28 + $0x470] sm:$0xff]  ;;  %v3285_v32 = vld [vmem:[%s5080_s28 + $0x80] sm:$0xff]  ;;  %3863 = vst.msk [vmem:[%s11687_s15 + $0x1a8] sm:$0xff] %vm1282_vm10, %v1859_v8  ;;  %4007 = vst.msk [vmem:[%s11687_s15 + $0x238] sm:$0xff] %vm1282_vm10, %v2148_v53  ;;  %v2437_v15 = vsel %vm1263_vm13, %v4133_v63, %v15173_v13 }
 0x381   : > { %1300 = vst.msk [vmem:[%s11687_s15 + $0x88] sm:$0xff] %vm1282_vm10, %v1281_v30  ;;  %v15174_v56 = vld [vmem:[#allocation47_spill] sm:$0xff]  ;;  %v15175_v19 = vld [vmem:[#allocation45_spill] sm:$0xff]  ;;  %v15176_v57 = vld [vmem:[#allocation4_spill] sm:$0xff]  ;;  %v3014_v36 = vsel %vm1262_vm14, %v4420_v9, %v2978_v28  ;;  %v3303_v10 = vsel %vm1262_vm14, %v3285_v32, %v3267_v5 }
 0x382   : > { %v2726_v25 = vsel %vm1263_vm13, %v4277_v43, %v15174_v56  ;;  %v3015_v40 = vsel %vm1263_vm13, %v4421_v39, %v15175_v19  ;;  %v3304_v47 = vsel %vm1263_vm13, %v3286_v18, %v15176_v57  ;;  %4151 = vst.msk [vmem:[%s11687_s15 + $0x2c8] sm:$0xff] %vm1282_vm10, %v2437_v15  ;;  %v15177_v62 = vld [vmem:[#allocation260_spill] sm:$0xff]  ;;  %v15178_v12 = vld [vmem:[#allocation33_spill] sm:$0xff]  ;;  %v15181_v14 = vld [vmem:[#allocation42_spill] sm:$0xff] }
 0x383   : > { %4295 = vst.msk [vmem:[%s11687_s15 + $0x358] sm:$0xff] %vm1282_vm10, %v2726_v25  ;;  %4439 = vst.msk [vmem:[%s11687_s15 + $0x3e8] sm:$0xff] %vm1282_vm10, %v3015_v40  ;;  %v1280_v16 = vsel %vm1262_vm14, %v3574_v24, %v15177_v62  ;;  %v1569_v29 = vsel %vm1262_vm14, %v3700_v60, %v15178_v12  ;;  %v15179_v45 = vld [vmem:[#allocation29_spill] sm:$0xff]  ;;  %v15180_v58 = vld [vmem:[#allocation24_spill] sm:$0xff]  ;;  %v2436_v42 = vsel %vm1262_vm14, %v4132_v3, %v15181_v14 }
 0x384   : > { %4583 = vst.msk [vmem:[%s11687_s15 + $0x478] sm:$0xff] %vm1282_vm10, %v3304_v47  ;;  %v1858_v51 = vsel %vm1262_vm14, %v3844_v46, %v15179_v45  ;;  %v2147_v54 = vsel %vm1262_vm14, %v3988_v49, %v15180_v58  ;;  %1299 = vst.msk [vmem:[%s11687_s15 + $0x80] sm:$0xff] %vm1282_vm10, %v1280_v16  ;;  %v15182_v44 = vld [vmem:[#allocation43_spill] sm:$0xff] }
 0x385   : > { %3718 = vst.msk [vmem:[%s11687_s15 + $0x110] sm:$0xff] %vm1282_vm10, %v1569_v29  ;;  %3862 = vst.msk [vmem:[%s11687_s15 + $0x1a0] sm:$0xff] %vm1282_vm10, %v1858_v51  ;;  %v2725_v22 = vsel %vm1262_vm14, %v4276_v41, %v15182_v44 }
 0x386   : > { %4006 = vst.msk [vmem:[%s11687_s15 + $0x230] sm:$0xff] %vm1282_vm10, %v2147_v54  ;;  %4150 = vst.msk [vmem:[%s11687_s15 + $0x2c0] sm:$0xff] %vm1282_vm10, %v2436_v42 }
 0x387   : > { %4294 = vst.msk [vmem:[%s11687_s15 + $0x350] sm:$0xff] %vm1282_vm10, %v2725_v22  ;;  %4438 = vst.msk [vmem:[%s11687_s15 + $0x3e0] sm:$0xff] %vm1282_vm10, %v3014_v36 }
 0x388   : > { %4582 = vst.msk [vmem:[%s11687_s15 + $0x470] sm:$0xff] %vm1282_vm10, %v3303_v10 }
 0x389 PF: > { %s12_s11 = sadd.s32 1, %s4642_s11   ;;  %s15183_s9 = smov %s4638_s10 }
 0x38a   : > { %p9_p5 = scmp.ge.s32.totalorder %s12_s11, 4   ;;  %s15184_s10 = smov %s15186_s12 }
 0x38c   :  { %11 = sbr.rel (!%p9_p5) target bundleno = 2 (0x2), region = 75 }

</bundles_post_ra>
